<compile_context>
chip_gen: v6e
topology: v6e:2x2x1
jax: 0.10.0
libtpu: 0.0.40
codegen_flags: <defaults>
</compile_context>

<pallas_src>
import math
from functools import partial

import jax
import jax.numpy as jnp
from jax.experimental import pallas as pl
from jax.experimental.pallas import tpu as pltpu


# ----------------------------------------------------------------------------
# The single fused kernel
# ----------------------------------------------------------------------------

def _eeg_fused_kernel(*refs, conv_cfgs, B, T, D, H, n_layers):
    n_conv = len(conv_cfgs)
    pos = 0
    x_ref = refs[pos]; pos += 1                       # (B, Cin0, L0) f32
    conv_refs = []
    for _ in range(n_conv):                           # (sel, w, b) per conv layer
        conv_refs.append(refs[pos:pos + 3]); pos += 3
    mask_ref = refs[pos]; pos += 1                    # (N, N) f32 additive mask
    (in_w, in_b, out_w, out_b,
     ff1_wq, ff1_s, ff1_b, ff2_wq, ff2_s, ff2_b,
     ln1_g, ln1_b, ln2_g, ln2_b) = refs[pos:pos + 14]; pos += 14
    mw1_hbm = refs[pos]; pos += 1                     # (T*D, 512) int8 in HBM
    mw1_s, mb1, mw2, mb2, mw3, mb3 = refs[pos:pos + 6]; pos += 6
    o_ref = refs[pos]; pos += 1                       # (B, n_classes) f32
    x_sc, w1_vmem, w1_sem = refs[pos:pos + 3]         # scratch

    l = pl.program_id(0)
    dh = D // H
    att_scale = 1.0 / math.sqrt(dh)

    def _dq(wq_i8):
        # int8 -> bf16 dequant (|q| <= 127 is exact in bf16); scale applied after dot
        return wq_i8.astype(jnp.float32).astype(jnp.bfloat16)

    # ------------------------------------------------------- step 0: conv stack
    @pl.when(l == 0)
    def _conv_step():
        # Start streaming the int8 MLP w1 now; it is waited on only at the last
        # grid step, so the transfer hides behind conv + all encoder layers.
        pltpu.make_async_copy(mw1_hbm, w1_vmem, w1_sem).start()

        for b in range(B):
            h_cf = x_ref[b].astype(jnp.bfloat16)      # (Cin0, L0) channels-first
            h = None                                  # channels-last after layer 0
            hf = None
            for i, (k, lout, cout) in enumerate(conv_cfgs):
                sel_r, w_r, b_r = conv_refs[i]
                acc = jnp.zeros((lout, cout), jnp.float32)
                for j in range(k):
                    if i == 0:
                        # first layer consumes the channels-first input directly
                        # (last-last contraction, no in-kernel transpose needed)
                        xj = jnp.einsum('ol,cl->oc', sel_r[j], h_cf,
                                        preferred_element_type=jnp.float32)
                    else:
                        xj = jnp.dot(sel_r[j], h,
                                     preferred_element_type=jnp.float32)
                    acc = acc + jnp.dot(xj.astype(jnp.bfloat16), w_r[j],
                                        preferred_element_type=jnp.float32)
                hf = jnp.maximum(acc + b_r[...], 0.0)  # conv + folded BN + ReLU
                h = hf.astype(jnp.bfloat16)
            # tokens land in (b, t) row order -> identical math to torch's (T,B,D)
            x_sc[b * T:(b + 1) * T, :] = hf            # (T, D) f32

    # ------------------------------------------ steps 1..n_layers: encoder layer
    @pl.when(jnp.logical_and(l >= 1, l <= n_layers))
    def _encoder_step():
        x = x_sc[...]                                  # (N, D) f32 residual stream
        xb = x.astype(jnp.bfloat16)

        qkv = jnp.dot(xb, in_w[0],
                      preferred_element_type=jnp.float32) + in_b[0]      # (N, 3D)
        q, k_, v = qkv[:, :D], qkv[:, D:2 * D], qkv[:, 2 * D:]
        mask = mask_ref[...]                           # precomputed, VMEM-resident

        heads = []
        for hh in range(H):
            cs = slice(hh * dh, (hh + 1) * dh)
            qh = q[:, cs].astype(jnp.bfloat16)         # (N, dh)
            kh = k_[:, cs].astype(jnp.bfloat16)
            vh = v[:, cs].astype(jnp.bfloat16)
            s = jnp.einsum('nd,md->nm', qh, kh,
                           preferred_element_type=jnp.float32) * att_scale + mask
            m = jnp.max(s, axis=-1, keepdims=True)
            p = jnp.exp(s - m)
            p = p * pl.reciprocal(jnp.sum(p, axis=-1, keepdims=True), approx=True)
            heads.append(jnp.dot(p.astype(jnp.bfloat16), vh,
                                 preferred_element_type=jnp.float32))    # (N, dh)
        attn_o = jnp.concatenate(heads, axis=1)        # (N, D) lane-dense
        attn = jnp.dot(attn_o.astype(jnp.bfloat16), out_w[0],
                       preferred_element_type=jnp.float32) + out_b[0]

        def layer_norm(a, g, bb):
            mu = jnp.mean(a, axis=-1, keepdims=True)
            var = jnp.mean(jnp.square(a - mu), axis=-1, keepdims=True)
            return (a - mu) * jax.lax.rsqrt(var + 1e-5) * g + bb

        # post-norm residual structure (eval: dropouts are identity)
        x1 = layer_norm(x + attn, ln1_g[0], ln1_b[0])

        f = jnp.dot(x1.astype(jnp.bfloat16), _dq(ff1_wq[0]),
                    preferred_element_type=jnp.float32) * ff1_s[0] + ff1_b[0]
        f = jnp.maximum(f, 0.0)
        f2 = jnp.dot(f.astype(jnp.bfloat16), _dq(ff2_wq[0]),
                     preferred_element_type=jnp.float32) * ff2_s[0] + ff2_b[0]

        x_sc[...] = layer_norm(x1 + f2, ln2_g[0], ln2_b[0])

    # ------------------------------------------------ last step: fused MLP head
    @pl.when(l == n_layers + 1)
    def _mlp_step():
        pltpu.make_async_copy(mw1_hbm, w1_vmem, w1_sem).wait()
        x = x_sc[...]                                  # (N, D) final encoder out

        # x2[b] = concat_t x[b, t, :]  (== torch permute(1,0,2).reshape(B,-1))
        rows = []
        for b in range(B):
            xb = x[b * T:(b + 1) * T, :]
            rows.append(jnp.concatenate([xb[t:t + 1, :] for t in range(T)],
                                        axis=1))       # (1, T*D)
        x2 = jnp.concatenate(rows, axis=0).astype(jnp.bfloat16)   # (B, T*D)

        fin = T * D
        h1_dim = mb1.shape[-1]
        kchunk = 256 if fin % 256 == 0 else fin
        h1 = jnp.zeros((B, h1_dim), jnp.float32)
        for kk in range(0, fin, kchunk):               # K-chunked to bound temps
            h1 = h1 + jnp.dot(x2[:, kk:kk + kchunk],
                              _dq(w1_vmem[kk:kk + kchunk, :]),
                              preferred_element_type=jnp.float32)
        h1 = jnp.maximum(h1 * mw1_s[...] + mb1[...], 0.0)

        h2 = jnp.dot(h1.astype(jnp.bfloat16), mw2[...],
                     preferred_element_type=jnp.float32) + mb2[...]
        h2 = jnp.maximum(h2, 0.0)
        o_ref[...] = jnp.dot(h2, mw3[...],
                             preferred_element_type=jnp.float32) + mb3[...]


# ----------------------------------------------------------------------------
# BlockSpec helpers + forward wrapper (one pallas_call for the whole model)
# ----------------------------------------------------------------------------

def _const_spec(shape):
    zeros = (0,) * len(shape)
    return pl.BlockSpec(tuple(shape), lambda l, _z=zeros: _z)


def _layer_spec(tail_shape, n_layers):
    zeros = (0,) * len(tail_shape)

    def idx(l, _z=zeros, _nl=n_layers):
        # step 0 = conv, steps 1..n_layers = encoder layer (l-1), last = MLP
        li = jnp.minimum(jnp.maximum(l - 1, 0), _nl - 1)
        return (li,) + _z

    return pl.BlockSpec((1,) + tuple(tail_shape), idx)


def eeg_classifier_forward(x, P):
    """x: (B, C_in, T) like PyTorch NCW. Returns logits (B, n_classes)."""
    cfg = P['cfg']
    T, D, H = cfg['T'], cfg['D'], cfg['H']
    n_layers, n_classes = cfg['n_layers'], cfg['n_classes']
    B = x.shape[0]
    N = B * T
    fin = T * D
    tr, mp = P['trans'], P['mlp']
    h1_dim = mp['mb1'].shape[-1]

    args = [x]
    in_specs = [_const_spec(x.shape)]
    for cl in P['conv']:
        for a in (cl['sel'], cl['w'], cl['b']):
            args.append(a)
            in_specs.append(_const_spec(a.shape))
    args.append(P['mask'])
    in_specs.append(_const_spec(P['mask'].shape))
    for name in ('in_w', 'in_b', 'out_w', 'out_b',
                 'ff1_wq', 'ff1_s', 'ff1_b', 'ff2_wq', 'ff2_s', 'ff2_b',
                 'ln1_g', 'ln1_b', 'ln2_g', 'ln2_b'):
        a = tr[name]
        args.append(a)
        in_specs.append(_layer_spec(a.shape[1:], n_layers))
    args.append(mp['mw1q'])                              # stays in HBM, manual DMA
    in_specs.append(pl.BlockSpec(memory_space=pl.ANY))
    for name in ('mw1s', 'mb1', 'mw2', 'mb2', 'mw3', 'mb3'):
        a = mp[name]
        args.append(a)
        in_specs.append(_const_spec(a.shape))

    kern = partial(_eeg_fused_kernel, conv_cfgs=cfg['conv_cfgs'],
                   B=B, T=T, D=D, H=H, n_layers=n_layers)
    return pl.pallas_call(
        kern,
        out_shape=jax.ShapeDtypeStruct((B, n_classes), jnp.float32),
        grid=(n_layers + 2,),
        in_specs=in_specs,
        out_specs=pl.BlockSpec((B, n_classes), lambda l: (0, 0)),
        scratch_shapes=[
            pltpu.VMEM((N, D), jnp.float32),             # residual stream
            pltpu.VMEM((fin, h1_dim), jnp.int8),         # MLP w1 prefetch buffer
            pltpu.SemaphoreType.DMA(()),                 # its completion sem
        ],
        compiler_params=pltpu.CompilerParams(dimension_semantics=("arbitrary",)),
    )(*args)


# ----------------------------------------------------------------------------
# Parameters: torch-layout synthetic init, then folding / stacking / quantizing
# ----------------------------------------------------------------------------

def init_params(key, n_channels=2, n_time=128, n_classes=6,
                d_model=128, nhead=8, dim_ff=2048, n_layers=3):
    conv_cfg = [(n_channels, 16, 7, 2, 3), (16, 32, 5, 2, 2),
                (32, 64, 3, 2, 1), (64, 128, 3, 2, 1)]
    keys = iter(jax.random.split(key, 64))

    def nrm(shape, s=0.02):
        return s * jax.random.normal(next(keys), shape, jnp.float32)

    cnn = []
    L = n_time
    for cin, cout, k, s, p in conv_cfg:
        cnn.append(dict(w=nrm((cout, cin, k), 0.1), b=nrm((cout,), 0.1),
                        gamma=1.0 + nrm((cout,), 0.1), beta=nrm((cout,), 0.1),
                        rmean=jnp.zeros((cout,), jnp.float32),
                        rvar=jnp.ones((cout,), jnp.float32),
                        stride=s, pad=p))
        L = (L + 2 * p - k) // s + 1
    cnn_output_size = 128 * L

    transformer = []
    for _ in range(n_layers):
        transformer.append(dict(
            in_proj_w=nrm((3 * d_model, d_model)), in_proj_b=nrm((3 * d_model,)),
            out_w=nrm((d_model, d_model)), out_b=nrm((d_model,)),
            lin1_w=nrm((dim_ff, d_model)), lin1_b=nrm((dim_ff,)),
            lin2_w=nrm((d_model, dim_ff)), lin2_b=nrm((d_model,)),
            ln1_g=jnp.ones((d_model,), jnp.float32),
            ln1_b=jnp.zeros((d_model,), jnp.float32),
            ln2_g=jnp.ones((d_model,), jnp.float32),
            ln2_b=jnp.zeros((d_model,), jnp.float32)))

    mlp = dict(w1=nrm((512, cnn_output_size)), b1=nrm((512,)),
               w2=nrm((128, 512)), b2=nrm((128,)),
               w3=nrm((n_classes, 128)), b3=nrm((n_classes,)))

    return dict(cnn=cnn, transformer=transformer, mlp=mlp,
                d_model=d_model, nhead=nhead, dim_ff=dim_ff,
                n_layers=n_layers, n_classes=n_classes)


def _make_sel(lin, lout, k, stride, pad):
    """(k, lout, lin) 0/1 taps: sel[j, lo, li] = 1 iff li == stride*lo + j - pad."""
    lo = jnp.arange(lout, dtype=jnp.int32)[:, None]
    li = jnp.arange(lin, dtype=jnp.int32)[None, :]
    taps = [(li == stride * lo + (j - pad)).astype(jnp.bfloat16) for j in range(k)]
    return jnp.stack(taps)


def _quantize_int8(w):
    """Per-output-channel symmetric int8 quantization of a (K, out) matrix."""
    amax = jnp.max(jnp.abs(w), axis=0, keepdims=True)
    scale = jnp.maximum(amax, 1e-8) / 127.0
    wq = jnp.clip(jnp.round(w / scale), -127.0, 127.0).astype(jnp.int8)
    return wq, scale.astype(jnp.float32)


def prepare_params(params, n_time, batch):
    eps = 1e-5
    conv = []
    L = n_time
    for cp in params['cnn']:
        w, b = cp['w'], cp['b']
        cout, cin, k = w.shape
        s, pad = cp['stride'], cp['pad']
        lout = (L + 2 * pad - k) // s + 1
        bscale = cp['gamma'] / jnp.sqrt(cp['rvar'] + eps)
        wf = (jnp.transpose(w, (2, 1, 0)) * bscale[None, None, :]).astype(jnp.bfloat16)
        bf = ((b - cp['rmean']) * bscale + cp['beta']).reshape(1, cout).astype(jnp.float32)
        conv.append(dict(sel=_make_sel(L, lout, k, s, pad), w=wf, b=bf,
                         cfg=(k, lout, cout)))
        L = lout
    T = L
    D, H = params['d_model'], params['nhead']

    tl = params['transformer']

    def stk_f32(fn):
        return jnp.stack([fn(lp) for lp in tl]).astype(jnp.float32)

    def stk_bf16(fn):
        return jnp.stack([fn(lp) for lp in tl]).astype(jnp.bfloat16)

    ff1 = [_quantize_int8(lp['lin1_w'].T) for lp in tl]
    ff2 = [_quantize_int8(lp['lin2_w'].T) for lp in tl]
    trans = dict(
        in_w=stk_bf16(lambda lp: lp['in_proj_w'].T),
        in_b=stk_f32(lambda lp: lp['in_proj_b'].reshape(1, -1)),
        out_w=stk_bf16(lambda lp: lp['out_w'].T),
        out_b=stk_f32(lambda lp: lp['out_b'].reshape(1, -1)),
        ff1_wq=jnp.stack([q for q, _ in ff1]),
        ff1_s=jnp.stack([sc for _, sc in ff1]),
        ff1_b=stk_f32(lambda lp: lp['lin1_b'].reshape(1, -1)),
        ff2_wq=jnp.stack([q for q, _ in ff2]),
        ff2_s=jnp.stack([sc for _, sc in ff2]),
        ff2_b=stk_f32(lambda lp: lp['lin2_b'].reshape(1, -1)),
        ln1_g=stk_f32(lambda lp: lp['ln1_g'].reshape(1, -1)),
        ln1_b=stk_f32(lambda lp: lp['ln1_b'].reshape(1, -1)),
        ln2_g=stk_f32(lambda lp: lp['ln2_g'].reshape(1, -1)),
        ln2_b=stk_f32(lambda lp: lp['ln2_b'].reshape(1, -1)),
    )

    mp = params['mlp']
    mw1q, mw1s = _quantize_int8(mp['w1'].T)                 # (T*D, 512) int8
    mlp = dict(mw1q=mw1q, mw1s=mw1s,
               mb1=mp['b1'].reshape(1, -1).astype(jnp.float32),
               mw2=mp['w2'].T.astype(jnp.bfloat16),
               mb2=mp['b2'].reshape(1, -1).astype(jnp.float32),
               mw3=mp['w3'].T.astype(jnp.float32),
               mb3=mp['b3'].reshape(1, -1).astype(jnp.float32))

    # block-diagonal (same-batch) additive attention mask; rows/cols in (b,t) order
    N = batch * T
    bi = jnp.arange(N, dtype=jnp.int32) // T
    mask = jnp.where(bi[:, None] == bi[None, :], 0.0, -1e30).astype(jnp.float32)

    cfg = dict(T=T, D=D, H=H, n_layers=params['n_layers'],
               n_classes=params['n_classes'],
               conv_cfgs=tuple(cl['cfg'] for cl in conv))
    return dict(conv=conv, trans=trans, mlp=mlp, mask=mask, cfg=cfg)


# ----------------------------------------------------------------------------

if __name__ == "__main__":
    key = jax.random.PRNGKey(0)
    k_x, k_p = jax.random.split(key)

    # Small shapes consistent with the module: B=2, n_channels=2, n_time=128
    # (4 stride-2 convs -> T'=8, cnn_output_size = 128*8 = 1024), n_classes=6.
    B, C_IN, N_TIME, N_CLASSES = 2, 2, 128, 6
    x = jax.random.normal(k_x, (B, C_IN, N_TIME), jnp.float32)
    params = init_params(k_p, n_channels=C_IN, n_time=N_TIME, n_classes=N_CLASSES)
    prepped = prepare_params(params, n_time=N_TIME, batch=B)

    fwd = jax.jit(lambda inp: eeg_classifier_forward(inp, prepped))
    out = jax.block_until_ready(fwd(x))
    assert out.shape == (B, N_CLASSES), out.shape
    assert bool(jnp.all(jnp.isfinite(out)))
    print("KERNEL_OK")
</pallas_src>

<mosaic_0001>
module attributes {stable_mosaic.version = 11 : i64} {
  func.func @_eeg_fused_kernel(%arg0: i32, %arg1: memref<2x2x128xf32, #tpu.memory_space<vmem>>, %arg2: memref<7x64x128xbf16, #tpu.memory_space<vmem>>, %arg3: memref<7x2x16xbf16, #tpu.memory_space<vmem>>, %arg4: memref<1x16xf32, #tpu.memory_space<vmem>>, %arg5: memref<5x32x64xbf16, #tpu.memory_space<vmem>>, %arg6: memref<5x16x32xbf16, #tpu.memory_space<vmem>>, %arg7: memref<1x32xf32, #tpu.memory_space<vmem>>, %arg8: memref<3x16x32xbf16, #tpu.memory_space<vmem>>, %arg9: memref<3x32x64xbf16, #tpu.memory_space<vmem>>, %arg10: memref<1x64xf32, #tpu.memory_space<vmem>>, %arg11: memref<3x8x16xbf16, #tpu.memory_space<vmem>>, %arg12: memref<3x64x128xbf16, #tpu.memory_space<vmem>>, %arg13: memref<1x128xf32, #tpu.memory_space<vmem>>, %arg14: memref<16x16xf32, #tpu.memory_space<vmem>>, %arg15: memref<1x128x384xbf16, #tpu.memory_space<vmem>>, %arg16: memref<1x1x384xf32, #tpu.memory_space<vmem>>, %arg17: memref<1x128x128xbf16, #tpu.memory_space<vmem>>, %arg18: memref<1x1x128xf32, #tpu.memory_space<vmem>>, %arg19: memref<1x128x2048xi8, #tpu.memory_space<vmem>>, %arg20: memref<1x1x2048xf32, #tpu.memory_space<vmem>>, %arg21: memref<1x1x2048xf32, #tpu.memory_space<vmem>>, %arg22: memref<1x2048x128xi8, #tpu.memory_space<vmem>>, %arg23: memref<1x1x128xf32, #tpu.memory_space<vmem>>, %arg24: memref<1x1x128xf32, #tpu.memory_space<vmem>>, %arg25: memref<1x1x128xf32, #tpu.memory_space<vmem>>, %arg26: memref<1x1x128xf32, #tpu.memory_space<vmem>>, %arg27: memref<1x1x128xf32, #tpu.memory_space<vmem>>, %arg28: memref<1x1x128xf32, #tpu.memory_space<vmem>>, %arg29: memref<1024x512xi8, #tpu.memory_space<any>>, %arg30: memref<1x512xf32, #tpu.memory_space<vmem>>, %arg31: memref<1x512xf32, #tpu.memory_space<vmem>>, %arg32: memref<512x128xbf16, #tpu.memory_space<vmem>>, %arg33: memref<1x128xf32, #tpu.memory_space<vmem>>, %arg34: memref<128x6xf32, #tpu.memory_space<vmem>>, %arg35: memref<1x6xf32, #tpu.memory_space<vmem>>, %arg36: memref<2x6xf32, #tpu.memory_space<vmem>>, %arg37: memref<16x128xf32, #tpu.memory_space<vmem>>, %arg38: memref<1024x512xi8, #tpu.memory_space<vmem>>, %arg39: memref<!tpu.dma_semaphore, #tpu.memory_space<semaphore_mem>>) attributes {dimension_semantics = [#tpu.dimension_semantics<arbitrary>], iteration_bounds = array<i64: 5>, scalar_prefetch = 0 : i64, scratch_operands = 3 : i64, tpu.core_type = #tpu.core_type<tc>, window_params = [{pipeline_mode = #tpu.pipeline_mode<synchronous>, transform_indices = @transform_0, window_bounds = array<i64: 2, 2, 128>}, {pipeline_mode = #tpu.pipeline_mode<synchronous>, transform_indices = @transform_1, window_bounds = array<i64: 7, 64, 128>}, {pipeline_mode = #tpu.pipeline_mode<synchronous>, transform_indices = @transform_2, window_bounds = array<i64: 7, 2, 16>}, {pipeline_mode = #tpu.pipeline_mode<synchronous>, transform_indices = @transform_3, window_bounds = array<i64: 1, 16>}, {pipeline_mode = #tpu.pipeline_mode<synchronous>, transform_indices = @transform_4, window_bounds = array<i64: 5, 32, 64>}, {pipeline_mode = #tpu.pipeline_mode<synchronous>, transform_indices = @transform_5, window_bounds = array<i64: 5, 16, 32>}, {pipeline_mode = #tpu.pipeline_mode<synchronous>, transform_indices = @transform_6, window_bounds = array<i64: 1, 32>}, {pipeline_mode = #tpu.pipeline_mode<synchronous>, transform_indices = @transform_7, window_bounds = array<i64: 3, 16, 32>}, {pipeline_mode = #tpu.pipeline_mode<synchronous>, transform_indices = @transform_8, window_bounds = array<i64: 3, 32, 64>}, {pipeline_mode = #tpu.pipeline_mode<synchronous>, transform_indices = @transform_9, window_bounds = array<i64: 1, 64>}, {pipeline_mode = #tpu.pipeline_mode<synchronous>, transform_indices = @transform_10, window_bounds = array<i64: 3, 8, 16>}, {pipeline_mode = #tpu.pipeline_mode<synchronous>, transform_indices = @transform_11, window_bounds = array<i64: 3, 64, 128>}, {pipeline_mode = #tpu.pipeline_mode<synchronous>, transform_indices = @transform_12, window_bounds = array<i64: 1, 128>}, {pipeline_mode = #tpu.pipeline_mode<synchronous>, transform_indices = @transform_13, window_bounds = array<i64: 16, 16>}, {transform_indices = @transform_14, window_bounds = array<i64: 1, 128, 384>}, {transform_indices = @transform_15, window_bounds = array<i64: 1, 1, 384>}, {transform_indices = @transform_16, window_bounds = array<i64: 1, 128, 128>}, {transform_indices = @transform_17, window_bounds = array<i64: 1, 1, 128>}, {transform_indices = @transform_18, window_bounds = array<i64: 1, 128, 2048>}, {transform_indices = @transform_19, window_bounds = array<i64: 1, 1, 2048>}, {transform_indices = @transform_20, window_bounds = array<i64: 1, 1, 2048>}, {transform_indices = @transform_21, window_bounds = array<i64: 1, 2048, 128>}, {transform_indices = @transform_22, window_bounds = array<i64: 1, 1, 128>}, {transform_indices = @transform_23, window_bounds = array<i64: 1, 1, 128>}, {transform_indices = @transform_24, window_bounds = array<i64: 1, 1, 128>}, {transform_indices = @transform_25, window_bounds = array<i64: 1, 1, 128>}, {transform_indices = @transform_26, window_bounds = array<i64: 1, 1, 128>}, {transform_indices = @transform_27, window_bounds = array<i64: 1, 1, 128>}, {}, {pipeline_mode = #tpu.pipeline_mode<synchronous>, transform_indices = @transform_29, window_bounds = array<i64: 1, 512>}, {pipeline_mode = #tpu.pipeline_mode<synchronous>, transform_indices = @transform_30, window_bounds = array<i64: 1, 512>}, {pipeline_mode = #tpu.pipeline_mode<synchronous>, transform_indices = @transform_31, window_bounds = array<i64: 512, 128>}, {pipeline_mode = #tpu.pipeline_mode<synchronous>, transform_indices = @transform_32, window_bounds = array<i64: 1, 128>}, {pipeline_mode = #tpu.pipeline_mode<synchronous>, transform_indices = @transform_33, window_bounds = array<i64: 128, 6>}, {pipeline_mode = #tpu.pipeline_mode<synchronous>, transform_indices = @transform_34, window_bounds = array<i64: 1, 6>}, {pipeline_mode = #tpu.pipeline_mode<synchronous>, transform_indices = @transform_35, window_bounds = array<i64: 2, 6>}]} {
    %c0_i32 = arith.constant 0 : i32
    %0 = arith.cmpi eq, %arg0, %c0_i32 : i32
    %1 = arith.extui %0 : i1 to i32
    %c0_i32_0 = arith.constant 0 : i32
    %2 = arith.cmpi ne, %1, %c0_i32_0 : i32
    scf.if %2 {
      tpu.enqueue_dma source(%arg29 : memref<1024x512xi8, #tpu.memory_space<any>>) target(%arg38 : memref<1024x512xi8, #tpu.memory_space<vmem>>) target_semaphore(%arg39 : memref<!tpu.dma_semaphore, #tpu.memory_space<semaphore_mem>>)
      %c0 = arith.constant 0 : index
      %c0_3 = arith.constant 0 : index
      %c0_4 = arith.constant 0 : index
      %11 = vector.load %arg1[%c0, %c0_3, %c0_4] : memref<2x2x128xf32, #tpu.memory_space<vmem>>, vector<1x2x128xf32>
      %12 = vector.shape_cast %11 : vector<1x2x128xf32> to vector<2x128xf32>
      %13 = arith.truncf %12 : vector<2x128xf32> to vector<2x128xbf16>
      %cst = arith.constant 0.000000e+00 : f32
      %14 = vector.broadcast %cst : f32 to vector<64x16xf32>
      %c0_5 = arith.constant 0 : index
      %c0_6 = arith.constant 0 : index
      %c0_7 = arith.constant 0 : index
      %15 = vector.load %arg2[%c0_5, %c0_6, %c0_7] : memref<7x64x128xbf16, #tpu.memory_space<vmem>>, vector<1x64x128xbf16>
      %16 = vector.shape_cast %15 : vector<1x64x128xbf16> to vector<64x128xbf16>
      "tpu.trace_start"() <{level = 10 : i32, message = "ol,cl->oc"}> : () -> ()
      %cst_8 = arith.constant dense<0.000000e+00> : vector<64x2xf32>
      %17 = tpu.matmul %16, %13, %cst_8 {dimension_numbers = #tpu.dot_dimension_numbers<[1], [1], [0], [0], [0, 0, 1, 0], [], []>} : vector<64x128xbf16>, vector<2x128xbf16>, vector<64x2xf32> -> vector<64x2xf32>
      "tpu.trace_stop"() : () -> ()
      %18 = arith.truncf %17 : vector<64x2xf32> to vector<64x2xbf16>
      %c0_9 = arith.constant 0 : index
      %c0_10 = arith.constant 0 : index
      %c0_11 = arith.constant 0 : index
      %19 = vector.load %arg3[%c0_9, %c0_10, %c0_11] : memref<7x2x16xbf16, #tpu.memory_space<vmem>>, vector<1x2x16xbf16>
      %20 = vector.shape_cast %19 : vector<1x2x16xbf16> to vector<2x16xbf16>
      %cst_12 = arith.constant dense<0.000000e+00> : vector<64x16xf32>
      %21 = tpu.matmul %18, %20, %cst_12 {dimension_numbers = #tpu.dot_dimension_numbers<[1], [0], [0], [1], [0, 0, 1, 1], [], []>} : vector<64x2xbf16>, vector<2x16xbf16>, vector<64x16xf32> -> vector<64x16xf32>
      %22 = arith.addf %14, %21 : vector<64x16xf32>
      %c1 = arith.constant 1 : index
      %c0_13 = arith.constant 0 : index
      %c0_14 = arith.constant 0 : index
      %23 = vector.load %arg2[%c1, %c0_13, %c0_14] : memref<7x64x128xbf16, #tpu.memory_space<vmem>>, vector<1x64x128xbf16>
      %24 = vector.shape_cast %23 : vector<1x64x128xbf16> to vector<64x128xbf16>
      "tpu.trace_start"() <{level = 10 : i32, message = "ol,cl->oc"}> : () -> ()
      %cst_15 = arith.constant dense<0.000000e+00> : vector<64x2xf32>
      %25 = tpu.matmul %24, %13, %cst_15 {dimension_numbers = #tpu.dot_dimension_numbers<[1], [1], [0], [0], [0, 0, 1, 0], [], []>} : vector<64x128xbf16>, vector<2x128xbf16>, vector<64x2xf32> -> vector<64x2xf32>
      "tpu.trace_stop"() : () -> ()
      %26 = arith.truncf %25 : vector<64x2xf32> to vector<64x2xbf16>
      %c1_16 = arith.constant 1 : index
      %c0_17 = arith.constant 0 : index
      %c0_18 = arith.constant 0 : index
      %27 = vector.load %arg3[%c1_16, %c0_17, %c0_18] : memref<7x2x16xbf16, #tpu.memory_space<vmem>>, vector<1x2x16xbf16>
      %28 = vector.shape_cast %27 : vector<1x2x16xbf16> to vector<2x16xbf16>
      %cst_19 = arith.constant dense<0.000000e+00> : vector<64x16xf32>
      %29 = tpu.matmul %26, %28, %cst_19 {dimension_numbers = #tpu.dot_dimension_numbers<[1], [0], [0], [1], [0, 0, 1, 1], [], []>} : vector<64x2xbf16>, vector<2x16xbf16>, vector<64x16xf32> -> vector<64x16xf32>
      %30 = arith.addf %22, %29 : vector<64x16xf32>
      %c2 = arith.constant 2 : index
      %c0_20 = arith.constant 0 : index
      %c0_21 = arith.constant 0 : index
      %31 = vector.load %arg2[%c2, %c0_20, %c0_21] : memref<7x64x128xbf16, #tpu.memory_space<vmem>>, vector<1x64x128xbf16>
      %32 = vector.shape_cast %31 : vector<1x64x128xbf16> to vector<64x128xbf16>
      "tpu.trace_start"() <{level = 10 : i32, message = "ol,cl->oc"}> : () -> ()
      %cst_22 = arith.constant dense<0.000000e+00> : vector<64x2xf32>
      %33 = tpu.matmul %32, %13, %cst_22 {dimension_numbers = #tpu.dot_dimension_numbers<[1], [1], [0], [0], [0, 0, 1, 0], [], []>} : vector<64x128xbf16>, vector<2x128xbf16>, vector<64x2xf32> -> vector<64x2xf32>
      "tpu.trace_stop"() : () -> ()
      %34 = arith.truncf %33 : vector<64x2xf32> to vector<64x2xbf16>
      %c2_23 = arith.constant 2 : index
      %c0_24 = arith.constant 0 : index
      %c0_25 = arith.constant 0 : index
      %35 = vector.load %arg3[%c2_23, %c0_24, %c0_25] : memref<7x2x16xbf16, #tpu.memory_space<vmem>>, vector<1x2x16xbf16>
      %36 = vector.shape_cast %35 : vector<1x2x16xbf16> to vector<2x16xbf16>
      %cst_26 = arith.constant dense<0.000000e+00> : vector<64x16xf32>
      %37 = tpu.matmul %34, %36, %cst_26 {dimension_numbers = #tpu.dot_dimension_numbers<[1], [0], [0], [1], [0, 0, 1, 1], [], []>} : vector<64x2xbf16>, vector<2x16xbf16>, vector<64x16xf32> -> vector<64x16xf32>
      %38 = arith.addf %30, %37 : vector<64x16xf32>
      %c3 = arith.constant 3 : index
      %c0_27 = arith.constant 0 : index
      %c0_28 = arith.constant 0 : index
      %39 = vector.load %arg2[%c3, %c0_27, %c0_28] : memref<7x64x128xbf16, #tpu.memory_space<vmem>>, vector<1x64x128xbf16>
      %40 = vector.shape_cast %39 : vector<1x64x128xbf16> to vector<64x128xbf16>
      "tpu.trace_start"() <{level = 10 : i32, message = "ol,cl->oc"}> : () -> ()
      %cst_29 = arith.constant dense<0.000000e+00> : vector<64x2xf32>
      %41 = tpu.matmul %40, %13, %cst_29 {dimension_numbers = #tpu.dot_dimension_numbers<[1], [1], [0], [0], [0, 0, 1, 0], [], []>} : vector<64x128xbf16>, vector<2x128xbf16>, vector<64x2xf32> -> vector<64x2xf32>
      "tpu.trace_stop"() : () -> ()
      %42 = arith.truncf %41 : vector<64x2xf32> to vector<64x2xbf16>
      %c3_30 = arith.constant 3 : index
      %c0_31 = arith.constant 0 : index
      %c0_32 = arith.constant 0 : index
      %43 = vector.load %arg3[%c3_30, %c0_31, %c0_32] : memref<7x2x16xbf16, #tpu.memory_space<vmem>>, vector<1x2x16xbf16>
      %44 = vector.shape_cast %43 : vector<1x2x16xbf16> to vector<2x16xbf16>
      %cst_33 = arith.constant dense<0.000000e+00> : vector<64x16xf32>
      %45 = tpu.matmul %42, %44, %cst_33 {dimension_numbers = #tpu.dot_dimension_numbers<[1], [0], [0], [1], [0, 0, 1, 1], [], []>} : vector<64x2xbf16>, vector<2x16xbf16>, vector<64x16xf32> -> vector<64x16xf32>
      %46 = arith.addf %38, %45 : vector<64x16xf32>
      %c4 = arith.constant 4 : index
      %c0_34 = arith.constant 0 : index
      %c0_35 = arith.constant 0 : index
      %47 = vector.load %arg2[%c4, %c0_34, %c0_35] : memref<7x64x128xbf16, #tpu.memory_space<vmem>>, vector<1x64x128xbf16>
      %48 = vector.shape_cast %47 : vector<1x64x128xbf16> to vector<64x128xbf16>
      "tpu.trace_start"() <{level = 10 : i32, message = "ol,cl->oc"}> : () -> ()
      %cst_36 = arith.constant dense<0.000000e+00> : vector<64x2xf32>
      %49 = tpu.matmul %48, %13, %cst_36 {dimension_numbers = #tpu.dot_dimension_numbers<[1], [1], [0], [0], [0, 0, 1, 0], [], []>} : vector<64x128xbf16>, vector<2x128xbf16>, vector<64x2xf32> -> vector<64x2xf32>
      "tpu.trace_stop"() : () -> ()
      %50 = arith.truncf %49 : vector<64x2xf32> to vector<64x2xbf16>
      %c4_37 = arith.constant 4 : index
      %c0_38 = arith.constant 0 : index
      %c0_39 = arith.constant 0 : index
      %51 = vector.load %arg3[%c4_37, %c0_38, %c0_39] : memref<7x2x16xbf16, #tpu.memory_space<vmem>>, vector<1x2x16xbf16>
      %52 = vector.shape_cast %51 : vector<1x2x16xbf16> to vector<2x16xbf16>
      %cst_40 = arith.constant dense<0.000000e+00> : vector<64x16xf32>
      %53 = tpu.matmul %50, %52, %cst_40 {dimension_numbers = #tpu.dot_dimension_numbers<[1], [0], [0], [1], [0, 0, 1, 1], [], []>} : vector<64x2xbf16>, vector<2x16xbf16>, vector<64x16xf32> -> vector<64x16xf32>
      %54 = arith.addf %46, %53 : vector<64x16xf32>
      %c5 = arith.constant 5 : index
      %c0_41 = arith.constant 0 : index
      %c0_42 = arith.constant 0 : index
      %55 = vector.load %arg2[%c5, %c0_41, %c0_42] : memref<7x64x128xbf16, #tpu.memory_space<vmem>>, vector<1x64x128xbf16>
      %56 = vector.shape_cast %55 : vector<1x64x128xbf16> to vector<64x128xbf16>
      "tpu.trace_start"() <{level = 10 : i32, message = "ol,cl->oc"}> : () -> ()
      %cst_43 = arith.constant dense<0.000000e+00> : vector<64x2xf32>
      %57 = tpu.matmul %56, %13, %cst_43 {dimension_numbers = #tpu.dot_dimension_numbers<[1], [1], [0], [0], [0, 0, 1, 0], [], []>} : vector<64x128xbf16>, vector<2x128xbf16>, vector<64x2xf32> -> vector<64x2xf32>
      "tpu.trace_stop"() : () -> ()
      %58 = arith.truncf %57 : vector<64x2xf32> to vector<64x2xbf16>
      %c5_44 = arith.constant 5 : index
      %c0_45 = arith.constant 0 : index
      %c0_46 = arith.constant 0 : index
      %59 = vector.load %arg3[%c5_44, %c0_45, %c0_46] : memref<7x2x16xbf16, #tpu.memory_space<vmem>>, vector<1x2x16xbf16>
      %60 = vector.shape_cast %59 : vector<1x2x16xbf16> to vector<2x16xbf16>
      %cst_47 = arith.constant dense<0.000000e+00> : vector<64x16xf32>
      %61 = tpu.matmul %58, %60, %cst_47 {dimension_numbers = #tpu.dot_dimension_numbers<[1], [0], [0], [1], [0, 0, 1, 1], [], []>} : vector<64x2xbf16>, vector<2x16xbf16>, vector<64x16xf32> -> vector<64x16xf32>
      %62 = arith.addf %54, %61 : vector<64x16xf32>
      %c6 = arith.constant 6 : index
      %c0_48 = arith.constant 0 : index
      %c0_49 = arith.constant 0 : index
      %63 = vector.load %arg2[%c6, %c0_48, %c0_49] : memref<7x64x128xbf16, #tpu.memory_space<vmem>>, vector<1x64x128xbf16>
      %64 = vector.shape_cast %63 : vector<1x64x128xbf16> to vector<64x128xbf16>
      "tpu.trace_start"() <{level = 10 : i32, message = "ol,cl->oc"}> : () -> ()
      %cst_50 = arith.constant dense<0.000000e+00> : vector<64x2xf32>
      %65 = tpu.matmul %64, %13, %cst_50 {dimension_numbers = #tpu.dot_dimension_numbers<[1], [1], [0], [0], [0, 0, 1, 0], [], []>} : vector<64x128xbf16>, vector<2x128xbf16>, vector<64x2xf32> -> vector<64x2xf32>
      "tpu.trace_stop"() : () -> ()
      %66 = arith.truncf %65 : vector<64x2xf32> to vector<64x2xbf16>
      %c6_51 = arith.constant 6 : index
      %c0_52 = arith.constant 0 : index
      %c0_53 = arith.constant 0 : index
      %67 = vector.load %arg3[%c6_51, %c0_52, %c0_53] : memref<7x2x16xbf16, #tpu.memory_space<vmem>>, vector<1x2x16xbf16>
      %68 = vector.shape_cast %67 : vector<1x2x16xbf16> to vector<2x16xbf16>
      %cst_54 = arith.constant dense<0.000000e+00> : vector<64x16xf32>
      %69 = tpu.matmul %66, %68, %cst_54 {dimension_numbers = #tpu.dot_dimension_numbers<[1], [0], [0], [1], [0, 0, 1, 1], [], []>} : vector<64x2xbf16>, vector<2x16xbf16>, vector<64x16xf32> -> vector<64x16xf32>
      %70 = arith.addf %62, %69 : vector<64x16xf32>
      %c0_55 = arith.constant 0 : index
      %c0_56 = arith.constant 0 : index
      %71 = vector.load %arg4[%c0_55, %c0_56] : memref<1x16xf32, #tpu.memory_space<vmem>>, vector<1x16xf32>
      %72 = vector.broadcast %71 : vector<1x16xf32> to vector<64x16xf32>
      %73 = arith.addf %70, %72 : vector<64x16xf32>
      %cst_57 = arith.constant 0.000000e+00 : f32
      %74 = vector.broadcast %cst_57 : f32 to vector<64x16xf32>
      %75 = arith.maximumf %73, %74 : vector<64x16xf32>
      %76 = arith.truncf %75 : vector<64x16xf32> to vector<64x16xbf16>
      %cst_58 = arith.constant 0.000000e+00 : f32
      %77 = vector.broadcast %cst_58 : f32 to vector<32x32xf32>
      %c0_59 = arith.constant 0 : index
      %c0_60 = arith.constant 0 : index
      %c0_61 = arith.constant 0 : index
      %78 = vector.load %arg5[%c0_59, %c0_60, %c0_61] : memref<5x32x64xbf16, #tpu.memory_space<vmem>>, vector<1x32x64xbf16>
      %79 = vector.shape_cast %78 : vector<1x32x64xbf16> to vector<32x64xbf16>
      %cst_62 = arith.constant dense<0.000000e+00> : vector<32x16xf32>
      %80 = tpu.matmul %79, %76, %cst_62 {dimension_numbers = #tpu.dot_dimension_numbers<[1], [0], [0], [1], [0, 0, 1, 1], [], []>} : vector<32x64xbf16>, vector<64x16xbf16>, vector<32x16xf32> -> vector<32x16xf32>
      %81 = arith.truncf %80 : vector<32x16xf32> to vector<32x16xbf16>
      %c0_63 = arith.constant 0 : index
      %c0_64 = arith.constant 0 : index
      %c0_65 = arith.constant 0 : index
      %82 = vector.load %arg6[%c0_63, %c0_64, %c0_65] : memref<5x16x32xbf16, #tpu.memory_space<vmem>>, vector<1x16x32xbf16>
      %83 = vector.shape_cast %82 : vector<1x16x32xbf16> to vector<16x32xbf16>
      %cst_66 = arith.constant dense<0.000000e+00> : vector<32x32xf32>
      %84 = tpu.matmul %81, %83, %cst_66 {dimension_numbers = #tpu.dot_dimension_numbers<[1], [0], [0], [1], [0, 0, 1, 1], [], []>} : vector<32x16xbf16>, vector<16x32xbf16>, vector<32x32xf32> -> vector<32x32xf32>
      %85 = arith.addf %77, %84 : vector<32x32xf32>
      %c1_67 = arith.constant 1 : index
      %c0_68 = arith.constant 0 : index
      %c0_69 = arith.constant 0 : index
      %86 = vector.load %arg5[%c1_67, %c0_68, %c0_69] : memref<5x32x64xbf16, #tpu.memory_space<vmem>>, vector<1x32x64xbf16>
      %87 = vector.shape_cast %86 : vector<1x32x64xbf16> to vector<32x64xbf16>
      %cst_70 = arith.constant dense<0.000000e+00> : vector<32x16xf32>
      %88 = tpu.matmul %87, %76, %cst_70 {dimension_numbers = #tpu.dot_dimension_numbers<[1], [0], [0], [1], [0, 0, 1, 1], [], []>} : vector<32x64xbf16>, vector<64x16xbf16>, vector<32x16xf32> -> vector<32x16xf32>
      %89 = arith.truncf %88 : vector<32x16xf32> to vector<32x16xbf16>
      %c1_71 = arith.constant 1 : index
      %c0_72 = arith.constant 0 : index
      %c0_73 = arith.constant 0 : index
      %90 = vector.load %arg6[%c1_71, %c0_72, %c0_73] : memref<5x16x32xbf16, #tpu.memory_space<vmem>>, vector<1x16x32xbf16>
      %91 = vector.shape_cast %90 : vector<1x16x32xbf16> to vector<16x32xbf16>
      %cst_74 = arith.constant dense<0.000000e+00> : vector<32x32xf32>
      %92 = tpu.matmul %89, %91, %cst_74 {dimension_numbers = #tpu.dot_dimension_numbers<[1], [0], [0], [1], [0, 0, 1, 1], [], []>} : vector<32x16xbf16>, vector<16x32xbf16>, vector<32x32xf32> -> vector<32x32xf32>
      %93 = arith.addf %85, %92 : vector<32x32xf32>
      %c2_75 = arith.constant 2 : index
      %c0_76 = arith.constant 0 : index
      %c0_77 = arith.constant 0 : index
      %94 = vector.load %arg5[%c2_75, %c0_76, %c0_77] : memref<5x32x64xbf16, #tpu.memory_space<vmem>>, vector<1x32x64xbf16>
      %95 = vector.shape_cast %94 : vector<1x32x64xbf16> to vector<32x64xbf16>
      %cst_78 = arith.constant dense<0.000000e+00> : vector<32x16xf32>
      %96 = tpu.matmul %95, %76, %cst_78 {dimension_numbers = #tpu.dot_dimension_numbers<[1], [0], [0], [1], [0, 0, 1, 1], [], []>} : vector<32x64xbf16>, vector<64x16xbf16>, vector<32x16xf32> -> vector<32x16xf32>
      %97 = arith.truncf %96 : vector<32x16xf32> to vector<32x16xbf16>
      %c2_79 = arith.constant 2 : index
      %c0_80 = arith.constant 0 : index
      %c0_81 = arith.constant 0 : index
      %98 = vector.load %arg6[%c2_79, %c0_80, %c0_81] : memref<5x16x32xbf16, #tpu.memory_space<vmem>>, vector<1x16x32xbf16>
      %99 = vector.shape_cast %98 : vector<1x16x32xbf16> to vector<16x32xbf16>
      %cst_82 = arith.constant dense<0.000000e+00> : vector<32x32xf32>
      %100 = tpu.matmul %97, %99, %cst_82 {dimension_numbers = #tpu.dot_dimension_numbers<[1], [0], [0], [1], [0, 0, 1, 1], [], []>} : vector<32x16xbf16>, vector<16x32xbf16>, vector<32x32xf32> -> vector<32x32xf32>
      %101 = arith.addf %93, %100 : vector<32x32xf32>
      %c3_83 = arith.constant 3 : index
      %c0_84 = arith.constant 0 : index
      %c0_85 = arith.constant 0 : index
      %102 = vector.load %arg5[%c3_83, %c0_84, %c0_85] : memref<5x32x64xbf16, #tpu.memory_space<vmem>>, vector<1x32x64xbf16>
      %103 = vector.shape_cast %102 : vector<1x32x64xbf16> to vector<32x64xbf16>
      %cst_86 = arith.constant dense<0.000000e+00> : vector<32x16xf32>
      %104 = tpu.matmul %103, %76, %cst_86 {dimension_numbers = #tpu.dot_dimension_numbers<[1], [0], [0], [1], [0, 0, 1, 1], [], []>} : vector<32x64xbf16>, vector<64x16xbf16>, vector<32x16xf32> -> vector<32x16xf32>
      %105 = arith.truncf %104 : vector<32x16xf32> to vector<32x16xbf16>
      %c3_87 = arith.constant 3 : index
      %c0_88 = arith.constant 0 : index
      %c0_89 = arith.constant 0 : index
      %106 = vector.load %arg6[%c3_87, %c0_88, %c0_89] : memref<5x16x32xbf16, #tpu.memory_space<vmem>>, vector<1x16x32xbf16>
      %107 = vector.shape_cast %106 : vector<1x16x32xbf16> to vector<16x32xbf16>
      %cst_90 = arith.constant dense<0.000000e+00> : vector<32x32xf32>
      %108 = tpu.matmul %105, %107, %cst_90 {dimension_numbers = #tpu.dot_dimension_numbers<[1], [0], [0], [1], [0, 0, 1, 1], [], []>} : vector<32x16xbf16>, vector<16x32xbf16>, vector<32x32xf32> -> vector<32x32xf32>
      %109 = arith.addf %101, %108 : vector<32x32xf32>
      %c4_91 = arith.constant 4 : index
      %c0_92 = arith.constant 0 : index
      %c0_93 = arith.constant 0 : index
      %110 = vector.load %arg5[%c4_91, %c0_92, %c0_93] : memref<5x32x64xbf16, #tpu.memory_space<vmem>>, vector<1x32x64xbf16>
      %111 = vector.shape_cast %110 : vector<1x32x64xbf16> to vector<32x64xbf16>
      %cst_94 = arith.constant dense<0.000000e+00> : vector<32x16xf32>
      %112 = tpu.matmul %111, %76, %cst_94 {dimension_numbers = #tpu.dot_dimension_numbers<[1], [0], [0], [1], [0, 0, 1, 1], [], []>} : vector<32x64xbf16>, vector<64x16xbf16>, vector<32x16xf32> -> vector<32x16xf32>
      %113 = arith.truncf %112 : vector<32x16xf32> to vector<32x16xbf16>
      %c4_95 = arith.constant 4 : index
      %c0_96 = arith.constant 0 : index
      %c0_97 = arith.constant 0 : index
      %114 = vector.load %arg6[%c4_95, %c0_96, %c0_97] : memref<5x16x32xbf16, #tpu.memory_space<vmem>>, vector<1x16x32xbf16>
      %115 = vector.shape_cast %114 : vector<1x16x32xbf16> to vector<16x32xbf16>
      %cst_98 = arith.constant dense<0.000000e+00> : vector<32x32xf32>
      %116 = tpu.matmul %113, %115, %cst_98 {dimension_numbers = #tpu.dot_dimension_numbers<[1], [0], [0], [1], [0, 0, 1, 1], [], []>} : vector<32x16xbf16>, vector<16x32xbf16>, vector<32x32xf32> -> vector<32x32xf32>
      %117 = arith.addf %109, %116 : vector<32x32xf32>
      %c0_99 = arith.constant 0 : index
      %c0_100 = arith.constant 0 : index
      %118 = vector.load %arg7[%c0_99, %c0_100] : memref<1x32xf32, #tpu.memory_space<vmem>>, vector<1x32xf32>
      %119 = vector.broadcast %118 : vector<1x32xf32> to vector<32x32xf32>
      %120 = arith.addf %117, %119 : vector<32x32xf32>
      %cst_101 = arith.constant 0.000000e+00 : f32
      %121 = vector.broadcast %cst_101 : f32 to vector<32x32xf32>
      %122 = arith.maximumf %120, %121 : vector<32x32xf32>
      %123 = arith.truncf %122 : vector<32x32xf32> to vector<32x32xbf16>
      %cst_102 = arith.constant 0.000000e+00 : f32
      %124 = vector.broadcast %cst_102 : f32 to vector<16x64xf32>
      %c0_103 = arith.constant 0 : index
      %c0_104 = arith.constant 0 : index
      %c0_105 = arith.constant 0 : index
      %125 = vector.load %arg8[%c0_103, %c0_104, %c0_105] : memref<3x16x32xbf16, #tpu.memory_space<vmem>>, vector<1x16x32xbf16>
      %126 = vector.shape_cast %125 : vector<1x16x32xbf16> to vector<16x32xbf16>
      %cst_106 = arith.constant dense<0.000000e+00> : vector<16x32xf32>
      %127 = tpu.matmul %126, %123, %cst_106 {dimension_numbers = #tpu.dot_dimension_numbers<[1], [0], [0], [1], [0, 0, 1, 1], [], []>} : vector<16x32xbf16>, vector<32x32xbf16>, vector<16x32xf32> -> vector<16x32xf32>
      %128 = arith.truncf %127 : vector<16x32xf32> to vector<16x32xbf16>
      %c0_107 = arith.constant 0 : index
      %c0_108 = arith.constant 0 : index
      %c0_109 = arith.constant 0 : index
      %129 = vector.load %arg9[%c0_107, %c0_108, %c0_109] : memref<3x32x64xbf16, #tpu.memory_space<vmem>>, vector<1x32x64xbf16>
      %130 = vector.shape_cast %129 : vector<1x32x64xbf16> to vector<32x64xbf16>
      %cst_110 = arith.constant dense<0.000000e+00> : vector<16x64xf32>
      %131 = tpu.matmul %128, %130, %cst_110 {dimension_numbers = #tpu.dot_dimension_numbers<[1], [0], [0], [1], [0, 0, 1, 1], [], []>} : vector<16x32xbf16>, vector<32x64xbf16>, vector<16x64xf32> -> vector<16x64xf32>
      %132 = arith.addf %124, %131 : vector<16x64xf32>
      %c1_111 = arith.constant 1 : index
      %c0_112 = arith.constant 0 : index
      %c0_113 = arith.constant 0 : index
      %133 = vector.load %arg8[%c1_111, %c0_112, %c0_113] : memref<3x16x32xbf16, #tpu.memory_space<vmem>>, vector<1x16x32xbf16>
      %134 = vector.shape_cast %133 : vector<1x16x32xbf16> to vector<16x32xbf16>
      %cst_114 = arith.constant dense<0.000000e+00> : vector<16x32xf32>
      %135 = tpu.matmul %134, %123, %cst_114 {dimension_numbers = #tpu.dot_dimension_numbers<[1], [0], [0], [1], [0, 0, 1, 1], [], []>} : vector<16x32xbf16>, vector<32x32xbf16>, vector<16x32xf32> -> vector<16x32xf32>
      %136 = arith.truncf %135 : vector<16x32xf32> to vector<16x32xbf16>
      %c1_115 = arith.constant 1 : index
      %c0_116 = arith.constant 0 : index
      %c0_117 = arith.constant 0 : index
      %137 = vector.load %arg9[%c1_115, %c0_116, %c0_117] : memref<3x32x64xbf16, #tpu.memory_space<vmem>>, vector<1x32x64xbf16>
      %138 = vector.shape_cast %137 : vector<1x32x64xbf16> to vector<32x64xbf16>
      %cst_118 = arith.constant dense<0.000000e+00> : vector<16x64xf32>
      %139 = tpu.matmul %136, %138, %cst_118 {dimension_numbers = #tpu.dot_dimension_numbers<[1], [0], [0], [1], [0, 0, 1, 1], [], []>} : vector<16x32xbf16>, vector<32x64xbf16>, vector<16x64xf32> -> vector<16x64xf32>
      %140 = arith.addf %132, %139 : vector<16x64xf32>
      %c2_119 = arith.constant 2 : index
      %c0_120 = arith.constant 0 : index
      %c0_121 = arith.constant 0 : index
      %141 = vector.load %arg8[%c2_119, %c0_120, %c0_121] : memref<3x16x32xbf16, #tpu.memory_space<vmem>>, vector<1x16x32xbf16>
      %142 = vector.shape_cast %141 : vector<1x16x32xbf16> to vector<16x32xbf16>
      %cst_122 = arith.constant dense<0.000000e+00> : vector<16x32xf32>
      %143 = tpu.matmul %142, %123, %cst_122 {dimension_numbers = #tpu.dot_dimension_numbers<[1], [0], [0], [1], [0, 0, 1, 1], [], []>} : vector<16x32xbf16>, vector<32x32xbf16>, vector<16x32xf32> -> vector<16x32xf32>
      %144 = arith.truncf %143 : vector<16x32xf32> to vector<16x32xbf16>
      %c2_123 = arith.constant 2 : index
      %c0_124 = arith.constant 0 : index
      %c0_125 = arith.constant 0 : index
      %145 = vector.load %arg9[%c2_123, %c0_124, %c0_125] : memref<3x32x64xbf16, #tpu.memory_space<vmem>>, vector<1x32x64xbf16>
      %146 = vector.shape_cast %145 : vector<1x32x64xbf16> to vector<32x64xbf16>
      %cst_126 = arith.constant dense<0.000000e+00> : vector<16x64xf32>
      %147 = tpu.matmul %144, %146, %cst_126 {dimension_numbers = #tpu.dot_dimension_numbers<[1], [0], [0], [1], [0, 0, 1, 1], [], []>} : vector<16x32xbf16>, vector<32x64xbf16>, vector<16x64xf32> -> vector<16x64xf32>
      %148 = arith.addf %140, %147 : vector<16x64xf32>
      %c0_127 = arith.constant 0 : index
      %c0_128 = arith.constant 0 : index
      %149 = vector.load %arg10[%c0_127, %c0_128] : memref<1x64xf32, #tpu.memory_space<vmem>>, vector<1x64xf32>
      %150 = vector.broadcast %149 : vector<1x64xf32> to vector<16x64xf32>
      %151 = arith.addf %148, %150 : vector<16x64xf32>
      %cst_129 = arith.constant 0.000000e+00 : f32
      %152 = vector.broadcast %cst_129 : f32 to vector<16x64xf32>
      %153 = arith.maximumf %151, %152 : vector<16x64xf32>
      %154 = arith.truncf %153 : vector<16x64xf32> to vector<16x64xbf16>
      %cst_130 = arith.constant 0.000000e+00 : f32
      %155 = vector.broadcast %cst_130 : f32 to vector<8x128xf32>
      %c0_131 = arith.constant 0 : index
      %c0_132 = arith.constant 0 : index
      %c0_133 = arith.constant 0 : index
      %156 = vector.load %arg11[%c0_131, %c0_132, %c0_133] : memref<3x8x16xbf16, #tpu.memory_space<vmem>>, vector<1x8x16xbf16>
      %157 = vector.shape_cast %156 : vector<1x8x16xbf16> to vector<8x16xbf16>
      %cst_134 = arith.constant dense<0.000000e+00> : vector<8x64xf32>
      %158 = tpu.matmul %157, %154, %cst_134 {dimension_numbers = #tpu.dot_dimension_numbers<[1], [0], [0], [1], [0, 0, 1, 1], [], []>} : vector<8x16xbf16>, vector<16x64xbf16>, vector<8x64xf32> -> vector<8x64xf32>
      %159 = arith.truncf %158 : vector<8x64xf32> to vector<8x64xbf16>
      %c0_135 = arith.constant 0 : index
      %c0_136 = arith.constant 0 : index
      %c0_137 = arith.constant 0 : index
      %160 = vector.load %arg12[%c0_135, %c0_136, %c0_137] : memref<3x64x128xbf16, #tpu.memory_space<vmem>>, vector<1x64x128xbf16>
      %161 = vector.shape_cast %160 : vector<1x64x128xbf16> to vector<64x128xbf16>
      %cst_138 = arith.constant dense<0.000000e+00> : vector<8x128xf32>
      %162 = tpu.matmul %159, %161, %cst_138 {dimension_numbers = #tpu.dot_dimension_numbers<[1], [0], [0], [1], [0, 0, 1, 1], [], []>} : vector<8x64xbf16>, vector<64x128xbf16>, vector<8x128xf32> -> vector<8x128xf32>
      %163 = arith.addf %155, %162 : vector<8x128xf32>
      %c1_139 = arith.constant 1 : index
      %c0_140 = arith.constant 0 : index
      %c0_141 = arith.constant 0 : index
      %164 = vector.load %arg11[%c1_139, %c0_140, %c0_141] : memref<3x8x16xbf16, #tpu.memory_space<vmem>>, vector<1x8x16xbf16>
      %165 = vector.shape_cast %164 : vector<1x8x16xbf16> to vector<8x16xbf16>
      %cst_142 = arith.constant dense<0.000000e+00> : vector<8x64xf32>
      %166 = tpu.matmul %165, %154, %cst_142 {dimension_numbers = #tpu.dot_dimension_numbers<[1], [0], [0], [1], [0, 0, 1, 1], [], []>} : vector<8x16xbf16>, vector<16x64xbf16>, vector<8x64xf32> -> vector<8x64xf32>
      %167 = arith.truncf %166 : vector<8x64xf32> to vector<8x64xbf16>
      %c1_143 = arith.constant 1 : index
      %c0_144 = arith.constant 0 : index
      %c0_145 = arith.constant 0 : index
      %168 = vector.load %arg12[%c1_143, %c0_144, %c0_145] : memref<3x64x128xbf16, #tpu.memory_space<vmem>>, vector<1x64x128xbf16>
      %169 = vector.shape_cast %168 : vector<1x64x128xbf16> to vector<64x128xbf16>
      %cst_146 = arith.constant dense<0.000000e+00> : vector<8x128xf32>
      %170 = tpu.matmul %167, %169, %cst_146 {dimension_numbers = #tpu.dot_dimension_numbers<[1], [0], [0], [1], [0, 0, 1, 1], [], []>} : vector<8x64xbf16>, vector<64x128xbf16>, vector<8x128xf32> -> vector<8x128xf32>
      %171 = arith.addf %163, %170 : vector<8x128xf32>
      %c2_147 = arith.constant 2 : index
      %c0_148 = arith.constant 0 : index
      %c0_149 = arith.constant 0 : index
      %172 = vector.load %arg11[%c2_147, %c0_148, %c0_149] : memref<3x8x16xbf16, #tpu.memory_space<vmem>>, vector<1x8x16xbf16>
      %173 = vector.shape_cast %172 : vector<1x8x16xbf16> to vector<8x16xbf16>
      %cst_150 = arith.constant dense<0.000000e+00> : vector<8x64xf32>
      %174 = tpu.matmul %173, %154, %cst_150 {dimension_numbers = #tpu.dot_dimension_numbers<[1], [0], [0], [1], [0, 0, 1, 1], [], []>} : vector<8x16xbf16>, vector<16x64xbf16>, vector<8x64xf32> -> vector<8x64xf32>
      %175 = arith.truncf %174 : vector<8x64xf32> to vector<8x64xbf16>
      %c2_151 = arith.constant 2 : index
      %c0_152 = arith.constant 0 : index
      %c0_153 = arith.constant 0 : index
      %176 = vector.load %arg12[%c2_151, %c0_152, %c0_153] : memref<3x64x128xbf16, #tpu.memory_space<vmem>>, vector<1x64x128xbf16>
      %177 = vector.shape_cast %176 : vector<1x64x128xbf16> to vector<64x128xbf16>
      %cst_154 = arith.constant dense<0.000000e+00> : vector<8x128xf32>
      %178 = tpu.matmul %175, %177, %cst_154 {dimension_numbers = #tpu.dot_dimension_numbers<[1], [0], [0], [1], [0, 0, 1, 1], [], []>} : vector<8x64xbf16>, vector<64x128xbf16>, vector<8x128xf32> -> vector<8x128xf32>
      %179 = arith.addf %171, %178 : vector<8x128xf32>
      %c0_155 = arith.constant 0 : index
      %c0_156 = arith.constant 0 : index
      %180 = vector.load %arg13[%c0_155, %c0_156] : memref<1x128xf32, #tpu.memory_space<vmem>>, vector<1x128xf32>
      %181 = vector.broadcast %180 : vector<1x128xf32> to vector<8x128xf32>
      %182 = arith.addf %179, %181 : vector<8x128xf32>
      %cst_157 = arith.constant 0.000000e+00 : f32
      %183 = vector.broadcast %cst_157 : f32 to vector<8x128xf32>
      %184 = arith.maximumf %182, %183 : vector<8x128xf32>
      %c0_158 = arith.constant 0 : index
      %c0_159 = arith.constant 0 : index
      %185 = vector.load %arg37[%c0_158, %c0_159] : memref<16x128xf32, #tpu.memory_space<vmem>>, vector<8x128xf32>
      tpu.vector_store %arg37[%c0_158, %c0_159], %184 {strides = array<i32>} : memref<16x128xf32, #tpu.memory_space<vmem>>, vector<8x128xf32>,
      %c1_160 = arith.constant 1 : index
      %c0_161 = arith.constant 0 : index
      %c0_162 = arith.constant 0 : index
      %186 = vector.load %arg1[%c1_160, %c0_161, %c0_162] : memref<2x2x128xf32, #tpu.memory_space<vmem>>, vector<1x2x128xf32>
      %187 = vector.shape_cast %186 : vector<1x2x128xf32> to vector<2x128xf32>
      %188 = arith.truncf %187 : vector<2x128xf32> to vector<2x128xbf16>
      %cst_163 = arith.constant 0.000000e+00 : f32
      %189 = vector.broadcast %cst_163 : f32 to vector<64x16xf32>
      %c0_164 = arith.constant 0 : index
      %c0_165 = arith.constant 0 : index
      %c0_166 = arith.constant 0 : index
      %190 = vector.load %arg2[%c0_164, %c0_165, %c0_166] : memref<7x64x128xbf16, #tpu.memory_space<vmem>>, vector<1x64x128xbf16>
      %191 = vector.shape_cast %190 : vector<1x64x128xbf16> to vector<64x128xbf16>
      "tpu.trace_start"() <{level = 10 : i32, message = "ol,cl->oc"}> : () -> ()
      %cst_167 = arith.constant dense<0.000000e+00> : vector<64x2xf32>
      %192 = tpu.matmul %191, %188, %cst_167 {dimension_numbers = #tpu.dot_dimension_numbers<[1], [1], [0], [0], [0, 0, 1, 0], [], []>} : vector<64x128xbf16>, vector<2x128xbf16>, vector<64x2xf32> -> vector<64x2xf32>
      "tpu.trace_stop"() : () -> ()
      %193 = arith.truncf %192 : vector<64x2xf32> to vector<64x2xbf16>
      %c0_168 = arith.constant 0 : index
      %c0_169 = arith.constant 0 : index
      %c0_170 = arith.constant 0 : index
      %194 = vector.load %arg3[%c0_168, %c0_169, %c0_170] : memref<7x2x16xbf16, #tpu.memory_space<vmem>>, vector<1x2x16xbf16>
      %195 = vector.shape_cast %194 : vector<1x2x16xbf16> to vector<2x16xbf16>
      %cst_171 = arith.constant dense<0.000000e+00> : vector<64x16xf32>
      %196 = tpu.matmul %193, %195, %cst_171 {dimension_numbers = #tpu.dot_dimension_numbers<[1], [0], [0], [1], [0, 0, 1, 1], [], []>} : vector<64x2xbf16>, vector<2x16xbf16>, vector<64x16xf32> -> vector<64x16xf32>
      %197 = arith.addf %189, %196 : vector<64x16xf32>
      %c1_172 = arith.constant 1 : index
      %c0_173 = arith.constant 0 : index
      %c0_174 = arith.constant 0 : index
      %198 = vector.load %arg2[%c1_172, %c0_173, %c0_174] : memref<7x64x128xbf16, #tpu.memory_space<vmem>>, vector<1x64x128xbf16>
      %199 = vector.shape_cast %198 : vector<1x64x128xbf16> to vector<64x128xbf16>
      "tpu.trace_start"() <{level = 10 : i32, message = "ol,cl->oc"}> : () -> ()
      %cst_175 = arith.constant dense<0.000000e+00> : vector<64x2xf32>
      %200 = tpu.matmul %199, %188, %cst_175 {dimension_numbers = #tpu.dot_dimension_numbers<[1], [1], [0], [0], [0, 0, 1, 0], [], []>} : vector<64x128xbf16>, vector<2x128xbf16>, vector<64x2xf32> -> vector<64x2xf32>
      "tpu.trace_stop"() : () -> ()
      %201 = arith.truncf %200 : vector<64x2xf32> to vector<64x2xbf16>
      %c1_176 = arith.constant 1 : index
      %c0_177 = arith.constant 0 : index
      %c0_178 = arith.constant 0 : index
      %202 = vector.load %arg3[%c1_176, %c0_177, %c0_178] : memref<7x2x16xbf16, #tpu.memory_space<vmem>>, vector<1x2x16xbf16>
      %203 = vector.shape_cast %202 : vector<1x2x16xbf16> to vector<2x16xbf16>
      %cst_179 = arith.constant dense<0.000000e+00> : vector<64x16xf32>
      %204 = tpu.matmul %201, %203, %cst_179 {dimension_numbers = #tpu.dot_dimension_numbers<[1], [0], [0], [1], [0, 0, 1, 1], [], []>} : vector<64x2xbf16>, vector<2x16xbf16>, vector<64x16xf32> -> vector<64x16xf32>
      %205 = arith.addf %197, %204 : vector<64x16xf32>
      %c2_180 = arith.constant 2 : index
      %c0_181 = arith.constant 0 : index
      %c0_182 = arith.constant 0 : index
      %206 = vector.load %arg2[%c2_180, %c0_181, %c0_182] : memref<7x64x128xbf16, #tpu.memory_space<vmem>>, vector<1x64x128xbf16>
      %207 = vector.shape_cast %206 : vector<1x64x128xbf16> to vector<64x128xbf16>
      "tpu.trace_start"() <{level = 10 : i32, message = "ol,cl->oc"}> : () -> ()
      %cst_183 = arith.constant dense<0.000000e+00> : vector<64x2xf32>
      %208 = tpu.matmul %207, %188, %cst_183 {dimension_numbers = #tpu.dot_dimension_numbers<[1], [1], [0], [0], [0, 0, 1, 0], [], []>} : vector<64x128xbf16>, vector<2x128xbf16>, vector<64x2xf32> -> vector<64x2xf32>
      "tpu.trace_stop"() : () -> ()
      %209 = arith.truncf %208 : vector<64x2xf32> to vector<64x2xbf16>
      %c2_184 = arith.constant 2 : index
      %c0_185 = arith.constant 0 : index
      %c0_186 = arith.constant 0 : index
      %210 = vector.load %arg3[%c2_184, %c0_185, %c0_186] : memref<7x2x16xbf16, #tpu.memory_space<vmem>>, vector<1x2x16xbf16>
      %211 = vector.shape_cast %210 : vector<1x2x16xbf16> to vector<2x16xbf16>
      %cst_187 = arith.constant dense<0.000000e+00> : vector<64x16xf32>
      %212 = tpu.matmul %209, %211, %cst_187 {dimension_numbers = #tpu.dot_dimension_numbers<[1], [0], [0], [1], [0, 0, 1, 1], [], []>} : vector<64x2xbf16>, vector<2x16xbf16>, vector<64x16xf32> -> vector<64x16xf32>
      %213 = arith.addf %205, %212 : vector<64x16xf32>
      %c3_188 = arith.constant 3 : index
      %c0_189 = arith.constant 0 : index
      %c0_190 = arith.constant 0 : index
      %214 = vector.load %arg2[%c3_188, %c0_189, %c0_190] : memref<7x64x128xbf16, #tpu.memory_space<vmem>>, vector<1x64x128xbf16>
      %215 = vector.shape_cast %214 : vector<1x64x128xbf16> to vector<64x128xbf16>
      "tpu.trace_start"() <{level = 10 : i32, message = "ol,cl->oc"}> : () -> ()
      %cst_191 = arith.constant dense<0.000000e+00> : vector<64x2xf32>
      %216 = tpu.matmul %215, %188, %cst_191 {dimension_numbers = #tpu.dot_dimension_numbers<[1], [1], [0], [0], [0, 0, 1, 0], [], []>} : vector<64x128xbf16>, vector<2x128xbf16>, vector<64x2xf32> -> vector<64x2xf32>
      "tpu.trace_stop"() : () -> ()
      %217 = arith.truncf %216 : vector<64x2xf32> to vector<64x2xbf16>
      %c3_192 = arith.constant 3 : index
      %c0_193 = arith.constant 0 : index
      %c0_194 = arith.constant 0 : index
      %218 = vector.load %arg3[%c3_192, %c0_193, %c0_194] : memref<7x2x16xbf16, #tpu.memory_space<vmem>>, vector<1x2x16xbf16>
      %219 = vector.shape_cast %218 : vector<1x2x16xbf16> to vector<2x16xbf16>
      %cst_195 = arith.constant dense<0.000000e+00> : vector<64x16xf32>
      %220 = tpu.matmul %217, %219, %cst_195 {dimension_numbers = #tpu.dot_dimension_numbers<[1], [0], [0], [1], [0, 0, 1, 1], [], []>} : vector<64x2xbf16>, vector<2x16xbf16>, vector<64x16xf32> -> vector<64x16xf32>
      %221 = arith.addf %213, %220 : vector<64x16xf32>
      %c4_196 = arith.constant 4 : index
      %c0_197 = arith.constant 0 : index
      %c0_198 = arith.constant 0 : index
      %222 = vector.load %arg2[%c4_196, %c0_197, %c0_198] : memref<7x64x128xbf16, #tpu.memory_space<vmem>>, vector<1x64x128xbf16>
      %223 = vector.shape_cast %222 : vector<1x64x128xbf16> to vector<64x128xbf16>
      "tpu.trace_start"() <{level = 10 : i32, message = "ol,cl->oc"}> : () -> ()
      %cst_199 = arith.constant dense<0.000000e+00> : vector<64x2xf32>
      %224 = tpu.matmul %223, %188, %cst_199 {dimension_numbers = #tpu.dot_dimension_numbers<[1], [1], [0], [0], [0, 0, 1, 0], [], []>} : vector<64x128xbf16>, vector<2x128xbf16>, vector<64x2xf32> -> vector<64x2xf32>
      "tpu.trace_stop"() : () -> ()
      %225 = arith.truncf %224 : vector<64x2xf32> to vector<64x2xbf16>
      %c4_200 = arith.constant 4 : index
      %c0_201 = arith.constant 0 : index
      %c0_202 = arith.constant 0 : index
      %226 = vector.load %arg3[%c4_200, %c0_201, %c0_202] : memref<7x2x16xbf16, #tpu.memory_space<vmem>>, vector<1x2x16xbf16>
      %227 = vector.shape_cast %226 : vector<1x2x16xbf16> to vector<2x16xbf16>
      %cst_203 = arith.constant dense<0.000000e+00> : vector<64x16xf32>
      %228 = tpu.matmul %225, %227, %cst_203 {dimension_numbers = #tpu.dot_dimension_numbers<[1], [0], [0], [1], [0, 0, 1, 1], [], []>} : vector<64x2xbf16>, vector<2x16xbf16>, vector<64x16xf32> -> vector<64x16xf32>
      %229 = arith.addf %221, %228 : vector<64x16xf32>
      %c5_204 = arith.constant 5 : index
      %c0_205 = arith.constant 0 : index
      %c0_206 = arith.constant 0 : index
      %230 = vector.load %arg2[%c5_204, %c0_205, %c0_206] : memref<7x64x128xbf16, #tpu.memory_space<vmem>>, vector<1x64x128xbf16>
      %231 = vector.shape_cast %230 : vector<1x64x128xbf16> to vector<64x128xbf16>
      "tpu.trace_start"() <{level = 10 : i32, message = "ol,cl->oc"}> : () -> ()
      %cst_207 = arith.constant dense<0.000000e+00> : vector<64x2xf32>
      %232 = tpu.matmul %231, %188, %cst_207 {dimension_numbers = #tpu.dot_dimension_numbers<[1], [1], [0], [0], [0, 0, 1, 0], [], []>} : vector<64x128xbf16>, vector<2x128xbf16>, vector<64x2xf32> -> vector<64x2xf32>
      "tpu.trace_stop"() : () -> ()
      %233 = arith.truncf %232 : vector<64x2xf32> to vector<64x2xbf16>
      %c5_208 = arith.constant 5 : index
      %c0_209 = arith.constant 0 : index
      %c0_210 = arith.constant 0 : index
      %234 = vector.load %arg3[%c5_208, %c0_209, %c0_210] : memref<7x2x16xbf16, #tpu.memory_space<vmem>>, vector<1x2x16xbf16>
      %235 = vector.shape_cast %234 : vector<1x2x16xbf16> to vector<2x16xbf16>
      %cst_211 = arith.constant dense<0.000000e+00> : vector<64x16xf32>
      %236 = tpu.matmul %233, %235, %cst_211 {dimension_numbers = #tpu.dot_dimension_numbers<[1], [0], [0], [1], [0, 0, 1, 1], [], []>} : vector<64x2xbf16>, vector<2x16xbf16>, vector<64x16xf32> -> vector<64x16xf32>
      %237 = arith.addf %229, %236 : vector<64x16xf32>
      %c6_212 = arith.constant 6 : index
      %c0_213 = arith.constant 0 : index
      %c0_214 = arith.constant 0 : index
      %238 = vector.load %arg2[%c6_212, %c0_213, %c0_214] : memref<7x64x128xbf16, #tpu.memory_space<vmem>>, vector<1x64x128xbf16>
      %239 = vector.shape_cast %238 : vector<1x64x128xbf16> to vector<64x128xbf16>
      "tpu.trace_start"() <{level = 10 : i32, message = "ol,cl->oc"}> : () -> ()
      %cst_215 = arith.constant dense<0.000000e+00> : vector<64x2xf32>
      %240 = tpu.matmul %239, %188, %cst_215 {dimension_numbers = #tpu.dot_dimension_numbers<[1], [1], [0], [0], [0, 0, 1, 0], [], []>} : vector<64x128xbf16>, vector<2x128xbf16>, vector<64x2xf32> -> vector<64x2xf32>
      "tpu.trace_stop"() : () -> ()
      %241 = arith.truncf %240 : vector<64x2xf32> to vector<64x2xbf16>
      %c6_216 = arith.constant 6 : index
      %c0_217 = arith.constant 0 : index
      %c0_218 = arith.constant 0 : index
      %242 = vector.load %arg3[%c6_216, %c0_217, %c0_218] : memref<7x2x16xbf16, #tpu.memory_space<vmem>>, vector<1x2x16xbf16>
      %243 = vector.shape_cast %242 : vector<1x2x16xbf16> to vector<2x16xbf16>
      %cst_219 = arith.constant dense<0.000000e+00> : vector<64x16xf32>
      %244 = tpu.matmul %241, %243, %cst_219 {dimension_numbers = #tpu.dot_dimension_numbers<[1], [0], [0], [1], [0, 0, 1, 1], [], []>} : vector<64x2xbf16>, vector<2x16xbf16>, vector<64x16xf32> -> vector<64x16xf32>
      %245 = arith.addf %237, %244 : vector<64x16xf32>
      %c0_220 = arith.constant 0 : index
      %c0_221 = arith.constant 0 : index
      %246 = vector.load %arg4[%c0_220, %c0_221] : memref<1x16xf32, #tpu.memory_space<vmem>>, vector<1x16xf32>
      %247 = vector.broadcast %246 : vector<1x16xf32> to vector<64x16xf32>
      %248 = arith.addf %245, %247 : vector<64x16xf32>
      %cst_222 = arith.constant 0.000000e+00 : f32
      %249 = vector.broadcast %cst_222 : f32 to vector<64x16xf32>
      %250 = arith.maximumf %248, %249 : vector<64x16xf32>
      %251 = arith.truncf %250 : vector<64x16xf32> to vector<64x16xbf16>
      %cst_223 = arith.constant 0.000000e+00 : f32
      %252 = vector.broadcast %cst_223 : f32 to vector<32x32xf32>
      %c0_224 = arith.constant 0 : index
      %c0_225 = arith.constant 0 : index
      %c0_226 = arith.constant 0 : index
      %253 = vector.load %arg5[%c0_224, %c0_225, %c0_226] : memref<5x32x64xbf16, #tpu.memory_space<vmem>>, vector<1x32x64xbf16>
      %254 = vector.shape_cast %253 : vector<1x32x64xbf16> to vector<32x64xbf16>
      %cst_227 = arith.constant dense<0.000000e+00> : vector<32x16xf32>
      %255 = tpu.matmul %254, %251, %cst_227 {dimension_numbers = #tpu.dot_dimension_numbers<[1], [0], [0], [1], [0, 0, 1, 1], [], []>} : vector<32x64xbf16>, vector<64x16xbf16>, vector<32x16xf32> -> vector<32x16xf32>
      %256 = arith.truncf %255 : vector<32x16xf32> to vector<32x16xbf16>
      %c0_228 = arith.constant 0 : index
      %c0_229 = arith.constant 0 : index
      %c0_230 = arith.constant 0 : index
      %257 = vector.load %arg6[%c0_228, %c0_229, %c0_230] : memref<5x16x32xbf16, #tpu.memory_space<vmem>>, vector<1x16x32xbf16>
      %258 = vector.shape_cast %257 : vector<1x16x32xbf16> to vector<16x32xbf16>
      %cst_231 = arith.constant dense<0.000000e+00> : vector<32x32xf32>
      %259 = tpu.matmul %256, %258, %cst_231 {dimension_numbers = #tpu.dot_dimension_numbers<[1], [0], [0], [1], [0, 0, 1, 1], [], []>} : vector<32x16xbf16>, vector<16x32xbf16>, vector<32x32xf32> -> vector<32x32xf32>
      %260 = arith.addf %252, %259 : vector<32x32xf32>
      %c1_232 = arith.constant 1 : index
      %c0_233 = arith.constant 0 : index
      %c0_234 = arith.constant 0 : index
      %261 = vector.load %arg5[%c1_232, %c0_233, %c0_234] : memref<5x32x64xbf16, #tpu.memory_space<vmem>>, vector<1x32x64xbf16>
      %262 = vector.shape_cast %261 : vector<1x32x64xbf16> to vector<32x64xbf16>
      %cst_235 = arith.constant dense<0.000000e+00> : vector<32x16xf32>
      %263 = tpu.matmul %262, %251, %cst_235 {dimension_numbers = #tpu.dot_dimension_numbers<[1], [0], [0], [1], [0, 0, 1, 1], [], []>} : vector<32x64xbf16>, vector<64x16xbf16>, vector<32x16xf32> -> vector<32x16xf32>
      %264 = arith.truncf %263 : vector<32x16xf32> to vector<32x16xbf16>
      %c1_236 = arith.constant 1 : index
      %c0_237 = arith.constant 0 : index
      %c0_238 = arith.constant 0 : index
      %265 = vector.load %arg6[%c1_236, %c0_237, %c0_238] : memref<5x16x32xbf16, #tpu.memory_space<vmem>>, vector<1x16x32xbf16>
      %266 = vector.shape_cast %265 : vector<1x16x32xbf16> to vector<16x32xbf16>
      %cst_239 = arith.constant dense<0.000000e+00> : vector<32x32xf32>
      %267 = tpu.matmul %264, %266, %cst_239 {dimension_numbers = #tpu.dot_dimension_numbers<[1], [0], [0], [1], [0, 0, 1, 1], [], []>} : vector<32x16xbf16>, vector<16x32xbf16>, vector<32x32xf32> -> vector<32x32xf32>
      %268 = arith.addf %260, %267 : vector<32x32xf32>
      %c2_240 = arith.constant 2 : index
      %c0_241 = arith.constant 0 : index
      %c0_242 = arith.constant 0 : index
      %269 = vector.load %arg5[%c2_240, %c0_241, %c0_242] : memref<5x32x64xbf16, #tpu.memory_space<vmem>>, vector<1x32x64xbf16>
      %270 = vector.shape_cast %269 : vector<1x32x64xbf16> to vector<32x64xbf16>
      %cst_243 = arith.constant dense<0.000000e+00> : vector<32x16xf32>
      %271 = tpu.matmul %270, %251, %cst_243 {dimension_numbers = #tpu.dot_dimension_numbers<[1], [0], [0], [1], [0, 0, 1, 1], [], []>} : vector<32x64xbf16>, vector<64x16xbf16>, vector<32x16xf32> -> vector<32x16xf32>
      %272 = arith.truncf %271 : vector<32x16xf32> to vector<32x16xbf16>
      %c2_244 = arith.constant 2 : index
      %c0_245 = arith.constant 0 : index
      %c0_246 = arith.constant 0 : index
      %273 = vector.load %arg6[%c2_244, %c0_245, %c0_246] : memref<5x16x32xbf16, #tpu.memory_space<vmem>>, vector<1x16x32xbf16>
      %274 = vector.shape_cast %273 : vector<1x16x32xbf16> to vector<16x32xbf16>
      %cst_247 = arith.constant dense<0.000000e+00> : vector<32x32xf32>
      %275 = tpu.matmul %272, %274, %cst_247 {dimension_numbers = #tpu.dot_dimension_numbers<[1], [0], [0], [1], [0, 0, 1, 1], [], []>} : vector<32x16xbf16>, vector<16x32xbf16>, vector<32x32xf32> -> vector<32x32xf32>
      %276 = arith.addf %268, %275 : vector<32x32xf32>
      %c3_248 = arith.constant 3 : index
      %c0_249 = arith.constant 0 : index
      %c0_250 = arith.constant 0 : index
      %277 = vector.load %arg5[%c3_248, %c0_249, %c0_250] : memref<5x32x64xbf16, #tpu.memory_space<vmem>>, vector<1x32x64xbf16>
      %278 = vector.shape_cast %277 : vector<1x32x64xbf16> to vector<32x64xbf16>
      %cst_251 = arith.constant dense<0.000000e+00> : vector<32x16xf32>
      %279 = tpu.matmul %278, %251, %cst_251 {dimension_numbers = #tpu.dot_dimension_numbers<[1], [0], [0], [1], [0, 0, 1, 1], [], []>} : vector<32x64xbf16>, vector<64x16xbf16>, vector<32x16xf32> -> vector<32x16xf32>
      %280 = arith.truncf %279 : vector<32x16xf32> to vector<32x16xbf16>
      %c3_252 = arith.constant 3 : index
      %c0_253 = arith.constant 0 : index
      %c0_254 = arith.constant 0 : index
      %281 = vector.load %arg6[%c3_252, %c0_253, %c0_254] : memref<5x16x32xbf16, #tpu.memory_space<vmem>>, vector<1x16x32xbf16>
      %282 = vector.shape_cast %281 : vector<1x16x32xbf16> to vector<16x32xbf16>
      %cst_255 = arith.constant dense<0.000000e+00> : vector<32x32xf32>
      %283 = tpu.matmul %280, %282, %cst_255 {dimension_numbers = #tpu.dot_dimension_numbers<[1], [0], [0], [1], [0, 0, 1, 1], [], []>} : vector<32x16xbf16>, vector<16x32xbf16>, vector<32x32xf32> -> vector<32x32xf32>
      %284 = arith.addf %276, %283 : vector<32x32xf32>
      %c4_256 = arith.constant 4 : index
      %c0_257 = arith.constant 0 : index
      %c0_258 = arith.constant 0 : index
      %285 = vector.load %arg5[%c4_256, %c0_257, %c0_258] : memref<5x32x64xbf16, #tpu.memory_space<vmem>>, vector<1x32x64xbf16>
      %286 = vector.shape_cast %285 : vector<1x32x64xbf16> to vector<32x64xbf16>
      %cst_259 = arith.constant dense<0.000000e+00> : vector<32x16xf32>
      %287 = tpu.matmul %286, %251, %cst_259 {dimension_numbers = #tpu.dot_dimension_numbers<[1], [0], [0], [1], [0, 0, 1, 1], [], []>} : vector<32x64xbf16>, vector<64x16xbf16>, vector<32x16xf32> -> vector<32x16xf32>
      %288 = arith.truncf %287 : vector<32x16xf32> to vector<32x16xbf16>
      %c4_260 = arith.constant 4 : index
      %c0_261 = arith.constant 0 : index
      %c0_262 = arith.constant 0 : index
      %289 = vector.load %arg6[%c4_260, %c0_261, %c0_262] : memref<5x16x32xbf16, #tpu.memory_space<vmem>>, vector<1x16x32xbf16>
      %290 = vector.shape_cast %289 : vector<1x16x32xbf16> to vector<16x32xbf16>
      %cst_263 = arith.constant dense<0.000000e+00> : vector<32x32xf32>
      %291 = tpu.matmul %288, %290, %cst_263 {dimension_numbers = #tpu.dot_dimension_numbers<[1], [0], [0], [1], [0, 0, 1, 1], [], []>} : vector<32x16xbf16>, vector<16x32xbf16>, vector<32x32xf32> -> vector<32x32xf32>
      %292 = arith.addf %284, %291 : vector<32x32xf32>
      %c0_264 = arith.constant 0 : index
      %c0_265 = arith.constant 0 : index
      %293 = vector.load %arg7[%c0_264, %c0_265] : memref<1x32xf32, #tpu.memory_space<vmem>>, vector<1x32xf32>
      %294 = vector.broadcast %293 : vector<1x32xf32> to vector<32x32xf32>
      %295 = arith.addf %292, %294 : vector<32x32xf32>
      %cst_266 = arith.constant 0.000000e+00 : f32
      %296 = vector.broadcast %cst_266 : f32 to vector<32x32xf32>
      %297 = arith.maximumf %295, %296 : vector<32x32xf32>
      %298 = arith.truncf %297 : vector<32x32xf32> to vector<32x32xbf16>
      %cst_267 = arith.constant 0.000000e+00 : f32
      %299 = vector.broadcast %cst_267 : f32 to vector<16x64xf32>
      %c0_268 = arith.constant 0 : index
      %c0_269 = arith.constant 0 : index
      %c0_270 = arith.constant 0 : index
      %300 = vector.load %arg8[%c0_268, %c0_269, %c0_270] : memref<3x16x32xbf16, #tpu.memory_space<vmem>>, vector<1x16x32xbf16>
      %301 = vector.shape_cast %300 : vector<1x16x32xbf16> to vector<16x32xbf16>
      %cst_271 = arith.constant dense<0.000000e+00> : vector<16x32xf32>
      %302 = tpu.matmul %301, %298, %cst_271 {dimension_numbers = #tpu.dot_dimension_numbers<[1], [0], [0], [1], [0, 0, 1, 1], [], []>} : vector<16x32xbf16>, vector<32x32xbf16>, vector<16x32xf32> -> vector<16x32xf32>
      %303 = arith.truncf %302 : vector<16x32xf32> to vector<16x32xbf16>
      %c0_272 = arith.constant 0 : index
      %c0_273 = arith.constant 0 : index
      %c0_274 = arith.constant 0 : index
      %304 = vector.load %arg9[%c0_272, %c0_273, %c0_274] : memref<3x32x64xbf16, #tpu.memory_space<vmem>>, vector<1x32x64xbf16>
      %305 = vector.shape_cast %304 : vector<1x32x64xbf16> to vector<32x64xbf16>
      %cst_275 = arith.constant dense<0.000000e+00> : vector<16x64xf32>
      %306 = tpu.matmul %303, %305, %cst_275 {dimension_numbers = #tpu.dot_dimension_numbers<[1], [0], [0], [1], [0, 0, 1, 1], [], []>} : vector<16x32xbf16>, vector<32x64xbf16>, vector<16x64xf32> -> vector<16x64xf32>
      %307 = arith.addf %299, %306 : vector<16x64xf32>
      %c1_276 = arith.constant 1 : index
      %c0_277 = arith.constant 0 : index
      %c0_278 = arith.constant 0 : index
      %308 = vector.load %arg8[%c1_276, %c0_277, %c0_278] : memref<3x16x32xbf16, #tpu.memory_space<vmem>>, vector<1x16x32xbf16>
      %309 = vector.shape_cast %308 : vector<1x16x32xbf16> to vector<16x32xbf16>
      %cst_279 = arith.constant dense<0.000000e+00> : vector<16x32xf32>
      %310 = tpu.matmul %309, %298, %cst_279 {dimension_numbers = #tpu.dot_dimension_numbers<[1], [0], [0], [1], [0, 0, 1, 1], [], []>} : vector<16x32xbf16>, vector<32x32xbf16>, vector<16x32xf32> -> vector<16x32xf32>
      %311 = arith.truncf %310 : vector<16x32xf32> to vector<16x32xbf16>
      %c1_280 = arith.constant 1 : index
      %c0_281 = arith.constant 0 : index
      %c0_282 = arith.constant 0 : index
      %312 = vector.load %arg9[%c1_280, %c0_281, %c0_282] : memref<3x32x64xbf16, #tpu.memory_space<vmem>>, vector<1x32x64xbf16>
      %313 = vector.shape_cast %312 : vector<1x32x64xbf16> to vector<32x64xbf16>
      %cst_283 = arith.constant dense<0.000000e+00> : vector<16x64xf32>
      %314 = tpu.matmul %311, %313, %cst_283 {dimension_numbers = #tpu.dot_dimension_numbers<[1], [0], [0], [1], [0, 0, 1, 1], [], []>} : vector<16x32xbf16>, vector<32x64xbf16>, vector<16x64xf32> -> vector<16x64xf32>
      %315 = arith.addf %307, %314 : vector<16x64xf32>
      %c2_284 = arith.constant 2 : index
      %c0_285 = arith.constant 0 : index
      %c0_286 = arith.constant 0 : index
      %316 = vector.load %arg8[%c2_284, %c0_285, %c0_286] : memref<3x16x32xbf16, #tpu.memory_space<vmem>>, vector<1x16x32xbf16>
      %317 = vector.shape_cast %316 : vector<1x16x32xbf16> to vector<16x32xbf16>
      %cst_287 = arith.constant dense<0.000000e+00> : vector<16x32xf32>
      %318 = tpu.matmul %317, %298, %cst_287 {dimension_numbers = #tpu.dot_dimension_numbers<[1], [0], [0], [1], [0, 0, 1, 1], [], []>} : vector<16x32xbf16>, vector<32x32xbf16>, vector<16x32xf32> -> vector<16x32xf32>
      %319 = arith.truncf %318 : vector<16x32xf32> to vector<16x32xbf16>
      %c2_288 = arith.constant 2 : index
      %c0_289 = arith.constant 0 : index
      %c0_290 = arith.constant 0 : index
      %320 = vector.load %arg9[%c2_288, %c0_289, %c0_290] : memref<3x32x64xbf16, #tpu.memory_space<vmem>>, vector<1x32x64xbf16>
      %321 = vector.shape_cast %320 : vector<1x32x64xbf16> to vector<32x64xbf16>
      %cst_291 = arith.constant dense<0.000000e+00> : vector<16x64xf32>
      %322 = tpu.matmul %319, %321, %cst_291 {dimension_numbers = #tpu.dot_dimension_numbers<[1], [0], [0], [1], [0, 0, 1, 1], [], []>} : vector<16x32xbf16>, vector<32x64xbf16>, vector<16x64xf32> -> vector<16x64xf32>
      %323 = arith.addf %315, %322 : vector<16x64xf32>
      %c0_292 = arith.constant 0 : index
      %c0_293 = arith.constant 0 : index
      %324 = vector.load %arg10[%c0_292, %c0_293] : memref<1x64xf32, #tpu.memory_space<vmem>>, vector<1x64xf32>
      %325 = vector.broadcast %324 : vector<1x64xf32> to vector<16x64xf32>
      %326 = arith.addf %323, %325 : vector<16x64xf32>
      %cst_294 = arith.constant 0.000000e+00 : f32
      %327 = vector.broadcast %cst_294 : f32 to vector<16x64xf32>
      %328 = arith.maximumf %326, %327 : vector<16x64xf32>
      %329 = arith.truncf %328 : vector<16x64xf32> to vector<16x64xbf16>
      %cst_295 = arith.constant 0.000000e+00 : f32
      %330 = vector.broadcast %cst_295 : f32 to vector<8x128xf32>
      %c0_296 = arith.constant 0 : index
      %c0_297 = arith.constant 0 : index
      %c0_298 = arith.constant 0 : index
      %331 = vector.load %arg11[%c0_296, %c0_297, %c0_298] : memref<3x8x16xbf16, #tpu.memory_space<vmem>>, vector<1x8x16xbf16>
      %332 = vector.shape_cast %331 : vector<1x8x16xbf16> to vector<8x16xbf16>
      %cst_299 = arith.constant dense<0.000000e+00> : vector<8x64xf32>
      %333 = tpu.matmul %332, %329, %cst_299 {dimension_numbers = #tpu.dot_dimension_numbers<[1], [0], [0], [1], [0, 0, 1, 1], [], []>} : vector<8x16xbf16>, vector<16x64xbf16>, vector<8x64xf32> -> vector<8x64xf32>
      %334 = arith.truncf %333 : vector<8x64xf32> to vector<8x64xbf16>
      %c0_300 = arith.constant 0 : index
      %c0_301 = arith.constant 0 : index
      %c0_302 = arith.constant 0 : index
      %335 = vector.load %arg12[%c0_300, %c0_301, %c0_302] : memref<3x64x128xbf16, #tpu.memory_space<vmem>>, vector<1x64x128xbf16>
      %336 = vector.shape_cast %335 : vector<1x64x128xbf16> to vector<64x128xbf16>
      %cst_303 = arith.constant dense<0.000000e+00> : vector<8x128xf32>
      %337 = tpu.matmul %334, %336, %cst_303 {dimension_numbers = #tpu.dot_dimension_numbers<[1], [0], [0], [1], [0, 0, 1, 1], [], []>} : vector<8x64xbf16>, vector<64x128xbf16>, vector<8x128xf32> -> vector<8x128xf32>
      %338 = arith.addf %330, %337 : vector<8x128xf32>
      %c1_304 = arith.constant 1 : index
      %c0_305 = arith.constant 0 : index
      %c0_306 = arith.constant 0 : index
      %339 = vector.load %arg11[%c1_304, %c0_305, %c0_306] : memref<3x8x16xbf16, #tpu.memory_space<vmem>>, vector<1x8x16xbf16>
      %340 = vector.shape_cast %339 : vector<1x8x16xbf16> to vector<8x16xbf16>
      %cst_307 = arith.constant dense<0.000000e+00> : vector<8x64xf32>
      %341 = tpu.matmul %340, %329, %cst_307 {dimension_numbers = #tpu.dot_dimension_numbers<[1], [0], [0], [1], [0, 0, 1, 1], [], []>} : vector<8x16xbf16>, vector<16x64xbf16>, vector<8x64xf32> -> vector<8x64xf32>
      %342 = arith.truncf %341 : vector<8x64xf32> to vector<8x64xbf16>
      %c1_308 = arith.constant 1 : index
      %c0_309 = arith.constant 0 : index
      %c0_310 = arith.constant 0 : index
      %343 = vector.load %arg12[%c1_308, %c0_309, %c0_310] : memref<3x64x128xbf16, #tpu.memory_space<vmem>>, vector<1x64x128xbf16>
      %344 = vector.shape_cast %343 : vector<1x64x128xbf16> to vector<64x128xbf16>
      %cst_311 = arith.constant dense<0.000000e+00> : vector<8x128xf32>
      %345 = tpu.matmul %342, %344, %cst_311 {dimension_numbers = #tpu.dot_dimension_numbers<[1], [0], [0], [1], [0, 0, 1, 1], [], []>} : vector<8x64xbf16>, vector<64x128xbf16>, vector<8x128xf32> -> vector<8x128xf32>
      %346 = arith.addf %338, %345 : vector<8x128xf32>
      %c2_312 = arith.constant 2 : index
      %c0_313 = arith.constant 0 : index
      %c0_314 = arith.constant 0 : index
      %347 = vector.load %arg11[%c2_312, %c0_313, %c0_314] : memref<3x8x16xbf16, #tpu.memory_space<vmem>>, vector<1x8x16xbf16>
      %348 = vector.shape_cast %347 : vector<1x8x16xbf16> to vector<8x16xbf16>
      %cst_315 = arith.constant dense<0.000000e+00> : vector<8x64xf32>
      %349 = tpu.matmul %348, %329, %cst_315 {dimension_numbers = #tpu.dot_dimension_numbers<[1], [0], [0], [1], [0, 0, 1, 1], [], []>} : vector<8x16xbf16>, vector<16x64xbf16>, vector<8x64xf32> -> vector<8x64xf32>
      %350 = arith.truncf %349 : vector<8x64xf32> to vector<8x64xbf16>
      %c2_316 = arith.constant 2 : index
      %c0_317 = arith.constant 0 : index
      %c0_318 = arith.constant 0 : index
      %351 = vector.load %arg12[%c2_316, %c0_317, %c0_318] : memref<3x64x128xbf16, #tpu.memory_space<vmem>>, vector<1x64x128xbf16>
      %352 = vector.shape_cast %351 : vector<1x64x128xbf16> to vector<64x128xbf16>
      %cst_319 = arith.constant dense<0.000000e+00> : vector<8x128xf32>
      %353 = tpu.matmul %350, %352, %cst_319 {dimension_numbers = #tpu.dot_dimension_numbers<[1], [0], [0], [1], [0, 0, 1, 1], [], []>} : vector<8x64xbf16>, vector<64x128xbf16>, vector<8x128xf32> -> vector<8x128xf32>
      %354 = arith.addf %346, %353 : vector<8x128xf32>
      %c0_320 = arith.constant 0 : index
      %c0_321 = arith.constant 0 : index
      %355 = vector.load %arg13[%c0_320, %c0_321] : memref<1x128xf32, #tpu.memory_space<vmem>>, vector<1x128xf32>
      %356 = vector.broadcast %355 : vector<1x128xf32> to vector<8x128xf32>
      %357 = arith.addf %354, %356 : vector<8x128xf32>
      %cst_322 = arith.constant 0.000000e+00 : f32
      %358 = vector.broadcast %cst_322 : f32 to vector<8x128xf32>
      %359 = arith.maximumf %357, %358 : vector<8x128xf32>
      %c8 = arith.constant 8 : index
      %c0_323 = arith.constant 0 : index
      %360 = vector.load %arg37[%c8, %c0_323] : memref<16x128xf32, #tpu.memory_space<vmem>>, vector<8x128xf32>
      tpu.vector_store %arg37[%c8, %c0_323], %359 {strides = array<i32>} : memref<16x128xf32, #tpu.memory_space<vmem>>, vector<8x128xf32>,
    } else {
    }
    %c1_i32 = arith.constant 1 : i32
    %3 = arith.cmpi sge, %arg0, %c1_i32 : i32
    %c3_i32 = arith.constant 3 : i32
    %4 = arith.cmpi sle, %arg0, %c3_i32 : i32
    %5 = arith.andi %3, %4 : i1
    %6 = arith.extui %5 : i1 to i32
    %c0_i32_1 = arith.constant 0 : i32
    %7 = arith.cmpi ne, %6, %c0_i32_1 : i32
    scf.if %7 {
      %c0 = arith.constant 0 : index
      %c0_3 = arith.constant 0 : index
      %11 = vector.load %arg37[%c0, %c0_3] : memref<16x128xf32, #tpu.memory_space<vmem>>, vector<16x128xf32>
      %12 = arith.truncf %11 : vector<16x128xf32> to vector<16x128xbf16>
      %c0_4 = arith.constant 0 : index
      %c0_5 = arith.constant 0 : index
      %c0_6 = arith.constant 0 : index
      %13 = vector.load %arg15[%c0_4, %c0_5, %c0_6] : memref<1x128x384xbf16, #tpu.memory_space<vmem>>, vector<1x128x384xbf16>
      %14 = vector.shape_cast %13 : vector<1x128x384xbf16> to vector<128x384xbf16>
      %cst = arith.constant dense<0.000000e+00> : vector<16x384xf32>
      %15 = tpu.matmul %12, %14, %cst {dimension_numbers = #tpu.dot_dimension_numbers<[1], [0], [0], [1], [0, 0, 1, 1], [], []>} : vector<16x128xbf16>, vector<128x384xbf16>, vector<16x384xf32> -> vector<16x384xf32>
      %c0_7 = arith.constant 0 : index
      %c0_8 = arith.constant 0 : index
      %c0_9 = arith.constant 0 : index
      %16 = vector.load %arg16[%c0_7, %c0_8, %c0_9] : memref<1x1x384xf32, #tpu.memory_space<vmem>>, vector<1x1x384xf32>
      %17 = vector.shape_cast %16 : vector<1x1x384xf32> to vector<1x384xf32>
      %18 = vector.broadcast %17 : vector<1x384xf32> to vector<16x384xf32>
      %19 = arith.addf %15, %18 : vector<16x384xf32>
      %20 = vector.extract_strided_slice %19 {offsets = [0, 0], sizes = [16, 128], strides = [1, 1]} : vector<16x384xf32> to vector<16x128xf32>
      %21 = vector.extract_strided_slice %19 {offsets = [0, 128], sizes = [16, 128], strides = [1, 1]} : vector<16x384xf32> to vector<16x128xf32>
      %22 = vector.extract_strided_slice %19 {offsets = [0, 256], sizes = [16, 128], strides = [1, 1]} : vector<16x384xf32> to vector<16x128xf32>
      %c0_10 = arith.constant 0 : index
      %c0_11 = arith.constant 0 : index
      %23 = vector.load %arg14[%c0_10, %c0_11] : memref<16x16xf32, #tpu.memory_space<vmem>>, vector<16x16xf32>
      %24 = vector.extract_strided_slice %20 {offsets = [0, 0], sizes = [16, 16], strides = [1, 1]} : vector<16x128xf32> to vector<16x16xf32>
      %25 = arith.truncf %24 : vector<16x16xf32> to vector<16x16xbf16>
      %26 = vector.extract_strided_slice %21 {offsets = [0, 0], sizes = [16, 16], strides = [1, 1]} : vector<16x128xf32> to vector<16x16xf32>
      %27 = arith.truncf %26 : vector<16x16xf32> to vector<16x16xbf16>
      %28 = vector.extract_strided_slice %22 {offsets = [0, 0], sizes = [16, 16], strides = [1, 1]} : vector<16x128xf32> to vector<16x16xf32>
      %29 = arith.truncf %28 : vector<16x16xf32> to vector<16x16xbf16>
      "tpu.trace_start"() <{level = 10 : i32, message = "nd,md->nm"}> : () -> ()
      %cst_12 = arith.constant dense<0.000000e+00> : vector<16x16xf32>
      %30 = tpu.matmul %25, %27, %cst_12 {dimension_numbers = #tpu.dot_dimension_numbers<[1], [1], [0], [0], [0, 0, 1, 0], [], []>} : vector<16x16xbf16>, vector<16x16xbf16>, vector<16x16xf32> -> vector<16x16xf32>
      "tpu.trace_stop"() : () -> ()
      %cst_13 = arith.constant 2.500000e-01 : f32
      %31 = vector.broadcast %cst_13 : f32 to vector<16x16xf32>
      %32 = arith.mulf %30, %31 : vector<16x16xf32>
      %33 = arith.addf %32, %23 : vector<16x16xf32>
      %cst_14 = arith.constant dense<0xFF800000> : vector<16xf32>
      %34 = vector.multi_reduction <maximumf>, %33, %cst_14 [1] : vector<16x16xf32> to vector<16xf32>
      %35 = vector.shape_cast %34 : vector<16xf32> to vector<16x1xf32>
      %36 = vector.broadcast %35 : vector<16x1xf32> to vector<16x16xf32>
      %37 = arith.subf %33, %36 : vector<16x16xf32>
      %38 = math.exp %37 : vector<16x16xf32>
      %cst_15 = arith.constant dense<0.000000e+00> : vector<16xf32>
      %39 = vector.multi_reduction <add>, %38, %cst_15 [1] : vector<16x16xf32> to vector<16xf32>
      %40 = vector.shape_cast %39 : vector<16xf32> to vector<16x1xf32>
      %41 = tpu.reciprocal %40 {approx = true} : vector<16x1xf32> -> vector<16x1xf32>
      %42 = vector.broadcast %41 : vector<16x1xf32> to vector<16x16xf32>
      %43 = arith.mulf %38, %42 : vector<16x16xf32>
      %44 = arith.truncf %43 : vector<16x16xf32> to vector<16x16xbf16>
      %cst_16 = arith.constant dense<0.000000e+00> : vector<16x16xf32>
      %45 = tpu.matmul %44, %29, %cst_16 {dimension_numbers = #tpu.dot_dimension_numbers<[1], [0], [0], [1], [0, 0, 1, 1], [], []>} : vector<16x16xbf16>, vector<16x16xbf16>, vector<16x16xf32> -> vector<16x16xf32>
      %46 = vector.extract_strided_slice %20 {offsets = [0, 16], sizes = [16, 16], strides = [1, 1]} : vector<16x128xf32> to vector<16x16xf32>
      %47 = arith.truncf %46 : vector<16x16xf32> to vector<16x16xbf16>
      %48 = vector.extract_strided_slice %21 {offsets = [0, 16], sizes = [16, 16], strides = [1, 1]} : vector<16x128xf32> to vector<16x16xf32>
      %49 = arith.truncf %48 : vector<16x16xf32> to vector<16x16xbf16>
      %50 = vector.extract_strided_slice %22 {offsets = [0, 16], sizes = [16, 16], strides = [1, 1]} : vector<16x128xf32> to vector<16x16xf32>
      %51 = arith.truncf %50 : vector<16x16xf32> to vector<16x16xbf16>
      "tpu.trace_start"() <{level = 10 : i32, message = "nd,md->nm"}> : () -> ()
      %cst_17 = arith.constant dense<0.000000e+00> : vector<16x16xf32>
      %52 = tpu.matmul %47, %49, %cst_17 {dimension_numbers = #tpu.dot_dimension_numbers<[1], [1], [0], [0], [0, 0, 1, 0], [], []>} : vector<16x16xbf16>, vector<16x16xbf16>, vector<16x16xf32> -> vector<16x16xf32>
      "tpu.trace_stop"() : () -> ()
      %cst_18 = arith.constant 2.500000e-01 : f32
      %53 = vector.broadcast %cst_18 : f32 to vector<16x16xf32>
      %54 = arith.mulf %52, %53 : vector<16x16xf32>
      %55 = arith.addf %54, %23 : vector<16x16xf32>
      %cst_19 = arith.constant dense<0xFF800000> : vector<16xf32>
      %56 = vector.multi_reduction <maximumf>, %55, %cst_19 [1] : vector<16x16xf32> to vector<16xf32>
      %57 = vector.shape_cast %56 : vector<16xf32> to vector<16x1xf32>
      %58 = vector.broadcast %57 : vector<16x1xf32> to vector<16x16xf32>
      %59 = arith.subf %55, %58 : vector<16x16xf32>
      %60 = math.exp %59 : vector<16x16xf32>
      %cst_20 = arith.constant dense<0.000000e+00> : vector<16xf32>
      %61 = vector.multi_reduction <add>, %60, %cst_20 [1] : vector<16x16xf32> to vector<16xf32>
      %62 = vector.shape_cast %61 : vector<16xf32> to vector<16x1xf32>
      %63 = tpu.reciprocal %62 {approx = true} : vector<16x1xf32> -> vector<16x1xf32>
      %64 = vector.broadcast %63 : vector<16x1xf32> to vector<16x16xf32>
      %65 = arith.mulf %60, %64 : vector<16x16xf32>
      %66 = arith.truncf %65 : vector<16x16xf32> to vector<16x16xbf16>
      %cst_21 = arith.constant dense<0.000000e+00> : vector<16x16xf32>
      %67 = tpu.matmul %66, %51, %cst_21 {dimension_numbers = #tpu.dot_dimension_numbers<[1], [0], [0], [1], [0, 0, 1, 1], [], []>} : vector<16x16xbf16>, vector<16x16xbf16>, vector<16x16xf32> -> vector<16x16xf32>
      %68 = vector.extract_strided_slice %20 {offsets = [0, 32], sizes = [16, 16], strides = [1, 1]} : vector<16x128xf32> to vector<16x16xf32>
      %69 = arith.truncf %68 : vector<16x16xf32> to vector<16x16xbf16>
      %70 = vector.extract_strided_slice %21 {offsets = [0, 32], sizes = [16, 16], strides = [1, 1]} : vector<16x128xf32> to vector<16x16xf32>
      %71 = arith.truncf %70 : vector<16x16xf32> to vector<16x16xbf16>
      %72 = vector.extract_strided_slice %22 {offsets = [0, 32], sizes = [16, 16], strides = [1, 1]} : vector<16x128xf32> to vector<16x16xf32>
      %73 = arith.truncf %72 : vector<16x16xf32> to vector<16x16xbf16>
      "tpu.trace_start"() <{level = 10 : i32, message = "nd,md->nm"}> : () -> ()
      %cst_22 = arith.constant dense<0.000000e+00> : vector<16x16xf32>
      %74 = tpu.matmul %69, %71, %cst_22 {dimension_numbers = #tpu.dot_dimension_numbers<[1], [1], [0], [0], [0, 0, 1, 0], [], []>} : vector<16x16xbf16>, vector<16x16xbf16>, vector<16x16xf32> -> vector<16x16xf32>
      "tpu.trace_stop"() : () -> ()
      %cst_23 = arith.constant 2.500000e-01 : f32
      %75 = vector.broadcast %cst_23 : f32 to vector<16x16xf32>
      %76 = arith.mulf %74, %75 : vector<16x16xf32>
      %77 = arith.addf %76, %23 : vector<16x16xf32>
      %cst_24 = arith.constant dense<0xFF800000> : vector<16xf32>
      %78 = vector.multi_reduction <maximumf>, %77, %cst_24 [1] : vector<16x16xf32> to vector<16xf32>
      %79 = vector.shape_cast %78 : vector<16xf32> to vector<16x1xf32>
      %80 = vector.broadcast %79 : vector<16x1xf32> to vector<16x16xf32>
      %81 = arith.subf %77, %80 : vector<16x16xf32>
      %82 = math.exp %81 : vector<16x16xf32>
      %cst_25 = arith.constant dense<0.000000e+00> : vector<16xf32>
      %83 = vector.multi_reduction <add>, %82, %cst_25 [1] : vector<16x16xf32> to vector<16xf32>
      %84 = vector.shape_cast %83 : vector<16xf32> to vector<16x1xf32>
      %85 = tpu.reciprocal %84 {approx = true} : vector<16x1xf32> -> vector<16x1xf32>
      %86 = vector.broadcast %85 : vector<16x1xf32> to vector<16x16xf32>
      %87 = arith.mulf %82, %86 : vector<16x16xf32>
      %88 = arith.truncf %87 : vector<16x16xf32> to vector<16x16xbf16>
      %cst_26 = arith.constant dense<0.000000e+00> : vector<16x16xf32>
      %89 = tpu.matmul %88, %73, %cst_26 {dimension_numbers = #tpu.dot_dimension_numbers<[1], [0], [0], [1], [0, 0, 1, 1], [], []>} : vector<16x16xbf16>, vector<16x16xbf16>, vector<16x16xf32> -> vector<16x16xf32>
      %90 = vector.extract_strided_slice %20 {offsets = [0, 48], sizes = [16, 16], strides = [1, 1]} : vector<16x128xf32> to vector<16x16xf32>
      %91 = arith.truncf %90 : vector<16x16xf32> to vector<16x16xbf16>
      %92 = vector.extract_strided_slice %21 {offsets = [0, 48], sizes = [16, 16], strides = [1, 1]} : vector<16x128xf32> to vector<16x16xf32>
      %93 = arith.truncf %92 : vector<16x16xf32> to vector<16x16xbf16>
      %94 = vector.extract_strided_slice %22 {offsets = [0, 48], sizes = [16, 16], strides = [1, 1]} : vector<16x128xf32> to vector<16x16xf32>
      %95 = arith.truncf %94 : vector<16x16xf32> to vector<16x16xbf16>
      "tpu.trace_start"() <{level = 10 : i32, message = "nd,md->nm"}> : () -> ()
      %cst_27 = arith.constant dense<0.000000e+00> : vector<16x16xf32>
      %96 = tpu.matmul %91, %93, %cst_27 {dimension_numbers = #tpu.dot_dimension_numbers<[1], [1], [0], [0], [0, 0, 1, 0], [], []>} : vector<16x16xbf16>, vector<16x16xbf16>, vector<16x16xf32> -> vector<16x16xf32>
      "tpu.trace_stop"() : () -> ()
      %cst_28 = arith.constant 2.500000e-01 : f32
      %97 = vector.broadcast %cst_28 : f32 to vector<16x16xf32>
      %98 = arith.mulf %96, %97 : vector<16x16xf32>
      %99 = arith.addf %98, %23 : vector<16x16xf32>
      %cst_29 = arith.constant dense<0xFF800000> : vector<16xf32>
      %100 = vector.multi_reduction <maximumf>, %99, %cst_29 [1] : vector<16x16xf32> to vector<16xf32>
      %101 = vector.shape_cast %100 : vector<16xf32> to vector<16x1xf32>
      %102 = vector.broadcast %101 : vector<16x1xf32> to vector<16x16xf32>
      %103 = arith.subf %99, %102 : vector<16x16xf32>
      %104 = math.exp %103 : vector<16x16xf32>
      %cst_30 = arith.constant dense<0.000000e+00> : vector<16xf32>
      %105 = vector.multi_reduction <add>, %104, %cst_30 [1] : vector<16x16xf32> to vector<16xf32>
      %106 = vector.shape_cast %105 : vector<16xf32> to vector<16x1xf32>
      %107 = tpu.reciprocal %106 {approx = true} : vector<16x1xf32> -> vector<16x1xf32>
      %108 = vector.broadcast %107 : vector<16x1xf32> to vector<16x16xf32>
      %109 = arith.mulf %104, %108 : vector<16x16xf32>
      %110 = arith.truncf %109 : vector<16x16xf32> to vector<16x16xbf16>
      %cst_31 = arith.constant dense<0.000000e+00> : vector<16x16xf32>
      %111 = tpu.matmul %110, %95, %cst_31 {dimension_numbers = #tpu.dot_dimension_numbers<[1], [0], [0], [1], [0, 0, 1, 1], [], []>} : vector<16x16xbf16>, vector<16x16xbf16>, vector<16x16xf32> -> vector<16x16xf32>
      %112 = vector.extract_strided_slice %20 {offsets = [0, 64], sizes = [16, 16], strides = [1, 1]} : vector<16x128xf32> to vector<16x16xf32>
      %113 = arith.truncf %112 : vector<16x16xf32> to vector<16x16xbf16>
      %114 = vector.extract_strided_slice %21 {offsets = [0, 64], sizes = [16, 16], strides = [1, 1]} : vector<16x128xf32> to vector<16x16xf32>
      %115 = arith.truncf %114 : vector<16x16xf32> to vector<16x16xbf16>
      %116 = vector.extract_strided_slice %22 {offsets = [0, 64], sizes = [16, 16], strides = [1, 1]} : vector<16x128xf32> to vector<16x16xf32>
      %117 = arith.truncf %116 : vector<16x16xf32> to vector<16x16xbf16>
      "tpu.trace_start"() <{level = 10 : i32, message = "nd,md->nm"}> : () -> ()
      %cst_32 = arith.constant dense<0.000000e+00> : vector<16x16xf32>
      %118 = tpu.matmul %113, %115, %cst_32 {dimension_numbers = #tpu.dot_dimension_numbers<[1], [1], [0], [0], [0, 0, 1, 0], [], []>} : vector<16x16xbf16>, vector<16x16xbf16>, vector<16x16xf32> -> vector<16x16xf32>
      "tpu.trace_stop"() : () -> ()
      %cst_33 = arith.constant 2.500000e-01 : f32
      %119 = vector.broadcast %cst_33 : f32 to vector<16x16xf32>
      %120 = arith.mulf %118, %119 : vector<16x16xf32>
      %121 = arith.addf %120, %23 : vector<16x16xf32>
      %cst_34 = arith.constant dense<0xFF800000> : vector<16xf32>
      %122 = vector.multi_reduction <maximumf>, %121, %cst_34 [1] : vector<16x16xf32> to vector<16xf32>
      %123 = vector.shape_cast %122 : vector<16xf32> to vector<16x1xf32>
      %124 = vector.broadcast %123 : vector<16x1xf32> to vector<16x16xf32>
      %125 = arith.subf %121, %124 : vector<16x16xf32>
      %126 = math.exp %125 : vector<16x16xf32>
      %cst_35 = arith.constant dense<0.000000e+00> : vector<16xf32>
      %127 = vector.multi_reduction <add>, %126, %cst_35 [1] : vector<16x16xf32> to vector<16xf32>
      %128 = vector.shape_cast %127 : vector<16xf32> to vector<16x1xf32>
      %129 = tpu.reciprocal %128 {approx = true} : vector<16x1xf32> -> vector<16x1xf32>
      %130 = vector.broadcast %129 : vector<16x1xf32> to vector<16x16xf32>
      %131 = arith.mulf %126, %130 : vector<16x16xf32>
      %132 = arith.truncf %131 : vector<16x16xf32> to vector<16x16xbf16>
      %cst_36 = arith.constant dense<0.000000e+00> : vector<16x16xf32>
      %133 = tpu.matmul %132, %117, %cst_36 {dimension_numbers = #tpu.dot_dimension_numbers<[1], [0], [0], [1], [0, 0, 1, 1], [], []>} : vector<16x16xbf16>, vector<16x16xbf16>, vector<16x16xf32> -> vector<16x16xf32>
      %134 = vector.extract_strided_slice %20 {offsets = [0, 80], sizes = [16, 16], strides = [1, 1]} : vector<16x128xf32> to vector<16x16xf32>
      %135 = arith.truncf %134 : vector<16x16xf32> to vector<16x16xbf16>
      %136 = vector.extract_strided_slice %21 {offsets = [0, 80], sizes = [16, 16], strides = [1, 1]} : vector<16x128xf32> to vector<16x16xf32>
      %137 = arith.truncf %136 : vector<16x16xf32> to vector<16x16xbf16>
      %138 = vector.extract_strided_slice %22 {offsets = [0, 80], sizes = [16, 16], strides = [1, 1]} : vector<16x128xf32> to vector<16x16xf32>
      %139 = arith.truncf %138 : vector<16x16xf32> to vector<16x16xbf16>
      "tpu.trace_start"() <{level = 10 : i32, message = "nd,md->nm"}> : () -> ()
      %cst_37 = arith.constant dense<0.000000e+00> : vector<16x16xf32>
      %140 = tpu.matmul %135, %137, %cst_37 {dimension_numbers = #tpu.dot_dimension_numbers<[1], [1], [0], [0], [0, 0, 1, 0], [], []>} : vector<16x16xbf16>, vector<16x16xbf16>, vector<16x16xf32> -> vector<16x16xf32>
      "tpu.trace_stop"() : () -> ()
      %cst_38 = arith.constant 2.500000e-01 : f32
      %141 = vector.broadcast %cst_38 : f32 to vector<16x16xf32>
      %142 = arith.mulf %140, %141 : vector<16x16xf32>
      %143 = arith.addf %142, %23 : vector<16x16xf32>
      %cst_39 = arith.constant dense<0xFF800000> : vector<16xf32>
      %144 = vector.multi_reduction <maximumf>, %143, %cst_39 [1] : vector<16x16xf32> to vector<16xf32>
      %145 = vector.shape_cast %144 : vector<16xf32> to vector<16x1xf32>
      %146 = vector.broadcast %145 : vector<16x1xf32> to vector<16x16xf32>
      %147 = arith.subf %143, %146 : vector<16x16xf32>
      %148 = math.exp %147 : vector<16x16xf32>
      %cst_40 = arith.constant dense<0.000000e+00> : vector<16xf32>
      %149 = vector.multi_reduction <add>, %148, %cst_40 [1] : vector<16x16xf32> to vector<16xf32>
      %150 = vector.shape_cast %149 : vector<16xf32> to vector<16x1xf32>
      %151 = tpu.reciprocal %150 {approx = true} : vector<16x1xf32> -> vector<16x1xf32>
      %152 = vector.broadcast %151 : vector<16x1xf32> to vector<16x16xf32>
      %153 = arith.mulf %148, %152 : vector<16x16xf32>
      %154 = arith.truncf %153 : vector<16x16xf32> to vector<16x16xbf16>
      %cst_41 = arith.constant dense<0.000000e+00> : vector<16x16xf32>
      %155 = tpu.matmul %154, %139, %cst_41 {dimension_numbers = #tpu.dot_dimension_numbers<[1], [0], [0], [1], [0, 0, 1, 1], [], []>} : vector<16x16xbf16>, vector<16x16xbf16>, vector<16x16xf32> -> vector<16x16xf32>
      %156 = vector.extract_strided_slice %20 {offsets = [0, 96], sizes = [16, 16], strides = [1, 1]} : vector<16x128xf32> to vector<16x16xf32>
      %157 = arith.truncf %156 : vector<16x16xf32> to vector<16x16xbf16>
      %158 = vector.extract_strided_slice %21 {offsets = [0, 96], sizes = [16, 16], strides = [1, 1]} : vector<16x128xf32> to vector<16x16xf32>
      %159 = arith.truncf %158 : vector<16x16xf32> to vector<16x16xbf16>
      %160 = vector.extract_strided_slice %22 {offsets = [0, 96], sizes = [16, 16], strides = [1, 1]} : vector<16x128xf32> to vector<16x16xf32>
      %161 = arith.truncf %160 : vector<16x16xf32> to vector<16x16xbf16>
      "tpu.trace_start"() <{level = 10 : i32, message = "nd,md->nm"}> : () -> ()
      %cst_42 = arith.constant dense<0.000000e+00> : vector<16x16xf32>
      %162 = tpu.matmul %157, %159, %cst_42 {dimension_numbers = #tpu.dot_dimension_numbers<[1], [1], [0], [0], [0, 0, 1, 0], [], []>} : vector<16x16xbf16>, vector<16x16xbf16>, vector<16x16xf32> -> vector<16x16xf32>
      "tpu.trace_stop"() : () -> ()
      %cst_43 = arith.constant 2.500000e-01 : f32
      %163 = vector.broadcast %cst_43 : f32 to vector<16x16xf32>
      %164 = arith.mulf %162, %163 : vector<16x16xf32>
      %165 = arith.addf %164, %23 : vector<16x16xf32>
      %cst_44 = arith.constant dense<0xFF800000> : vector<16xf32>
      %166 = vector.multi_reduction <maximumf>, %165, %cst_44 [1] : vector<16x16xf32> to vector<16xf32>
      %167 = vector.shape_cast %166 : vector<16xf32> to vector<16x1xf32>
      %168 = vector.broadcast %167 : vector<16x1xf32> to vector<16x16xf32>
      %169 = arith.subf %165, %168 : vector<16x16xf32>
      %170 = math.exp %169 : vector<16x16xf32>
      %cst_45 = arith.constant dense<0.000000e+00> : vector<16xf32>
      %171 = vector.multi_reduction <add>, %170, %cst_45 [1] : vector<16x16xf32> to vector<16xf32>
      %172 = vector.shape_cast %171 : vector<16xf32> to vector<16x1xf32>
      %173 = tpu.reciprocal %172 {approx = true} : vector<16x1xf32> -> vector<16x1xf32>
      %174 = vector.broadcast %173 : vector<16x1xf32> to vector<16x16xf32>
      %175 = arith.mulf %170, %174 : vector<16x16xf32>
      %176 = arith.truncf %175 : vector<16x16xf32> to vector<16x16xbf16>
      %cst_46 = arith.constant dense<0.000000e+00> : vector<16x16xf32>
      %177 = tpu.matmul %176, %161, %cst_46 {dimension_numbers = #tpu.dot_dimension_numbers<[1], [0], [0], [1], [0, 0, 1, 1], [], []>} : vector<16x16xbf16>, vector<16x16xbf16>, vector<16x16xf32> -> vector<16x16xf32>
      %178 = vector.extract_strided_slice %20 {offsets = [0, 112], sizes = [16, 16], strides = [1, 1]} : vector<16x128xf32> to vector<16x16xf32>
      %179 = arith.truncf %178 : vector<16x16xf32> to vector<16x16xbf16>
      %180 = vector.extract_strided_slice %21 {offsets = [0, 112], sizes = [16, 16], strides = [1, 1]} : vector<16x128xf32> to vector<16x16xf32>
      %181 = arith.truncf %180 : vector<16x16xf32> to vector<16x16xbf16>
      %182 = vector.extract_strided_slice %22 {offsets = [0, 112], sizes = [16, 16], strides = [1, 1]} : vector<16x128xf32> to vector<16x16xf32>
      %183 = arith.truncf %182 : vector<16x16xf32> to vector<16x16xbf16>
      "tpu.trace_start"() <{level = 10 : i32, message = "nd,md->nm"}> : () -> ()
      %cst_47 = arith.constant dense<0.000000e+00> : vector<16x16xf32>
      %184 = tpu.matmul %179, %181, %cst_47 {dimension_numbers = #tpu.dot_dimension_numbers<[1], [1], [0], [0], [0, 0, 1, 0], [], []>} : vector<16x16xbf16>, vector<16x16xbf16>, vector<16x16xf32> -> vector<16x16xf32>
      "tpu.trace_stop"() : () -> ()
      %cst_48 = arith.constant 2.500000e-01 : f32
      %185 = vector.broadcast %cst_48 : f32 to vector<16x16xf32>
      %186 = arith.mulf %184, %185 : vector<16x16xf32>
      %187 = arith.addf %186, %23 : vector<16x16xf32>
      %cst_49 = arith.constant dense<0xFF800000> : vector<16xf32>
      %188 = vector.multi_reduction <maximumf>, %187, %cst_49 [1] : vector<16x16xf32> to vector<16xf32>
      %189 = vector.shape_cast %188 : vector<16xf32> to vector<16x1xf32>
      %190 = vector.broadcast %189 : vector<16x1xf32> to vector<16x16xf32>
      %191 = arith.subf %187, %190 : vector<16x16xf32>
      %192 = math.exp %191 : vector<16x16xf32>
      %cst_50 = arith.constant dense<0.000000e+00> : vector<16xf32>
      %193 = vector.multi_reduction <add>, %192, %cst_50 [1] : vector<16x16xf32> to vector<16xf32>
      %194 = vector.shape_cast %193 : vector<16xf32> to vector<16x1xf32>
      %195 = tpu.reciprocal %194 {approx = true} : vector<16x1xf32> -> vector<16x1xf32>
      %196 = vector.broadcast %195 : vector<16x1xf32> to vector<16x16xf32>
      %197 = arith.mulf %192, %196 : vector<16x16xf32>
      %198 = arith.truncf %197 : vector<16x16xf32> to vector<16x16xbf16>
      %cst_51 = arith.constant dense<0.000000e+00> : vector<16x16xf32>
      %199 = tpu.matmul %198, %183, %cst_51 {dimension_numbers = #tpu.dot_dimension_numbers<[1], [0], [0], [1], [0, 0, 1, 1], [], []>} : vector<16x16xbf16>, vector<16x16xbf16>, vector<16x16xf32> -> vector<16x16xf32>
      %200 = tpu.concatenate %45, %67, %89, %111, %133, %155, %177, %199 in 1 : vector<16x16xf32>, vector<16x16xf32>, vector<16x16xf32>, vector<16x16xf32>, vector<16x16xf32>, vector<16x16xf32>, vector<16x16xf32>, vector<16x16xf32> -> vector<16x128xf32>
      %201 = arith.truncf %200 : vector<16x128xf32> to vector<16x128xbf16>
      %c0_52 = arith.constant 0 : index
      %c0_53 = arith.constant 0 : index
      %c0_54 = arith.constant 0 : index
      %202 = vector.load %arg17[%c0_52, %c0_53, %c0_54] : memref<1x128x128xbf16, #tpu.memory_space<vmem>>, vector<1x128x128xbf16>
      %203 = vector.shape_cast %202 : vector<1x128x128xbf16> to vector<128x128xbf16>
      %cst_55 = arith.constant dense<0.000000e+00> : vector<16x128xf32>
      %204 = tpu.matmul %201, %203, %cst_55 {dimension_numbers = #tpu.dot_dimension_numbers<[1], [0], [0], [1], [0, 0, 1, 1], [], []>} : vector<16x128xbf16>, vector<128x128xbf16>, vector<16x128xf32> -> vector<16x128xf32>
      %c0_56 = arith.constant 0 : index
      %c0_57 = arith.constant 0 : index
      %c0_58 = arith.constant 0 : index
      %205 = vector.load %arg18[%c0_56, %c0_57, %c0_58] : memref<1x1x128xf32, #tpu.memory_space<vmem>>, vector<1x1x128xf32>
      %206 = vector.shape_cast %205 : vector<1x1x128xf32> to vector<1x128xf32>
      %207 = vector.broadcast %206 : vector<1x128xf32> to vector<16x128xf32>
      %208 = arith.addf %204, %207 : vector<16x128xf32>
      %209 = arith.addf %11, %208 : vector<16x128xf32>
      %c0_59 = arith.constant 0 : index
      %c0_60 = arith.constant 0 : index
      %c0_61 = arith.constant 0 : index
      %210 = vector.load %arg25[%c0_59, %c0_60, %c0_61] : memref<1x1x128xf32, #tpu.memory_space<vmem>>, vector<1x1x128xf32>
      %211 = vector.shape_cast %210 : vector<1x1x128xf32> to vector<1x128xf32>
      %c0_62 = arith.constant 0 : index
      %c0_63 = arith.constant 0 : index
      %c0_64 = arith.constant 0 : index
      %212 = vector.load %arg26[%c0_62, %c0_63, %c0_64] : memref<1x1x128xf32, #tpu.memory_space<vmem>>, vector<1x1x128xf32>
      %213 = vector.shape_cast %212 : vector<1x1x128xf32> to vector<1x128xf32>
      %cst_65 = arith.constant dense<0.000000e+00> : vector<16xf32>
      %214 = vector.multi_reduction <add>, %209, %cst_65 [1] : vector<16x128xf32> to vector<16xf32>
      %215 = vector.shape_cast %214 : vector<16xf32> to vector<16x1xf32>
      %cst_66 = arith.constant 1.280000e+02 : f32
      %216 = vector.broadcast %cst_66 : f32 to vector<16x1xf32>
      %217 = arith.divf %215, %216 : vector<16x1xf32>
      %218 = vector.broadcast %217 : vector<16x1xf32> to vector<16x128xf32>
      %219 = arith.subf %209, %218 : vector<16x128xf32>
      %220 = arith.mulf %219, %219 : vector<16x128xf32>
      %cst_67 = arith.constant dense<0.000000e+00> : vector<16xf32>
      %221 = vector.multi_reduction <add>, %220, %cst_67 [1] : vector<16x128xf32> to vector<16xf32>
      %222 = vector.shape_cast %221 : vector<16xf32> to vector<16x1xf32>
      %cst_68 = arith.constant 1.280000e+02 : f32
      %223 = vector.broadcast %cst_68 : f32 to vector<16x1xf32>
      %224 = arith.divf %222, %223 : vector<16x1xf32>
      %225 = vector.broadcast %217 : vector<16x1xf32> to vector<16x128xf32>
      %226 = arith.subf %209, %225 : vector<16x128xf32>
      %cst_69 = arith.constant 9.99999974E-6 : f32
      %227 = vector.broadcast %cst_69 : f32 to vector<16x1xf32>
      %228 = arith.addf %224, %227 : vector<16x1xf32>
      %229 = math.rsqrt %228 : vector<16x1xf32>
      %230 = vector.broadcast %229 : vector<16x1xf32> to vector<16x128xf32>
      %231 = arith.mulf %226, %230 : vector<16x128xf32>
      %232 = vector.broadcast %211 : vector<1x128xf32> to vector<16x128xf32>
      %233 = arith.mulf %231, %232 : vector<16x128xf32>
      %234 = vector.broadcast %213 : vector<1x128xf32> to vector<16x128xf32>
      %235 = arith.addf %233, %234 : vector<16x128xf32>
      %236 = arith.truncf %235 : vector<16x128xf32> to vector<16x128xbf16>
      %c0_70 = arith.constant 0 : index
      %c0_71 = arith.constant 0 : index
      %c0_72 = arith.constant 0 : index
      %237 = vector.load %arg19[%c0_70, %c0_71, %c0_72] : memref<1x128x2048xi8, #tpu.memory_space<vmem>>, vector<1x128x2048xi8>
      %238 = vector.shape_cast %237 : vector<1x128x2048xi8> to vector<128x2048xi8>
      %239 = arith.sitofp %238 : vector<128x2048xi8> to vector<128x2048xf32>
      %240 = arith.truncf %239 : vector<128x2048xf32> to vector<128x2048xbf16>
      %cst_73 = arith.constant dense<0.000000e+00> : vector<16x2048xf32>
      %241 = tpu.matmul %236, %240, %cst_73 {dimension_numbers = #tpu.dot_dimension_numbers<[1], [0], [0], [1], [0, 0, 1, 1], [], []>} : vector<16x128xbf16>, vector<128x2048xbf16>, vector<16x2048xf32> -> vector<16x2048xf32>
      %c0_74 = arith.constant 0 : index
      %c0_75 = arith.constant 0 : index
      %c0_76 = arith.constant 0 : index
      %242 = vector.load %arg20[%c0_74, %c0_75, %c0_76] : memref<1x1x2048xf32, #tpu.memory_space<vmem>>, vector<1x1x2048xf32>
      %243 = vector.shape_cast %242 : vector<1x1x2048xf32> to vector<1x2048xf32>
      %244 = vector.broadcast %243 : vector<1x2048xf32> to vector<16x2048xf32>
      %245 = arith.mulf %241, %244 : vector<16x2048xf32>
      %c0_77 = arith.constant 0 : index
      %c0_78 = arith.constant 0 : index
      %c0_79 = arith.constant 0 : index
      %246 = vector.load %arg21[%c0_77, %c0_78, %c0_79] : memref<1x1x2048xf32, #tpu.memory_space<vmem>>, vector<1x1x2048xf32>
      %247 = vector.shape_cast %246 : vector<1x1x2048xf32> to vector<1x2048xf32>
      %248 = vector.broadcast %247 : vector<1x2048xf32> to vector<16x2048xf32>
      %249 = arith.addf %245, %248 : vector<16x2048xf32>
      %cst_80 = arith.constant 0.000000e+00 : f32
      %250 = vector.broadcast %cst_80 : f32 to vector<16x2048xf32>
      %251 = arith.maximumf %249, %250 : vector<16x2048xf32>
      %252 = arith.truncf %251 : vector<16x2048xf32> to vector<16x2048xbf16>
      %c0_81 = arith.constant 0 : index
      %c0_82 = arith.constant 0 : index
      %c0_83 = arith.constant 0 : index
      %253 = vector.load %arg22[%c0_81, %c0_82, %c0_83] : memref<1x2048x128xi8, #tpu.memory_space<vmem>>, vector<1x2048x128xi8>
      %254 = vector.shape_cast %253 : vector<1x2048x128xi8> to vector<2048x128xi8>
      %255 = arith.sitofp %254 : vector<2048x128xi8> to vector<2048x128xf32>
      %256 = arith.truncf %255 : vector<2048x128xf32> to vector<2048x128xbf16>
      %cst_84 = arith.constant dense<0.000000e+00> : vector<16x128xf32>
      %257 = tpu.matmul %252, %256, %cst_84 {dimension_numbers = #tpu.dot_dimension_numbers<[1], [0], [0], [1], [0, 0, 1, 1], [], []>} : vector<16x2048xbf16>, vector<2048x128xbf16>, vector<16x128xf32> -> vector<16x128xf32>
      %c0_85 = arith.constant 0 : index
      %c0_86 = arith.constant 0 : index
      %c0_87 = arith.constant 0 : index
      %258 = vector.load %arg23[%c0_85, %c0_86, %c0_87] : memref<1x1x128xf32, #tpu.memory_space<vmem>>, vector<1x1x128xf32>
      %259 = vector.shape_cast %258 : vector<1x1x128xf32> to vector<1x128xf32>
      %260 = vector.broadcast %259 : vector<1x128xf32> to vector<16x128xf32>
      %261 = arith.mulf %257, %260 : vector<16x128xf32>
      %c0_88 = arith.constant 0 : index
      %c0_89 = arith.constant 0 : index
      %c0_90 = arith.constant 0 : index
      %262 = vector.load %arg24[%c0_88, %c0_89, %c0_90] : memref<1x1x128xf32, #tpu.memory_space<vmem>>, vector<1x1x128xf32>
      %263 = vector.shape_cast %262 : vector<1x1x128xf32> to vector<1x128xf32>
      %264 = vector.broadcast %263 : vector<1x128xf32> to vector<16x128xf32>
      %265 = arith.addf %261, %264 : vector<16x128xf32>
      %266 = arith.addf %235, %265 : vector<16x128xf32>
      %c0_91 = arith.constant 0 : index
      %c0_92 = arith.constant 0 : index
      %c0_93 = arith.constant 0 : index
      %267 = vector.load %arg27[%c0_91, %c0_92, %c0_93] : memref<1x1x128xf32, #tpu.memory_space<vmem>>, vector<1x1x128xf32>
      %268 = vector.shape_cast %267 : vector<1x1x128xf32> to vector<1x128xf32>
      %c0_94 = arith.constant 0 : index
      %c0_95 = arith.constant 0 : index
      %c0_96 = arith.constant 0 : index
      %269 = vector.load %arg28[%c0_94, %c0_95, %c0_96] : memref<1x1x128xf32, #tpu.memory_space<vmem>>, vector<1x1x128xf32>
      %270 = vector.shape_cast %269 : vector<1x1x128xf32> to vector<1x128xf32>
      %cst_97 = arith.constant dense<0.000000e+00> : vector<16xf32>
      %271 = vector.multi_reduction <add>, %266, %cst_97 [1] : vector<16x128xf32> to vector<16xf32>
      %272 = vector.shape_cast %271 : vector<16xf32> to vector<16x1xf32>
      %cst_98 = arith.constant 1.280000e+02 : f32
      %273 = vector.broadcast %cst_98 : f32 to vector<16x1xf32>
      %274 = arith.divf %272, %273 : vector<16x1xf32>
      %275 = vector.broadcast %274 : vector<16x1xf32> to vector<16x128xf32>
      %276 = arith.subf %266, %275 : vector<16x128xf32>
      %277 = arith.mulf %276, %276 : vector<16x128xf32>
      %cst_99 = arith.constant dense<0.000000e+00> : vector<16xf32>
      %278 = vector.multi_reduction <add>, %277, %cst_99 [1] : vector<16x128xf32> to vector<16xf32>
      %279 = vector.shape_cast %278 : vector<16xf32> to vector<16x1xf32>
      %cst_100 = arith.constant 1.280000e+02 : f32
      %280 = vector.broadcast %cst_100 : f32 to vector<16x1xf32>
      %281 = arith.divf %279, %280 : vector<16x1xf32>
      %282 = vector.broadcast %274 : vector<16x1xf32> to vector<16x128xf32>
      %283 = arith.subf %266, %282 : vector<16x128xf32>
      %cst_101 = arith.constant 9.99999974E-6 : f32
      %284 = vector.broadcast %cst_101 : f32 to vector<16x1xf32>
      %285 = arith.addf %281, %284 : vector<16x1xf32>
      %286 = math.rsqrt %285 : vector<16x1xf32>
      %287 = vector.broadcast %286 : vector<16x1xf32> to vector<16x128xf32>
      %288 = arith.mulf %283, %287 : vector<16x128xf32>
      %289 = vector.broadcast %268 : vector<1x128xf32> to vector<16x128xf32>
      %290 = arith.mulf %288, %289 : vector<16x128xf32>
      %291 = vector.broadcast %270 : vector<1x128xf32> to vector<16x128xf32>
      %292 = arith.addf %290, %291 : vector<16x128xf32>
      %c0_102 = arith.constant 0 : index
      %c0_103 = arith.constant 0 : index
      %293 = vector.load %arg37[%c0_102, %c0_103] : memref<16x128xf32, #tpu.memory_space<vmem>>, vector<16x128xf32>
      tpu.vector_store %arg37[%c0_102, %c0_103], %292 {strides = array<i32>} : memref<16x128xf32, #tpu.memory_space<vmem>>, vector<16x128xf32>,
    } else {
    }
    %c4_i32 = arith.constant 4 : i32
    %8 = arith.cmpi eq, %arg0, %c4_i32 : i32
    %9 = arith.extui %8 : i1 to i32
    %c0_i32_2 = arith.constant 0 : i32
    %10 = arith.cmpi ne, %9, %c0_i32_2 : i32
    scf.if %10 {
      tpu.wait_dma2 semaphore(%arg39 : memref<!tpu.dma_semaphore, #tpu.memory_space<semaphore_mem>>) src(%arg29 : memref<1024x512xi8, #tpu.memory_space<any>>) dst(%arg38 : memref<1024x512xi8, #tpu.memory_space<vmem>>)
      %c0 = arith.constant 0 : index
      %c0_3 = arith.constant 0 : index
      %11 = vector.load %arg37[%c0, %c0_3] : memref<16x128xf32, #tpu.memory_space<vmem>>, vector<16x128xf32>
      %12 = vector.extract_strided_slice %11 {offsets = [0, 0], sizes = [8, 128], strides = [1, 1]} : vector<16x128xf32> to vector<8x128xf32>
      %13 = vector.extract_strided_slice %12 {offsets = [0, 0], sizes = [1, 128], strides = [1, 1]} : vector<8x128xf32> to vector<1x128xf32>
      %14 = vector.extract_strided_slice %12 {offsets = [1, 0], sizes = [1, 128], strides = [1, 1]} : vector<8x128xf32> to vector<1x128xf32>
      %15 = vector.extract_strided_slice %12 {offsets = [2, 0], sizes = [1, 128], strides = [1, 1]} : vector<8x128xf32> to vector<1x128xf32>
      %16 = vector.extract_strided_slice %12 {offsets = [3, 0], sizes = [1, 128], strides = [1, 1]} : vector<8x128xf32> to vector<1x128xf32>
      %17 = vector.extract_strided_slice %12 {offsets = [4, 0], sizes = [1, 128], strides = [1, 1]} : vector<8x128xf32> to vector<1x128xf32>
      %18 = vector.extract_strided_slice %12 {offsets = [5, 0], sizes = [1, 128], strides = [1, 1]} : vector<8x128xf32> to vector<1x128xf32>
      %19 = vector.extract_strided_slice %12 {offsets = [6, 0], sizes = [1, 128], strides = [1, 1]} : vector<8x128xf32> to vector<1x128xf32>
      %20 = vector.extract_strided_slice %12 {offsets = [7, 0], sizes = [1, 128], strides = [1, 1]} : vector<8x128xf32> to vector<1x128xf32>
      %21 = tpu.concatenate %13, %14, %15, %16, %17, %18, %19, %20 in 1 : vector<1x128xf32>, vector<1x128xf32>, vector<1x128xf32>, vector<1x128xf32>, vector<1x128xf32>, vector<1x128xf32>, vector<1x128xf32>, vector<1x128xf32> -> vector<1x1024xf32>
      %22 = vector.extract_strided_slice %11 {offsets = [8, 0], sizes = [8, 128], strides = [1, 1]} : vector<16x128xf32> to vector<8x128xf32>
      %23 = vector.extract_strided_slice %22 {offsets = [0, 0], sizes = [1, 128], strides = [1, 1]} : vector<8x128xf32> to vector<1x128xf32>
      %24 = vector.extract_strided_slice %22 {offsets = [1, 0], sizes = [1, 128], strides = [1, 1]} : vector<8x128xf32> to vector<1x128xf32>
      %25 = vector.extract_strided_slice %22 {offsets = [2, 0], sizes = [1, 128], strides = [1, 1]} : vector<8x128xf32> to vector<1x128xf32>
      %26 = vector.extract_strided_slice %22 {offsets = [3, 0], sizes = [1, 128], strides = [1, 1]} : vector<8x128xf32> to vector<1x128xf32>
      %27 = vector.extract_strided_slice %22 {offsets = [4, 0], sizes = [1, 128], strides = [1, 1]} : vector<8x128xf32> to vector<1x128xf32>
      %28 = vector.extract_strided_slice %22 {offsets = [5, 0], sizes = [1, 128], strides = [1, 1]} : vector<8x128xf32> to vector<1x128xf32>
      %29 = vector.extract_strided_slice %22 {offsets = [6, 0], sizes = [1, 128], strides = [1, 1]} : vector<8x128xf32> to vector<1x128xf32>
      %30 = vector.extract_strided_slice %22 {offsets = [7, 0], sizes = [1, 128], strides = [1, 1]} : vector<8x128xf32> to vector<1x128xf32>
      %31 = tpu.concatenate %23, %24, %25, %26, %27, %28, %29, %30 in 1 : vector<1x128xf32>, vector<1x128xf32>, vector<1x128xf32>, vector<1x128xf32>, vector<1x128xf32>, vector<1x128xf32>, vector<1x128xf32>, vector<1x128xf32> -> vector<1x1024xf32>
      %32 = tpu.concatenate %21, %31 in 0 : vector<1x1024xf32>, vector<1x1024xf32> -> vector<2x1024xf32>
      %33 = arith.truncf %32 : vector<2x1024xf32> to vector<2x1024xbf16>
      %cst = arith.constant 0.000000e+00 : f32
      %34 = vector.broadcast %cst : f32 to vector<2x512xf32>
      %35 = vector.extract_strided_slice %33 {offsets = [0, 0], sizes = [2, 256], strides = [1, 1]} : vector<2x1024xbf16> to vector<2x256xbf16>
      %c0_4 = arith.constant 0 : index
      %c0_5 = arith.constant 0 : index
      %36 = vector.load %arg38[%c0_4, %c0_5] : memref<1024x512xi8, #tpu.memory_space<vmem>>, vector<256x512xi8>
      %37 = arith.sitofp %36 : vector<256x512xi8> to vector<256x512xf32>
      %38 = arith.truncf %37 : vector<256x512xf32> to vector<256x512xbf16>
      %cst_6 = arith.constant dense<0.000000e+00> : vector<2x512xf32>
      %39 = tpu.matmul %35, %38, %cst_6 {dimension_numbers = #tpu.dot_dimension_numbers<[1], [0], [0], [1], [0, 0, 1, 1], [], []>} : vector<2x256xbf16>, vector<256x512xbf16>, vector<2x512xf32> -> vector<2x512xf32>
      %40 = arith.addf %34, %39 : vector<2x512xf32>
      %41 = vector.extract_strided_slice %33 {offsets = [0, 256], sizes = [2, 256], strides = [1, 1]} : vector<2x1024xbf16> to vector<2x256xbf16>
      %c256 = arith.constant 256 : index
      %c0_7 = arith.constant 0 : index
      %42 = vector.load %arg38[%c256, %c0_7] : memref<1024x512xi8, #tpu.memory_space<vmem>>, vector<256x512xi8>
      %43 = arith.sitofp %42 : vector<256x512xi8> to vector<256x512xf32>
      %44 = arith.truncf %43 : vector<256x512xf32> to vector<256x512xbf16>
      %cst_8 = arith.constant dense<0.000000e+00> : vector<2x512xf32>
      %45 = tpu.matmul %41, %44, %cst_8 {dimension_numbers = #tpu.dot_dimension_numbers<[1], [0], [0], [1], [0, 0, 1, 1], [], []>} : vector<2x256xbf16>, vector<256x512xbf16>, vector<2x512xf32> -> vector<2x512xf32>
      %46 = arith.addf %40, %45 : vector<2x512xf32>
      %47 = vector.extract_strided_slice %33 {offsets = [0, 512], sizes = [2, 256], strides = [1, 1]} : vector<2x1024xbf16> to vector<2x256xbf16>
      %c512 = arith.constant 512 : index
      %c0_9 = arith.constant 0 : index
      %48 = vector.load %arg38[%c512, %c0_9] : memref<1024x512xi8, #tpu.memory_space<vmem>>, vector<256x512xi8>
      %49 = arith.sitofp %48 : vector<256x512xi8> to vector<256x512xf32>
      %50 = arith.truncf %49 : vector<256x512xf32> to vector<256x512xbf16>
      %cst_10 = arith.constant dense<0.000000e+00> : vector<2x512xf32>
      %51 = tpu.matmul %47, %50, %cst_10 {dimension_numbers = #tpu.dot_dimension_numbers<[1], [0], [0], [1], [0, 0, 1, 1], [], []>} : vector<2x256xbf16>, vector<256x512xbf16>, vector<2x512xf32> -> vector<2x512xf32>
      %52 = arith.addf %46, %51 : vector<2x512xf32>
      %53 = vector.extract_strided_slice %33 {offsets = [0, 768], sizes = [2, 256], strides = [1, 1]} : vector<2x1024xbf16> to vector<2x256xbf16>
      %c768 = arith.constant 768 : index
      %c0_11 = arith.constant 0 : index
      %54 = vector.load %arg38[%c768, %c0_11] : memref<1024x512xi8, #tpu.memory_space<vmem>>, vector<256x512xi8>
      %55 = arith.sitofp %54 : vector<256x512xi8> to vector<256x512xf32>
      %56 = arith.truncf %55 : vector<256x512xf32> to vector<256x512xbf16>
      %cst_12 = arith.constant dense<0.000000e+00> : vector<2x512xf32>
      %57 = tpu.matmul %53, %56, %cst_12 {dimension_numbers = #tpu.dot_dimension_numbers<[1], [0], [0], [1], [0, 0, 1, 1], [], []>} : vector<2x256xbf16>, vector<256x512xbf16>, vector<2x512xf32> -> vector<2x512xf32>
      %58 = arith.addf %52, %57 : vector<2x512xf32>
      %c0_13 = arith.constant 0 : index
      %c0_14 = arith.constant 0 : index
      %59 = vector.load %arg30[%c0_13, %c0_14] : memref<1x512xf32, #tpu.memory_space<vmem>>, vector<1x512xf32>
      %60 = vector.broadcast %59 : vector<1x512xf32> to vector<2x512xf32>
      %61 = arith.mulf %58, %60 : vector<2x512xf32>
      %c0_15 = arith.constant 0 : index
      %c0_16 = arith.constant 0 : index
      %62 = vector.load %arg31[%c0_15, %c0_16] : memref<1x512xf32, #tpu.memory_space<vmem>>, vector<1x512xf32>
      %63 = vector.broadcast %62 : vector<1x512xf32> to vector<2x512xf32>
      %64 = arith.addf %61, %63 : vector<2x512xf32>
      %cst_17 = arith.constant 0.000000e+00 : f32
      %65 = vector.broadcast %cst_17 : f32 to vector<2x512xf32>
      %66 = arith.maximumf %64, %65 : vector<2x512xf32>
      %67 = arith.truncf %66 : vector<2x512xf32> to vector<2x512xbf16>
      %c0_18 = arith.constant 0 : index
      %c0_19 = arith.constant 0 : index
      %68 = vector.load %arg32[%c0_18, %c0_19] : memref<512x128xbf16, #tpu.memory_space<vmem>>, vector<512x128xbf16>
      %cst_20 = arith.constant dense<0.000000e+00> : vector<2x128xf32>
      %69 = tpu.matmul %67, %68, %cst_20 {dimension_numbers = #tpu.dot_dimension_numbers<[1], [0], [0], [1], [0, 0, 1, 1], [], []>} : vector<2x512xbf16>, vector<512x128xbf16>, vector<2x128xf32> -> vector<2x128xf32>
      %c0_21 = arith.constant 0 : index
      %c0_22 = arith.constant 0 : index
      %70 = vector.load %arg33[%c0_21, %c0_22] : memref<1x128xf32, #tpu.memory_space<vmem>>, vector<1x128xf32>
      %71 = vector.broadcast %70 : vector<1x128xf32> to vector<2x128xf32>
      %72 = arith.addf %69, %71 : vector<2x128xf32>
      %cst_23 = arith.constant 0.000000e+00 : f32
      %73 = vector.broadcast %cst_23 : f32 to vector<2x128xf32>
      %74 = arith.maximumf %72, %73 : vector<2x128xf32>
      %c0_24 = arith.constant 0 : index
      %c0_25 = arith.constant 0 : index
      %75 = vector.load %arg34[%c0_24, %c0_25] : memref<128x6xf32, #tpu.memory_space<vmem>>, vector<128x6xf32>
      %cst_26 = arith.constant dense<0.000000e+00> : vector<2x6xf32>
      %76 = tpu.matmul %74, %75, %cst_26 {dimension_numbers = #tpu.dot_dimension_numbers<[1], [0], [0], [1], [0, 0, 1, 1], [], []>} : vector<2x128xf32>, vector<128x6xf32>, vector<2x6xf32> -> vector<2x6xf32>
      %c0_27 = arith.constant 0 : index
      %c0_28 = arith.constant 0 : index
      %77 = vector.load %arg35[%c0_27, %c0_28] : memref<1x6xf32, #tpu.memory_space<vmem>>, vector<1x6xf32>
      %78 = vector.broadcast %77 : vector<1x6xf32> to vector<2x6xf32>
      %79 = arith.addf %76, %78 : vector<2x6xf32>
      %c0_29 = arith.constant 0 : index
      %c0_30 = arith.constant 0 : index
      %80 = vector.load %arg36[%c0_29, %c0_30] : memref<2x6xf32, #tpu.memory_space<vmem>>, vector<2x6xf32>
      tpu.vector_store %arg36[%c0_29, %c0_30], %79 {strides = array<i32>} : memref<2x6xf32, #tpu.memory_space<vmem>>, vector<2x6xf32>,
    } else {
    }
    return
  }
  func.func @transform_0(%arg0: i32) -> (i32, i32, i32) {
    %c0_i32 = arith.constant 0 : i32
    %c0_i32_0 = arith.constant 0 : i32
    %c0_i32_1 = arith.constant 0 : i32
    %c0_i32_2 = arith.constant 0 : i32
    return %c0_i32, %c0_i32_0, %c0_i32_1 : i32, i32, i32
  }
  func.func @transform_1(%arg0: i32) -> (i32, i32, i32) {
    %c0_i32 = arith.constant 0 : i32
    %c0_i32_0 = arith.constant 0 : i32
    %c0_i32_1 = arith.constant 0 : i32
    %c0_i32_2 = arith.constant 0 : i32
    return %c0_i32, %c0_i32_0, %c0_i32_1 : i32, i32, i32
  }
  func.func @transform_2(%arg0: i32) -> (i32, i32, i32) {
    %c0_i32 = arith.constant 0 : i32
    %c0_i32_0 = arith.constant 0 : i32
    %c0_i32_1 = arith.constant 0 : i32
    %c0_i32_2 = arith.constant 0 : i32
    return %c0_i32, %c0_i32_0, %c0_i32_1 : i32, i32, i32
  }
  func.func @transform_3(%arg0: i32) -> (i32, i32) {
    %c0_i32 = arith.constant 0 : i32
    %c0_i32_0 = arith.constant 0 : i32
    %c0_i32_1 = arith.constant 0 : i32
    return %c0_i32, %c0_i32_0 : i32, i32
  }
  func.func @transform_4(%arg0: i32) -> (i32, i32, i32) {
    %c0_i32 = arith.constant 0 : i32
    %c0_i32_0 = arith.constant 0 : i32
    %c0_i32_1 = arith.constant 0 : i32
    %c0_i32_2 = arith.constant 0 : i32
    return %c0_i32, %c0_i32_0, %c0_i32_1 : i32, i32, i32
  }
  func.func @transform_5(%arg0: i32) -> (i32, i32, i32) {
    %c0_i32 = arith.constant 0 : i32
    %c0_i32_0 = arith.constant 0 : i32
    %c0_i32_1 = arith.constant 0 : i32
    %c0_i32_2 = arith.constant 0 : i32
    return %c0_i32, %c0_i32_0, %c0_i32_1 : i32, i32, i32
  }
  func.func @transform_6(%arg0: i32) -> (i32, i32) {
    %c0_i32 = arith.constant 0 : i32
    %c0_i32_0 = arith.constant 0 : i32
    %c0_i32_1 = arith.constant 0 : i32
    return %c0_i32, %c0_i32_0 : i32, i32
  }
  func.func @transform_7(%arg0: i32) -> (i32, i32, i32) {
    %c0_i32 = arith.constant 0 : i32
    %c0_i32_0 = arith.constant 0 : i32
    %c0_i32_1 = arith.constant 0 : i32
    %c0_i32_2 = arith.constant 0 : i32
    return %c0_i32, %c0_i32_0, %c0_i32_1 : i32, i32, i32
  }
  func.func @transform_8(%arg0: i32) -> (i32, i32, i32) {
    %c0_i32 = arith.constant 0 : i32
    %c0_i32_0 = arith.constant 0 : i32
    %c0_i32_1 = arith.constant 0 : i32
    %c0_i32_2 = arith.constant 0 : i32
    return %c0_i32, %c0_i32_0, %c0_i32_1 : i32, i32, i32
  }
  func.func @transform_9(%arg0: i32) -> (i32, i32) {
    %c0_i32 = arith.constant 0 : i32
    %c0_i32_0 = arith.constant 0 : i32
    %c0_i32_1 = arith.constant 0 : i32
    return %c0_i32, %c0_i32_0 : i32, i32
  }
  func.func @transform_10(%arg0: i32) -> (i32, i32, i32) {
    %c0_i32 = arith.constant 0 : i32
    %c0_i32_0 = arith.constant 0 : i32
    %c0_i32_1 = arith.constant 0 : i32
    %c0_i32_2 = arith.constant 0 : i32
    return %c0_i32, %c0_i32_0, %c0_i32_1 : i32, i32, i32
  }
  func.func @transform_11(%arg0: i32) -> (i32, i32, i32) {
    %c0_i32 = arith.constant 0 : i32
    %c0_i32_0 = arith.constant 0 : i32
    %c0_i32_1 = arith.constant 0 : i32
    %c0_i32_2 = arith.constant 0 : i32
    return %c0_i32, %c0_i32_0, %c0_i32_1 : i32, i32, i32
  }
  func.func @transform_12(%arg0: i32) -> (i32, i32) {
    %c0_i32 = arith.constant 0 : i32
    %c0_i32_0 = arith.constant 0 : i32
    %c0_i32_1 = arith.constant 0 : i32
    return %c0_i32, %c0_i32_0 : i32, i32
  }
  func.func @transform_13(%arg0: i32) -> (i32, i32) {
    %c0_i32 = arith.constant 0 : i32
    %c0_i32_0 = arith.constant 0 : i32
    %c0_i32_1 = arith.constant 0 : i32
    return %c0_i32, %c0_i32_0 : i32, i32
  }
  func.func @transform_14(%arg0: i32) -> (i32, i32, i32) {
    %c1_i32 = arith.constant 1 : i32
    %0 = arith.subi %arg0, %c1_i32 : i32
    %c0_i32 = arith.constant 0 : i32
    %1 = arith.maxsi %0, %c0_i32 : i32
    %c2_i32 = arith.constant 2 : i32
    %2 = arith.minsi %1, %c2_i32 : i32
    %c0_i32_0 = arith.constant 0 : i32
    %c0_i32_1 = arith.constant 0 : i32
    %c0_i32_2 = arith.constant 0 : i32
    return %2, %c0_i32_0, %c0_i32_1 : i32, i32, i32
  }
  func.func @transform_15(%arg0: i32) -> (i32, i32, i32) {
    %c1_i32 = arith.constant 1 : i32
    %0 = arith.subi %arg0, %c1_i32 : i32
    %c0_i32 = arith.constant 0 : i32
    %1 = arith.maxsi %0, %c0_i32 : i32
    %c2_i32 = arith.constant 2 : i32
    %2 = arith.minsi %1, %c2_i32 : i32
    %c0_i32_0 = arith.constant 0 : i32
    %c0_i32_1 = arith.constant 0 : i32
    %c0_i32_2 = arith.constant 0 : i32
    return %2, %c0_i32_0, %c0_i32_1 : i32, i32, i32
  }
  func.func @transform_16(%arg0: i32) -> (i32, i32, i32) {
    %c1_i32 = arith.constant 1 : i32
    %0 = arith.subi %arg0, %c1_i32 : i32
    %c0_i32 = arith.constant 0 : i32
    %1 = arith.maxsi %0, %c0_i32 : i32
    %c2_i32 = arith.constant 2 : i32
    %2 = arith.minsi %1, %c2_i32 : i32
    %c0_i32_0 = arith.constant 0 : i32
    %c0_i32_1 = arith.constant 0 : i32
    %c0_i32_2 = arith.constant 0 : i32
    return %2, %c0_i32_0, %c0_i32_1 : i32, i32, i32
  }
  func.func @transform_17(%arg0: i32) -> (i32, i32, i32) {
    %c1_i32 = arith.constant 1 : i32
    %0 = arith.subi %arg0, %c1_i32 : i32
    %c0_i32 = arith.constant 0 : i32
    %1 = arith.maxsi %0, %c0_i32 : i32
    %c2_i32 = arith.constant 2 : i32
    %2 = arith.minsi %1, %c2_i32 : i32
    %c0_i32_0 = arith.constant 0 : i32
    %c0_i32_1 = arith.constant 0 : i32
    %c0_i32_2 = arith.constant 0 : i32
    return %2, %c0_i32_0, %c0_i32_1 : i32, i32, i32
  }
  func.func @transform_18(%arg0: i32) -> (i32, i32, i32) {
    %c1_i32 = arith.constant 1 : i32
    %0 = arith.subi %arg0, %c1_i32 : i32
    %c0_i32 = arith.constant 0 : i32
    %1 = arith.maxsi %0, %c0_i32 : i32
    %c2_i32 = arith.constant 2 : i32
    %2 = arith.minsi %1, %c2_i32 : i32
    %c0_i32_0 = arith.constant 0 : i32
    %c0_i32_1 = arith.constant 0 : i32
    %c0_i32_2 = arith.constant 0 : i32
    return %2, %c0_i32_0, %c0_i32_1 : i32, i32, i32
  }
  func.func @transform_19(%arg0: i32) -> (i32, i32, i32) {
    %c1_i32 = arith.constant 1 : i32
    %0 = arith.subi %arg0, %c1_i32 : i32
    %c0_i32 = arith.constant 0 : i32
    %1 = arith.maxsi %0, %c0_i32 : i32
    %c2_i32 = arith.constant 2 : i32
    %2 = arith.minsi %1, %c2_i32 : i32
    %c0_i32_0 = arith.constant 0 : i32
    %c0_i32_1 = arith.constant 0 : i32
    %c0_i32_2 = arith.constant 0 : i32
    return %2, %c0_i32_0, %c0_i32_1 : i32, i32, i32
  }
  func.func @transform_20(%arg0: i32) -> (i32, i32, i32) {
    %c1_i32 = arith.constant 1 : i32
    %0 = arith.subi %arg0, %c1_i32 : i32
    %c0_i32 = arith.constant 0 : i32
    %1 = arith.maxsi %0, %c0_i32 : i32
    %c2_i32 = arith.constant 2 : i32
    %2 = arith.minsi %1, %c2_i32 : i32
    %c0_i32_0 = arith.constant 0 : i32
    %c0_i32_1 = arith.constant 0 : i32
    %c0_i32_2 = arith.constant 0 : i32
    return %2, %c0_i32_0, %c0_i32_1 : i32, i32, i32
  }
  func.func @transform_21(%arg0: i32) -> (i32, i32, i32) {
    %c1_i32 = arith.constant 1 : i32
    %0 = arith.subi %arg0, %c1_i32 : i32
    %c0_i32 = arith.constant 0 : i32
    %1 = arith.maxsi %0, %c0_i32 : i32
    %c2_i32 = arith.constant 2 : i32
    %2 = arith.minsi %1, %c2_i32 : i32
    %c0_i32_0 = arith.constant 0 : i32
    %c0_i32_1 = arith.constant 0 : i32
    %c0_i32_2 = arith.constant 0 : i32
    return %2, %c0_i32_0, %c0_i32_1 : i32, i32, i32
  }
  func.func @transform_22(%arg0: i32) -> (i32, i32, i32) {
    %c1_i32 = arith.constant 1 : i32
    %0 = arith.subi %arg0, %c1_i32 : i32
    %c0_i32 = arith.constant 0 : i32
    %1 = arith.maxsi %0, %c0_i32 : i32
    %c2_i32 = arith.constant 2 : i32
    %2 = arith.minsi %1, %c2_i32 : i32
    %c0_i32_0 = arith.constant 0 : i32
    %c0_i32_1 = arith.constant 0 : i32
    %c0_i32_2 = arith.constant 0 : i32
    return %2, %c0_i32_0, %c0_i32_1 : i32, i32, i32
  }
  func.func @transform_23(%arg0: i32) -> (i32, i32, i32) {
    %c1_i32 = arith.constant 1 : i32
    %0 = arith.subi %arg0, %c1_i32 : i32
    %c0_i32 = arith.constant 0 : i32
    %1 = arith.maxsi %0, %c0_i32 : i32
    %c2_i32 = arith.constant 2 : i32
    %2 = arith.minsi %1, %c2_i32 : i32
    %c0_i32_0 = arith.constant 0 : i32
    %c0_i32_1 = arith.constant 0 : i32
    %c0_i32_2 = arith.constant 0 : i32
    return %2, %c0_i32_0, %c0_i32_1 : i32, i32, i32
  }
  func.func @transform_24(%arg0: i32) -> (i32, i32, i32) {
    %c1_i32 = arith.constant 1 : i32
    %0 = arith.subi %arg0, %c1_i32 : i32
    %c0_i32 = arith.constant 0 : i32
    %1 = arith.maxsi %0, %c0_i32 : i32
    %c2_i32 = arith.constant 2 : i32
    %2 = arith.minsi %1, %c2_i32 : i32
    %c0_i32_0 = arith.constant 0 : i32
    %c0_i32_1 = arith.constant 0 : i32
    %c0_i32_2 = arith.constant 0 : i32
    return %2, %c0_i32_0, %c0_i32_1 : i32, i32, i32
  }
  func.func @transform_25(%arg0: i32) -> (i32, i32, i32) {
    %c1_i32 = arith.constant 1 : i32
    %0 = arith.subi %arg0, %c1_i32 : i32
    %c0_i32 = arith.constant 0 : i32
    %1 = arith.maxsi %0, %c0_i32 : i32
    %c2_i32 = arith.constant 2 : i32
    %2 = arith.minsi %1, %c2_i32 : i32
    %c0_i32_0 = arith.constant 0 : i32
    %c0_i32_1 = arith.constant 0 : i32
    %c0_i32_2 = arith.constant 0 : i32
    return %2, %c0_i32_0, %c0_i32_1 : i32, i32, i32
  }
  func.func @transform_26(%arg0: i32) -> (i32, i32, i32) {
    %c1_i32 = arith.constant 1 : i32
    %0 = arith.subi %arg0, %c1_i32 : i32
    %c0_i32 = arith.constant 0 : i32
    %1 = arith.maxsi %0, %c0_i32 : i32
    %c2_i32 = arith.constant 2 : i32
    %2 = arith.minsi %1, %c2_i32 : i32
    %c0_i32_0 = arith.constant 0 : i32
    %c0_i32_1 = arith.constant 0 : i32
    %c0_i32_2 = arith.constant 0 : i32
    return %2, %c0_i32_0, %c0_i32_1 : i32, i32, i32
  }
  func.func @transform_27(%arg0: i32) -> (i32, i32, i32) {
    %c1_i32 = arith.constant 1 : i32
    %0 = arith.subi %arg0, %c1_i32 : i32
    %c0_i32 = arith.constant 0 : i32
    %1 = arith.maxsi %0, %c0_i32 : i32
    %c2_i32 = arith.constant 2 : i32
    %2 = arith.minsi %1, %c2_i32 : i32
    %c0_i32_0 = arith.constant 0 : i32
    %c0_i32_1 = arith.constant 0 : i32
    %c0_i32_2 = arith.constant 0 : i32
    return %2, %c0_i32_0, %c0_i32_1 : i32, i32, i32
  }
  func.func @transform_29(%arg0: i32) -> (i32, i32) {
    %c0_i32 = arith.constant 0 : i32
    %c0_i32_0 = arith.constant 0 : i32
    %c0_i32_1 = arith.constant 0 : i32
    return %c0_i32, %c0_i32_0 : i32, i32
  }
  func.func @transform_30(%arg0: i32) -> (i32, i32) {
    %c0_i32 = arith.constant 0 : i32
    %c0_i32_0 = arith.constant 0 : i32
    %c0_i32_1 = arith.constant 0 : i32
    return %c0_i32, %c0_i32_0 : i32, i32
  }
  func.func @transform_31(%arg0: i32) -> (i32, i32) {
    %c0_i32 = arith.constant 0 : i32
    %c0_i32_0 = arith.constant 0 : i32
    %c0_i32_1 = arith.constant 0 : i32
    return %c0_i32, %c0_i32_0 : i32, i32
  }
  func.func @transform_32(%arg0: i32) -> (i32, i32) {
    %c0_i32 = arith.constant 0 : i32
    %c0_i32_0 = arith.constant 0 : i32
    %c0_i32_1 = arith.constant 0 : i32
    return %c0_i32, %c0_i32_0 : i32, i32
  }
  func.func @transform_33(%arg0: i32) -> (i32, i32) {
    %c0_i32 = arith.constant 0 : i32
    %c0_i32_0 = arith.constant 0 : i32
    %c0_i32_1 = arith.constant 0 : i32
    return %c0_i32, %c0_i32_0 : i32, i32
  }
  func.func @transform_34(%arg0: i32) -> (i32, i32) {
    %c0_i32 = arith.constant 0 : i32
    %c0_i32_0 = arith.constant 0 : i32
    %c0_i32_1 = arith.constant 0 : i32
    return %c0_i32, %c0_i32_0 : i32, i32
  }
  func.func @transform_35(%arg0: i32) -> (i32, i32) {
    %c0_i32 = arith.constant 0 : i32
    %c0_i32_0 = arith.constant 0 : i32
    %c0_i32_1 = arith.constant 0 : i32
    return %c0_i32, %c0_i32_0 : i32, i32
  }
}

</mosaic_0001>

<bundles_post_ra>
// kernel: _lambda_.1
= control target key start
LH: loop header
LB: loop body
LE: loop exit
PB: predicated region body
PF: predicated region fallthrough
CT: control target
= control target key end

     0   :  { %s15806_s6 = smov 1   ;;  %s15807_s10 = smov 2   ;;  %s17713_s0 = inlined_call_operand.smem [shape: u32[36], index: -1, kind: input, shape index: {}] }
   0x1   :  { %s15901_s5 = sld [smem:[%s17713_s0]]   ;;  %s15808_s14 = smov 3  }
   0x2   :  { %s15906_s9 = sld [smem:[%s17713_s0 + %s15806_s6]]   ;;  %s15809_s18 = smov 4  }
   0x3   :  { %s15911_s13 = sld [smem:[%s17713_s0 + %s15807_s10]]   ;;  %s15810_s22 = smov 5  }
   0x4   :  { %s15916_s17 = sld [smem:[%s17713_s0 + %s15808_s14]]   ;;  %s15811_s26 = smov 6  }
   0x5   :  { %s15921_s21 = sld [smem:[%s17713_s0 + %s15809_s18]]   ;;  %s15812_s30 = smov 7  }
   0x6   :  { %s15926_s25 = sld [smem:[%s17713_s0 + %s15810_s22]]   ;;  %s15813_s4 = smov 8  }
   0x7   :  { %17757 = sst [smem:[#allocation57_spill]] %s15901_s5  ;;  %s15814_s10 = smov 9  }
   0x8   :  { %s15931_s29 = sld [smem:[%s17713_s0 + %s15811_s26]]   ;;  %s15815_s15 = smov 10  }
   0x9   :  { %s15936_s3 = sld [smem:[%s17713_s0 + %s15812_s30]]   ;;  %s15816_s20 = smov 11  }
   0xa   :  { %s15941_s8 = sld [smem:[%s17713_s0 + %s15813_s4]]   ;;  %s15817_s26 = smov 12  }
   0xb   :  { %s15946_s14 = sld [smem:[%s17713_s0 + %s15814_s10]]   ;;  %s15818_s1 = smov 13  }
   0xc   :  { %s15951_s19 = sld [smem:[%s17713_s0 + %s15815_s15]]   ;;  %s15819_s7 = smov 14  }
   0xd   :  { %s15956_s24 = sld [smem:[%s17713_s0 + %s15816_s20]]   ;;  %s15820_s15 = smov 15  }
   0xe   :  { %17758 = sst [smem:[#allocation58_spill]] %s15931_s29  ;;  %s15821_s22 = smov 16  }
   0xf   :  { %17759 = sst [smem:[#allocation59_spill]] %s15936_s3  ;;  %s15822_s28 = smov 17  }
  0x10   :  { %17760 = sst [smem:[#allocation60_spill]] %s15941_s8 }
  0x11   :  { %17761 = sst [smem:[#allocation61_spill]] %s15946_s14 }
  0x12   :  { %17762 = sst [smem:[#allocation62_spill]] %s15951_s19 }
  0x13   :  { %17763 = sst [smem:[#allocation63_spill]] %s15956_s24 }
  0x14   :  { %s15961_s30 = sld [smem:[%s17713_s0 + %s15817_s26]]  }
  0x15   :  { %s15966_s6 = sld [smem:[%s17713_s0 + %s15818_s1]]  }
  0x16   :  { %s15971_s12 = sld [smem:[%s17713_s0 + %s15819_s7]]   ;;  %s15823_s7 = smov 18  }
  0x17   :  { %s15976_s20 = sld [smem:[%s17713_s0 + %s15820_s15]]   ;;  %s15824_s15 = smov 19  }
  0x18   :  { %s15981_s27 = sld [smem:[%s17713_s0 + %s15821_s22]]   ;;  %s15825_s22 = smov 20  }
  0x19   :  { %s15986_s4 = sld [smem:[%s17713_s0 + %s15822_s28]]   ;;  %s15826_s28 = smov 21  }
  0x1a   :  { %17764 = sst [smem:[#allocation64_spill]] %s15961_s30 }
  0x1b   :  { %17765 = sst [smem:[#allocation65_spill]] %s15966_s6 }
  0x1c   :  { %17766 = sst [smem:[#allocation66_spill]] %s15971_s12 }
  0x1d   :  { %s15991_s6 = sld [smem:[%s17713_s0 + %s15823_s7]]   ;;  %s15827_s7 = smov 22  }
  0x1e   :  { %s15996_s30 = sld [smem:[%s17713_s0 + %s15824_s15]]   ;;  %s15828_s15 = smov 23  }
  0x1f   :  { %17767 = sst [smem:[#allocation67_spill]] %s15986_s4 }
  0x20   :  { %s16001_s19 = sld [smem:[%s17713_s0 + %s15825_s22]]   ;;  %s15829_s22 = smov 24  }
  0x21   :  { %s16006_s8 = sld [smem:[%s17713_s0 + %s15826_s28]]   ;;  %s15830_s28 = smov 25  }
  0x22   :  { %s16011_s29 = sld [smem:[%s17713_s0 + %s15827_s7]]   ;;  %s15831_s7 = smov 26  }
  0x23   :  { %17768 = sst [smem:[#allocation68_spill]] %s15991_s6 }
  0x24   :  { %s16016_s24 = sld [smem:[%s17713_s0 + %s15828_s15]]   ;;  %s15832_s15 = smov 27  }
  0x25   :  { %s16026_s14 = sld [smem:[%s17713_s0 + %s15830_s28]]   ;;  %s15834_s28 = smov 29  }
  0x26   :  { %17769 = sst [smem:[#allocation69_spill]] %s16001_s19 }
  0x27   :  { %s16021_s19 = sld [smem:[%s17713_s0 + %s15829_s22]]   ;;  %s15833_s22 = smov 28  }
  0x28   :  { %17770 = sst [smem:[#allocation70_spill]] %s16011_s29 }
  0x29   :  { %s16031_s29 = sld [smem:[%s17713_s0 + %s15831_s7]]   ;;  %s15835_s7 = smov 30  }
  0x2a   :  { %17771 = sst [smem:[#allocation71_spill]] %s16016_s24 }
  0x2b   :  { %17773 = sst [smem:[#allocation73_spill]] %s16026_s14 }
  0x2c   :  { %s16036_s24 = sld [smem:[%s17713_s0 + %s15832_s15]]   ;;  %s15836_s15 = smov 31  }
  0x2d   :  { %17772 = sst [smem:[#allocation72_spill]] %s16021_s19 }
  0x2e   :  { %s16041_s19 = sld [smem:[%s17713_s0 + %s15833_s22]]   ;;  %s15837_s22 = smov 32  }
  0x2f   :  { %17774 = sst [smem:[#allocation74_spill]] %s16031_s29 }
  0x30   :  { %s16046_s14 = sld [smem:[%s17713_s0 + %s15834_s28]]   ;;  %s15838_s28 = smov 33  }
  0x31   :  { %s16051_s29 = sld [smem:[%s17713_s0 + %s15835_s7]]   ;;  %s15839_s7 = smov 34  }
  0x32   :  { %17775 = sst [smem:[#allocation75_spill]] %s16036_s24 }
  0x33   :  { %s16056_s24 = sld [smem:[%s17713_s0 + %s15836_s15]]   ;;  %s15840_s15 = smov 35  }
  0x34   :  { %17776 = sst [smem:[#allocation76_spill]] %s16041_s19 }
  0x35   :  { %s16061_s19 = sld [smem:[%s17713_s0 + %s15837_s22]]  }
  0x36   :  { %17777 = sst [smem:[#allocation77_spill]] %s16046_s14 }
  0x37   :  { %17778 = sst [smem:[#allocation78_spill]] %s16051_s29 }
  0x38   :  { %s16066_s14 = sld [smem:[%s17713_s0 + %s15838_s28]]  }
  0x39   :  { %17779 = sst [smem:[#allocation79_spill]] %s16056_s24 }
  0x3a   :  { %s16071_s29 = sld [smem:[%s17713_s0 + %s15839_s7]]  }
  0x3b   :  { %17780 = sst [smem:[#allocation80_spill]] %s16061_s19 }
  0x3c   :  { %s16076_s24 = sld [smem:[%s17713_s0 + %s15840_s15]]  }
  0x3e   :  { %17781 = sst [smem:[#allocation81_spill]] %s16066_s14 }
  0x40   :  { %17782 = sst [smem:[#allocation82_spill]] %s16071_s29 }
  0x42   :  { %17783 = sst [smem:[#allocation83_spill]] %s16076_s24 }
  0x43   :  { %76 = vsyncpa [#allocation6], 0 }
  0x44   :  { %77 = vsyncpa [#allocation9], 0 }
  0x45   :  { %78 = vsyncpa [#allocation12], 0 }
  0x46   :  { %79 = vsyncpa [#allocation15], 0 }
  0x47   :  { %80 = vsyncpa [#allocation18], 0 }
  0x48   :  { %81 = vsyncpa [#allocation21], 0 }
  0x49   :  { %82 = vsyncpa [#allocation24], 0 }
  0x4a   :  { %83 = vsyncpa [#allocation27], 0 }
  0x4b   :  { %84 = vsyncpa [#allocation7], 0  ;;  %s16078_s22 = smov 0   ;;  %s16080_s23 = smov 0  }
  0x4c   :  { %s16082_s26 = smov 0   ;;  %s16084_s28 = smov 0  }
  0x4d LB: > { %s17784_s6 = sld [smem:[#allocation68_spill]]  ;;  %s15841_s0 = smov [#allocation5]   ;;  %s15800_s26 = sphi %s16082_s26, %s17881_s26   ;;  %s15796_s23 = sphi %s16080_s23, %s17880_s23   ;;  %s15792_s22 = sphi %s16078_s22, %s17879_s22   ;;  %s15804_s28 = sphi %s16084_s28, %s17878_s28  }
  0x4e   : > { %s17785_s4 = sld [smem:[#allocation67_spill]]  ;;  %s1052_s1 = sshll.u32 %s15841_s0, 4  ;;  %s1053_s1 = int_to_ptr.vmem [resolvable:$true] %s1052_s1 }
  0x4f   : > { %s17786_s12 = sld [smem:[#allocation66_spill]]  ;;  %s16099_s2 = sadd.s32 4294967295, %s15804_s28  }
  0x50   : > { %17787 = sst [smem:[#allocation84_spill]] %s15796_s23  ;;  %p12354_p0 = scmp.ge.s32.totalorder %s15804_s28, 1 }
  0x51   : > { %17788 = sst [smem:[#allocation85_spill]] %s15800_s26  ;;  %p17723_p1 = scmp.eq.s32.totalorder %s16099_s2, 0 }
  0x52   : > { %17789 = sst [smem:[#allocation86_spill]] %s16099_s2  ;;  %p1040_p2 = scmp.lt.s32.totalorder %s15804_s28, 6 }
  0x53   : > { %s16118_s11 = sadd.s32 1, %s15804_s28   ;;  %s15023_s16 = scalar_lea.vmem %s1053_s1, 64 }
  0x54   : > { %p16105_p4 = pnand %p12354_p0, %p1040_p2  ;;  %17793 = sst [smem:[#allocation88_spill]] %s16118_s11 }
  0x55   : > { %p15024_p8 = scmp.ne.s32.totalorder %s1053_s1, %s15023_s16  ;;  %p15031_p11 = scmp.lt.s32.totalorder %s1053_s1, %s1053_s1 }
  0x56   : > { %s17790_s7 = scalar_select %p16105_p4, 1, 0 }
  0x57   : > { %p14479_p5 = pneg %p16105_p4  ;;  %p15032_p12 = scmp.lt.s32.totalorder %s15023_s16, %s15023_s16 }
  0x58   : > { %17791 = sst [smem:[#allocation87_spill]] %s17790_s7 }
  0x59   : > { %p16113_p6 = pnand %p14479_p5, %p17723_p1  ;;  %p15033_p13 = por %p15032_p12, %p15031_p11 }
  0x5b   : > { %s17792_s10 = scalar_select %p16113_p6, 1, 0 }
  0x5c   : > { %p16122_p7 = pneg %p16113_p6 }
  0x5e   : > { %s17794_s15 = scalar_select %p16122_p7, 1, 0 }
  0x5f   : > { %p15026_p9 = pnand %p15024_p8, %p16122_p7 }
  0x61   : > { %p15027_p10 = pneg %p15026_p9 }
  0x63   : > { %p15034_p0 = pnand %p15033_p13, %p15027_p10 }
  0x65   : > { %15037 = shalt.err (!%p15034_p0)
}
  0x66   : > { %s15842_s18 = smov 32   ;;  %s17795_s5 = sld [smem:[#allocation57_spill]] }
  0x67   : > { %s15843_s0 = smov 2   ;;  %p389_p2 = scmp.gt.s32.totalorder %s16099_s2, 0 }
  0x68   : > { %p12187_p5 = scmp.lt.s32.totalorder %s16099_s2, 2  ;;  %s12192_s16 = sadd.s32 4294967295, %s16118_s11 }
  0x69   : > { %s401_s24 = sadd.s32 1, %s15800_s26  ;;  %p394_p8 = scmp.gt.s32.totalorder %s12192_s16, 0 }
  0x6a   : > { %s390_s29 = scalar_select %p389_p2, %s16099_s2, 0 }
  0x6b   : > { %p12193_p9 = scmp.lt.s32.totalorder %s12192_s16, 2  ;;  %s17885_s16 = smov (!%p394_p8, %s12192_s16), 0 }
  0x6c   : > { %14482 = dma.hbm_to_vmem [thread:$0]  (!%p16113_p6), %s17795_s5, 64, %s1053_s1, [#allocation6], %s15842_s18, %s15842_s18, %s15843_s0  }
  0x6d   : > { %s17883_s29 = smov (!%p12187_p5, %s390_s29), 2  ;;  %p408_p10 = scmp.ne.s32.totalorder %s15800_s26, %s15796_s23 }
  0x6e   : > { %p409_p11 = scmp.eq.s32.totalorder %s15804_s28, 0  ;;  %s17887_s16 = smov (!%p12193_p9, %s17885_s16), 2 }
  0x6f   : > { %p414_p13 = scmp.ne.s32.totalorder %s15796_s23, %s15792_s22  ;;  %s398_s1 = ssub.s32 %s17883_s29, %s17887_s16 }
  0x70   : > { %p410_p12 = por %p409_p11, %p408_p10  ;;  %p14572_p0 = scmp.lt.s32.totalorder %s15804_s28, 5 }
  0x71   : > { %p399_p3 = scmp.eq.s32.totalorder %s398_s1, 0  ;;  %p16147_p4 = por %p17723_p1, %p414_p13 }
  0x72   : > { %s1265_s0 = sand.u32 1, %s15804_s28   ;;  %s16153_s5 = sand.u32 1, %s15800_s26  }
  0x73   : > { %s17796_s18 = scalar_select %p16147_p4, 1, 0 }
  0x74   : > { %s16156_s11 = scalar_select %p399_p3, %s15800_s26, %s401_s24  }
  0x75   : > { %17797 = sst [smem:[#allocation89_spill]] %s17796_s18  ;;  %s14387_s19 = smul.u32 192, %s16153_s5 }
  0x76   : > { %17798 = sst [smem:[#allocation90_spill]] %s16156_s11  ;;  %s14388_s7 = smul.u32 3072, %s17883_s29 }
  0x77   : > { %p16160_p2 = pnand %p14572_p0, %p410_p12  ;;  %s1269_s28 = scalar_lea.vmem [#allocation28], %s14387_s19 }
  0x78   : > { %s16165_s16 = scalar_lea.hbm %s17786_s12, %s14388_s7  ;;  %s1281_s1 = sshll.u32 %s1269_s28, 4  ;;  %s16167_s1 = int_to_ptr.vmem [resolvable:$true] %s1281_s1 }
  0x79   : > { %s17799_s22 = scalar_select %p16160_p2, 1, 0 }
  0x7a   : > { %s16170_s24 = scalar_lea.sflag [#allocation6], %s1265_s0  ;;  %s15038_s11 = scalar_lea.hbm %s16165_s16, 3072 }
  0x7b   : > { %p15039_p3 = scmp.ne.s32.totalorder %s16165_s16, %s15038_s11  ;;  %p16176_p5 = pneg %p16160_p2 }
  0x7c   : > { %s15043_s7 = scalar_lea.hbm %s17786_s12, 9216  ;;  %p15044_p10 = scmp.lt.s32.totalorder %s16165_s16, %s17786_s12 }
  0x7d   : > { %s17800_s26 = scalar_select %p16176_p5, 1, 0 }
  0x7e   : > { %p15041_p8 = pnand %p16176_p5, %p15039_p3  ;;  %p15045_p11 = scmp.lt.s32.totalorder %s15043_s7, %s15038_s11 }
  0x80   : > { %p15042_p9 = pneg %p15041_p8  ;;  %p15046_p12 = por %p15045_p11, %p15044_p10 }
  0x82   : > { %p15047_p13 = pnand %p15046_p12, %p15042_p9 }
  0x84   : > { %15050 = shalt.err (!%p15047_p13)
}
  0x85   : > { %s15051_s19 = scalar_lea.vmem %s16167_s1, 3072  ;;  %s15844_s0 = smov [#allocation28]  }
  0x86   : > { %p15052_p0 = scmp.ne.s32.totalorder %s16167_s1, %s15051_s19  ;;  %s15056_s28 = sshll.u32 %s15844_s0, 4  ;;  %s15057_s28 = int_to_ptr.vmem [resolvable:$false] %s15056_s28 }
  0x87   : > { %s15058_s18 = scalar_lea.vmem %s15057_s28, 6144  ;;  %p15059_p3 = scmp.lt.s32.totalorder %s16167_s1, %s15057_s28 }
  0x88   : > { %p15054_p1 = pnand %p15052_p0, %p16176_p5  ;;  %p15060_p8 = scmp.lt.s32.totalorder %s15058_s18, %s15051_s19 }
  0x8a   : > { %p15055_p4 = pneg %p15054_p1  ;;  %p15061_p6 = por %p15060_p8, %p15059_p3 }
  0x8c   : > { %p15062_p7 = pnand %p15061_p6, %p15055_p4 }
  0x8e   : > { %15065 = shalt.err (!%p15062_p7)
}
  0x8f   : > { %s15845_s11 = smov 192   ;;  %s15846_s7 = smov 12  }
  0x90   : > { %14531 = dma.hbm_to_vmem [thread:$0]  (!%p16160_p2), %s16165_s16, 3072, %s16167_s1, %s16170_s24, %s15845_s11, %s15845_s11, %s15846_s7  }
  0x91   : > { %s14390_s0 = smul.u32 48, %s17883_s29  ;;  %s15071_s2 = scalar_lea.hbm %s15976_s20, 144 }
  0x92   : > { %s17801_s28 = smul.u32 3, %s16153_s5 }
  0x93   : > { %s1306_s12 = scalar_lea.hbm %s15976_s20, %s14390_s0 }
  0x94   : > { %s1295_s18 = scalar_lea.vmem [#allocation29], %s17801_s28  ;;  %s15066_s23 = scalar_lea.hbm %s1306_s12, 48 }
  0x95   : > { %s1308_s19 = sshll.u32 %s1295_s18, 4  ;;  %p15067_p1 = scmp.ne.s32.totalorder %s1306_s12, %s15066_s23  ;;  %s1309_s19 = int_to_ptr.vmem [resolvable:$true] %s1308_s19 }
  0x96   : > { %p15072_p7 = scmp.lt.s32.totalorder %s1306_s12, %s15976_s20  ;;  %p15073_p9 = scmp.lt.s32.totalorder %s15071_s2, %s15066_s23 }
  0x97   : > { %p15069_p4 = pnand %p15067_p1, %p16176_p5 }
  0x98   : > { %p15074_p10 = por %p15073_p9, %p15072_p7 }
  0x99   : > { %p15070_p6 = pneg %p15069_p4 }
  0x9b   : > { %p15075_p11 = pnand %p15074_p10, %p15070_p6 }
  0x9d   : > { %15078 = shalt.err (!%p15075_p11)
}
  0x9e   : > { %s15079_s14 = scalar_lea.vmem %s1309_s19, 48  ;;  %s15847_s16 = smov [#allocation29]  }
  0x9f   : > { %p15080_p12 = scmp.ne.s32.totalorder %s1309_s19, %s15079_s14  ;;  %s15084_s1 = sshll.u32 %s15847_s16, 4  ;;  %s15085_s1 = int_to_ptr.vmem [resolvable:$false] %s15084_s1 }
  0xa0   : > { %s15086_s11 = scalar_lea.vmem %s15085_s1, 96  ;;  %p15087_p3 = scmp.lt.s32.totalorder %s1309_s19, %s15085_s1 }
  0xa1   : > { %p15082_p13 = pnand %p15080_p12, %p16176_p5  ;;  %p15088_p8 = scmp.lt.s32.totalorder %s15086_s11, %s15079_s14 }
  0xa3   : > { %p15083_p0 = pneg %p15082_p13  ;;  %p15089_p1 = por %p15088_p8, %p15087_p3 }
  0xa5   : > { %p15090_p4 = pnand %p15089_p1, %p15083_p0 }
  0xa7   : > { %15093 = shalt.err (!%p15090_p4)
}
  0xa8   : > { %14534 = dma.hbm_to_vmem [thread:$0]  (!%p16160_p2), %s1306_s12, 48, %s1309_s19, %s16170_s24  }
  0xa9   : > { %s12386_s23 = sshll.u32 %s16153_s5, 6  ;;  %s12915_s2 = sshll.u32 %s17883_s29, 10 }
  0xaa   : > { %s16211_s7 = scalar_lea.hbm %s15981_s27, %s12915_s2  ;;  %s1319_s14 = scalar_lea.vmem [#allocation30], %s12386_s23 }
  0xab   : > { %s1331_s0 = sshll.u32 %s1319_s14, 4  ;;  %s15094_s28 = scalar_lea.hbm %s16211_s7, 1024  ;;  %s16213_s0 = int_to_ptr.vmem [resolvable:$true] %s1331_s0 }
  0xac   : > { %p15095_p6 = scmp.ne.s32.totalorder %s16211_s7, %s15094_s28  ;;  %s15099_s18 = scalar_lea.hbm %s15981_s27, 3072 }
  0xad   : > { %p15100_p10 = scmp.lt.s32.totalorder %s16211_s7, %s15981_s27  ;;  %p15101_p11 = scmp.lt.s32.totalorder %s15099_s18, %s15094_s28 }
  0xae   : > { %p15097_p7 = pnand %p15095_p6, %p16176_p5 }
  0xaf   : > { %p15102_p12 = por %p15101_p11, %p15100_p10 }
  0xb0   : > { %p15098_p9 = pneg %p15097_p7 }
  0xb2   : > { %p15103_p13 = pnand %p15102_p12, %p15098_p9 }
  0xb4   : > { %15106 = shalt.err (!%p15103_p13)
}
  0xb5   : > { %s15107_s12 = scalar_lea.vmem %s16213_s0, 1024  ;;  %s15848_s19 = smov [#allocation30]  }
  0xb6   : > { %p15108_p0 = scmp.ne.s32.totalorder %s16213_s0, %s15107_s12  ;;  %s15112_s16 = sshll.u32 %s15848_s19, 4  ;;  %s15113_s16 = int_to_ptr.vmem [resolvable:$false] %s15112_s16 }
  0xb7   : > { %s15114_s1 = scalar_lea.vmem %s15113_s16, 2048  ;;  %p15115_p1 = scmp.lt.s32.totalorder %s16213_s0, %s15113_s16 }
  0xb8   : > { %p15110_p3 = pnand %p15108_p0, %p16176_p5  ;;  %p15116_p4 = scmp.lt.s32.totalorder %s15114_s1, %s15107_s12 }
  0xba   : > { %p15111_p8 = pneg %p15110_p3  ;;  %p15117_p6 = por %p15116_p4, %p15115_p1 }
  0xbc   : > { %p15118_p7 = pnand %p15117_p6, %p15111_p8 }
  0xbe   : > { %15121 = shalt.err (!%p15118_p7)
}
  0xbf   : > { %s17737_s11 = smov 64   ;;  %s17739_s23 = smov 4  }
  0xc0   : > { %14537 = dma.hbm_to_vmem [thread:$0]  (!%p16160_p2), %s16211_s7, 1024, %s16213_s0, %s16170_s24, %s17737_s11, %s17737_s11, %s17739_s23  }
  0xc1   : > { %s16236_s2 = sshll.u32 %s17883_s29, 4  ;;  %s1344_s14 = scalar_lea.vmem [#allocation31], %s16153_s5 }
  0xc2   : > { %s1356_s28 = sshll.u32 %s1344_s14, 4  ;;  %s1354_s18 = scalar_lea.hbm %s17785_s4, %s16236_s2  ;;  %s1357_s28 = int_to_ptr.vmem [resolvable:$true] %s1356_s28 }
  0xc3   : > { %s15122_s12 = scalar_lea.hbm %s1354_s18, 16  ;;  %s15127_s19 = scalar_lea.hbm %s17785_s4, 48 }
  0xc4   : > { %p15123_p9 = scmp.ne.s32.totalorder %s1354_s18, %s15122_s12  ;;  %p15128_p12 = scmp.lt.s32.totalorder %s1354_s18, %s17785_s4 }
  0xc5   : > { %p15129_p13 = scmp.lt.s32.totalorder %s15127_s19, %s15122_s12 }
  0xc6   : > { %p15125_p10 = pnand %p15123_p9, %p16176_p5 }
  0xc7   : > { %p15130_p0 = por %p15129_p13, %p15128_p12 }
  0xc8   : > { %p15126_p11 = pneg %p15125_p10 }
  0xca   : > { %p15131_p3 = pnand %p15130_p0, %p15126_p11 }
  0xcc   : > { %15134 = shalt.err (!%p15131_p3)
}
  0xcd   : > { %s15135_s16 = scalar_lea.vmem %s1357_s28, 16  ;;  %s15851_s7 = smov [#allocation31]  }
  0xce   : > { %p15136_p8 = scmp.ne.s32.totalorder %s1357_s28, %s15135_s16  ;;  %s15140_s0 = sshll.u32 %s15851_s7, 4  ;;  %s15141_s0 = int_to_ptr.vmem [resolvable:$false] %s15140_s0 }
  0xcf   : > { %s15142_s1 = scalar_lea.vmem %s15141_s0, 32  ;;  %p15143_p6 = scmp.lt.s32.totalorder %s1357_s28, %s15141_s0 }
  0xd0   : > { %p15138_p1 = pnand %p15136_p8, %p16176_p5  ;;  %p15144_p7 = scmp.lt.s32.totalorder %s15142_s1, %s15135_s16 }
  0xd2   : > { %p15139_p4 = pneg %p15138_p1  ;;  %p15145_p9 = por %p15144_p7, %p15143_p6 }
  0xd4   : > { %p15146_p10 = pnand %p15145_p9, %p15139_p4 }
  0xd6   : > { %15149 = shalt.err (!%p15146_p10)
}
  0xd7   : > { %14540 = dma.hbm_to_vmem [thread:$0]  (!%p16160_p2), %s1354_s18, 16, %s1357_s28, %s16170_s24  }
  0xd8   : > { %s17735_s14 = sshll.u32 %s16153_s5, 9  ;;  %s17736_s12 = sshll.u32 %s17883_s29, 13 }
  0xd9   : > { %s16255_s19 = scalar_lea.hbm %s17784_s6, %s17736_s12  ;;  %s1367_s16 = scalar_lea.vmem [#allocation32], %s17735_s14 }
  0xda   : > { %s1379_s7 = sshll.u32 %s1367_s16, 4  ;;  %s15150_s0 = scalar_lea.hbm %s16255_s19, 8192  ;;  %s16259_s7 = int_to_ptr.vmem [resolvable:$true] %s1379_s7 }
  0xdb   : > { %p15151_p11 = scmp.ne.s32.totalorder %s16255_s19, %s15150_s0  ;;  %s15155_s1 = scalar_lea.hbm %s17784_s6, 24576 }
  0xdc   : > { %p15156_p0 = scmp.lt.s32.totalorder %s16255_s19, %s17784_s6  ;;  %p15157_p3 = scmp.lt.s32.totalorder %s15155_s1, %s15150_s0 }
  0xdd   : > { %p15153_p12 = pnand %p15151_p11, %p16176_p5 }
  0xde   : > { %p15158_p8 = por %p15157_p3, %p15156_p0 }
  0xdf   : > { %p15154_p13 = pneg %p15153_p12 }
  0xe1   : > { %p15159_p1 = pnand %p15158_p8, %p15154_p13 }
  0xe3   : > { %15162 = shalt.err (!%p15159_p1)
}
  0xe4   : > { %s15163_s28 = scalar_lea.vmem %s16259_s7, 8192  ;;  %s15852_s18 = smov [#allocation32]  }
  0xe5   : > { %p15164_p4 = scmp.ne.s32.totalorder %s16259_s7, %s15163_s28  ;;  %s15168_s16 = sshll.u32 %s15852_s18, 4  ;;  %s15169_s16 = int_to_ptr.vmem [resolvable:$false] %s15168_s16 }
  0xe6   : > { %s15170_s14 = scalar_lea.vmem %s15169_s16, 16384  ;;  %p15171_p9 = scmp.lt.s32.totalorder %s16259_s7, %s15169_s16 }
  0xe7   : > { %p15166_p6 = pnand %p15164_p4, %p16176_p5  ;;  %p15172_p10 = scmp.lt.s32.totalorder %s15170_s14, %s15163_s28 }
  0xe9   : > { %p15167_p7 = pneg %p15166_p6  ;;  %p15173_p11 = por %p15172_p10, %p15171_p9 }
  0xeb   : > { %p15174_p12 = pnand %p15173_p11, %p15167_p7 }
  0xed   : > { %15177 = shalt.err (!%p15174_p12)
}
  0xee   : > { %s15853_s0 = smov 2048   ;;  %s17750_s1 = smov 128  }
  0xef   : > { %14543 = dma.hbm_to_vmem [thread:$0]  (!%p16160_p2), %s16255_s19, 8192, %s16259_s7, %s16170_s24, %s15853_s0, %s15853_s0, %s17750_s1  }
  0xf0   : > { %s12411_s18 = sshll.u32 %s16153_s5, 4  ;;  %s12923_s14 = sshll.u32 %s17883_s29, 8 }
  0xf1   : > { %s16282_s28 = scalar_lea.hbm %s15996_s30, %s12923_s14  ;;  %s1393_s16 = scalar_lea.vmem [#allocation33], %s12411_s18 }
  0xf2   : > { %s1406_s12 = sshll.u32 %s1393_s16, 4  ;;  %s15855_s11 = smov [#allocation8]   ;;  %s1407_s12 = int_to_ptr.vmem [resolvable:$true] %s1406_s12 }
  0xf3   : > { %s1065_s23 = sshll.u32 %s15855_s11, 4  ;;  %s15178_s4 = scalar_lea.hbm %s16282_s28, 256  ;;  %s1066_s23 = int_to_ptr.vmem [resolvable:$true] %s1065_s23 }
  0xf4   : > { %p15179_p13 = scmp.ne.s32.totalorder %s16282_s28, %s15178_s4  ;;  %s15183_s6 = scalar_lea.hbm %s15996_s30, 768 }
  0xf5   : > { %p15184_p8 = scmp.lt.s32.totalorder %s16282_s28, %s15996_s30  ;;  %p15185_p1 = scmp.lt.s32.totalorder %s15183_s6, %s15178_s4 }
  0xf6   : > { %p15181_p0 = pnand %p15179_p13, %p16176_p5 }
  0xf7   : > { %p15186_p4 = por %p15185_p1, %p15184_p8 }
  0xf8   : > { %p15182_p3 = pneg %p15181_p0 }
  0xfa   : > { %p15187_p6 = pnand %p15186_p4, %p15182_p3 }
  0xfc   : > { %15190 = shalt.err (!%p15187_p6)
}
  0xfd   : > { %s15191_s19 = scalar_lea.vmem %s1407_s12, 256  ;;  %s15856_s7 = smov [#allocation33]  }
  0xfe   : > { %p15192_p7 = scmp.ne.s32.totalorder %s1407_s12, %s15191_s19  ;;  %s15196_s0 = sshll.u32 %s15856_s7, 4  ;;  %s15197_s0 = int_to_ptr.vmem [resolvable:$false] %s15196_s0 }
  0xff   : > { %s15198_s11 = scalar_lea.vmem %s15197_s0, 512  ;;  %p15199_p11 = scmp.lt.s32.totalorder %s1407_s12, %s15197_s0 }
 0x100   : > { %p15194_p9 = pnand %p15192_p7, %p16176_p5  ;;  %p15200_p12 = scmp.lt.s32.totalorder %s15198_s11, %s15191_s19 }
 0x102   : > { %p15195_p10 = pneg %p15194_p9  ;;  %p15201_p13 = por %p15200_p12, %p15199_p11 }
 0x104   : > { %p15202_p0 = pnand %p15201_p13, %p15195_p10 }
 0x106   : > { %15205 = shalt.err (!%p15202_p0)
}
 0x107   : > { %14546 = dma.hbm_to_vmem [thread:$0]  (!%p16160_p2), %s16282_s28, 256, %s1407_s12, %s16170_s24  }
 0x108   : > { %s15217_s6 = scalar_lea.vmem %s1066_s23, 3584  ;;  %p17802_p8 = scmp.ne.s32.totalorder %s17794_s15, 0 }
 0x109   : > { %p15218_p3 = scmp.ne.s32.totalorder %s1066_s23, %s15217_s6  ;;  %p15225_p6 = scmp.lt.s32.totalorder %s1066_s23, %s1066_s23 }
 0x10a   : > { %p15226_p7 = scmp.lt.s32.totalorder %s15217_s6, %s15217_s6 }
 0x10b   : > { %p15220_p1 = pnand %p15218_p3, %p17802_p8 }
 0x10c   : > { %p15227_p9 = por %p15226_p7, %p15225_p6 }
 0x10d   : > { %p15221_p4 = pneg %p15220_p1 }
 0x10f   : > { %p15228_p5 = pnand %p15227_p9, %p15221_p4 }
 0x111   : > { %15231 = shalt.err (!%p15228_p5)
}
 0x112   : > { %p17803_p10 = scmp.ne.s32.totalorder %s17792_s10, 0  ;;  %s17804_s4 = smov 4  }
 0x113   : > { %s17805_s18 = smov 64   ;;  %s15857_s12 = smov [#allocation11]  }
 0x114   : > { %14485 = dma.hbm_to_vmem [thread:$0]  (!%p17803_p10), %s15906_s9, 3584, %s1066_s23, [#allocation9], %s17805_s18, %s17805_s18, %s17804_s4  }
 0x115   : > { %s1092_s14 = sshll.u32 %s15857_s12, 4  ;;  %s1093_s14 = int_to_ptr.vmem [resolvable:$true] %s1092_s14 }
 0x116   : > { %s15243_s28 = scalar_lea.vmem %s1093_s14, 16  ;;  %s15250_s16 = scalar_lea.vmem %s1093_s14, 32 }
 0x117   : > { %p15244_p11 = scmp.ne.s32.totalorder %s1093_s14, %s15243_s28  ;;  %p15251_p0 = scmp.lt.s32.totalorder %s1093_s14, %s1093_s14 }
 0x118   : > { %p15252_p3 = scmp.lt.s32.totalorder %s15250_s16, %s15243_s28 }
 0x119   : > { %p15246_p12 = pnand %p15244_p11, %p17802_p8 }
 0x11a   : > { %p15253_p5 = por %p15252_p3, %p15251_p0 }
 0x11b   : > { %p15247_p13 = pneg %p15246_p12 }
 0x11d   : > { %p15254_p1 = pnand %p15253_p5, %p15247_p13 }
 0x11f   : > { %15257 = shalt.err (!%p15254_p1)
}
 0x120   : > { %14491 = dma.hbm_to_vmem [thread:$0]  (!%p17803_p10), %s15916_s17, 16, %s1093_s14, [#allocation12]  }
 0x121   : > { %s17806_s23 = sshll.u32 %s17883_s29, 13  ;;  %s17807_s7 = sshll.u32 %s16153_s5, 9 }
 0x122   : > { %s16313_s19 = scalar_lea.hbm %s16006_s8, %s17806_s23  ;;  %s1434_s0 = scalar_lea.vmem [#allocation34], %s17807_s7 }
 0x123   : > { %s1446_s11 = sshll.u32 %s1434_s0, 4  ;;  %s15258_s6 = scalar_lea.hbm %s16313_s19, 8192  ;;  %s16317_s11 = int_to_ptr.vmem [resolvable:$true] %s1446_s11 }
 0x124   : > { %p15259_p4 = scmp.ne.s32.totalorder %s16313_s19, %s15258_s6  ;;  %p17808_p6 = scmp.ne.s32.totalorder %s17800_s26, 0 }
 0x125   : > { %s15263_s12 = scalar_lea.hbm %s16006_s8, 24576  ;;  %p15264_p11 = scmp.lt.s32.totalorder %s16313_s19, %s16006_s8 }
 0x126   : > { %p15261_p7 = pnand %p15259_p4, %p17808_p6  ;;  %p15265_p12 = scmp.lt.s32.totalorder %s15263_s12, %s15258_s6 }
 0x128   : > { %p15262_p9 = pneg %p15261_p7  ;;  %p15266_p13 = por %p15265_p12, %p15264_p11 }
 0x12a   : > { %p15267_p0 = pnand %p15266_p13, %p15262_p9 }
 0x12c   : > { %15270 = shalt.err (!%p15267_p0)
}
 0x12d   : > { %s15271_s29 = scalar_lea.vmem %s16317_s11, 8192  ;;  %s15858_s14 = smov [#allocation34]  }
 0x12e   : > { %p15272_p3 = scmp.ne.s32.totalorder %s16317_s11, %s15271_s29  ;;  %s15276_s28 = sshll.u32 %s15858_s14, 4  ;;  %s15277_s28 = int_to_ptr.vmem [resolvable:$false] %s15276_s28 }
 0x12f   : > { %s15278_s16 = scalar_lea.vmem %s15277_s28, 16384  ;;  %p15279_p4 = scmp.lt.s32.totalorder %s16317_s11, %s15277_s28 }
 0x130   : > { %p15274_p5 = pnand %p15272_p3, %p17808_p6  ;;  %p15280_p7 = scmp.lt.s32.totalorder %s15278_s16, %s15271_s29 }
 0x132   : > { %p15275_p1 = pneg %p15274_p5  ;;  %p15281_p10 = por %p15280_p7, %p15279_p4 }
 0x134   : > { %p15282_p8 = pnand %p15281_p10, %p15275_p1 }
 0x136   : > { %15285 = shalt.err (!%p15282_p8)
}
 0x137   : > { %s17754_s23 = smov 8   ;;  %s15860_s7 = smov [#allocation10]  }
 0x138   : > { %14549 = dma.hbm_to_vmem [thread:$0]  (!%p16160_p2), %s16313_s19, 8192, %s16317_s11, %s16170_s24, %s17750_s1, %s17750_s1, %s17754_s23  }
 0x139   : > { %s1078_s0 = sshll.u32 %s15860_s7, 4  ;;  %p17809_p11 = scmp.ne.s32.totalorder %s17794_s15, 0  ;;  %s1079_s0 = int_to_ptr.vmem [resolvable:$true] %s1078_s0 }
 0x13a   : > { %s15297_s6 = scalar_lea.vmem %s1079_s0, 112  ;;  %s15304_s12 = scalar_lea.vmem %s1079_s0, 128 }
 0x13b   : > { %p15298_p9 = scmp.ne.s32.totalorder %s1079_s0, %s15297_s6  ;;  %p15305_p8 = scmp.lt.s32.totalorder %s1079_s0, %s1079_s0 }
 0x13c   : > { %p15306_p13 = scmp.lt.s32.totalorder %s15304_s12, %s15297_s6 }
 0x13d   : > { %p15300_p12 = pnand %p15298_p9, %p17809_p11 }
 0x13e   : > { %p15307_p0 = por %p15306_p13, %p15305_p8 }
 0x13f   : > { %p15301_p10 = pneg %p15300_p12 }
 0x141   : > { %p15308_p3 = pnand %p15307_p0, %p15301_p10 }
 0x143   : > { %15311 = shalt.err (!%p15308_p3)
}
 0x144   : > { %s15861_s29 = smov 16   ;;  %s15862_s14 = smov 1  }
 0x145   : > { %p17810_p5 = scmp.ne.s32.totalorder %s17792_s10, 0  ;;  %s15863_s19 = smov [#allocation13]  }
 0x146   : > { %s1102_s11 = sshll.u32 %s15863_s19, 4  ;;  %s15864_s28 = smov [#allocation14]   ;;  %s1103_s11 = int_to_ptr.vmem [resolvable:$true] %s1102_s11 }
 0x147   : > { %14488 = dma.hbm_to_vmem [thread:$0]  (!%p17810_p5), %s15911_s13, 112, %s1079_s0, [#allocation9], %s15861_s29, %s15861_s29, %s15862_s14  }
 0x148   : > { %s1115_s16 = sshll.u32 %s15864_s28, 4  ;;  %s15323_s7 = scalar_lea.vmem %s1103_s11, 1280  ;;  %s1116_s16 = int_to_ptr.vmem [resolvable:$true] %s1115_s16 }
 0x149   : > { %p15324_p1 = scmp.ne.s32.totalorder %s1103_s11, %s15323_s7  ;;  %p15331_p9 = scmp.lt.s32.totalorder %s1103_s11, %s1103_s11 }
 0x14a   : > { %p15332_p12 = scmp.lt.s32.totalorder %s15323_s7, %s15323_s7 }
 0x14b   : > { %p15326_p4 = pnand %p15324_p1, %p17809_p11 }
 0x14c   : > { %p15333_p10 = por %p15332_p12, %p15331_p9 }
 0x14d   : > { %p15327_p7 = pneg %p15326_p4 }
 0x14f   : > { %p15334_p8 = pnand %p15333_p10, %p15327_p7 }
 0x151   : > { %15337 = shalt.err (!%p15334_p8)
}
 0x152   : > { %14494 = dma.hbm_to_vmem [thread:$0]  (!%p17810_p5), %s15921_s21, 1280, %s1103_s11, [#allocation12], %s17805_s18, %s17805_s18, %s17804_s4  }
 0x153   : > { %s15349_s0 = scalar_lea.vmem %s1116_s16, 640  ;;  %p15357_p1 = scmp.lt.s32.totalorder %s1116_s16, %s1116_s16 }
 0x154   : > { %p15350_p13 = scmp.ne.s32.totalorder %s1116_s16, %s15349_s0  ;;  %p15358_p4 = scmp.lt.s32.totalorder %s15349_s0, %s15349_s0 }
 0x156   : > { %p15352_p0 = pnand %p15350_p13, %p17809_p11  ;;  %p15359_p2 = por %p15358_p4, %p15357_p1 }
 0x158   : > { %p15353_p3 = pneg %p15352_p0 }
 0x15a   : > { %p15360_p6 = pnand %p15359_p2, %p15353_p3 }
 0x15c   : > { %15363 = shalt.err (!%p15360_p6)
}
 0x15d   : > { %14497 = dma.hbm_to_vmem [thread:$0]  (!%p17810_p5), %s15926_s25, 640, %s1116_s16, [#allocation15], %s17805_s18, %s17805_s18, %s17804_s4  }
 0x15e   : > { %s15865_s6 = smov [#allocation17]   ;;  %s15866_s29 = smov [#allocation20]  }
 0x15f   : > { %s1139_s12 = sshll.u32 %s15865_s6, 4  ;;  %s1166_s14 = sshll.u32 %s15866_s29, 4  ;;  %s1140_s12 = int_to_ptr.vmem [resolvable:$true] %s1139_s12  ;;  %s1167_s14 = int_to_ptr.vmem [resolvable:$true] %s1166_s14 }
 0x160   : > { %s15375_s19 = scalar_lea.vmem %s1140_s12, 384  ;;  %p15383_p6 = scmp.lt.s32.totalorder %s1140_s12, %s1140_s12 }
 0x161   : > { %p15376_p7 = scmp.ne.s32.totalorder %s1140_s12, %s15375_s19  ;;  %p15384_p12 = scmp.lt.s32.totalorder %s15375_s19, %s15375_s19 }
 0x163   : > { %p15378_p9 = pnand %p15376_p7, %p17809_p11  ;;  %p15385_p10 = por %p15384_p12, %p15383_p6 }
 0x165   : > { %p15379_p2 = pneg %p15378_p9 }
 0x167   : > { %p15386_p8 = pnand %p15385_p10, %p15379_p2 }
 0x169   : > { %15389 = shalt.err (!%p15386_p8)
}
 0x16a   : > { %s17811_s3 = sld [smem:[#allocation59_spill]]  ;;  %s15401_s11 = scalar_lea.vmem %s1167_s14, 16 }
 0x16b   : > { %p15402_p13 = scmp.ne.s32.totalorder %s1167_s14, %s15401_s11  ;;  %s15408_s28 = scalar_lea.vmem %s1167_s14, 32 }
 0x16c   : > { %p15409_p1 = scmp.lt.s32.totalorder %s1167_s14, %s1167_s14  ;;  %p15410_p4 = scmp.lt.s32.totalorder %s15408_s28, %s15401_s11 }
 0x16d   : > { %p15404_p0 = pnand %p15402_p13, %p17809_p11 }
 0x16e   : > { %p15411_p7 = por %p15410_p4, %p15409_p1 }
 0x16f   : > { %p15405_p3 = pneg %p15404_p0 }
 0x170   : > { %14503 = dma.hbm_to_vmem [thread:$0]  (!%p17810_p5), %s17811_s3, 384, %s1140_s12, [#allocation18], %s17805_s18, %s17805_s18, %s17804_s4  }
 0x171   : > { %p15412_p9 = pnand %p15411_p7, %p15405_p3 }
 0x173   : > { %15415 = shalt.err (!%p15412_p9)
}
 0x174   : > { %s17812_s16 = sld [smem:[#allocation61_spill]]  ;;  %s15867_s0 = smov [#allocation23]  }
 0x175   : > { %s17813_s7 = sld [smem:[#allocation70_spill]]  ;;  %s1189_s6 = sshll.u32 %s15867_s0, 4  ;;  %s1190_s6 = int_to_ptr.vmem [resolvable:$true] %s1189_s6 }
 0x176   : > { %s1459_s29 = scalar_lea.vmem [#allocation35], %s16153_s5  ;;  %s15427_s1 = scalar_lea.vmem %s1190_s6, 1536 }
 0x177   : > { %s1471_s19 = sshll.u32 %s1459_s29, 4  ;;  %p15428_p2 = scmp.ne.s32.totalorder %s1190_s6, %s15427_s1  ;;  %s1472_s19 = int_to_ptr.vmem [resolvable:$true] %s1471_s19 }
 0x178   : > { %p15435_p10 = scmp.lt.s32.totalorder %s1190_s6, %s1190_s6  ;;  %p15436_p8 = scmp.lt.s32.totalorder %s15427_s1, %s15427_s1 }
 0x179   : > { %p15430_p6 = pnand %p15428_p2, %p17809_p11 }
 0x17a   : > { %14509 = dma.hbm_to_vmem [thread:$0]  (!%p17810_p5), %s17812_s16, 16, %s1167_s14, [#allocation21]  }
 0x17b   : > { %s16375_s12 = scalar_lea.hbm %s17813_s7, %s16236_s2  ;;  %p15431_p12 = pneg %p15430_p6 }
 0x17c   : > { %p15437_p13 = por %p15436_p8, %p15435_p10 }
 0x17e   : > { %p15438_p0 = pnand %p15437_p13, %p15431_p12 }
 0x180   : > { %15441 = shalt.err (!%p15438_p0)
}
 0x181   : > { %s17814_s14 = sld [smem:[#allocation63_spill]]  ;;  %s15442_s11 = scalar_lea.hbm %s16375_s12, 16 }
 0x182   : > { %p15443_p3 = scmp.ne.s32.totalorder %s16375_s12, %s15442_s11  ;;  %p17815_p1 = scmp.ne.s32.totalorder %s17800_s26, 0 }
 0x183   : > { %s15447_s1 = scalar_lea.hbm %s17813_s7, 48  ;;  %p15448_p9 = scmp.lt.s32.totalorder %s16375_s12, %s17813_s7 }
 0x184   : > { %p15445_p4 = pnand %p15443_p3, %p17815_p1  ;;  %p15449_p2 = scmp.lt.s32.totalorder %s15447_s1, %s15442_s11 }
 0x186   : > { %p15446_p7 = pneg %p15445_p4  ;;  %p15450_p6 = por %p15449_p2, %p15448_p9 }
 0x187   : > { %14515 = dma.hbm_to_vmem [thread:$0]  (!%p17810_p5), %s17814_s14, 1536, %s1190_s6, [#allocation24], %s17805_s18, %s17805_s18, %s17804_s4  }
 0x188   : > { %p15451_p12 = pnand %p15450_p6, %p15446_p7 }
 0x18a   : > { %15454 = shalt.err (!%p15451_p12)
}
 0x18b   : > { %s15455_s28 = scalar_lea.vmem %s1472_s19, 16  ;;  %s15868_s16 = smov [#allocation35]  }
 0x18c   : > { %p15456_p10 = scmp.ne.s32.totalorder %s1472_s19, %s15455_s28  ;;  %s15460_s0 = sshll.u32 %s15868_s16, 4  ;;  %s15461_s0 = int_to_ptr.vmem [resolvable:$false] %s15460_s0 }
 0x18d   : > { %s15462_s6 = scalar_lea.vmem %s15461_s0, 32  ;;  %p15463_p0 = scmp.lt.s32.totalorder %s1472_s19, %s15461_s0 }
 0x18e   : > { %p15458_p8 = pnand %p15456_p10, %p17815_p1  ;;  %p15464_p5 = scmp.lt.s32.totalorder %s15462_s6, %s15455_s28 }
 0x190   : > { %p15459_p13 = pneg %p15458_p8  ;;  %p15465_p3 = por %p15464_p5, %p15463_p0 }
 0x192   : > { %p15466_p4 = pnand %p15465_p3, %p15459_p13 }
 0x194   : > { %15469 = shalt.err (!%p15466_p4)
}
 0x195   : > { %p17816_p11 = scmp.ne.s32.totalorder %s17799_s22, 0  ;;  %s15869_s29 = smov [#allocation16]  }
 0x196   : > { %s1129_s14 = sshll.u32 %s15869_s29, 4  ;;  %s15870_s11 = smov [#allocation19]   ;;  %s1130_s14 = int_to_ptr.vmem [resolvable:$true] %s1129_s14 }
 0x197   : > { %14552 = dma.hbm_to_vmem [thread:$0]  (!%p17816_p11), %s16375_s12, 16, %s1472_s19, %s16170_s24  }
 0x198   : > { %s1152_s1 = sshll.u32 %s15870_s11, 4  ;;  %s15481_s23 = scalar_lea.vmem %s1130_s14, 16  ;;  %s1153_s1 = int_to_ptr.vmem [resolvable:$true] %s1152_s1 }
 0x199   : > { %p15482_p7 = scmp.ne.s32.totalorder %s1130_s14, %s15481_s23  ;;  %p17817_p9 = scmp.ne.s32.totalorder %s17794_s15, 0 }
 0x19a   : > { %s15488_s28 = scalar_lea.vmem %s1130_s14, 32  ;;  %p15489_p5 = scmp.lt.s32.totalorder %s1130_s14, %s1130_s14 }
 0x19b   : > { %p15484_p2 = pnand %p15482_p7, %p17817_p9  ;;  %p15490_p12 = scmp.lt.s32.totalorder %s15488_s28, %s15481_s23 }
 0x19d   : > { %p15485_p6 = pneg %p15484_p2  ;;  %p15491_p10 = por %p15490_p12, %p15489_p5 }
 0x19f   : > { %p15492_p8 = pnand %p15491_p10, %p15485_p6 }
 0x1a1   : > { %15495 = shalt.err (!%p15492_p8)
}
 0x1a2   : > { %p17818_p13 = scmp.ne.s32.totalorder %s17792_s10, 0  ;;  %s17819_s16 = sld [smem:[#allocation58_spill]] }
 0x1a3   : > { %s15507_s12 = scalar_lea.vmem %s1153_s1, 768  ;;  %p15515_p11 = scmp.lt.s32.totalorder %s1153_s1, %s1153_s1 }
 0x1a4   : > { %p15508_p0 = scmp.ne.s32.totalorder %s1153_s1, %s15507_s12  ;;  %p15516_p7 = scmp.lt.s32.totalorder %s15507_s12, %s15507_s12 }
 0x1a6   : > { %p15510_p3 = pnand %p15508_p0, %p17817_p9  ;;  %p15517_p2 = por %p15516_p7, %p15515_p11 }
 0x1a8   : > { %14500 = dma.hbm_to_vmem [thread:$0]  (!%p17818_p13), %s17819_s16, 16, %s1130_s14, [#allocation15]  }
 0x1a9   : > { %p15511_p4 = pneg %p15510_p3 }
 0x1ab   : > { %p15518_p1 = pnand %p15517_p2, %p15511_p4 }
 0x1ad   : > { %15521 = shalt.err (!%p15518_p1)
}
 0x1ae   : > { %s17820_s23 = sld [smem:[#allocation60_spill]]  ;;  %s15871_s19 = smov [#allocation22]  }
 0x1af   : > { %s1176_s0 = sshll.u32 %s15871_s19, 4  ;;  %s15872_s6 = smov [#allocation25]   ;;  %s1177_s0 = int_to_ptr.vmem [resolvable:$true] %s1176_s0 }
 0x1b0   : > { %s1203_s29 = sshll.u32 %s15872_s6, 4  ;;  %s15533_s14 = scalar_lea.vmem %s1177_s0, 192  ;;  %s1204_s29 = int_to_ptr.vmem [resolvable:$true] %s1203_s29 }
 0x1b1   : > { %p15534_p6 = scmp.ne.s32.totalorder %s1177_s0, %s15533_s14  ;;  %p15541_p12 = scmp.lt.s32.totalorder %s1177_s0, %s1177_s0 }
 0x1b2   : > { %p15542_p1 = scmp.lt.s32.totalorder %s15533_s14, %s15533_s14 }
 0x1b3   : > { %p15536_p5 = pnand %p15534_p6, %p17817_p9 }
 0x1b4   : > { %14506 = dma.hbm_to_vmem [thread:$0]  (!%p17818_p13), %s17820_s23, 768, %s1153_s1, [#allocation18], %s17805_s18, %s17805_s18, %s17804_s4  }
 0x1b5   : > { %p15537_p11 = pneg %p15536_p5  ;;  %p15543_p10 = por %p15542_p1, %p15541_p12 }
 0x1b7   : > { %p15544_p8 = pnand %p15543_p10, %p15537_p11 }
 0x1b9   : > { %15547 = shalt.err (!%p15544_p8)
}
 0x1ba   : > { %s17821_s11 = sld [smem:[#allocation62_spill]]  ;;  %s15559_s1 = scalar_lea.vmem %s1204_s29, 16 }
 0x1bb   : > { %p15560_p0 = scmp.ne.s32.totalorder %s1204_s29, %s15559_s1  ;;  %s15566_s28 = scalar_lea.vmem %s1204_s29, 32 }
 0x1bc   : > { %p15567_p7 = scmp.lt.s32.totalorder %s1204_s29, %s1204_s29  ;;  %p15568_p2 = scmp.lt.s32.totalorder %s15566_s28, %s15559_s1 }
 0x1bd   : > { %p15562_p3 = pnand %p15560_p0, %p17817_p9 }
 0x1be   : > { %p15569_p6 = por %p15568_p2, %p15567_p7 }
 0x1bf   : > { %p15563_p4 = pneg %p15562_p3 }
 0x1c0   : > { %14512 = dma.hbm_to_vmem [thread:$0]  (!%p17818_p13), %s17821_s11, 192, %s1177_s0, [#allocation21], %s17805_s18, %s17805_s18, %s17804_s4  }
 0x1c1   : > { %p15570_p5 = pnand %p15569_p6, %p15563_p4 }
 0x1c3   : > { %15573 = shalt.err (!%p15570_p5)
}
 0x1c4   : > { %s17822_s16 = sld [smem:[#allocation64_spill]]  ;;  %s15873_s12 = smov [#allocation26]  }
 0x1c5   : > { %s1213_s23 = sshll.u32 %s15873_s12, 4  ;;  %s15874_s19 = smov [#allocation37]   ;;  %s1214_s23 = int_to_ptr.vmem [resolvable:$true] %s1213_s23 }
 0x1c6   : > { %s1232_s0 = sshll.u32 %s15874_s19, 4  ;;  %s15585_s6 = scalar_lea.vmem %s1214_s23, 256  ;;  %s1233_s0 = int_to_ptr.vmem [resolvable:$true] %s1232_s0 }
 0x1c7   : > { %p15586_p11 = scmp.ne.s32.totalorder %s1214_s23, %s15585_s6  ;;  %p15593_p10 = scmp.lt.s32.totalorder %s1214_s23, %s1214_s23 }
 0x1c8   : > { %p15594_p8 = scmp.lt.s32.totalorder %s15585_s6, %s15585_s6 }
 0x1c9   : > { %p15588_p12 = pnand %p15586_p11, %p17817_p9 }
 0x1ca   : > { %14518 = dma.hbm_to_vmem [thread:$0]  (!%p17818_p13), %s17822_s16, 16, %s1204_s29, [#allocation24]  }
 0x1cb   : > { %p15589_p1 = pneg %p15588_p12  ;;  %p15595_p0 = por %p15594_p8, %p15593_p10 }
 0x1cd   : > { %p15596_p3 = pnand %p15595_p0, %p15589_p1 }
 0x1cf   : > { %15599 = shalt.err (!%p15596_p3)
}
 0x1d0   : > { %s17823_s14 = smov 8   ;;  %s17824_s11 = smov 128  }
 0x1d1   : > { %s17825_s29 = sld [smem:[#allocation65_spill]]  ;;  %s15611_s1 = scalar_lea.vmem %s1233_s0, 4096 }
 0x1d2   : > { %p15612_p4 = scmp.ne.s32.totalorder %s1233_s0, %s15611_s1  ;;  %p15619_p6 = scmp.lt.s32.totalorder %s1233_s0, %s1233_s0 }
 0x1d3   : > { %p15620_p5 = scmp.lt.s32.totalorder %s15611_s1, %s15611_s1 }
 0x1d4   : > { %p15614_p7 = pnand %p15612_p4, %p17817_p9 }
 0x1d5   : > { %p15621_p11 = por %p15620_p5, %p15619_p6 }
 0x1d6   : > { %p15615_p2 = pneg %p15614_p7 }
 0x1d7   : > { %14521 = dma.hbm_to_vmem [thread:$0]  (!%p17818_p13), %s17825_s29, 256, %s1214_s23, [#allocation27], %s17824_s11, %s17824_s11, %s17823_s14  }
 0x1d8   : > { %p15622_p12 = pnand %p15621_p11, %p15615_p2 }
 0x1da   : > { %15625 = shalt.err (!%p15622_p12)
}
 0x1db   : > { %s17826_s28 = sld [smem:[#allocation79_spill]]  ;;  %s15875_s12 = smov [#allocation38]  }
 0x1dc   : > { %s17827_s16 = sld [smem:[#allocation71_spill]]  ;;  %s1248_s23 = sshll.u32 %s15875_s12, 4  ;;  %s1249_s23 = int_to_ptr.vmem [resolvable:$true] %s1248_s23 }
 0x1dd   : > { %s15637_s6 = scalar_lea.vmem %s1249_s23, 2048  ;;  %p15645_p0 = scmp.lt.s32.totalorder %s1249_s23, %s1249_s23 }
 0x1de   : > { %p15638_p1 = scmp.ne.s32.totalorder %s1249_s23, %s15637_s6  ;;  %p15646_p3 = scmp.lt.s32.totalorder %s15637_s6, %s15637_s6 }
 0x1e0   : > { %p15640_p10 = pnand %p15638_p1, %p17817_p9  ;;  %p15647_p4 = por %p15646_p3, %p15645_p0 }
 0x1e1   : > { %14524 = dma.hbm_to_vmem [thread:$0]  (!%p17818_p13), %s17826_s28, 4096, %s1233_s0, [#allocation9], %s17805_s18, %s17805_s18, %s17804_s4  }
 0x1e2   : > { %s16443_s19 = scalar_lea.hbm %s17827_s16, %s16236_s2  ;;  %p15641_p8 = pneg %p15640_p10 }
 0x1e4   : > { %p15648_p7 = pnand %p15647_p4, %p15641_p8 }
 0x1e6   : > { %15651 = shalt.err (!%p15648_p7)
}
 0x1e7   : > { %s17828_s4 = sld [smem:[#allocation81_spill]]  ;;  %s1481_s15 = scalar_lea.vmem [#allocation36], %s16153_s5 }
 0x1e8   : > { %s1493_s2 = sshll.u32 %s1481_s15, 4  ;;  %s15652_s18 = scalar_lea.hbm %s16443_s19, 16  ;;  %s1494_s2 = int_to_ptr.vmem [resolvable:$true] %s1493_s2 }
 0x1e9   : > { %p15653_p9 = scmp.ne.s32.totalorder %s16443_s19, %s15652_s18  ;;  %p17829_p2 = scmp.ne.s32.totalorder %s17800_s26, 0 }
 0x1ea   : > { %s15657_s10 = scalar_lea.hbm %s17827_s16, 48  ;;  %p15658_p11 = scmp.lt.s32.totalorder %s16443_s19, %s17827_s16 }
 0x1eb   : > { %p15655_p6 = pnand %p15653_p9, %p17829_p2  ;;  %p15659_p12 = scmp.lt.s32.totalorder %s15657_s10, %s15652_s18 }
 0x1ed   : > { %14527 = dma.hbm_to_vmem [thread:$0]  (!%p17818_p13), %s17828_s4, 2048, %s1249_s23, [#allocation12], %s17824_s11, %s17824_s11, %s17823_s14  }
 0x1ee   : > { %p15656_p5 = pneg %p15655_p6  ;;  %p15660_p1 = por %p15659_p12, %p15658_p11 }
 0x1f0   : > { %p15661_p10 = pnand %p15660_p1, %p15656_p5 }
 0x1f2   : > { %15664 = shalt.err (!%p15661_p10)
}
 0x1f3   : > { %s15665_s0 = scalar_lea.vmem %s1494_s2, 16  ;;  %s15876_s5 = smov [#allocation36]  }
 0x1f4   : > { %p15666_p8 = scmp.ne.s32.totalorder %s1494_s2, %s15665_s0  ;;  %s15670_s14 = sshll.u32 %s15876_s5, 4  ;;  %s15671_s14 = int_to_ptr.vmem [resolvable:$false] %s15670_s14 }
 0x1f5   : > { %s15672_s11 = scalar_lea.vmem %s15671_s14, 32  ;;  %p15673_p3 = scmp.lt.s32.totalorder %s1494_s2, %s15671_s14 }
 0x1f6   : > { %p15668_p0 = pnand %p15666_p8, %p17829_p2  ;;  %p15674_p4 = scmp.lt.s32.totalorder %s15672_s11, %s15665_s0 }
 0x1f8   : > { %p15669_p13 = pneg %p15668_p0  ;;  %p15675_p7 = por %p15674_p4, %p15673_p3 }
 0x1fa   : > { %p15676_p9 = pnand %p15675_p7, %p15669_p13 }
 0x1fc   : > { %15679 = shalt.err (!%p15676_p9)
}
 0x1fd   : > { %p17830_p6 = scmp.ne.s32.totalorder %s17799_s22, 0  ;;  %s17831_s29 = sld [smem:[#allocation87_spill]] }
 0x1ff   : > { %14555 = dma.hbm_to_vmem [thread:$0]  (!%p17830_p6), %s16443_s19, 16, %s1494_s2, %s16170_s24  }
 0x203   : > { %p17832_p5 = scmp.ne.s32.totalorder %s17831_s29, 0 }
 0x204   : > { %s17833_s26 = sld [smem:[#allocation86_spill]] (!%p17832_p5) }
 0x205   : > { %1566 = sbr.rel (%p17832_p5) target bundleno = 10139 (0x279b), region = 156 }
 0x20a   : > { %p17834_p2 = scmp.eq.s32.totalorder %s17833_s26, 0 }
 0x20c   : > { %15741 = dma.done.wait (%p17834_p2), [#allocation6], 64   ;;  %p17835_p11 = pmov %p17834_p2 }
 0x20d   : > { %p17836_p12 = pmov %p17834_p2 }
 0x20e   : > { %15743 = vsyncadd (%p17835_p11), [#allocation6], 4294967232 }
 0x20f   : > { %15745 = dma.done.wait (%p17836_p12), [#allocation9], 3696   ;;  %p17837_p1 = pmov %p17834_p2 }
 0x211   : > { %15747 = vsyncadd (%p17837_p1), [#allocation9], 4294963600  ;;  %p17838_p10 = pmov %p17837_p1 }
 0x212   : > { %p17839_p8 = pmov %p17837_p1 }
 0x213   : > { %15749 = dma.done.wait (%p17838_p10), [#allocation12], 1296  }
 0x214   : > { %15751 = vsyncadd (%p17839_p8), [#allocation12], 4294966000  ;;  %p17840_p0 = pmov %p17837_p1 }
 0x216   : > { %15753 = dma.done.wait (%p17840_p0), [#allocation15], 656   ;;  %p17841_p13 = pmov %p17840_p0 }
 0x217   : > { %p17842_p3 = pmov %p17840_p0 }
 0x218   : > { %15755 = vsyncadd (%p17841_p13), [#allocation15], 4294966640 }
 0x219   : > { %15757 = dma.done.wait (%p17842_p3), [#allocation18], 1152   ;;  %p17843_p4 = pmov %p17840_p0 }
 0x21a   : > { %p17844_p7 = pmov %p17840_p0 }
 0x21b   : > { %15759 = vsyncadd (%p17843_p4), [#allocation18], 4294966144 }
 0x21c   : > { %15761 = dma.done.wait (%p17844_p7), [#allocation21], 208   ;;  %p17845_p9 = pmov %p17840_p0 }
 0x21d   : > { %p17846_p6 = pmov %p17840_p0 }
 0x21e   : > { %15763 = vsyncadd (%p17845_p9), [#allocation21], 4294967088 }
 0x21f   : > { %15765 = dma.done.wait (%p17846_p6), [#allocation24], 1552   ;;  %p17847_p5 = pmov %p17840_p0 }
 0x220   : > { %p17848_p2 = pmov %p17840_p0 }
 0x221   : > { %15767 = vsyncadd (%p17847_p5), [#allocation24], 4294965744 }
 0x222   : > { %15769 = dma.done.wait (%p17848_p2), [#allocation27], 256   ;;  %p17849_p11 = pmov %p17840_p0 }
 0x223   : > { %s17850_s22 = sld [smem:[#allocation84_spill]]  ;;  %s1624_s1 = sand.u32 1, %s17833_s26  }
 0x224   : > { %15771 = vsyncadd (%p17849_p11), [#allocation27], 4294967040  ;;  %s17851_s24 = sld [smem:[#allocation89_spill]]  ;;  %s1625_s23 = scalar_lea.sflag [#allocation6], %s1624_s1 }
 0x229   : > { %s16503_s28 = sand.u32 1, %s17850_s22  }
 0x22a   : > { %s14391_s12 = smul.u32 192, %s16503_s28  ;;  %p17852_p12 = scmp.ne.s32.totalorder %s17851_s24, 0 }
 0x22c   : > { %s16506_s19 = scalar_lea.vmem [#allocation28], %s14391_s12 }
 0x22d   : > { %15773 = dma.done.wait (%p17852_p12), %s1625_s23, 20832  }
 0x22e   : > { %15775 = vsyncadd (%p17852_p12), %s1625_s23, 4294946464  ;;  %s14392_s6 = smul.u32 3, %s16503_s28  ;;  %s12458_s4 = sshll.u32 %s16503_s28, 6 }
 0x22f   : > { %s12459_s15 = sshll.u32 %s16503_s28, 9  ;;  %s12460_s2 = sshll.u32 %s16503_s28, 4 }
 0x230   : > { %s16516_s18 = scalar_lea.vmem [#allocation29], %s14392_s6  ;;  %s16518_s10 = scalar_lea.vmem [#allocation30], %s12458_s4 }
 0x231   : > { %s16521_s5 = scalar_lea.vmem [#allocation32], %s12459_s15  ;;  %s16523_s14 = scalar_lea.vmem [#allocation33], %s12460_s2 }
 0x232   : > { %s16525_s11 = scalar_lea.vmem [#allocation34], %s12459_s15  ;;  %p17853_p1 = pmov %p17840_p0 }
 0x233   : > { %p17854_p10 = pmov %p17840_p0 }
 0x234   : > { %15777 = dma.done.wait (%p17853_p1), [#allocation9], 4096  }
 0x235   : > { %15779 = vsyncadd (%p17854_p10), [#allocation9], 4294963200  ;;  %p17855_p8 = pmov %p17840_p0 }
 0x237   : > { %15781 = dma.done.wait (%p17855_p8), [#allocation12], 2048  }
 0x238   : > { %15783 = vsyncadd (%p17840_p0), [#allocation12], 4294965248  ;;  %s17856_s24 = sld [smem:[#allocation72_spill]]  ;;  %s12464_s4 = sadd.s32 4294967295, %s17833_s26 }
 0x239   : > { %s17857_s1 = sld [smem:[#allocation69_spill]]  ;;  %p1894_p13 = scmp.gt.s32.totalorder %s12464_s4, 0 }
 0x23a   : > { %s17858_s12 = sld [smem:[#allocation73_spill]]  ;;  %p12465_p3 = scmp.lt.s32.totalorder %s12464_s4, 2 }
 0x23b   : > { %s17859_s23 = sld [smem:[#allocation74_spill]]  ;;  %s17889_s4 = smov (!%p1894_p13, %s12464_s4), 0 }
 0x23c   : > { %s17860_s6 = sld [smem:[#allocation75_spill]]  ;;  %s17891_s4 = smov (!%p12465_p3, %s17889_s4), 2 }
 0x23d   : > { %p1898_p4 = scmp.lt.s32.totalorder %s17891_s4, 2  ;;  %p17861_p7 = scmp.ne.s32.totalorder %s17833_s26, 0 }
 0x23e   : > { %s15879_s26 = smov (!%p17861_p7), [#allocation3]  }
 0x23f   : > { %s17893_s4 = smov (!%p1898_p4, %s17891_s4), 2  ;;  %1978 = sbr.rel (%p17861_p7) target bundleno = 6191 (0x182f), region = 260 }
 0x240   : > { %s12470_s15 = sshll.u32 %s17893_s4, 4  ;;  %s1929_s2 = scalar_lea.vmem %s17856_s24, %s17893_s4 }
 0x241   : > { %s16544_s22 = scalar_lea.vmem %s17857_s1, %s12470_s15  ;;  %s1942_s29 = scalar_lea.vmem %s17858_s12, %s17893_s4 }
 0x242   : > { %s1955_s0 = scalar_lea.vmem %s17859_s23, %s17893_s4  ;;  %s1968_s3 = scalar_lea.vmem %s17860_s6, %s17893_s4 }
 0x243   : > { %s1986_s24 = sshll.u32 (!%p17861_p7), %s15879_s26, 4  ;;  %s1987_s24 = int_to_ptr.vmem [resolvable:$true] %s1986_s24 }
 0x244   : > { %v1990_v0 = vld [vmem:[#allocation5] sm:$0x3]  ;;  %v14701_v2 = vld [vmem:[#allocation8] sm:$0xff]   ;;  %v14702_v3 = vld [vmem:[#allocation8 + $0x10] sm:$0xff]   ;;  %vm2211_vm0 = vcmask 1040384   ;;  %vm2198_vm1 = vcmask 15360   ;;  %p15693_p6 = scmp.lt.s32.totalorder %s1987_s24, %s1987_s24 }
 0x245   : > { %v16554_v1 = vpack.c.bf16 %v1990_v0, %v1990_v0  ;;  %13538 = vmatprep.mubr.bf16.mxu0 %v14701_v2  ;;  %13542 = vmatprep.mubr.bf16.mxu1 %v14702_v3  ;;  %v14703_v4 = vld [vmem:[#allocation8 + $0x8] sm:$0xff]   ;;  %v14704_v5 = vld [vmem:[#allocation8 + $0x18] sm:$0xff]   ;;  %v14705_v6 = vld [vmem:[#allocation8 + $0x20] sm:$0xff]   ;;  %vm3361_vm2 = vcmask 523264   ;;  %vm3502_vm3 = vcmask 130048   ;;  %vm15878_vm4 = vmmov 0  }
 0x246   : > { %v14706_v7 = vld [vmem:[#allocation8 + $0x28] sm:$0xff]   ;;  %v14707_v8 = vld [vmem:[#allocation8 + $0x30] sm:$0xff]   ;;  %v14708_v9 = vld [vmem:[#allocation8 + $0x38] sm:$0xff]   ;;  %vm4063_vm5 = vcmask 261120   ;;  %s15688_s1 = scalar_lea.vmem %s1987_s24, 16384 }
 0x247   : > { %13536 = vmatprep.subr.bf16.mxu0 %v16554_v1  ;;  %14371 = vmatprep.subr.bf16.mxu1 %v16554_v1  ;;  %v2093_v10 = vld [vmem:[#allocation10] sm:$0x1]  ;;  %v2197_v12 = vld [vmem:[#allocation10 + $0x1] sm:$0x1]  ;;  %v14710_v39 = vld [vmem:[#allocation8 + $0x48] sm:$0xff]   ;;  %p15689_p9 = scmp.ne.s32.totalorder %s1987_s24, %s15688_s1  ;;  %p15694_p5 = scmp.lt.s32.totalorder %s15688_s1, %s15688_s1 }
 0x248   : > { %13537 = vmatpush3.bf16.xpose.msra.mxu0 %v16554_v1  ;;  %14372 = vmatpush3.bf16.xpose.msra.mxu1 %v16554_v1  ;;  %v2293_v11 = vsel %vm2211_vm0, %v2093_v10, 0  ;;  %v2213_v13 = vsel %vm2211_vm0, %v2197_v12, 0  ;;  %v14709_v37 = vld [vmem:[#allocation8 + $0x40] sm:$0xff]   ;;  %v14711_v40 = vld [vmem:[#allocation8 + $0x50] sm:$0xff]   ;;  %v14712_v41 = vld [vmem:[#allocation8 + $0x58] sm:$0xff]  }
 0x249   : > { %13546 = vmatprep.subr.bf16.mxu1 %v16554_v1  ;;  %14373 = vmatprep.subr.msk.bf16.mxu0 %vm2211_vm0, %v2197_v12  ;;  %v14713_v42 = vld [vmem:[#allocation8 + $0x60] sm:$0xff]   ;;  %v14714_v43 = vld [vmem:[#allocation8 + $0x68] sm:$0xff]   ;;  %v14715_v44 = vld [vmem:[#allocation8 + $0x70] sm:$0xff]   ;;  %p15695_p2 = por %p15694_p5, %p15693_p6 }
 0x24a   : > { %v14716_v45 = vld [vmem:[#allocation8 + $0x78] sm:$0xff]   ;;  %v14717_v46 = vld [vmem:[#allocation8 + $0x80] sm:$0xff]   ;;  %v14718_v47 = vld [vmem:[#allocation8 + $0x88] sm:$0xff]  }
 0x24b   : > { %v14719_v48 = vld [vmem:[#allocation8 + $0x90] sm:$0xff]   ;;  %v14720_v49 = vld [vmem:[#allocation8 + $0x98] sm:$0xff]   ;;  %v14721_v50 = vld [vmem:[#allocation8 + $0xa0] sm:$0xff]   ;;  %p15696_p11 = pnand %p15695_p2, %p15689_p9 }
 0x24c   : > { %v14722_v51 = vld [vmem:[#allocation8 + $0xa8] sm:$0xff]   ;;  %v14723_v52 = vld [vmem:[#allocation8 + $0xb0] sm:$0xff]   ;;  %v14724_v53 = vld [vmem:[#allocation8 + $0xb8] sm:$0xff]  }
 0x24d   : > { %v14725_v54 = vld [vmem:[#allocation8 + $0xc0] sm:$0xff]   ;;  %v14726_v55 = vld [vmem:[#allocation8 + $0xc8] sm:$0xff]   ;;  %v14727_v56 = vld [vmem:[#allocation8 + $0xd0] sm:$0xff]  }
 0x24e   : > { %v2463_v57 = vld [vmem:[#allocation10 + $0x2] sm:$0x1]  ;;  %v14728_v59 = vld [vmem:[#allocation8 + $0xd8] sm:$0xff]   ;;  %v2655_v60 = vld [vmem:[#allocation10 + $0x3] sm:$0x1] }
 0x24f   : > { %13539 = vmatmul.mubr.bf16.vlgmr.msra.gmra.mxu0 %v14703_v4  ;;  %13543 = vmatmul.mubr.bf16.vlgmr.msra.gmra.mxu1 %v14704_v5  ;;  %v2477_v58 = vsel %vm2211_vm0, %v2463_v57, 0 }
 0x250   : > { %13547 = vmatpush3.bf16.xpose.msra.mxu1 %v16554_v1  ;;  %13548 = vmatprep.mubr.bf16.mxu1 %v14705_v6 }
 0x251   : > { %14374 = vmatprep.subr.msk.bf16.mxu1 %vm2211_vm0, %v2093_v10  ;;  %13557 = vmatpush3.bf16.msra.mxu0 %v2213_v13 }
 0x252   : > { %13576 = vmatprep.subr.bf16.mxu0 %v16554_v1 }
 0x257   : > { %13549 = vmatmul.mubr.bf16.vlgmr.msra.gmra.mxu1 %v14706_v7 }
 0x258   : > { %13552 = vmatprep.mubr.bf16.mxu1 %v14707_v8  ;;  %13567 = vmatpush3.bf16.msra.mxu1 %v2293_v11 }
 0x259   : > { %14375 = vmatprep.subr.msk.bf16.mxu1 %vm2211_vm0, %v2463_v57 }
 0x25f   : > { %13553 = vmatmul.mubr.bf16.gmra.mxu1 %v14708_v9 }
 0x30f   : > { %v13540_v14 = vpop.f32.mrf.mxu0  ;;  %v13544_v15 = vpop.f32.mrf.mxu1 }
 0x311   : > { %v2058_v16 = vpop.f32.mrf.mxu0  ;;  %v2074_v17 = vpop.f32.mrf.mxu1 }
 0x313   : > { %v13541_v18 = vpop.f32.mrf.mxu0  ;;  %v13545_v19 = vpop.f32.mrf.mxu1 }
 0x314   : > { %v2090_v20 = vpack.c.bf16 %v13541_v18, %v13540_v14  ;;  %v2092_v30 = vpack.c.bf16 %v13545_v19, %v13544_v15 }
 0x315   : > { %v2061_v21 = vpop.f32.mrf.mxu0  ;;  %v2077_v22 = vpop.f32.mrf.mxu1 }
 0x316   : > { %v2089_v23 = vpack.c.bf16 %v2061_v21, %v2058_v16  ;;  %v2091_v25 = vpack.c.bf16 %v2077_v22, %v2074_v17 }
 0x317   : > { %v13550_v24 = vpop.f32.mrf.mxu1 }
 0x318   : > { %13568 = vmatprep.mubr.msk.bf16.mxu1 %vm2198_vm1, %v2089_v23 }
 0x319   : > { %v2161_v26 = vpop.f32.mrf.mxu1  ;;  %13569 = vmatmul.mubr.msk.bf16.vlgmr.msra.gmra.mxu1 %vm2198_vm1, %v2090_v20 }
 0x31a   : > { %13572 = vmatprep.mubr.msk.bf16.mxu1 %vm2198_vm1, %v2091_v25  ;;  %13587 = vmatpush3.bf16.msra.mxu1 %v2477_v58  ;;  %v2669_v25 = vsel %vm2211_vm0, %v2655_v60, 0 }
 0x31b   : > { %v13551_v27 = vpop.f32.mrf.mxu1  ;;  %14376 = vmatprep.subr.msk.bf16.mxu1 %vm2211_vm0, %v2655_v60 }
 0x31c   : > { %v2193_v31 = vpack.c.bf16 %v13551_v27, %v13550_v24 }
 0x31d   : > { %v2164_v28 = vpop.f32.mrf.mxu1 }
 0x31e   : > { %v2192_v29 = vpack.c.bf16 %v2164_v28, %v2161_v26  ;;  %v2847_v26 = vld [vmem:[#allocation10 + $0x4] sm:$0x1] }
 0x31f   : > { %v13554_v32 = vpop.f32.mrf.mxu1 }
 0x320   : > { %13558 = vmatprep.mubr.msk.bf16.mxu0 %vm2198_vm1, %v2192_v29 }
 0x321   : > { %v2177_v33 = vpop.f32.mrf.mxu1  ;;  %13559 = vmatmul.mubr.msk.bf16.vlgmr.msra.gmra.mxu0 %vm2198_vm1, %v2193_v31  ;;  %13573 = vmatmul.mubr.msk.bf16.gmra.mxu1 %vm2198_vm1, %v2092_v30 }
 0x322   : > { %13577 = vmatpush3.bf16.xpose.msra.mxu0 %v16554_v1 }
 0x323   : > { %v13555_v34 = vpop.f32.mrf.mxu1  ;;  %13596 = vmatprep.subr.bf16.mxu0 %v16554_v1 }
 0x324   : > { %v2195_v38 = vpack.c.bf16 %v13555_v34, %v13554_v32 }
 0x325   : > { %v2180_v35 = vpop.f32.mrf.mxu1 }
 0x326   : > { %v2194_v36 = vpack.c.bf16 %v2180_v35, %v2177_v33 }
 0x328   : > { %13562 = vmatprep.mubr.msk.bf16.mxu0 %vm2198_vm1, %v2194_v36 }
 0x329   : > { %13563 = vmatmul.mubr.msk.bf16.gmra.mxu0 %vm2198_vm1, %v2195_v38 }
 0x32a   : > { %13578 = vmatprep.mubr.bf16.mxu0 %v14709_v37 }
 0x331   : > { %13579 = vmatmul.mubr.bf16.vlgmr.msra.gmra.mxu0 %v14710_v39  ;;  %v2861_v39 = vsel %vm2211_vm0, %v2847_v26, 0 }
 0x332   : > { %13597 = vmatpush3.bf16.xpose.msra.mxu0 %v16554_v1  ;;  %13582 = vmatprep.mubr.bf16.mxu0 %v14711_v40  ;;  %v3039_v40 = vld [vmem:[#allocation10 + $0x5] sm:$0x1] }
 0x333   : > { %13616 = vmatprep.subr.bf16.mxu0 %v16554_v1 }
 0x339   : > { %13583 = vmatmul.mubr.bf16.gmra.mxu0 %v14712_v41 }
 0x33a   : > { %13598 = vmatprep.mubr.bf16.mxu0 %v14713_v42 }
 0x341   : > { %13599 = vmatmul.mubr.bf16.vlgmr.msra.gmra.mxu0 %v14714_v43 }
 0x342   : > { %13617 = vmatpush3.bf16.xpose.msra.mxu0 %v16554_v1  ;;  %13602 = vmatprep.mubr.bf16.mxu0 %v14715_v44 }
 0x343   : > { %13636 = vmatprep.subr.bf16.mxu0 %v16554_v1 }
 0x349   : > { %13603 = vmatmul.mubr.bf16.gmra.mxu0 %v14716_v45 }
 0x34a   : > { %13618 = vmatprep.mubr.bf16.mxu0 %v14717_v46 }
 0x351   : > { %13619 = vmatmul.mubr.bf16.vlgmr.msra.gmra.mxu0 %v14718_v47 }
 0x352   : > { %13637 = vmatpush3.bf16.xpose.msra.mxu0 %v16554_v1  ;;  %13622 = vmatprep.mubr.bf16.mxu0 %v14719_v48 }
 0x353   : > { %13656 = vmatprep.subr.bf16.mxu0 %v16554_v1 }
 0x359   : > { %13623 = vmatmul.mubr.bf16.gmra.mxu0 %v14720_v49 }
 0x35a   : > { %13638 = vmatprep.mubr.bf16.mxu0 %v14721_v50 }
 0x361   : > { %13639 = vmatmul.mubr.bf16.vlgmr.msra.gmra.mxu0 %v14722_v51 }
 0x362   : > { %13657 = vmatpush3.bf16.xpose.msra.mxu0 %v16554_v1  ;;  %13642 = vmatprep.mubr.bf16.mxu0 %v14723_v52 }
 0x369   : > { %13643 = vmatmul.mubr.bf16.gmra.mxu0 %v14724_v53  ;;  %v3053_v53 = vsel %vm2211_vm0, %v3039_v40, 0 }
 0x36a   : > { %13658 = vmatprep.mubr.bf16.mxu0 %v14725_v54  ;;  %v3231_v54 = vld [vmem:[#allocation10 + $0x6] sm:$0x1] }
 0x371   : > { %13659 = vmatmul.mubr.bf16.vlgmr.msra.gmra.mxu0 %v14726_v55 }
 0x372   : > { %13662 = vmatprep.mubr.bf16.mxu0 %v14727_v56 }
 0x379   : > { %13663 = vmatmul.mubr.bf16.gmra.mxu0 %v14728_v59 }
 0x3d9   : > { %v13570_v61 = vpop.f32.mrf.mxu1 }
 0x3db   : > { %v2329_v62 = vpop.f32.mrf.mxu1 }
 0x3dd   : > { %v13571_v63 = vpop.f32.mrf.mxu1 }
 0x3df   : > { %v16587_v0 = vpop.f32.mrf.mxu1 }
 0x3e1   : > { %v13560_v1 = vpop.f32.mrf.mxu0  ;;  %v13574_v5 = vpop.f32.mrf.mxu1 }
 0x3e2   : > { %v16589_v2 = vadd.f32 %v13570_v61, %v13560_v1 }
 0x3e3   : > { %v2249_v3 = vpop.f32.mrf.mxu0  ;;  %v2345_v9 = vpop.f32.mrf.mxu1 }
 0x3e4   : > { %v16591_v4 = vadd.f32 %v2329_v62, %v2249_v3 }
 0x3e5   : > { %v13561_v6 = vpop.f32.mrf.mxu0  ;;  %v13575_v14 = vpop.f32.mrf.mxu1 }
 0x3e6   : > { %v16593_v7 = vadd.f32 %v13571_v63, %v13561_v6  ;;  %v3245_v6 = vsel %vm2211_vm0, %v3231_v54, 0 }
 0x3e7   : > { %v16595_v8 = vpop.f32.mrf.mxu0 }
 0x3e9   : > { %v13564_v10 = vpop.f32.mrf.mxu0 }
 0x3ea   : > { %v16597_v11 = vadd.f32 %v13574_v5, %v13564_v10 }
 0x3eb   : > { %v2265_v12 = vpop.f32.mrf.mxu0 }
 0x3ec   : > { %v16599_v13 = vadd.f32 %v2345_v9, %v2265_v12 }
 0x3ed   : > { %v13565_v15 = vpop.f32.mrf.mxu0 }
 0x3ee   : > { %v16601_v16 = vadd.f32 %v13575_v14, %v13565_v15 }
 0x3ef   : > { %v16603_v17 = vpop.f32.mrf.mxu0 }
 0x3f1   : > { %v13580_v18 = vpop.f32.mrf.mxu0 }
 0x3f3   : > { %v2427_v19 = vpop.f32.mrf.mxu0 }
 0x3f5   : > { %v13581_v20 = vpop.f32.mrf.mxu0 }
 0x3f6   : > { %v2459_v23 = vpack.c.bf16 %v13581_v20, %v13580_v18 }
 0x3f7   : > { %v2430_v21 = vpop.f32.mrf.mxu0 }
 0x3f8   : > { %v2458_v22 = vpack.c.bf16 %v2430_v21, %v2427_v19 }
 0x3f9   : > { %v13584_v24 = vpop.f32.mrf.mxu0 }
 0x3fa   : > { %13588 = vmatprep.mubr.msk.bf16.mxu1 %vm2198_vm1, %v2458_v22 }
 0x3fb   : > { %v2443_v27 = vpop.f32.mrf.mxu0  ;;  %13589 = vmatmul.mubr.msk.bf16.vlgmr.msra.gmra.mxu1 %vm2198_vm1, %v2459_v23 }
 0x3fc   : > { %13607 = vmatpush3.bf16.msra.mxu1 %v2669_v25 }
 0x3fd   : > { %v13585_v28 = vpop.f32.mrf.mxu0  ;;  %14377 = vmatprep.subr.msk.bf16.mxu1 %vm2211_vm0, %v2847_v26 }
 0x3fe   : > { %v2461_v31 = vpack.c.bf16 %v13585_v28, %v13584_v24 }
 0x3ff   : > { %v2446_v29 = vpop.f32.mrf.mxu0 }
 0x400   : > { %v2460_v30 = vpack.c.bf16 %v2446_v29, %v2443_v27 }
 0x401   : > { %v13600_v32 = vpop.f32.mrf.mxu0 }
 0x402   : > { %13592 = vmatprep.mubr.msk.bf16.mxu1 %vm2198_vm1, %v2460_v30  ;;  %v14729_v30 = vld [vmem:[#allocation13] sm:$0xff]  }
 0x403   : > { %13593 = vmatmul.mubr.msk.bf16.gmra.mxu1 %vm2198_vm1, %v2461_v31  ;;  %v2619_v33 = vpop.f32.mrf.mxu0  ;;  %v14730_v31 = vld [vmem:[#allocation13 + $0x10] sm:$0xff]   ;;  %13684 = vmatprep.mubr.msk.bf16.mxu0 %vm3361_vm2, %v14729_v30 }
 0x405   : > { %v13601_v34 = vpop.f32.mrf.mxu0 }
 0x406   : > { %v2651_v37 = vpack.c.bf16 %v13601_v34, %v13600_v32  ;;  %v2348_v32 = vpop.f32.mrf.mxu1 }
 0x407   : > { %v2622_v35 = vpop.f32.mrf.mxu0 }
 0x408   : > { %v2650_v36 = vpack.c.bf16 %v2622_v35, %v2619_v33 }
 0x409   : > { %v13604_v38 = vpop.f32.mrf.mxu0 }
 0x40a   : > { %13608 = vmatprep.mubr.msk.bf16.mxu1 %vm2198_vm1, %v2650_v36 }
 0x40b   : > { %v2635_v41 = vpop.f32.mrf.mxu0  ;;  %13609 = vmatmul.mubr.msk.bf16.vlgmr.msra.gmra.mxu1 %vm2198_vm1, %v2651_v37 }
 0x40c   : > { %13627 = vmatpush3.bf16.msra.mxu1 %v2861_v39 }
 0x40d   : > { %v13605_v42 = vpop.f32.mrf.mxu0  ;;  %14378 = vmatprep.subr.msk.bf16.mxu1 %vm2211_vm0, %v3039_v40 }
 0x40e   : > { %v2653_v45 = vpack.c.bf16 %v13605_v42, %v13604_v38 }
 0x40f   : > { %v2638_v43 = vpop.f32.mrf.mxu0 }
 0x410   : > { %v2652_v44 = vpack.c.bf16 %v2638_v43, %v2635_v41 }
 0x411   : > { %v13620_v46 = vpop.f32.mrf.mxu0 }
 0x412   : > { %13612 = vmatprep.mubr.msk.bf16.mxu1 %vm2198_vm1, %v2652_v44 }
 0x413   : > { %13613 = vmatmul.mubr.msk.bf16.gmra.mxu1 %vm2198_vm1, %v2653_v45  ;;  %v2811_v47 = vpop.f32.mrf.mxu0 }
 0x415   : > { %v13621_v48 = vpop.f32.mrf.mxu0 }
 0x416   : > { %v2843_v51 = vpack.c.bf16 %v13621_v48, %v13620_v46 }
 0x417   : > { %v2814_v49 = vpop.f32.mrf.mxu0 }
 0x418   : > { %v2842_v50 = vpack.c.bf16 %v2814_v49, %v2811_v47 }
 0x419   : > { %v13624_v52 = vpop.f32.mrf.mxu0 }
 0x41a   : > { %13628 = vmatprep.mubr.msk.bf16.mxu1 %vm2198_vm1, %v2842_v50 }
 0x41b   : > { %v2827_v55 = vpop.f32.mrf.mxu0  ;;  %13629 = vmatmul.mubr.msk.bf16.vlgmr.msra.gmra.mxu1 %vm2198_vm1, %v2843_v51 }
 0x41c   : > { %13647 = vmatpush3.bf16.msra.mxu1 %v3053_v53 }
 0x41d   : > { %v13625_v56 = vpop.f32.mrf.mxu0  ;;  %14379 = vmatprep.subr.msk.bf16.mxu1 %vm2211_vm0, %v3231_v54 }
 0x41e   : > { %v2845_v59 = vpack.c.bf16 %v13625_v56, %v13624_v52 }
 0x41f   : > { %v2830_v57 = vpop.f32.mrf.mxu0 }
 0x420   : > { %v2844_v58 = vpack.c.bf16 %v2830_v57, %v2827_v55 }
 0x421   : > { %v13640_v60 = vpop.f32.mrf.mxu0 }
 0x422   : > { %13632 = vmatprep.mubr.msk.bf16.mxu1 %vm2198_vm1, %v2844_v58 }
 0x423   : > { %13633 = vmatmul.mubr.msk.bf16.gmra.mxu1 %vm2198_vm1, %v2845_v59  ;;  %v3003_v61 = vpop.f32.mrf.mxu0 }
 0x425   : > { %v13641_v62 = vpop.f32.mrf.mxu0 }
 0x426   : > { %v3035_v3 = vpack.c.bf16 %v13641_v62, %v13640_v60 }
 0x427   : > { %v3006_v63 = vpop.f32.mrf.mxu0 }
 0x428   : > { %v3034_v1 = vpack.c.bf16 %v3006_v63, %v3003_v61 }
 0x429   : > { %v13644_v5 = vpop.f32.mrf.mxu0 }
 0x42a   : > { %13648 = vmatprep.mubr.msk.bf16.mxu1 %vm2198_vm1, %v3034_v1 }
 0x42b   : > { %v3019_v9 = vpop.f32.mrf.mxu0  ;;  %13649 = vmatmul.mubr.msk.bf16.vlgmr.msra.gmra.mxu1 %vm2198_vm1, %v3035_v3 }
 0x42c   : > { %13667 = vmatpush3.bf16.msra.mxu1 %v3245_v6 }
 0x42d   : > { %v13645_v10 = vpop.f32.mrf.mxu0 }
 0x42e   : > { %v3037_v15 = vpack.c.bf16 %v13645_v10, %v13644_v5 }
 0x42f   : > { %v3022_v12 = vpop.f32.mrf.mxu0 }
 0x430   : > { %v3036_v14 = vpack.c.bf16 %v3022_v12, %v3019_v9 }
 0x431   : > { %v13660_v18 = vpop.f32.mrf.mxu0 }
 0x432   : > { %13652 = vmatprep.mubr.msk.bf16.mxu1 %vm2198_vm1, %v3036_v14 }
 0x433   : > { %13653 = vmatmul.mubr.msk.bf16.gmra.mxu1 %vm2198_vm1, %v3037_v15  ;;  %v3195_v19 = vpop.f32.mrf.mxu0 }
 0x435   : > { %v13661_v20 = vpop.f32.mrf.mxu0 }
 0x436   : > { %v3227_v23 = vpack.c.bf16 %v13661_v20, %v13660_v18  ;;  %v12552_v18 = vld [vmem:[#allocation11] ss:$0 sm:$0xff] }
 0x437   : > { %v3198_v21 = vpop.f32.mrf.mxu0 }
 0x438   : > { %v3226_v22 = vpack.c.bf16 %v3198_v21, %v3195_v19 }
 0x439   : > { %v13664_v24 = vpop.f32.mrf.mxu0 }
 0x43a   : > { %13668 = vmatprep.mubr.msk.bf16.mxu1 %vm2198_vm1, %v3226_v22 }
 0x43b   : > { %v3211_v25 = vpop.f32.mrf.mxu0  ;;  %13669 = vmatmul.mubr.msk.bf16.vlgmr.msra.gmra.mxu1 %vm2198_vm1, %v3227_v23  ;;  %v2349_v23 = vadd.f32 %v2348_v32, %v16603_v17 }
 0x43d   : > { %v13665_v26 = vpop.f32.mrf.mxu0 }
 0x43e   : > { %v3229_v29 = vpack.c.bf16 %v13665_v26, %v13664_v24 }
 0x43f   : > { %v3214_v27 = vpop.f32.mrf.mxu0 }
 0x440   : > { %v3228_v28 = vpack.c.bf16 %v3214_v27, %v3211_v25 }
 0x442   : > { %13672 = vmatprep.mubr.msk.bf16.mxu1 %vm2198_vm1, %v3228_v28 }
 0x443   : > { %13673 = vmatmul.mubr.msk.bf16.gmra.mxu1 %vm2198_vm1, %v3229_v29 }
 0x444   : > { %13696 = vmatprep.mubr.msk.bf16.mxu1 %vm3361_vm2, %v14730_v31 }
 0x4bb   : > { %v13590_v33 = vpop.f32.mrf.mxu1 }
 0x4bc   : > { %v2546_v34 = vadd.f32 %v13590_v33, %v16589_v2 }
 0x4bd   : > { %v2513_v35 = vpop.f32.mrf.mxu1 }
 0x4be   : > { %v16636_v36 = vadd.f32 %v2513_v35, %v16591_v4 }
 0x4bf   : > { %v13591_v37 = vpop.f32.mrf.mxu1 }
 0x4c0   : > { %v2547_v38 = vadd.f32 %v13591_v37, %v16593_v7 }
 0x4c1   : > { %v2516_v39 = vpop.f32.mrf.mxu1 }
 0x4c3   : > { %v13594_v40 = vpop.f32.mrf.mxu1 }
 0x4c4   : > { %v2550_v12 = vadd.f32 %v13594_v40, %v16597_v11  ;;  %v2333_v11 = vadd.f32 %v16587_v0, %v16595_v8 }
 0x4c5   : > { %v2529_v41 = vpop.f32.mrf.mxu1 }
 0x4c6   : > { %v2548_v20 = vadd.f32 %v2529_v41, %v16599_v13  ;;  %v2545_v37 = vadd.f32 %v2516_v39, %v2333_v11 }
 0x4c7   : > { %v13595_v42 = vpop.f32.mrf.mxu1 }
 0x4c8   : > { %v2551_v24 = vadd.f32 %v13595_v42, %v16601_v16 }
 0x4c9   : > { %v2532_v43 = vpop.f32.mrf.mxu1 }
 0x4ca   : > { %v2549_v30 = vadd.f32 %v2532_v43, %v2349_v23 }
 0x4cb   : > { %v13610_v44 = vpop.f32.mrf.mxu1 }
 0x4cc   : > { %v2738_v63 = vadd.f32 %v13610_v44, %v2546_v34 }
 0x4cd   : > { %v16639_v45 = vpop.f32.mrf.mxu1 }
 0x4ce   : > { %v2736_v8 = vadd.f32 %v16639_v45, %v16636_v36 }
 0x4cf   : > { %v13611_v46 = vpop.f32.mrf.mxu1 }
 0x4d0   : > { %v2739_v6 = vadd.f32 %v13611_v46, %v2547_v38 }
 0x4d1   : > { %v2708_v47 = vpop.f32.mrf.mxu1 }
 0x4d2   : > { %v2737_v44 = vadd.f32 %v2708_v47, %v2545_v37 }
 0x4d3   : > { %v13614_v48 = vpop.f32.mrf.mxu1 }
 0x4d4   : > { %v2742_v21 = vadd.f32 %v13614_v48, %v2550_v12  ;;  %v14731_v12 = vld [vmem:[#allocation13 + $0x8] sm:$0xff]  }
 0x4d5   : > { %v2721_v49 = vpop.f32.mrf.mxu1 }
 0x4d6   : > { %v2740_v26 = vadd.f32 %v2721_v49, %v2548_v20 }
 0x4d7   : > { %v13615_v2 = vpop.f32.mrf.mxu1 }
 0x4d8   : > { %v2743_v31 = vadd.f32 %v13615_v2, %v2551_v24 }
 0x4d9   : > { %v2724_v50 = vpop.f32.mrf.mxu1 }
 0x4da   : > { %v2741_v38 = vadd.f32 %v2724_v50, %v2549_v30  ;;  %v14736_v30 = vld [vmem:[#allocation13 + $0x20] sm:$0xff]  }
 0x4db   : > { %v13630_v51 = vpop.f32.mrf.mxu1 }
 0x4dc   : > { %v2930_v3 = vadd.f32 %v13630_v51, %v2738_v63 }
 0x4dd   : > { %v2897_v4 = vpop.f32.mrf.mxu1 }
 0x4df   : > { %v13631_v52 = vpop.f32.mrf.mxu1 }
 0x4e0   : > { %v2931_v14 = vadd.f32 %v13631_v52, %v2739_v6 }
 0x4e1   : > { %v2900_v53 = vpop.f32.mrf.mxu1 }
 0x4e2   : > { %v2929_v2 = vadd.f32 %v2900_v53, %v2737_v44 }
 0x4e3   : > { %v13634_v54 = vpop.f32.mrf.mxu1 }
 0x4e4   : > { %v2934_v27 = vadd.f32 %v13634_v54, %v2742_v21  ;;  %v2928_v54 = vadd.f32 %v2897_v4, %v2736_v8 }
 0x4e5   : > { %v2913_v7 = vpop.f32.mrf.mxu1 }
 0x4e6   : > { %v2932_v34 = vadd.f32 %v2913_v7, %v2740_v26 }
 0x4e7   : > { %v13635_v55 = vpop.f32.mrf.mxu1 }
 0x4e8   : > { %v2935_v40 = vadd.f32 %v13635_v55, %v2743_v31  ;;  %v14738_v31 = vld [vmem:[#allocation14 + $0x18] sm:$0xff]  }
 0x4e9   : > { %v2916_v56 = vpop.f32.mrf.mxu1 }
 0x4ea   : > { %v2933_v48 = vadd.f32 %v2916_v56, %v2741_v38 }
 0x4eb   : > { %v13650_v57 = vpop.f32.mrf.mxu1 }
 0x4ec   : > { %v3122_v9 = vadd.f32 %v13650_v57, %v2930_v3 }
 0x4ed   : > { %v3089_v58 = vpop.f32.mrf.mxu1 }
 0x4ef   : > { %v13651_v59 = vpop.f32.mrf.mxu1 }
 0x4f0   : > { %v3123_v22 = vadd.f32 %v13651_v59, %v2931_v14  ;;  %v14732_v14 = vld [vmem:[#allocation13 + $0x18] sm:$0xff]  }
 0x4f1   : > { %v3092_v60 = vpop.f32.mrf.mxu1 }
 0x4f2   : > { %v3121_v55 = vadd.f32 %v3092_v60, %v2929_v2 }
 0x4f3   : > { %v13654_v61 = vpop.f32.mrf.mxu1 }
 0x4f4   : > { %v3126_v35 = vadd.f32 %v13654_v61, %v2934_v27  ;;  %v3120_v61 = vadd.f32 %v3089_v58, %v2928_v54 }
 0x4f5   : > { %v3105_v62 = vpop.f32.mrf.mxu1 }
 0x4f6   : > { %v3124_v32 = vadd.f32 %v3105_v62, %v2932_v34 }
 0x4f7   : > { %v13655_v1 = vpop.f32.mrf.mxu1 }
 0x4f8   : > { %v3127_v49 = vadd.f32 %v13655_v1, %v2935_v40 }
 0x4f9   : > { %v3108_v5 = vpop.f32.mrf.mxu1 }
 0x4fa   : > { %v3125_v39 = vadd.f32 %v3108_v5, %v2933_v48 }
 0x4fb   : > { %v13670_v10 = vpop.f32.mrf.mxu1 }
 0x4fc   : > { %v3314_v15 = vadd.f32 %v13670_v10, %v3122_v9  ;;  %v14733_v10 = vld [vmem:[#allocation14 + $0x8] sm:$0xff]  }
 0x4fd   : > { %v3281_v19 = vpop.f32.mrf.mxu1 }
 0x4fe   : > { %v3329_v28 = vadd.f32 %v12552_v18, %v3314_v15  ;;  %v3312_v3 = vadd.f32 %v3281_v19, %v3120_v61  ;;  %v14734_v15 = vld [vmem:[#allocation14] sm:$0xff]  }
 0x4ff   : > { %v13671_v25 = vpop.f32.mrf.mxu1 }
 0x500   : > { %v3315_v29 = vadd.f32 %v13671_v25, %v3123_v22  ;;  %v3337_v16 = vmax.f32 %v3329_v28, 0.0  ;;  %v3327_v4 = vadd.f32 %v12552_v18, %v3312_v3  ;;  %v14742_v3 = vld [vmem:[#allocation13 + $0x48] sm:$0xff]  }
 0x501   : > { %v3284_v33 = vpop.f32.mrf.mxu1 }
 0x502   : > { %v3330_v13 = vadd.f32 %v12552_v18, %v3315_v29  ;;  %v3313_v56 = vadd.f32 %v3284_v33, %v3121_v55  ;;  %v3335_v60 = vmax.f32 %v3327_v4, 0.0  ;;  %v14737_v33 = vld [vmem:[#allocation13 + $0x28] sm:$0xff]  }
 0x503   : > { %v13674_v17 = vpop.f32.mrf.mxu1 }
 0x504   : > { %v3338_v41 = vmax.f32 %v3330_v13, 0.0  ;;  %v3318_v42 = vadd.f32 %v13674_v17, %v3126_v35  ;;  %v3328_v45 = vadd.f32 %v12552_v18, %v3313_v56 }
 0x505   : > { %v3297_v46 = vpop.f32.mrf.mxu1 }
 0x506   : > { %v16647_v51 = vpack.c.bf16 %v3338_v41, %v3337_v16  ;;  %v3316_v0 = vadd.f32 %v3297_v46, %v3124_v32  ;;  %v3333_v50 = vadd.f32 %v12552_v18, %v3318_v42  ;;  %v3336_v58 = vmax.f32 %v3328_v45, 0.0 }
 0x507   : > { %v13675_v43 = vpop.f32.mrf.mxu1 }
 0x508   : > { %v3319_v52 = vadd.f32 %v13675_v43, %v3127_v49  ;;  %v3331_v57 = vadd.f32 %v12552_v18, %v3316_v0  ;;  %v3341_v62 = vmax.f32 %v3333_v50, 0.0  ;;  %v16665_v5 = vpack.c.bf16 %v3336_v58, %v3335_v60  ;;  %v14739_v0 = vld [vmem:[#allocation13 + $0x30] sm:$0xff]   ;;  %v14740_v43 = vld [vmem:[#allocation13 + $0x38] sm:$0xff]  }
 0x509   : > { %v3300_v7 = vpop.f32.mrf.mxu1 }
 0x50a   : > { %v3334_v59 = vadd.f32 %v12552_v18, %v3319_v52  ;;  %v3317_v47 = vadd.f32 %v3300_v7, %v3125_v39  ;;  %v3339_v6 = vmax.f32 %v3331_v57, 0.0 }
 0x50c   : > { %v3342_v63 = vmax.f32 %v3334_v59, 0.0  ;;  %v3332_v1 = vadd.f32 %v12552_v18, %v3317_v47  ;;  %v14735_v18 = vld [vmem:[#allocation14 + $0x10] sm:$0xff]  }
 0x50e   : > { %v16651_v9 = vpack.c.bf16 %v3342_v63, %v3341_v62  ;;  %v3340_v36 = vmax.f32 %v3332_v1, 0.0  ;;  %v14741_v63 = vld [vmem:[#allocation13 + $0x40] sm:$0xff]  }
 0x510   : > { %v16653_v53 = vpack.c.bf16 %v3340_v36, %v3339_v6  ;;  %13676 = vmatprep.subr.bf16.mxu0 %v16651_v9  ;;  %13688 = vmatprep.subr.bf16.mxu1 %v16651_v9  ;;  %v14743_v6 = vld [vmem:[#allocation14 + $0x20] sm:$0xff]  }
 0x511   : > { %13677 = vmatpush3.bf16.msra.mxu0 %v16651_v9  ;;  %13689 = vmatpush3.bf16.msra.mxu1 %v16651_v9 }
 0x512   : > { %13678 = vmatprep.subr.bf16.mxu0 %v16653_v53  ;;  %13690 = vmatprep.subr.bf16.mxu1 %v16653_v53 }
 0x515   : > { %13679 = vmatpush3.bf16.msra.mxu0 %v16653_v53  ;;  %13691 = vmatpush3.bf16.msra.mxu1 %v16653_v53 }
 0x516   : > { %13680 = vmatprep.subr.bf16.mxu0 %v16647_v51  ;;  %13692 = vmatprep.subr.bf16.mxu1 %v16647_v51 }
 0x519   : > { %13681 = vmatpush3.bf16.msra.mxu0 %v16647_v51  ;;  %13693 = vmatpush3.bf16.msra.mxu1 %v16647_v51 }
 0x51a   : > { %13682 = vmatprep.subr.bf16.mxu0 %v16665_v5  ;;  %13694 = vmatprep.subr.bf16.mxu1 %v16665_v5 }
 0x51d   : > { %13683 = vmatpush3.bf16.msra.mxu0 %v16665_v5  ;;  %13695 = vmatpush3.bf16.msra.mxu1 %v16665_v5 }
 0x51e   : > { %13700 = vmatprep.subr.bf16.mxu0 %v14733_v10  ;;  %13706 = vmatprep.subr.bf16.mxu1 %v14734_v15 }
 0x520   : > { %13685 = vmatmul.mubr.msk.bf16.vlgmr.msra.gmra.mxu0 %vm3361_vm2, %v14731_v12  ;;  %13697 = vmatmul.mubr.msk.bf16.vlgmr.msra.gmra.mxu1 %vm3361_vm2, %v14732_v14 }
 0x521   : > { %13701 = vmatpush3.bf16.msra.mxu0 %v14733_v10  ;;  %13707 = vmatpush3.bf16.msra.mxu1 %v14734_v15 }
 0x522   : > { %13712 = vmatprep.subr.bf16.mxu0 %v16651_v9  ;;  %13724 = vmatprep.subr.bf16.mxu1 %v14735_v18 }
 0x5e0   : > { %v13686_v19 = vpop.f32.mrf.mxu0  ;;  %v13698_v20 = vpop.f32.mrf.mxu1 }
 0x5e2   : > { %v3402_v21 = vpop.f32.mrf.mxu0  ;;  %v3476_v22 = vpop.f32.mrf.mxu1 }
 0x5e4   : > { %v13687_v23 = vpop.f32.mrf.mxu0  ;;  %v13699_v24 = vpop.f32.mrf.mxu1 }
 0x5e5   : > { %v3418_v25 = vpack.c.bf16 %v13687_v23, %v13686_v19  ;;  %v3492_v11 = vpack.c.bf16 %v13699_v24, %v13698_v20 }
 0x5e6   : > { %v3405_v26 = vpop.f32.mrf.mxu0  ;;  %v3479_v27 = vpop.f32.mrf.mxu1 }
 0x5e7   : > { %v3417_v28 = vpack.c.bf16 %v3405_v26, %v3402_v21  ;;  %v3491_v29 = vpack.c.bf16 %v3479_v27, %v3476_v22  ;;  %v12588_v22 = vld [vmem:[#allocation16] ss:$0 sm:$0xff] }
 0x5e9   : > { %13702 = vmatprep.mubr.msk.bf16.mxu0 %vm3502_vm3, %v3491_v29  ;;  %13708 = vmatprep.mubr.msk.bf16.mxu1 %vm3502_vm3, %v3417_v28 }
 0x5ea   : > { %13703 = vmatmul.mubr.msk.bf16.vlgmr.msra.gmra.mxu0 %vm3502_vm3, %v3492_v11  ;;  %13709 = vmatmul.mubr.msk.bf16.vlgmr.msra.gmra.mxu1 %vm3502_vm3, %v3418_v25 }
 0x5eb   : > { %13713 = vmatpush3.bf16.msra.mxu0 %v16651_v9  ;;  %13725 = vmatpush3.bf16.msra.mxu1 %v14735_v18 }
 0x5ec   : > { %13714 = vmatprep.subr.bf16.mxu0 %v16653_v53  ;;  %13730 = vmatprep.subr.bf16.mxu1 %v16651_v9 }
 0x5ed   : > { %13720 = vmatprep.mubr.msk.bf16.mxu0 %vm3361_vm2, %v14736_v30 }
 0x5ef   : > { %13715 = vmatpush3.bf16.msra.mxu0 %v16653_v53 }
 0x5f0   : > { %13716 = vmatprep.subr.bf16.mxu0 %v16647_v51 }
 0x5f3   : > { %13717 = vmatpush3.bf16.msra.mxu0 %v16647_v51 }
 0x5f4   : > { %13718 = vmatprep.subr.bf16.mxu0 %v16665_v5 }
 0x5f7   : > { %13719 = vmatpush3.bf16.msra.mxu0 %v16665_v5 }
 0x5f8   : > { %13742 = vmatprep.subr.bf16.mxu0 %v14738_v31 }
 0x5fa   : > { %13721 = vmatmul.mubr.msk.bf16.vlgmr.msra.gmra.mxu0 %vm3361_vm2, %v14737_v33 }
 0x5fb   : > { %13743 = vmatpush3.bf16.msra.mxu0 %v14738_v31 }
 0x5fc   : > { %13748 = vmatprep.subr.bf16.mxu0 %v16651_v9 }
 0x6aa   : > { %v13704_v34 = vpop.f32.mrf.mxu0  ;;  %v13710_v35 = vpop.f32.mrf.mxu1 }
 0x6ab   : > { %v3613_v13 = vadd.f32 %v13710_v35, %v13704_v34 }
 0x6ac   : > { %v3543_v37 = vpop.f32.mrf.mxu0  ;;  %v3604_v38 = vpop.f32.mrf.mxu1 }
 0x6ad   : > { %v3605_v40 = vadd.f32 %v3604_v38, %v3543_v37 }
 0x6ae   : > { %v13705_v17 = vpop.f32.mrf.mxu0  ;;  %v13711_v32 = vpop.f32.mrf.mxu1 }
 0x6af   : > { %v3616_v16 = vadd.f32 %v13711_v32, %v13705_v17  ;;  %v14744_v32 = vld [vmem:[#allocation17] sm:$0xff]  }
 0x6b0   : > { %v16691_v41 = vpop.f32.mrf.mxu0  ;;  %v3607_v2 = vpop.f32.mrf.mxu1 }
 0x6b1   : > { %v3608_v20 = vadd.f32 %v3607_v2, %v16691_v41  ;;  %v14746_v41 = vld [vmem:[#allocation19 + $0x18] sm:$0xff]  }
 0x6ba   : > { %v13722_v42 = vpop.f32.mrf.mxu0 }
 0x6bc   : > { %v3674_v44 = vpop.f32.mrf.mxu0 }
 0x6be   : > { %v13723_v46 = vpop.f32.mrf.mxu0 }
 0x6bf   : > { %v3690_v8 = vpack.c.bf16 %v13723_v46, %v13722_v42  ;;  %v14747_v42 = vld [vmem:[#allocation19 + $0x8] sm:$0xff]   ;;  %v14749_v46 = vld [vmem:[#allocation19] sm:$0xff]  }
 0x6c0   : > { %v3677_v48 = vpop.f32.mrf.mxu0 }
 0x6c1   : > { %v3689_v49 = vpack.c.bf16 %v3677_v48, %v3674_v44  ;;  %v14748_v44 = vld [vmem:[#allocation19 + $0x10] sm:$0xff]  }
 0x6c3   : > { %13726 = vmatprep.mubr.msk.bf16.mxu1 %vm3502_vm3, %v3689_v49 }
 0x6c4   : > { %13727 = vmatmul.mubr.msk.bf16.vlgmr.msra.gmra.mxu1 %vm3502_vm3, %v3690_v8 }
 0x6c5   : > { %13731 = vmatpush3.bf16.msra.mxu1 %v16651_v9  ;;  %13738 = vmatprep.mubr.msk.bf16.mxu1 %vm3361_vm2, %v14739_v0 }
 0x6c6   : > { %13732 = vmatprep.subr.bf16.mxu1 %v16653_v53 }
 0x6c9   : > { %13733 = vmatpush3.bf16.msra.mxu1 %v16653_v53 }
 0x6ca   : > { %13734 = vmatprep.subr.bf16.mxu1 %v16647_v51 }
 0x6cd   : > { %13735 = vmatpush3.bf16.msra.mxu1 %v16647_v51 }
 0x6ce   : > { %13736 = vmatprep.subr.bf16.mxu1 %v16665_v5 }
 0x6d1   : > { %13737 = vmatpush3.bf16.msra.mxu1 %v16665_v5 }
 0x6d2   : > { %13760 = vmatprep.subr.bf16.mxu1 %v14743_v6 }
 0x6d4   : > { %13739 = vmatmul.mubr.msk.bf16.vlgmr.msra.gmra.mxu1 %vm3361_vm2, %v14740_v43 }
 0x6d5   : > { %13761 = vmatpush3.bf16.msra.mxu1 %v14743_v6 }
 0x784   : > { %v13728_v39 = vpop.f32.mrf.mxu1 }
 0x785   : > { %v3757_v50 = vadd.f32 %v13728_v39, %v3613_v13 }
 0x786   : > { %v3740_v52 = vpop.f32.mrf.mxu1 }
 0x787   : > { %v3755_v54 = vadd.f32 %v3740_v52, %v3605_v40 }
 0x788   : > { %v13729_v7 = vpop.f32.mrf.mxu1 }
 0x789   : > { %v3758_v55 = vadd.f32 %v13729_v7, %v3616_v16  ;;  %v14745_v16 = vld [vmem:[#allocation17 + $0x8] sm:$0xff]   ;;  %v14750_v7 = vld [vmem:[#allocation17 + $0x10] sm:$0xff]  }
 0x78a   : > { %v3743_v57 = vpop.f32.mrf.mxu1 }
 0x78b   : > { %v3756_v24 = vadd.f32 %v3743_v57, %v3608_v20  ;;  %v14752_v57 = vld [vmem:[#allocation19 + $0x20] sm:$0xff]  }
 0x794   : > { %v13740_v59 = vpop.f32.mrf.mxu1 }
 0x796   : > { %v3814_v47 = vpop.f32.mrf.mxu1 }
 0x798   : > { %v13741_v61 = vpop.f32.mrf.mxu1 }
 0x799   : > { %v3830_v1 = vpack.c.bf16 %v13741_v61, %v13740_v59 }
 0x79a   : > { %v3817_v56 = vpop.f32.mrf.mxu1 }
 0x79b   : > { %v3829_v62 = vpack.c.bf16 %v3817_v56, %v3814_v47 }
 0x79d   : > { %13744 = vmatprep.mubr.msk.bf16.mxu0 %vm3502_vm3, %v3829_v62 }
 0x79e   : > { %13745 = vmatmul.mubr.msk.bf16.vlgmr.msra.gmra.mxu0 %vm3502_vm3, %v3830_v1 }
 0x79f   : > { %13749 = vmatpush3.bf16.msra.mxu0 %v16651_v9  ;;  %13756 = vmatprep.mubr.msk.bf16.mxu0 %vm3361_vm2, %v14741_v63 }
 0x7a0   : > { %13750 = vmatprep.subr.bf16.mxu0 %v16653_v53 }
 0x7a3   : > { %13751 = vmatpush3.bf16.msra.mxu0 %v16653_v53 }
 0x7a4   : > { %13752 = vmatprep.subr.bf16.mxu0 %v16647_v51 }
 0x7a7   : > { %13753 = vmatpush3.bf16.msra.mxu0 %v16647_v51 }
 0x7a8   : > { %13754 = vmatprep.subr.bf16.mxu0 %v16665_v5 }
 0x7ab   : > { %13755 = vmatpush3.bf16.msra.mxu0 %v16665_v5  ;;  %v15877_v5 = vmov 0.0  }
 0x7ac   : > { %13766 = vmatprep.subr.bf16.mxu1 %v15877_v5  ;;  %13774 = vmatprep.subr.bf16.mxu0 %v15877_v5 }
 0x7ae   : > { %13757 = vmatmul.mubr.msk.bf16.vlgmr.msra.gmra.mxu0 %vm3361_vm2, %v14742_v3 }
 0x7af   : > { %13778 = vmatprep.mubr.msk.bf16.mxu0 %vm15878_vm4, %v15877_v5 }
 0x85e   : > { %v13746_v9 = vpop.f32.mrf.mxu0 }
 0x85f   : > { %v3897_v36 = vadd.f32 %v13746_v9, %v3757_v50 }
 0x860   : > { %v3880_v45 = vpop.f32.mrf.mxu0 }
 0x861   : > { %v3895_v4 = vadd.f32 %v3880_v45, %v3755_v54 }
 0x862   : > { %v13747_v58 = vpop.f32.mrf.mxu0 }
 0x863   : > { %v3898_v53 = vadd.f32 %v13747_v58, %v3758_v55  ;;  %v14751_v55 = vld [vmem:[#allocation19 + $0x28] sm:$0xff]  }
 0x864   : > { %v3883_v60 = vpop.f32.mrf.mxu0 }
 0x865   : > { %v3896_v26 = vadd.f32 %v3883_v60, %v3756_v24  ;;  %v4411_v24 = vld [vmem:[#allocation22] sm:$0xf] }
 0x86e   : > { %v13758_v10 = vpop.f32.mrf.mxu0 }
 0x870   : > { %v3954_v12 = vpop.f32.mrf.mxu0 }
 0x872   : > { %v13759_v51 = vpop.f32.mrf.mxu0 }
 0x873   : > { %v3970_v18 = vpack.c.bf16 %v13759_v51, %v13758_v10 }
 0x874   : > { %v3957_v14 = vpop.f32.mrf.mxu0 }
 0x875   : > { %v3969_v15 = vpack.c.bf16 %v3957_v14, %v3954_v12  ;;  %v12604_v12 = vld [vmem:[#allocation20] ss:$0 sm:$0xff] }
 0x877   : > { %13762 = vmatprep.mubr.msk.bf16.mxu1 %vm3502_vm3, %v3969_v15 }
 0x878   : > { %13763 = vmatmul.mubr.msk.bf16.vlgmr.msra.gmra.mxu1 %vm3502_vm3, %v3970_v18 }
 0x879   : > { %13770 = vmatprep.mubr.msk.bf16.mxu1 %vm15878_vm4, %v15877_v5 }
 0x938   : > { %v13764_v19 = vpop.f32.mrf.mxu1 }
 0x939   : > { %v4037_v21 = vadd.f32 %v13764_v19, %v3897_v36 }
 0x93a   : > { %v4020_v23 = vpop.f32.mrf.mxu1 }
 0x93b   : > { %v4048_v27 = vadd.f32 %v12588_v22, %v4037_v21  ;;  %v4035_v28 = vadd.f32 %v4020_v23, %v3895_v4 }
 0x93c   : > { %v13765_v25 = vpop.f32.mrf.mxu1 }
 0x93d   : > { %v4038_v29 = vadd.f32 %v13765_v25, %v3898_v53  ;;  %v4052_v33 = vmax.f32 %v4048_v27, 0.0  ;;  %v4046_v34 = vadd.f32 %v12588_v22, %v4035_v28  ;;  %v4465_v25 = vld [vmem:[#allocation22 + $0x4] sm:$0xf]  ;;  %v14755_v28 = vld [vmem:[#allocation23 + $0x30] sm:$0xff]  }
 0x93e   : > { %v4023_v11 = vpop.f32.mrf.mxu1  ;;  %v14754_v27 = vld [vmem:[#allocation23 + $0x18] sm:$0xff]  }
 0x93f   : > { %v4049_v30 = vadd.f32 %v12588_v22, %v4038_v29  ;;  %v4036_v31 = vadd.f32 %v4023_v11, %v3896_v26  ;;  %v4050_v40 = vmax.f32 %v4046_v34, 0.0  ;;  %v14753_v26 = vld [vmem:[#allocation23 + $0x38] sm:$0xff]   ;;  %v14756_v29 = vld [vmem:[#allocation23 + $0x10] sm:$0xff]   ;;  %v14757_v11 = vld [vmem:[#allocation23 + $0x28] sm:$0xff]  }
 0x941   : > { %v4053_v35 = vmax.f32 %v4049_v30, 0.0  ;;  %v4047_v13 = vadd.f32 %v12588_v22, %v4036_v31  ;;  %v14758_v30 = vld [vmem:[#allocation23 + $0x8] sm:$0xff]   ;;  %v14759_v31 = vld [vmem:[#allocation23 + $0x20] sm:$0xff]  }
 0x943   : > { %v4055_v37 = vpack.c.bf16 %v4053_v35, %v4052_v33  ;;  %v4051_v38 = vmax.f32 %v4047_v13, 0.0  ;;  %v14760_v33 = vld [vmem:[#allocation23] sm:$0xff]  }
 0x945   : > { %13767 = vmatpush3.bf16.msra.mxu1 %v4055_v37  ;;  %13775 = vmatpush3.bf16.msra.mxu0 %v4055_v37  ;;  %v4054_v17 = vpack.c.bf16 %v4051_v38, %v4050_v40  ;;  %v14761_v38 = vld [vmem:[#allocation23 + $0x58] sm:$0xff]  }
 0x946   : > { %13768 = vmatprep.subr.bf16.mxu1 %v15877_v5  ;;  %13776 = vmatprep.subr.bf16.mxu0 %v15877_v5 }
 0x949   : > { %13769 = vmatpush3.bf16.msra.mxu1 %v4054_v17  ;;  %13777 = vmatpush3.bf16.msra.mxu0 %v4054_v17 }
 0x94a   : > { %13782 = vmatprep.subr.bf16.mxu1 %v15877_v5  ;;  %13790 = vmatprep.subr.bf16.mxu0 %v15877_v5 }
 0x94c   : > { %13771 = vmatmul.mubr.msk.bf16.vlgmr.msra.gmra.mxu1 %vm4063_vm5, %v14744_v32  ;;  %13779 = vmatmul.mubr.msk.bf16.vlgmr.msra.gmra.mxu0 %vm4063_vm5, %v14745_v16 }
 0x94d   : > { %13783 = vmatpush3.bf16.msra.mxu1 %v14746_v41  ;;  %13786 = vmatprep.mubr.msk.bf16.mxu1 %vm15878_vm4, %v15877_v5 }
 0x94e   : > { %13784 = vmatprep.subr.bf16.mxu1 %v15877_v5  ;;  %13794 = vmatprep.mubr.msk.bf16.mxu0 %vm15878_vm4, %v15877_v5 }
 0x94f   : > { %13791 = vmatpush3.bf16.msra.mxu0 %v14747_v42 }
 0x950   : > { %13792 = vmatprep.subr.bf16.mxu0 %v15877_v5 }
 0x951   : > { %13785 = vmatpush3.bf16.msra.mxu1 %v14748_v44  ;;  %v4654_v44 = vld [vmem:[#allocation22 + $0x8] sm:$0xf] }
 0x952   : > { %13798 = vmatprep.subr.bf16.mxu1 %v15877_v5 }
 0x953   : > { %13793 = vmatpush3.bf16.msra.mxu0 %v14749_v46  ;;  %v14762_v46 = vld [vmem:[#allocation23 + $0x50] sm:$0xff]  }
 0x954   : > { %13806 = vmatprep.subr.bf16.mxu0 %v15877_v5 }
 0xa0c   : > { %v4101_v48 = vpop.f32.mrf.mxu1  ;;  %v4158_v49 = vpop.f32.mrf.mxu0 }
 0xa0e   : > { %v13772_v0 = vpop.f32.mrf.mxu1  ;;  %v13780_v8 = vpop.f32.mrf.mxu0 }
 0xa0f   : > { %v4787_v0 = vld [vmem:[#allocation5 + $0x2] sm:$0x3] }
 0xa10   : > { %v4104_v43 = vpop.f32.mrf.mxu1  ;;  %v4161_v2 = vpop.f32.mrf.mxu0  ;;  %v16780_v8 = vpack.c.bf16 %v4787_v0, %v4787_v0  ;;  %v14776_v0 = vld [vmem:[#allocation8 + $0x58] sm:$0xff]  }
 0xa11   : > { %v4108_v39 = vpack.c.bf16 %v4104_v43, %v4101_v48  ;;  %v4165_v50 = vpack.c.bf16 %v4161_v2, %v4158_v49  ;;  %v14763_v48 = vld [vmem:[#allocation23 + $0x48] sm:$0xff]   ;;  %v14764_v49 = vld [vmem:[#allocation23 + $0x40] sm:$0xff]  }
 0xa12   : > { %v13781_v52 = vpop.f32.mrf.mxu0  ;;  %v13773_v54 = vpop.f32.mrf.mxu1  ;;  %v14765_v43 = vld [vmem:[#allocation8] sm:$0xff]   ;;  %v14767_v2 = vld [vmem:[#allocation8 + $0x8] sm:$0xff]  }
 0xa13   : > { %13787 = vmatmul.mubr.msk.bf16.vlgmr.msra.gmra.mxu1 %vm4063_vm5, %v4165_v50  ;;  %13795 = vmatmul.mubr.msk.bf16.vlgmr.msra.gmra.mxu0 %vm4063_vm5, %v4108_v39  ;;  %v14769_v39 = vld [vmem:[#allocation8 + $0x10] sm:$0xff]   ;;  %v14771_v50 = vld [vmem:[#allocation8 + $0x18] sm:$0xff]  }
 0xa14   : > { %13799 = vmatpush3.bf16.msra.mxu1 %v4055_v37  ;;  %13802 = vmatprep.mubr.msk.bf16.mxu1 %vm15878_vm4, %v15877_v5 }
 0xa15   : > { %13800 = vmatprep.subr.bf16.mxu1 %v15877_v5  ;;  %13810 = vmatprep.mubr.msk.bf16.mxu0 %vm15878_vm4, %v15877_v5 }
 0xa16   : > { %13807 = vmatpush3.bf16.msra.mxu0 %v14751_v55 }
 0xa17   : > { %13808 = vmatprep.subr.bf16.mxu0 %v15877_v5 }
 0xa18   : > { %13801 = vmatpush3.bf16.msra.mxu1 %v4054_v17 }
 0xa19   : > { %13814 = vmatprep.subr.bf16.mxu1 %v15877_v5 }
 0xa1a   : > { %13809 = vmatpush3.bf16.msra.mxu0 %v14752_v57 }
 0xa1b   : > { %13803 = vmatmul.mubr.msk.bf16.vlgmr.msra.gmra.mxu1 %vm4063_vm5, %v14750_v7  ;;  %13820 = vmatprep.subr.bf16.mxu0 %v15877_v5 }
 0xa1c   : > { %13816 = vmatprep.mubr.msk.bf16.mxu1 %vm15878_vm4, %v15877_v5 }
 0xad3   : > { %v4220_v59 = vpop.f32.mrf.mxu1  ;;  %v4276_v47 = vpop.f32.mrf.mxu0 }
 0xad4   : > { %v4277_v61 = vadd.f32 %v4276_v47, %v4220_v59 }
 0xad5   : > { %v13788_v56 = vpop.f32.mrf.mxu1  ;;  %v13796_v62 = vpop.f32.mrf.mxu0 }
 0xad7   : > { %v4223_v63 = vpop.f32.mrf.mxu1  ;;  %v4279_v1 = vpop.f32.mrf.mxu0 }
 0xad8   : > { %v4280_v3 = vadd.f32 %v4279_v1, %v4223_v63  ;;  %v14766_v63 = vld [vmem:[#allocation8 + $0x20] sm:$0xff]  }
 0xad9   : > { %v13789_v6 = vpop.f32.mrf.mxu1  ;;  %v13797_v9 = vpop.f32.mrf.mxu0 }
 0xadb   : > { %v4328_v36 = vpop.f32.mrf.mxu1 }
 0xadd   : > { %v13804_v45 = vpop.f32.mrf.mxu1 }
 0xade   : > { %v14770_v45 = vld [vmem:[#allocation8 + $0x30] sm:$0xff]  }
 0xadf   : > { %v4331_v4 = vpop.f32.mrf.mxu1 }
 0xae0   : > { %v4335_v58 = vpack.c.bf16 %v4331_v4, %v4328_v36  ;;  %v14768_v36 = vld [vmem:[#allocation8 + $0x28] sm:$0xff]   ;;  %v14772_v4 = vld [vmem:[#allocation8 + $0x38] sm:$0xff]  }
 0xae1   : > { %v13805_v53 = vpop.f32.mrf.mxu1 }
 0xae2   : > { %13811 = vmatmul.mubr.msk.bf16.vlgmr.msra.gmra.mxu0 %vm4063_vm5, %v4335_v58  ;;  %v4992_v58 = vld [vmem:[#allocation10 + $0x1] sm:$0x1] }
 0xae3   : > { %13822 = vmatprep.mubr.msk.bf16.mxu0 %vm15878_vm4, %v15877_v5  ;;  %v5006_v53 = vsel %vm2211_vm0, %v4992_v58, 0 }
 0xba2   : > { %v4390_v60 = vpop.f32.mrf.mxu0 }
 0xba3   : > { %v4397_v10 = vadd.f32 %v4390_v60, %v4277_v61 }
 0xba4   : > { %v13812_v51 = vpop.f32.mrf.mxu0 }
 0xba5   : > { %v4406_v15 = vadd.f32 %v12604_v12, %v4397_v10  ;;  %v4890_v51 = vld [vmem:[#allocation10] sm:$0x1] }
 0xba6   : > { %v4393_v14 = vpop.f32.mrf.mxu0 }
 0xba7   : > { %v4398_v18 = vadd.f32 %v4393_v14, %v4280_v3  ;;  %v4408_v21 = vmax.f32 %v4406_v15, 0.0 }
 0xba8   : > { %v13813_v19 = vpop.f32.mrf.mxu0 }
 0xba9   : > { %v4407_v20 = vadd.f32 %v12604_v12, %v4398_v18  ;;  %v5086_v18 = vsel %vm2211_vm0, %v4890_v51, 0 }
 0xbab   : > { %v4409_v22 = vmax.f32 %v4407_v20, 0.0 }
 0xbad   : > { %v4410_v23 = vpack.c.bf16 %v4409_v22, %v4408_v21 }
 0xbaf   : > { %13815 = vmatpush3.bf16.msra.mxu1 %v4410_v23  ;;  %13821 = vmatpush3.bf16.msra.mxu0 %v4410_v23 }
 0xbb0   : > { %13826 = vmatprep.subr.bf16.mxu1 %v15877_v5  ;;  %13838 = vmatprep.subr.bf16.mxu0 %v15877_v5 }
 0xbb2   : > { %13817 = vmatmul.mubr.msk.bf16.vlgmr.msra.gmra.mxu1 %vm3502_vm3, %v4411_v24  ;;  %13823 = vmatmul.mubr.msk.bf16.vlgmr.msra.gmra.mxu0 %vm3502_vm3, %v4465_v25 }
 0xbb3   : > { %13827 = vmatpush3.bf16.msra.mxu1 %v14753_v26  ;;  %13839 = vmatpush3.bf16.msra.mxu0 %v14754_v27  ;;  %v12623_v27 = vld [vmem:[#allocation25] ss:$0 sm:$0xff] }
 0xbb4   : > { %13828 = vmatprep.subr.bf16.mxu1 %v15877_v5  ;;  %13840 = vmatprep.subr.bf16.mxu0 %v15877_v5 }
 0xbb5   : > { %13834 = vmatprep.mubr.msk.bf16.mxu1 %vm15878_vm4, %v15877_v5  ;;  %13846 = vmatprep.mubr.msk.bf16.mxu0 %vm15878_vm4, %v15877_v5 }
 0xbb7   : > { %13829 = vmatpush3.bf16.msra.mxu1 %v14755_v28  ;;  %13841 = vmatpush3.bf16.msra.mxu0 %v14756_v29 }
 0xbb8   : > { %13830 = vmatprep.subr.bf16.mxu1 %v15877_v5  ;;  %13842 = vmatprep.subr.bf16.mxu0 %v15877_v5 }
 0xbbb   : > { %13831 = vmatpush3.bf16.msra.mxu1 %v14757_v11  ;;  %13843 = vmatpush3.bf16.msra.mxu0 %v14758_v30 }
 0xbbc   : > { %13832 = vmatprep.subr.bf16.mxu1 %v15877_v5  ;;  %13844 = vmatprep.subr.bf16.mxu0 %v15877_v5 }
 0xbbf   : > { %13833 = vmatpush3.bf16.msra.mxu1 %v14759_v31  ;;  %13845 = vmatpush3.bf16.msra.mxu0 %v14760_v33 }
 0xbc0   : > { %13850 = vmatprep.subr.bf16.mxu1 %v15877_v5  ;;  %13856 = vmatprep.subr.bf16.mxu0 %v15877_v5 }
 0xc72   : > { %v4449_v34 = vpop.f32.mrf.mxu1  ;;  %v4503_v35 = vpop.f32.mrf.mxu0 }
 0xc73   : > { %v4455_v13 = vpack.c.bf16 %v4449_v34, %v4449_v34  ;;  %v4509_v37 = vpack.c.bf16 %v4503_v35, %v4503_v35 }
 0xc74   : > { %v13824_v40 = vpop.f32.mrf.mxu0  ;;  %v13818_v17 = vpop.f32.mrf.mxu1 }
 0xc75   : > { %13835 = vmatmul.mubr.msk.bf16.vlgmr.msra.gmra.mxu1 %vm3361_vm2, %v4509_v37  ;;  %13847 = vmatmul.mubr.msk.bf16.vlgmr.msra.gmra.mxu0 %vm3361_vm2, %v4455_v13 }
 0xc76   : > { %13851 = vmatpush3.bf16.msra.mxu1 %v4410_v23  ;;  %v4506_v32 = vpop.f32.mrf.mxu0  ;;  %13852 = vmatprep.mubr.msk.bf16.mxu1 %vm15878_vm4, %v15877_v5  ;;  %v4452_v16 = vpop.f32.mrf.mxu1 }
 0xc77   : > { %13857 = vmatpush3.bf16.msra.mxu0 %v14761_v38  ;;  %13864 = vmatprep.mubr.msk.bf16.mxu0 %vm15878_vm4, %v15877_v5 }
 0xc78   : > { %v13825_v41 = vpop.f32.mrf.mxu0  ;;  %v13819_v42 = vpop.f32.mrf.mxu1  ;;  %13858 = vmatprep.subr.bf16.mxu0 %v15877_v5  ;;  %13868 = vmatprep.subr.bf16.mxu1 %v16780_v8 }
 0xc7b   : > { %13859 = vmatpush3.bf16.msra.mxu0 %v14762_v46 }
 0xc7c   : > { %13860 = vmatprep.subr.bf16.mxu0 %v15877_v5 }
 0xc7d   : > { %13853 = vmatmul.mubr.msk.bf16.vlgmr.msra.gmra.mxu1 %vm3502_vm3, %v4654_v44  ;;  %v14773_v44 = vld [vmem:[#allocation8 + $0x40] sm:$0xff]  }
 0xc7e   : > { %13869 = vmatpush3.bf16.xpose.msra.mxu1 %v16780_v8  ;;  %13870 = vmatprep.mubr.bf16.mxu1 %v14765_v43  ;;  %v14777_v43 = vld [vmem:[#allocation8 + $0x60] sm:$0xff]  }
 0xc7f   : > { %13861 = vmatpush3.bf16.msra.mxu0 %v14763_v48  ;;  %14380 = vmatprep.subr.msk.bf16.mxu1 %vm2211_vm0, %v4992_v58  ;;  %v14774_v48 = vld [vmem:[#allocation8 + $0x48] sm:$0xff]  }
 0xc80   : > { %13862 = vmatprep.subr.bf16.mxu0 %v15877_v5 }
 0xc83   : > { %13863 = vmatpush3.bf16.msra.mxu0 %v14764_v49  ;;  %v14775_v49 = vld [vmem:[#allocation8 + $0x50] sm:$0xff]  }
 0xc84   : > { %13878 = vmatprep.subr.bf16.mxu0 %v16780_v8 }
 0xc85   : > { %13871 = vmatmul.mubr.bf16.vlgmr.msra.gmra.mxu1 %v14767_v2  ;;  %v14778_v2 = vld [vmem:[#allocation8 + $0x68] sm:$0xff]  }
 0xc86   : > { %13874 = vmatprep.mubr.bf16.mxu1 %v14769_v39  ;;  %13889 = vmatpush3.bf16.msra.mxu1 %v5006_v53  ;;  %v14779_v39 = vld [vmem:[#allocation8 + $0x70] sm:$0xff]  }
 0xc87   : > { %13908 = vmatprep.subr.bf16.mxu1 %v16780_v8 }
 0xc8d   : > { %13875 = vmatmul.mubr.bf16.gmra.mxu1 %v14771_v50  ;;  %v14780_v50 = vld [vmem:[#allocation8 + $0x78] sm:$0xff]  }
 0xd35   : > { %v4580_v52 = vpop.f32.mrf.mxu1  ;;  %v4647_v54 = vpop.f32.mrf.mxu0 }
 0xd36   : > { %v4648_v7 = vadd.f32 %v4647_v54, %v4580_v52  ;;  %v14781_v52 = vld [vmem:[#allocation8 + $0x80] sm:$0xff]   ;;  %v14782_v54 = vld [vmem:[#allocation8 + $0x88] sm:$0xff]  }
 0xd37   : > { %v13836_v55 = vpop.f32.mrf.mxu1  ;;  %v13848_v57 = vpop.f32.mrf.mxu0 }
 0xd38   : > { %v14784_v55 = vld [vmem:[#allocation8 + $0x98] sm:$0xff]   ;;  %v14785_v57 = vld [vmem:[#allocation8 + $0xa0] sm:$0xff]  }
 0xd39   : > { %v4583_v59 = vpop.f32.mrf.mxu1  ;;  %v4650_v47 = vpop.f32.mrf.mxu0 }
 0xd3a   : > { %v14786_v59 = vld [vmem:[#allocation8 + $0xa8] sm:$0xff]   ;;  %v14787_v47 = vld [vmem:[#allocation8 + $0xb0] sm:$0xff]  }
 0xd3b   : > { %v13837_v61 = vpop.f32.mrf.mxu1  ;;  %v13849_v56 = vpop.f32.mrf.mxu0 }
 0xd3c   : > { %v14788_v61 = vld [vmem:[#allocation8 + $0xb8] sm:$0xff]   ;;  %v14789_v56 = vld [vmem:[#allocation8 + $0xc0] sm:$0xff]  }
 0xd3d   : > { %v4692_v62 = vpop.f32.mrf.mxu1 }
 0xd3e   : > { %v4698_v1 = vpack.c.bf16 %v4692_v62, %v4692_v62  ;;  %v14790_v62 = vld [vmem:[#allocation8 + $0xc8] sm:$0xff]  }
 0xd3f   : > { %v13854_v3 = vpop.f32.mrf.mxu1 }
 0xd40   : > { %13865 = vmatmul.mubr.msk.bf16.vlgmr.msra.gmra.mxu0 %vm3361_vm2, %v4698_v1  ;;  %v5254_v1 = vld [vmem:[#allocation10 + $0x2] sm:$0x1] }
 0xd41   : > { %v4695_v6 = vpop.f32.mrf.mxu1  ;;  %13879 = vmatpush3.bf16.xpose.msra.mxu0 %v16780_v8  ;;  %13880 = vmatprep.mubr.bf16.mxu0 %v14766_v63  ;;  %v14791_v63 = vld [vmem:[#allocation8 + $0xd0] sm:$0xff]   ;;  %v5268_v3 = vsel %vm2211_vm0, %v5254_v1, 0 }
 0xd42   : > { %14381 = vmatprep.subr.msk.bf16.mxu0 %vm2211_vm0, %v4890_v51  ;;  %v14792_v6 = vld [vmem:[#allocation8 + $0xd8] sm:$0xff]  }
 0xd43   : > { %v13855_v9 = vpop.f32.mrf.mxu1 }
 0xd44   : > { %v5444_v9 = vld [vmem:[#allocation10 + $0x3] sm:$0x1] }
 0xd45   : > { %v13872_v60 = vpop.f32.mrf.mxu1 }
 0xd47   : > { %v4855_v10 = vpop.f32.mrf.mxu1 }
 0xd48   : > { %13881 = vmatmul.mubr.bf16.vlgmr.msra.gmra.mxu0 %v14768_v36 }
 0xd49   : > { %13884 = vmatprep.mubr.bf16.mxu0 %v14770_v45  ;;  %v13873_v12 = vpop.f32.mrf.mxu1  ;;  %13899 = vmatpush3.bf16.msra.mxu0 %v5086_v18 }
 0xd4a   : > { %v4887_v14 = vpack.c.bf16 %v13873_v12, %v13872_v60  ;;  %14382 = vmatprep.subr.msk.bf16.mxu0 %vm2211_vm0, %v5254_v1 }
 0xd4b   : > { %v4858_v15 = vpop.f32.mrf.mxu1 }
 0xd4c   : > { %v4886_v19 = vpack.c.bf16 %v4858_v15, %v4855_v10 }
 0xd4d   : > { %v13876_v20 = vpop.f32.mrf.mxu1 }
 0xd4f   : > { %v4871_v21 = vpop.f32.mrf.mxu1 }
 0xd50   : > { %13885 = vmatmul.mubr.bf16.gmra.mxu0 %v14772_v4 }
 0xd51   : > { %13900 = vmatprep.mubr.msk.bf16.mxu0 %vm2198_vm1, %v4886_v19  ;;  %v13877_v22 = vpop.f32.mrf.mxu1 }
 0xd52   : > { %v4889_v23 = vpack.c.bf16 %v13877_v22, %v13876_v20  ;;  %v5634_v22 = vld [vmem:[#allocation10 + $0x4] sm:$0x1] }
 0xd53   : > { %v4874_v24 = vpop.f32.mrf.mxu1 }
 0xd54   : > { %v4888_v25 = vpack.c.bf16 %v4874_v24, %v4871_v21  ;;  %v5458_v21 = vsel %vm2211_vm0, %v5444_v9, 0 }
 0xd58   : > { %13901 = vmatmul.mubr.msk.bf16.vlgmr.msra.gmra.mxu0 %vm2198_vm1, %v4887_v14 }
 0xd59   : > { %13904 = vmatprep.mubr.msk.bf16.mxu0 %vm2198_vm1, %v4888_v25  ;;  %13919 = vmatpush3.bf16.msra.mxu0 %v5268_v3 }
 0xd5a   : > { %14383 = vmatprep.subr.msk.bf16.mxu0 %vm2211_vm0, %v5444_v9 }
 0xd60   : > { %13905 = vmatmul.mubr.msk.bf16.gmra.mxu0 %vm2198_vm1, %v4889_v23 }
 0xe00   : > { %v4769_v26 = vpop.f32.mrf.mxu0 }
 0xe01   : > { %v4775_v28 = vadd.f32 %v4769_v26, %v4648_v7  ;;  %v14783_v7 = vld [vmem:[#allocation8 + $0x90] sm:$0xff]  }
 0xe02   : > { %v13866_v29 = vpop.f32.mrf.mxu0 }
 0xe03   : > { %v4783_v11 = vadd.f32 %v12623_v27, %v4775_v28 }
 0xe04   : > { %v4772_v30 = vpop.f32.mrf.mxu0 }
 0xe05   : > { %v4784_v31 = vmax.f32 %v4783_v11, 0.0 }
 0xe06   : > { %v13867_v33 = vpop.f32.mrf.mxu0 }
 0xe07   : > { %4785 = vst [vmem:[#allocation2] sm:$0xff] %v4784_v31 }
 0xe08   : > { %v13882_v34 = vpop.f32.mrf.mxu0 }
 0xe0a   : > { %v4957_v35 = vpop.f32.mrf.mxu0 }
 0xe0c   : > { %v13883_v13 = vpop.f32.mrf.mxu0 }
 0xe0d   : > { %v4989_v40 = vpack.c.bf16 %v13883_v13, %v13882_v34  ;;  %v5824_v13 = vld [vmem:[#allocation10 + $0x5] sm:$0x1] }
 0xe0e   : > { %v4960_v37 = vpop.f32.mrf.mxu0 }
 0xe0f   : > { %v4988_v38 = vpack.c.bf16 %v4960_v37, %v4957_v35  ;;  %v5648_v35 = vsel %vm2211_vm0, %v5634_v22, 0 }
 0xe10   : > { %v13886_v17 = vpop.f32.mrf.mxu0 }
 0xe11   : > { %13890 = vmatprep.mubr.msk.bf16.mxu1 %vm2198_vm1, %v4988_v38 }
 0xe12   : > { %v4973_v32 = vpop.f32.mrf.mxu0  ;;  %13891 = vmatmul.mubr.msk.bf16.vlgmr.msra.gmra.mxu1 %vm2198_vm1, %v4989_v40 }
 0xe13   : > { %13909 = vmatpush3.bf16.xpose.msra.mxu1 %v16780_v8 }
 0xe14   : > { %v13887_v16 = vpop.f32.mrf.mxu0  ;;  %13928 = vmatprep.subr.bf16.mxu1 %v16780_v8 }
 0xe15   : > { %v4991_v46 = vpack.c.bf16 %v13887_v16, %v13886_v17 }
 0xe16   : > { %v4976_v41 = vpop.f32.mrf.mxu0 }
 0xe17   : > { %v4990_v42 = vpack.c.bf16 %v4976_v41, %v4973_v32 }
 0xe19   : > { %13894 = vmatprep.mubr.msk.bf16.mxu1 %vm2198_vm1, %v4990_v42 }
 0xe1a   : > { %13895 = vmatmul.mubr.msk.bf16.gmra.mxu1 %vm2198_vm1, %v4991_v46 }
 0xe1b   : > { %13910 = vmatprep.mubr.bf16.mxu1 %v14773_v44 }
 0xe22   : > { %13911 = vmatmul.mubr.bf16.vlgmr.msra.gmra.mxu1 %v14774_v48 }
 0xe23   : > { %13929 = vmatpush3.bf16.xpose.msra.mxu1 %v16780_v8  ;;  %13914 = vmatprep.mubr.bf16.mxu1 %v14775_v49 }
 0xe24   : > { %13948 = vmatprep.subr.bf16.mxu1 %v16780_v8 }
 0xe2a   : > { %13915 = vmatmul.mubr.bf16.gmra.mxu1 %v14776_v0  ;;  %v5838_v0 = vsel %vm2211_vm0, %v5824_v13, 0 }
 0xe2b   : > { %13930 = vmatprep.mubr.bf16.mxu1 %v14777_v43  ;;  %v6014_v43 = vld [vmem:[#allocation10 + $0x6] sm:$0x1] }
 0xe32   : > { %13931 = vmatmul.mubr.bf16.vlgmr.msra.gmra.mxu1 %v14778_v2 }
 0xe33   : > { %13949 = vmatpush3.bf16.xpose.msra.mxu1 %v16780_v8  ;;  %13934 = vmatprep.mubr.bf16.mxu1 %v14779_v39 }
 0xe34   : > { %13968 = vmatprep.subr.bf16.mxu1 %v16780_v8 }
 0xe3a   : > { %13935 = vmatmul.mubr.bf16.gmra.mxu1 %v14780_v50 }
 0xe3b   : > { %13950 = vmatprep.mubr.bf16.mxu1 %v14781_v52 }
 0xe42   : > { %13951 = vmatmul.mubr.bf16.vlgmr.msra.gmra.mxu1 %v14782_v54 }
 0xe43   : > { %13969 = vmatpush3.bf16.xpose.msra.mxu1 %v16780_v8  ;;  %13954 = vmatprep.mubr.bf16.mxu1 %v14783_v7 }
 0xe44   : > { %13988 = vmatprep.subr.bf16.mxu1 %v16780_v8 }
 0xe4a   : > { %13955 = vmatmul.mubr.bf16.gmra.mxu1 %v14784_v55 }
 0xe4b   : > { %13970 = vmatprep.mubr.bf16.mxu1 %v14785_v57 }
 0xe52   : > { %13971 = vmatmul.mubr.bf16.vlgmr.msra.gmra.mxu1 %v14786_v59 }
 0xe53   : > { %13989 = vmatpush3.bf16.xpose.msra.mxu1 %v16780_v8  ;;  %13974 = vmatprep.mubr.bf16.mxu1 %v14787_v47 }
 0xe5a   : > { %13975 = vmatmul.mubr.bf16.gmra.mxu1 %v14788_v61 }
 0xe5b   : > { %13990 = vmatprep.mubr.bf16.mxu1 %v14789_v56 }
 0xe62   : > { %13991 = vmatmul.mubr.bf16.vlgmr.msra.gmra.mxu1 %v14790_v62  ;;  %v6028_v62 = vsel %vm2211_vm0, %v6014_v43, 0 }
 0xe63   : > { %13994 = vmatprep.mubr.bf16.mxu1 %v14791_v63 }
 0xe6a   : > { %13995 = vmatmul.mubr.bf16.gmra.mxu1 %v14792_v6 }
 0xed2   : > { %v16812_v8 = vpop.f32.mrf.mxu1 }
 0xed4   : > { %v16814_v36 = vpop.f32.mrf.mxu1 }
 0xed6   : > { %v16816_v45 = vpop.f32.mrf.mxu1 }
 0xed8   : > { %v16818_v4 = vpop.f32.mrf.mxu1 }
 0xeda   : > { %v16820_v58 = vpop.f32.mrf.mxu1 }
 0xedc   : > { %v16822_v53 = vpop.f32.mrf.mxu1 }
 0xede   : > { %v16824_v60 = vpop.f32.mrf.mxu1 }
 0xee0   : > { %v16826_v10 = vpop.f32.mrf.mxu1 }
 0xee2   : > { %v13912_v12 = vpop.f32.mrf.mxu1 }
 0xee4   : > { %v5219_v51 = vpop.f32.mrf.mxu1 }
 0xee6   : > { %v13913_v14 = vpop.f32.mrf.mxu1 }
 0xee7   : > { %v5251_v19 = vpack.c.bf16 %v13913_v14, %v13912_v12 }
 0xee8   : > { %v5222_v15 = vpop.f32.mrf.mxu1 }
 0xee9   : > { %v5250_v18 = vpack.c.bf16 %v5222_v15, %v5219_v51 }
 0xeea   : > { %v13916_v20 = vpop.f32.mrf.mxu1 }
 0xeeb   : > { %13920 = vmatprep.mubr.msk.bf16.mxu0 %vm2198_vm1, %v5250_v18 }
 0xeec   : > { %v5235_v23 = vpop.f32.mrf.mxu1  ;;  %13921 = vmatmul.mubr.msk.bf16.vlgmr.msra.gmra.mxu0 %vm2198_vm1, %v5251_v19 }
 0xeed   : > { %13939 = vmatpush3.bf16.msra.mxu0 %v5458_v21 }
 0xeee   : > { %v13917_v24 = vpop.f32.mrf.mxu1  ;;  %14384 = vmatprep.subr.msk.bf16.mxu0 %vm2211_vm0, %v5634_v22 }
 0xeef   : > { %v5253_v27 = vpack.c.bf16 %v13917_v24, %v13916_v20 }
 0xef0   : > { %v5238_v25 = vpop.f32.mrf.mxu1 }
 0xef1   : > { %v5252_v26 = vpack.c.bf16 %v5238_v25, %v5235_v23 }
 0xef2   : > { %v13932_v28 = vpop.f32.mrf.mxu1 }
 0xef3   : > { %13924 = vmatprep.mubr.msk.bf16.mxu0 %vm2198_vm1, %v5252_v26  ;;  %v13902_v26 = vpop.f32.mrf.mxu0 }
 0xef4   : > { %13925 = vmatmul.mubr.msk.bf16.gmra.mxu0 %vm2198_vm1, %v5253_v27  ;;  %v5409_v29 = vpop.f32.mrf.mxu1  ;;  %v14793_v27 = vld [vmem:[#allocation13 + $0x10] sm:$0xff]  }
 0xef6   : > { %v13933_v11 = vpop.f32.mrf.mxu1 }
 0xef7   : > { %v5441_v33 = vpack.c.bf16 %v13933_v11, %v13932_v28  ;;  %v14795_v28 = vld [vmem:[#allocation13] sm:$0xff]  }
 0xef8   : > { %v5412_v30 = vpop.f32.mrf.mxu1  ;;  %14016 = vmatprep.mubr.msk.bf16.mxu1 %vm3361_vm2, %v14795_v28 }
 0xef9   : > { %v5440_v31 = vpack.c.bf16 %v5412_v30, %v5409_v29  ;;  %v5122_v29 = vpop.f32.mrf.mxu0 }
 0xefa   : > { %v13936_v34 = vpop.f32.mrf.mxu1 }
 0xefb   : > { %13940 = vmatprep.mubr.msk.bf16.mxu0 %vm2198_vm1, %v5440_v31  ;;  %v13903_v11 = vpop.f32.mrf.mxu0 }
 0xefc   : > { %v5425_v37 = vpop.f32.mrf.mxu1  ;;  %13941 = vmatmul.mubr.msk.bf16.vlgmr.msra.gmra.mxu0 %vm2198_vm1, %v5441_v33 }
 0xefd   : > { %13959 = vmatpush3.bf16.msra.mxu0 %v5648_v35  ;;  %v5125_v30 = vpop.f32.mrf.mxu0 }
 0xefe   : > { %v13937_v38 = vpop.f32.mrf.mxu1  ;;  %14385 = vmatprep.subr.msk.bf16.mxu0 %vm2211_vm0, %v5824_v13  ;;  %v5131_v13 = vadd.f32 %v13902_v26, %v16812_v8 }
 0xeff   : > { %v5443_v32 = vpack.c.bf16 %v13937_v38, %v13936_v34  ;;  %v13906_v31 = vpop.f32.mrf.mxu0  ;;  %v5123_v38 = vadd.f32 %v5122_v29, %v16814_v36 }
 0xf00   : > { %v5428_v40 = vpop.f32.mrf.mxu1 }
 0xf01   : > { %v5442_v17 = vpack.c.bf16 %v5428_v40, %v5425_v37  ;;  %v5138_v33 = vpop.f32.mrf.mxu0 }
 0xf02   : > { %v13952_v16 = vpop.f32.mrf.mxu1 }
 0xf03   : > { %13944 = vmatprep.mubr.msk.bf16.mxu0 %vm2198_vm1, %v5442_v17  ;;  %v13907_v34 = vpop.f32.mrf.mxu0 }
 0xf04   : > { %13945 = vmatmul.mubr.msk.bf16.gmra.mxu0 %vm2198_vm1, %v5443_v32  ;;  %v5599_v41 = vpop.f32.mrf.mxu1  ;;  %v5134_v32 = vadd.f32 %v13903_v11, %v16816_v45 }
 0xf05   : > { %v16857_v35 = vpop.f32.mrf.mxu0 }
 0xf06   : > { %v13953_v42 = vpop.f32.mrf.mxu1 }
 0xf07   : > { %v5631_v48 = vpack.c.bf16 %v13953_v42, %v13952_v16  ;;  %v5126_v42 = vadd.f32 %v5125_v30, %v16818_v4  ;;  %v5150_v30 = vadd.f32 %v13907_v34, %v16824_v60 }
 0xf08   : > { %v5602_v44 = vpop.f32.mrf.mxu1 }
 0xf09   : > { %v5630_v46 = vpack.c.bf16 %v5602_v44, %v5599_v41 }
 0xf0a   : > { %v13956_v49 = vpop.f32.mrf.mxu1 }
 0xf0b   : > { %13960 = vmatprep.mubr.msk.bf16.mxu0 %vm2198_vm1, %v5630_v46 }
 0xf0c   : > { %v5615_v2 = vpop.f32.mrf.mxu1  ;;  %13961 = vmatmul.mubr.msk.bf16.vlgmr.msra.gmra.mxu0 %vm2198_vm1, %v5631_v48 }
 0xf0d   : > { %13979 = vmatpush3.bf16.msra.mxu0 %v5838_v0 }
 0xf0e   : > { %v13957_v39 = vpop.f32.mrf.mxu1  ;;  %14386 = vmatprep.subr.msk.bf16.mxu0 %vm2211_vm0, %v6014_v43 }
 0xf0f   : > { %v5633_v54 = vpack.c.bf16 %v13957_v39, %v13956_v49 }
 0xf10   : > { %v5618_v50 = vpop.f32.mrf.mxu1 }
 0xf11   : > { %v5632_v52 = vpack.c.bf16 %v5618_v50, %v5615_v2 }
 0xf12   : > { %v13972_v7 = vpop.f32.mrf.mxu1 }
 0xf13   : > { %13964 = vmatprep.mubr.msk.bf16.mxu0 %vm2198_vm1, %v5632_v52 }
 0xf14   : > { %13965 = vmatmul.mubr.msk.bf16.gmra.mxu0 %vm2198_vm1, %v5633_v54  ;;  %v5789_v55 = vpop.f32.mrf.mxu1 }
 0xf16   : > { %v13973_v57 = vpop.f32.mrf.mxu1 }
 0xf17   : > { %v5821_v61 = vpack.c.bf16 %v13973_v57, %v13972_v7 }
 0xf18   : > { %v5792_v59 = vpop.f32.mrf.mxu1 }
 0xf19   : > { %v5820_v47 = vpack.c.bf16 %v5792_v59, %v5789_v55 }
 0xf1a   : > { %v13976_v56 = vpop.f32.mrf.mxu1 }
 0xf1b   : > { %13980 = vmatprep.mubr.msk.bf16.mxu0 %vm2198_vm1, %v5820_v47 }
 0xf1c   : > { %v5805_v63 = vpop.f32.mrf.mxu1  ;;  %13981 = vmatmul.mubr.msk.bf16.vlgmr.msra.gmra.mxu0 %vm2198_vm1, %v5821_v61 }
 0xf1d   : > { %13999 = vmatpush3.bf16.msra.mxu0 %v6028_v62 }
 0xf1e   : > { %v13977_v1 = vpop.f32.mrf.mxu1 }
 0xf1f   : > { %v5823_v9 = vpack.c.bf16 %v13977_v1, %v13976_v56 }
 0xf20   : > { %v5808_v3 = vpop.f32.mrf.mxu1 }
 0xf21   : > { %v5822_v6 = vpack.c.bf16 %v5808_v3, %v5805_v63 }
 0xf22   : > { %v13992_v12 = vpop.f32.mrf.mxu1 }
 0xf23   : > { %13984 = vmatprep.mubr.msk.bf16.mxu0 %vm2198_vm1, %v5822_v6 }
 0xf24   : > { %13985 = vmatmul.mubr.msk.bf16.gmra.mxu0 %vm2198_vm1, %v5823_v9  ;;  %v5979_v51 = vpop.f32.mrf.mxu1 }
 0xf26   : > { %v13993_v14 = vpop.f32.mrf.mxu1 }
 0xf27   : > { %v6011_v19 = vpack.c.bf16 %v13993_v14, %v13992_v12 }
 0xf28   : > { %v5982_v15 = vpop.f32.mrf.mxu1 }
 0xf29   : > { %v6010_v18 = vpack.c.bf16 %v5982_v15, %v5979_v51 }
 0xf2a   : > { %v13996_v20 = vpop.f32.mrf.mxu1 }
 0xf2b   : > { %14000 = vmatprep.mubr.msk.bf16.mxu0 %vm2198_vm1, %v6010_v18 }
 0xf2c   : > { %v5995_v21 = vpop.f32.mrf.mxu1  ;;  %14001 = vmatmul.mubr.msk.bf16.vlgmr.msra.gmra.mxu0 %vm2198_vm1, %v6011_v19  ;;  %v5147_v19 = vadd.f32 %v13906_v31, %v16820_v58 }
 0xf2e   : > { %v13997_v22 = vpop.f32.mrf.mxu1 }
 0xf2f   : > { %v6013_v25 = vpack.c.bf16 %v13997_v22, %v13996_v20 }
 0xf30   : > { %v5998_v23 = vpop.f32.mrf.mxu1 }
 0xf31   : > { %v6012_v24 = vpack.c.bf16 %v5998_v23, %v5995_v21 }
 0xf33   : > { %14004 = vmatprep.mubr.msk.bf16.mxu0 %vm2198_vm1, %v6012_v24  ;;  %v5139_v24 = vadd.f32 %v5138_v33, %v16822_v53 }
 0xf34   : > { %14005 = vmatmul.mubr.msk.bf16.gmra.mxu0 %vm2198_vm1, %v6013_v25 }
 0xf35   : > { %14028 = vmatprep.mubr.msk.bf16.mxu0 %vm3361_vm2, %v14793_v27 }
 0xfac   : > { %v13922_v37 = vpop.f32.mrf.mxu0 }
 0xfad   : > { %v5337_v40 = vadd.f32 %v13922_v37, %v5131_v13  ;;  %v12680_v37 = vld [vmem:[#allocation11] ss:$0 sm:$0xff] }
 0xfae   : > { %v5304_v17 = vpop.f32.mrf.mxu0 }
 0xfaf   : > { %v5335_v16 = vadd.f32 %v5304_v17, %v5123_v38 }
 0xfb0   : > { %v13923_v41 = vpop.f32.mrf.mxu0 }
 0xfb1   : > { %v5338_v44 = vadd.f32 %v13923_v41, %v5134_v32  ;;  %v5142_v32 = vadd.f32 %v16857_v35, %v16826_v10 }
 0xfb2   : > { %v5307_v46 = vpop.f32.mrf.mxu0 }
 0xfb3   : > { %v5336_v48 = vadd.f32 %v5307_v46, %v5126_v42 }
 0xfb4   : > { %v13926_v49 = vpop.f32.mrf.mxu0 }
 0xfb5   : > { %v5341_v25 = vadd.f32 %v13926_v49, %v5147_v19 }
 0xfb6   : > { %v5320_v0 = vpop.f32.mrf.mxu0 }
 0xfb7   : > { %v5339_v13 = vadd.f32 %v5320_v0, %v5139_v24  ;;  %v14796_v24 = vld [vmem:[#allocation13 + $0x8] sm:$0xff]  }
 0xfb8   : > { %v13927_v43 = vpop.f32.mrf.mxu0 }
 0xfba   : > { %v5323_v2 = vpop.f32.mrf.mxu0 }
 0xfbc   : > { %v13942_v39 = vpop.f32.mrf.mxu0 }
 0xfbd   : > { %v5527_v51 = vadd.f32 %v13942_v39, %v5337_v40 }
 0xfbe   : > { %v5494_v8 = vpop.f32.mrf.mxu0 }
 0xfbf   : > { %v5525_v15 = vadd.f32 %v5494_v8, %v5335_v16  ;;  %v5342_v16 = vadd.f32 %v13927_v43, %v5150_v30 }
 0xfc0   : > { %v13943_v50 = vpop.f32.mrf.mxu0 }
 0xfc1   : > { %v5528_v21 = vadd.f32 %v13943_v50, %v5338_v44 }
 0xfc2   : > { %v5497_v52 = vpop.f32.mrf.mxu0 }
 0xfc3   : > { %v5526_v27 = vadd.f32 %v5497_v52, %v5336_v48  ;;  %v5340_v48 = vadd.f32 %v5323_v2, %v5142_v32 }
 0xfc4   : > { %v13946_v36 = vpop.f32.mrf.mxu0 }
 0xfc5   : > { %v5531_v40 = vadd.f32 %v13946_v36, %v5341_v25  ;;  %v14797_v25 = vld [vmem:[#allocation13 + $0x20] sm:$0xff]  }
 0xfc6   : > { %v5510_v54 = vpop.f32.mrf.mxu0 }
 0xfc7   : > { %v5529_v53 = vadd.f32 %v5510_v54, %v5339_v13 }
 0xfc8   : > { %v13947_v7 = vpop.f32.mrf.mxu0 }
 0xfc9   : > { %v5532_v49 = vadd.f32 %v13947_v7, %v5342_v16 }
 0xfca   : > { %v5513_v55 = vpop.f32.mrf.mxu0 }
 0xfcb   : > { %v5530_v52 = vadd.f32 %v5513_v55, %v5340_v48 }
 0xfcc   : > { %v13962_v45 = vpop.f32.mrf.mxu0 }
 0xfcd   : > { %v5717_v18 = vadd.f32 %v13962_v45, %v5527_v51 }
 0xfce   : > { %v5684_v57 = vpop.f32.mrf.mxu0 }
 0xfcf   : > { %v5715_v22 = vadd.f32 %v5684_v57, %v5525_v15 }
 0xfd0   : > { %v13963_v59 = vpop.f32.mrf.mxu0 }
 0xfd1   : > { %v5718_v28 = vadd.f32 %v13963_v59, %v5528_v21 }
 0xfd2   : > { %v5687_v47 = vpop.f32.mrf.mxu0 }
 0xfd3   : > { %v5716_v17 = vadd.f32 %v5687_v47, %v5526_v27  ;;  %v14798_v27 = vld [vmem:[#allocation13 + $0x28] sm:$0xff]  }
 0xfd4   : > { %v13966_v4 = vpop.f32.mrf.mxu0 }
 0xfd5   : > { %v5721_v41 = vadd.f32 %v13966_v4, %v5531_v40 }
 0xfd6   : > { %v5700_v61 = vpop.f32.mrf.mxu0 }
 0xfd7   : > { %v5719_v60 = vadd.f32 %v5700_v61, %v5529_v53  ;;  %v14802_v53 = vld [vmem:[#allocation14 + $0x10] sm:$0xff]  }
 0xfd8   : > { %v13967_v56 = vpop.f32.mrf.mxu0 }
 0xfd9   : > { %v5722_v36 = vadd.f32 %v13967_v56, %v5532_v49  ;;  %v14803_v49 = vld [vmem:[#allocation13 + $0x30] sm:$0xff]  }
 0xfda   : > { %v5703_v62 = vpop.f32.mrf.mxu0 }
 0xfdb   : > { %v5720_v59 = vadd.f32 %v5703_v62, %v5530_v52 }
 0xfdc   : > { %v13982_v63 = vpop.f32.mrf.mxu0 }
 0xfdd   : > { %v5907_v23 = vadd.f32 %v13982_v63, %v5717_v18 }
 0xfde   : > { %v5874_v1 = vpop.f32.mrf.mxu0 }
 0xfdf   : > { %v5905_v29 = vadd.f32 %v5874_v1, %v5715_v22 }
 0xfe0   : > { %v13983_v3 = vpop.f32.mrf.mxu0 }
 0xfe1   : > { %v5908_v58 = vadd.f32 %v13983_v3, %v5718_v28  ;;  %v14800_v28 = vld [vmem:[#allocation14 + $0x8] sm:$0xff]  }
 0xfe2   : > { %v5877_v6 = vpop.f32.mrf.mxu0 }
 0xfe3   : > { %v5906_v42 = vadd.f32 %v5877_v6, %v5716_v17 }
 0xfe4   : > { %v13986_v9 = vpop.f32.mrf.mxu0 }
 0xfe5   : > { %v5911_v0 = vadd.f32 %v13986_v9, %v5721_v41 }
 0xfe6   : > { %v5890_v12 = vpop.f32.mrf.mxu0 }
 0xfe7   : > { %v5909_v45 = vadd.f32 %v5890_v12, %v5719_v60 }
 0xfe8   : > { %v13987_v14 = vpop.f32.mrf.mxu0 }
 0xfe9   : > { %v5912_v47 = vadd.f32 %v13987_v14, %v5722_v36 }
 0xfea   : > { %v5893_v20 = vpop.f32.mrf.mxu0 }
 0xfeb   : > { %v5910_v3 = vadd.f32 %v5893_v20, %v5720_v59  ;;  %v14794_v20 = vld [vmem:[#allocation13 + $0x18] sm:$0xff]  }
 0xfec   : > { %v14002_v26 = vpop.f32.mrf.mxu0 }
 0xfed   : > { %v6097_v11 = vadd.f32 %v14002_v26, %v5907_v23  ;;  %v14799_v26 = vld [vmem:[#allocation14 + $0x18] sm:$0xff]  }
 0xfee   : > { %v6064_v38 = vpop.f32.mrf.mxu0 }
 0xfef   : > { %v6095_v31 = vadd.f32 %v6064_v38, %v5905_v29  ;;  %v6112_v44 = vadd.f32 %v12680_v37, %v6097_v11  ;;  %v14801_v29 = vld [vmem:[#allocation14] sm:$0xff]  }
 0xff0   : > { %v14003_v33 = vpop.f32.mrf.mxu0 }
 0xff1   : > { %v6098_v46 = vadd.f32 %v14003_v33, %v5908_v58  ;;  %v6110_v39 = vadd.f32 %v12680_v37, %v6095_v31  ;;  %v6120_v10 = vmax.f32 %v6112_v44, 0.0 }
 0xff2   : > { %v6067_v34 = vpop.f32.mrf.mxu0 }
 0xff3   : > { %v6113_v8 = vadd.f32 %v12680_v37, %v6098_v46  ;;  %v6096_v50 = vadd.f32 %v6067_v34, %v5906_v42  ;;  %v6118_v63 = vmax.f32 %v6110_v39, 0.0  ;;  %v14804_v34 = vld [vmem:[#allocation13 + $0x38] sm:$0xff]  }
 0xff4   : > { %v14006_v57 = vpop.f32.mrf.mxu0 }
 0xff5   : > { %v6121_v35 = vmax.f32 %v6113_v8, 0.0  ;;  %v6111_v43 = vadd.f32 %v12680_v37, %v6096_v50  ;;  %v6101_v54 = vadd.f32 %v14006_v57, %v5911_v0 }
 0xff6   : > { %v6080_v4 = vpop.f32.mrf.mxu0 }
 0xff7   : > { %v16868_v2 = vpack.c.bf16 %v6121_v35, %v6120_v10  ;;  %v6119_v7 = vmax.f32 %v6111_v43, 0.0  ;;  %v6099_v61 = vadd.f32 %v6080_v4, %v5909_v45  ;;  %v6116_v55 = vadd.f32 %v12680_v37, %v6101_v54 }
 0xff8   : > { %v14007_v1 = vpop.f32.mrf.mxu0 }
 0xff9   : > { %v16870_v6 = vpack.c.bf16 %v6119_v7, %v6118_v63  ;;  %v6102_v56 = vadd.f32 %v14007_v1, %v5912_v47  ;;  %v6114_v12 = vadd.f32 %v12680_v37, %v6099_v61  ;;  %v6124_v18 = vmax.f32 %v6116_v55, 0.0 }
 0xffa   : > { %v6083_v9 = vpop.f32.mrf.mxu0 }
 0xffb   : > { %v6117_v51 = vadd.f32 %v12680_v37, %v6102_v56  ;;  %v6100_v15 = vadd.f32 %v6083_v9, %v5910_v3  ;;  %v6122_v14 = vmax.f32 %v6114_v12, 0.0 }
 0xffd   : > { %v6125_v19 = vmax.f32 %v6117_v51, 0.0  ;;  %v6115_v62 = vadd.f32 %v12680_v37, %v6100_v15  ;;  %v14805_v15 = vld [vmem:[#allocation13 + $0x40] sm:$0xff]  }
 0xfff   : > { %v16872_v21 = vpack.c.bf16 %v6125_v19, %v6124_v18  ;;  %v6123_v22 = vmax.f32 %v6115_v62, 0.0  ;;  %v14806_v19 = vld [vmem:[#allocation13 + $0x48] sm:$0xff]   ;;  %v14807_v62 = vld [vmem:[#allocation14 + $0x20] sm:$0xff]  }
0x1001   : > { %v16874_v23 = vpack.c.bf16 %v6123_v22, %v6122_v14  ;;  %14008 = vmatprep.subr.bf16.mxu1 %v16872_v21  ;;  %14020 = vmatprep.subr.bf16.mxu0 %v16872_v21 }
0x1002   : > { %14009 = vmatpush3.bf16.msra.mxu1 %v16872_v21  ;;  %14021 = vmatpush3.bf16.msra.mxu0 %v16872_v21 }
0x1003   : > { %14010 = vmatprep.subr.bf16.mxu1 %v16874_v23  ;;  %14022 = vmatprep.subr.bf16.mxu0 %v16874_v23 }
0x1006   : > { %14011 = vmatpush3.bf16.msra.mxu1 %v16874_v23  ;;  %14023 = vmatpush3.bf16.msra.mxu0 %v16874_v23 }
0x1007   : > { %14012 = vmatprep.subr.bf16.mxu1 %v16868_v2  ;;  %14024 = vmatprep.subr.bf16.mxu0 %v16868_v2 }
0x100a   : > { %14013 = vmatpush3.bf16.msra.mxu1 %v16868_v2  ;;  %14025 = vmatpush3.bf16.msra.mxu0 %v16868_v2 }
0x100b   : > { %14014 = vmatprep.subr.bf16.mxu1 %v16870_v6  ;;  %14026 = vmatprep.subr.bf16.mxu0 %v16870_v6 }
0x100e   : > { %14015 = vmatpush3.bf16.msra.mxu1 %v16870_v6  ;;  %14027 = vmatpush3.bf16.msra.mxu0 %v16870_v6 }
0x100f   : > { %14044 = vmatprep.subr.bf16.mxu0 %v16872_v21  ;;  %14032 = vmatprep.subr.bf16.mxu1 %v14800_v28 }
0x1011   : > { %14029 = vmatmul.mubr.msk.bf16.vlgmr.msra.gmra.mxu0 %vm3361_vm2, %v14794_v20  ;;  %14017 = vmatmul.mubr.msk.bf16.vlgmr.msra.gmra.mxu1 %vm3361_vm2, %v14796_v24 }
0x1012   : > { %14045 = vmatpush3.bf16.msra.mxu0 %v16872_v21  ;;  %14052 = vmatprep.mubr.msk.bf16.mxu0 %vm3361_vm2, %v14797_v25 }
0x1013   : > { %14046 = vmatprep.subr.bf16.mxu0 %v16874_v23  ;;  %14033 = vmatpush3.bf16.msra.mxu1 %v14800_v28 }
0x1014   : > { %14038 = vmatprep.subr.bf16.mxu1 %v14801_v29 }
0x1016   : > { %14047 = vmatpush3.bf16.msra.mxu0 %v16874_v23 }
0x1017   : > { %14048 = vmatprep.subr.bf16.mxu0 %v16868_v2 }
0x101a   : > { %14049 = vmatpush3.bf16.msra.mxu0 %v16868_v2 }
0x101b   : > { %14050 = vmatprep.subr.bf16.mxu0 %v16870_v6 }
0x101e   : > { %14051 = vmatpush3.bf16.msra.mxu0 %v16870_v6 }
0x101f   : > { %14074 = vmatprep.subr.bf16.mxu0 %v14799_v26 }
0x1021   : > { %14053 = vmatmul.mubr.msk.bf16.vlgmr.msra.gmra.mxu0 %vm3361_vm2, %v14798_v27 }
0x1022   : > { %14075 = vmatpush3.bf16.msra.mxu0 %v14799_v26 }
0x1023   : > { %14080 = vmatprep.subr.bf16.mxu0 %v16872_v21 }
0x10d1   : > { %v14030_v11 = vpop.f32.mrf.mxu0  ;;  %v14018_v30 = vpop.f32.mrf.mxu1 }
0x10d3   : > { %v6257_v13 = vpop.f32.mrf.mxu0  ;;  %v6184_v37 = vpop.f32.mrf.mxu1 }
0x10d5   : > { %v14031_v38 = vpop.f32.mrf.mxu0  ;;  %v14019_v40 = vpop.f32.mrf.mxu1 }
0x10d6   : > { %v6273_v16 = vpack.c.bf16 %v14031_v38, %v14030_v11  ;;  %v6200_v33 = vpack.c.bf16 %v14019_v40, %v14018_v30 }
0x10d7   : > { %v6260_v17 = vpop.f32.mrf.mxu0  ;;  %v6187_v58 = vpop.f32.mrf.mxu1 }
0x10d8   : > { %v6272_v31 = vpack.c.bf16 %v6260_v17, %v6257_v13  ;;  %v6199_v32 = vpack.c.bf16 %v6187_v58, %v6184_v37  ;;  %v12716_v37 = vld [vmem:[#allocation16] ss:$0 sm:$0xff] }
0x10da   : > { %14034 = vmatprep.mubr.msk.bf16.mxu1 %vm3502_vm3, %v6272_v31 }
0x10db   : > { %14035 = vmatmul.mubr.msk.bf16.vlgmr.msra.gmra.mxu1 %vm3502_vm3, %v6273_v16 }
0x10dc   : > { %14040 = vmatprep.mubr.msk.bf16.mxu1 %vm3502_vm3, %v6199_v32  ;;  %14039 = vmatpush3.bf16.msra.mxu1 %v14801_v29 }
0x10dd   : > { %14056 = vmatprep.subr.bf16.mxu1 %v14802_v53 }
0x10e1   : > { %v14054_v41 = vpop.f32.mrf.mxu0 }
0x10e3   : > { %14041 = vmatmul.mubr.msk.bf16.vlgmr.msra.gmra.mxu1 %vm3502_vm3, %v6200_v33  ;;  %v6452_v42 = vpop.f32.mrf.mxu0 }
0x10e4   : > { %14057 = vmatpush3.bf16.msra.mxu1 %v14802_v53 }
0x10e5   : > { %14062 = vmatprep.subr.bf16.mxu1 %v16872_v21  ;;  %v14055_v44 = vpop.f32.mrf.mxu0 }
0x10e6   : > { %v6468_v60 = vpack.c.bf16 %v14055_v44, %v14054_v41 }
0x10e7   : > { %v6455_v46 = vpop.f32.mrf.mxu0 }
0x10e8   : > { %v6467_v48 = vpack.c.bf16 %v6455_v46, %v6452_v42 }
0x10ea   : > { %14058 = vmatprep.mubr.msk.bf16.mxu1 %vm3502_vm3, %v6467_v48 }
0x10eb   : > { %14059 = vmatmul.mubr.msk.bf16.vlgmr.msra.gmra.mxu1 %vm3502_vm3, %v6468_v60 }
0x10ec   : > { %14063 = vmatpush3.bf16.msra.mxu1 %v16872_v21  ;;  %14070 = vmatprep.mubr.msk.bf16.mxu1 %vm3361_vm2, %v14803_v49 }
0x10ed   : > { %14064 = vmatprep.subr.bf16.mxu1 %v16874_v23 }
0x10f0   : > { %14065 = vmatpush3.bf16.msra.mxu1 %v16874_v23 }
0x10f1   : > { %14066 = vmatprep.subr.bf16.mxu1 %v16868_v2 }
0x10f4   : > { %14067 = vmatpush3.bf16.msra.mxu1 %v16868_v2 }
0x10f5   : > { %14068 = vmatprep.subr.bf16.mxu1 %v16870_v6 }
0x10f8   : > { %14069 = vmatpush3.bf16.msra.mxu1 %v16870_v6 }
0x10f9   : > { %14092 = vmatprep.subr.bf16.mxu1 %v14807_v62 }
0x10fb   : > { %14071 = vmatmul.mubr.msk.bf16.vlgmr.msra.gmra.mxu1 %vm3361_vm2, %v14804_v34  ;;  %v14808_v34 = vld [vmem:[#allocation17] sm:$0xff]  }
0x10fc   : > { %14093 = vmatpush3.bf16.msra.mxu1 %v14807_v62 }
0x10fd   : > { %14098 = vmatprep.subr.bf16.mxu1 %v15877_v5 }
0x119b   : > { %v14036_v0 = vpop.f32.mrf.mxu1 }
0x119d   : > { %v6322_v39 = vpop.f32.mrf.mxu1 }
0x119f   : > { %v14037_v8 = vpop.f32.mrf.mxu1 }
0x11a1   : > { %v6325_v50 = vpop.f32.mrf.mxu1 }
0x11a3   : > { %v14042_v52 = vpop.f32.mrf.mxu1 }
0x11a4   : > { %v6392_v36 = vadd.f32 %v14042_v52, %v14036_v0  ;;  %v14809_v0 = vld [vmem:[#allocation17 + $0x8] sm:$0xff]   ;;  %v14813_v52 = vld [vmem:[#allocation19] sm:$0xff]  }
0x11a5   : > { %v6383_v45 = vpop.f32.mrf.mxu1 }
0x11a6   : > { %v6384_v57 = vadd.f32 %v6383_v45, %v6322_v39  ;;  %v14810_v39 = vld [vmem:[#allocation19 + $0x18] sm:$0xff]  }
0x11a7   : > { %v14043_v10 = vpop.f32.mrf.mxu1 }
0x11a8   : > { %v6395_v35 = vadd.f32 %v14043_v10, %v14037_v8  ;;  %v14811_v8 = vld [vmem:[#allocation19 + $0x8] sm:$0xff]  }
0x11a9   : > { %v6386_v43 = vpop.f32.mrf.mxu1 }
0x11aa   : > { %v6387_v54 = vadd.f32 %v6386_v43, %v6325_v50  ;;  %v14812_v50 = vld [vmem:[#allocation19 + $0x10] sm:$0xff]  }
0x11ab   : > { %v14060_v59 = vpop.f32.mrf.mxu1 }
0x11ac   : > { %v6534_v47 = vadd.f32 %v14060_v59, %v6392_v36 }
0x11ad   : > { %v6517_v4 = vpop.f32.mrf.mxu1 }
0x11ae   : > { %v6532_v63 = vadd.f32 %v6517_v4, %v6384_v57 }
0x11af   : > { %v14061_v7 = vpop.f32.mrf.mxu1 }
0x11b0   : > { %v6535_v61 = vadd.f32 %v14061_v7, %v6395_v35  ;;  %v14815_v7 = vld [vmem:[#allocation19 + $0x28] sm:$0xff]  }
0x11b1   : > { %v6520_v1 = vpop.f32.mrf.mxu1 }
0x11b2   : > { %v6533_v3 = vadd.f32 %v6520_v1, %v6387_v54 }
0x11bb   : > { %v14072_v55 = vpop.f32.mrf.mxu1 }
0x11bd   : > { %v6590_v56 = vpop.f32.mrf.mxu1 }
0x11bf   : > { %v14073_v9 = vpop.f32.mrf.mxu1 }
0x11c0   : > { %v6606_v18 = vpack.c.bf16 %v14073_v9, %v14072_v55 }
0x11c1   : > { %v6593_v12 = vpop.f32.mrf.mxu1 }
0x11c2   : > { %v6605_v51 = vpack.c.bf16 %v6593_v12, %v6590_v56 }
0x11c4   : > { %14076 = vmatprep.mubr.msk.bf16.mxu0 %vm3502_vm3, %v6605_v51 }
0x11c5   : > { %14077 = vmatmul.mubr.msk.bf16.vlgmr.msra.gmra.mxu0 %vm3502_vm3, %v6606_v18 }
0x11c6   : > { %14081 = vmatpush3.bf16.msra.mxu0 %v16872_v21  ;;  %14088 = vmatprep.mubr.msk.bf16.mxu0 %vm3361_vm2, %v14805_v15 }
0x11c7   : > { %14082 = vmatprep.subr.bf16.mxu0 %v16874_v23 }
0x11ca   : > { %14083 = vmatpush3.bf16.msra.mxu0 %v16874_v23 }
0x11cb   : > { %14084 = vmatprep.subr.bf16.mxu0 %v16868_v2 }
0x11ce   : > { %14085 = vmatpush3.bf16.msra.mxu0 %v16868_v2 }
0x11cf   : > { %14086 = vmatprep.subr.bf16.mxu0 %v16870_v6 }
0x11d2   : > { %14087 = vmatpush3.bf16.msra.mxu0 %v16870_v6 }
0x11d3   : > { %14106 = vmatprep.subr.bf16.mxu0 %v15877_v5 }
0x11d5   : > { %14089 = vmatmul.mubr.msk.bf16.vlgmr.msra.gmra.mxu0 %vm3361_vm2, %v14806_v19 }
0x11d6   : > { %14110 = vmatprep.mubr.msk.bf16.mxu0 %vm15878_vm4, %v15877_v5 }
0x1285   : > { %v14078_v14 = vpop.f32.mrf.mxu0 }
0x1286   : > { %v6672_v21 = vadd.f32 %v14078_v14, %v6534_v47 }
0x1287   : > { %v6655_v2 = vpop.f32.mrf.mxu0 }
0x1288   : > { %v6670_v22 = vadd.f32 %v6655_v2, %v6532_v63  ;;  %v14814_v63 = vld [vmem:[#allocation17 + $0x10] sm:$0xff]  }
0x1289   : > { %v14079_v23 = vpop.f32.mrf.mxu0 }
0x128a   : > { %v6673_v20 = vadd.f32 %v14079_v23, %v6535_v61  ;;  %v14816_v61 = vld [vmem:[#allocation19 + $0x20] sm:$0xff]  }
0x128b   : > { %v6658_v24 = vpop.f32.mrf.mxu0 }
0x128c   : > { %v6671_v6 = vadd.f32 %v6658_v24, %v6533_v3  ;;  %v12732_v24 = vld [vmem:[#allocation20] ss:$0 sm:$0xff] }
0x1295   : > { %v14090_v25 = vpop.f32.mrf.mxu0 }
0x1297   : > { %v6728_v26 = vpop.f32.mrf.mxu0 }
0x1299   : > { %v14091_v27 = vpop.f32.mrf.mxu0 }
0x129a   : > { %v6744_v11 = vpack.c.bf16 %v14091_v27, %v14090_v25 }
0x129b   : > { %v6731_v28 = vpop.f32.mrf.mxu0 }
0x129c   : > { %v6743_v29 = vpack.c.bf16 %v6731_v28, %v6728_v26 }
0x129e   : > { %14094 = vmatprep.mubr.msk.bf16.mxu1 %vm3502_vm3, %v6743_v29 }
0x129f   : > { %14095 = vmatmul.mubr.msk.bf16.vlgmr.msra.gmra.mxu1 %vm3502_vm3, %v6744_v11 }
0x12a0   : > { %14102 = vmatprep.mubr.msk.bf16.mxu1 %vm15878_vm4, %v15877_v5 }
0x135f   : > { %v14096_v30 = vpop.f32.mrf.mxu1 }
0x1360   : > { %v6810_v13 = vadd.f32 %v14096_v30, %v6672_v21 }
0x1361   : > { %v6793_v38 = vpop.f32.mrf.mxu1 }
0x1362   : > { %v6808_v40 = vadd.f32 %v6793_v38, %v6670_v22  ;;  %v6821_v58 = vadd.f32 %v12716_v37, %v6810_v13  ;;  %v7179_v38 = vld [vmem:[#allocation22] sm:$0xf] }
0x1363   : > { %v14097_v17 = vpop.f32.mrf.mxu1 }
0x1364   : > { %v6811_v31 = vadd.f32 %v14097_v17, %v6673_v20  ;;  %v6819_v16 = vadd.f32 %v12716_v37, %v6808_v40  ;;  %v6825_v41 = vmax.f32 %v6821_v58, 0.0  ;;  %v14817_v40 = vld [vmem:[#allocation23 + $0x38] sm:$0xff]   ;;  %v14818_v58 = vld [vmem:[#allocation23 + $0x30] sm:$0xff]  }
0x1365   : > { %v6796_v32 = vpop.f32.mrf.mxu1  ;;  %v14819_v17 = vld [vmem:[#allocation23 + $0x18] sm:$0xff]  }
0x1366   : > { %v6822_v53 = vadd.f32 %v12716_v37, %v6811_v31  ;;  %v6809_v33 = vadd.f32 %v6796_v32, %v6671_v6  ;;  %v6823_v46 = vmax.f32 %v6819_v16, 0.0  ;;  %v14821_v31 = vld [vmem:[#allocation23 + $0x10] sm:$0xff]   ;;  %v14820_v32 = vld [vmem:[#allocation23 + $0x28] sm:$0xff]   ;;  %v14822_v16 = vld [vmem:[#allocation23 + $0x20] sm:$0xff]  }
0x1368   : > { %v6826_v42 = vmax.f32 %v6822_v53, 0.0  ;;  %v6820_v44 = vadd.f32 %v12716_v37, %v6809_v33  ;;  %v7232_v37 = vld [vmem:[#allocation22 + $0x4] sm:$0xf]  ;;  %v14823_v53 = vld [vmem:[#allocation23 + $0x8] sm:$0xff]   ;;  %v14824_v33 = vld [vmem:[#allocation23] sm:$0xff]  }
0x136a   : > { %v6828_v48 = vpack.c.bf16 %v6826_v42, %v6825_v41  ;;  %v6824_v49 = vmax.f32 %v6820_v44, 0.0 }
0x136c   : > { %v6827_v60 = vpack.c.bf16 %v6824_v49, %v6823_v46  ;;  %14099 = vmatpush3.bf16.msra.mxu1 %v6828_v48  ;;  %14107 = vmatpush3.bf16.msra.mxu0 %v6828_v48 }
0x136d   : > { %14100 = vmatprep.subr.bf16.mxu1 %v15877_v5  ;;  %14108 = vmatprep.subr.bf16.mxu0 %v15877_v5 }
0x1370   : > { %14101 = vmatpush3.bf16.msra.mxu1 %v6827_v60  ;;  %14109 = vmatpush3.bf16.msra.mxu0 %v6827_v60 }
0x1371   : > { %14114 = vmatprep.subr.bf16.mxu1 %v15877_v5  ;;  %14122 = vmatprep.subr.bf16.mxu0 %v15877_v5 }
0x1373   : > { %14103 = vmatmul.mubr.msk.bf16.vlgmr.msra.gmra.mxu1 %vm4063_vm5, %v14808_v34  ;;  %14111 = vmatmul.mubr.msk.bf16.vlgmr.msra.gmra.mxu0 %vm4063_vm5, %v14809_v0 }
0x1374   : > { %14115 = vmatpush3.bf16.msra.mxu1 %v14810_v39  ;;  %14118 = vmatprep.mubr.msk.bf16.mxu1 %vm15878_vm4, %v15877_v5 }
0x1375   : > { %14116 = vmatprep.subr.bf16.mxu1 %v15877_v5  ;;  %14126 = vmatprep.mubr.msk.bf16.mxu0 %vm15878_vm4, %v15877_v5 }
0x1376   : > { %14123 = vmatpush3.bf16.msra.mxu0 %v14811_v8 }
0x1377   : > { %14124 = vmatprep.subr.bf16.mxu0 %v15877_v5 }
0x1378   : > { %14117 = vmatpush3.bf16.msra.mxu1 %v14812_v50  ;;  %v7419_v50 = vld [vmem:[#allocation22 + $0x8] sm:$0xf] }
0x1379   : > { %14130 = vmatprep.subr.bf16.mxu1 %v15877_v5 }
0x137a   : > { %14125 = vmatpush3.bf16.msra.mxu0 %v14813_v52  ;;  %v14826_v52 = vld [vmem:[#allocation23 + $0x50] sm:$0xff]  }
0x137b   : > { %14138 = vmatprep.subr.bf16.mxu0 %v15877_v5 }
0x1433   : > { %v6873_v36 = vpop.f32.mrf.mxu1  ;;  %v6929_v45 = vpop.f32.mrf.mxu0 }
0x1435   : > { %v14104_v57 = vpop.f32.mrf.mxu1  ;;  %v14112_v10 = vpop.f32.mrf.mxu0 }
0x1437   : > { %v6876_v35 = vpop.f32.mrf.mxu1  ;;  %v6932_v43 = vpop.f32.mrf.mxu0 }
0x1438   : > { %v6880_v54 = vpack.c.bf16 %v6876_v35, %v6873_v36  ;;  %v6936_v59 = vpack.c.bf16 %v6932_v43, %v6929_v45  ;;  %v14827_v36 = vld [vmem:[#allocation23 + $0x48] sm:$0xff]   ;;  %v14828_v45 = vld [vmem:[#allocation23 + $0x40] sm:$0xff]  }
0x1439   : > { %v14113_v47 = vpop.f32.mrf.mxu0  ;;  %v14105_v4 = vpop.f32.mrf.mxu1 }
0x143a   : > { %14119 = vmatmul.mubr.msk.bf16.vlgmr.msra.gmra.mxu1 %vm4063_vm5, %v6936_v59  ;;  %14127 = vmatmul.mubr.msk.bf16.vlgmr.msra.gmra.mxu0 %vm4063_vm5, %v6880_v54 }
0x143b   : > { %14131 = vmatpush3.bf16.msra.mxu1 %v6828_v48  ;;  %14134 = vmatprep.mubr.msk.bf16.mxu1 %vm15878_vm4, %v15877_v5  ;;  %v14825_v48 = vld [vmem:[#allocation23 + $0x58] sm:$0xff]  }
0x143c   : > { %14132 = vmatprep.subr.bf16.mxu1 %v15877_v5  ;;  %14142 = vmatprep.mubr.msk.bf16.mxu0 %vm15878_vm4, %v15877_v5 }
0x143d   : > { %14139 = vmatpush3.bf16.msra.mxu0 %v14815_v7 }
0x143e   : > { %14140 = vmatprep.subr.bf16.mxu0 %v15877_v5 }
0x143f   : > { %14133 = vmatpush3.bf16.msra.mxu1 %v6827_v60 }
0x1440   : > { %14146 = vmatprep.subr.bf16.mxu1 %v15877_v5 }
0x1441   : > { %14141 = vmatpush3.bf16.msra.mxu0 %v14816_v61 }
0x1442   : > { %14135 = vmatmul.mubr.msk.bf16.vlgmr.msra.gmra.mxu1 %vm4063_vm5, %v14814_v63  ;;  %14152 = vmatprep.subr.bf16.mxu0 %v15877_v5 }
0x1443   : > { %14148 = vmatprep.mubr.msk.bf16.mxu1 %vm15878_vm4, %v15877_v5 }
0x14fa   : > { %v6990_v1 = vpop.f32.mrf.mxu1  ;;  %v7046_v3 = vpop.f32.mrf.mxu0 }
0x14fb   : > { %v7047_v55 = vadd.f32 %v7046_v3, %v6990_v1 }
0x14fc   : > { %v14120_v56 = vpop.f32.mrf.mxu1  ;;  %v14128_v9 = vpop.f32.mrf.mxu0 }
0x14fe   : > { %v6993_v12 = vpop.f32.mrf.mxu1  ;;  %v7049_v51 = vpop.f32.mrf.mxu0 }
0x14ff   : > { %v7050_v15 = vadd.f32 %v7049_v51, %v6993_v12 }
0x1500   : > { %v14121_v18 = vpop.f32.mrf.mxu1  ;;  %v14129_v19 = vpop.f32.mrf.mxu0 }
0x1502   : > { %v7097_v62 = vpop.f32.mrf.mxu1 }
0x1504   : > { %v14136_v14 = vpop.f32.mrf.mxu1 }
0x1506   : > { %v7100_v21 = vpop.f32.mrf.mxu1 }
0x1507   : > { %v7104_v2 = vpack.c.bf16 %v7100_v21, %v7097_v62 }
0x1508   : > { %v14137_v22 = vpop.f32.mrf.mxu1 }
0x1509   : > { %14143 = vmatmul.mubr.msk.bf16.vlgmr.msra.gmra.mxu0 %vm4063_vm5, %v7104_v2 }
0x150a   : > { %14154 = vmatprep.mubr.msk.bf16.mxu0 %vm15878_vm4, %v15877_v5 }
0x15c9   : > { %v7158_v23 = vpop.f32.mrf.mxu0 }
0x15ca   : > { %v7165_v20 = vadd.f32 %v7158_v23, %v7047_v55 }
0x15cb   : > { %v14144_v6 = vpop.f32.mrf.mxu0 }
0x15cc   : > { %v7174_v26 = vadd.f32 %v12732_v24, %v7165_v20 }
0x15cd   : > { %v7161_v25 = vpop.f32.mrf.mxu0 }
0x15ce   : > { %v7166_v27 = vadd.f32 %v7161_v25, %v7050_v15  ;;  %v7176_v11 = vmax.f32 %v7174_v26, 0.0 }
0x15cf   : > { %v14145_v28 = vpop.f32.mrf.mxu0 }
0x15d0   : > { %v7175_v29 = vadd.f32 %v12732_v24, %v7166_v27 }
0x15d2   : > { %v7177_v30 = vmax.f32 %v7175_v29, 0.0 }
0x15d4   : > { %v7178_v13 = vpack.c.bf16 %v7177_v30, %v7176_v11 }
0x15d6   : > { %14147 = vmatpush3.bf16.msra.mxu1 %v7178_v13  ;;  %14153 = vmatpush3.bf16.msra.mxu0 %v7178_v13 }
0x15d7   : > { %14158 = vmatprep.subr.bf16.mxu1 %v15877_v5  ;;  %14170 = vmatprep.subr.bf16.mxu0 %v15877_v5 }
0x15d9   : > { %14155 = vmatmul.mubr.msk.bf16.vlgmr.msra.gmra.mxu0 %vm3502_vm3, %v7232_v37  ;;  %14149 = vmatmul.mubr.msk.bf16.vlgmr.msra.gmra.mxu1 %vm3502_vm3, %v7179_v38 }
0x15da   : > { %14159 = vmatpush3.bf16.msra.mxu1 %v14817_v40  ;;  %14171 = vmatpush3.bf16.msra.mxu0 %v14819_v17 }
0x15db   : > { %14160 = vmatprep.subr.bf16.mxu1 %v15877_v5  ;;  %14172 = vmatprep.subr.bf16.mxu0 %v15877_v5 }
0x15dc   : > { %14166 = vmatprep.mubr.msk.bf16.mxu1 %vm15878_vm4, %v15877_v5  ;;  %14178 = vmatprep.mubr.msk.bf16.mxu0 %vm15878_vm4, %v15877_v5 }
0x15de   : > { %14161 = vmatpush3.bf16.msra.mxu1 %v14818_v58  ;;  %14173 = vmatpush3.bf16.msra.mxu0 %v14821_v31 }
0x15df   : > { %14162 = vmatprep.subr.bf16.mxu1 %v15877_v5  ;;  %14174 = vmatprep.subr.bf16.mxu0 %v15877_v5 }
0x15e2   : > { %14163 = vmatpush3.bf16.msra.mxu1 %v14820_v32  ;;  %14175 = vmatpush3.bf16.msra.mxu0 %v14823_v53 }
0x15e3   : > { %14164 = vmatprep.subr.bf16.mxu1 %v15877_v5  ;;  %14176 = vmatprep.subr.bf16.mxu0 %v15877_v5 }
0x15e6   : > { %14165 = vmatpush3.bf16.msra.mxu1 %v14822_v16  ;;  %14177 = vmatpush3.bf16.msra.mxu0 %v14824_v33 }
0x15e7   : > { %14182 = vmatprep.subr.bf16.mxu1 %v15877_v5  ;;  %14188 = vmatprep.subr.bf16.mxu0 %v15877_v5 }
0x1699   : > { %v7270_v41 = vpop.f32.mrf.mxu0  ;;  %v7217_v42 = vpop.f32.mrf.mxu1 }
0x169a   : > { %v7276_v44 = vpack.c.bf16 %v7270_v41, %v7270_v41  ;;  %v7223_v46 = vpack.c.bf16 %v7217_v42, %v7217_v42 }
0x169b   : > { %v14156_v49 = vpop.f32.mrf.mxu0  ;;  %v14150_v60 = vpop.f32.mrf.mxu1 }
0x169c   : > { %14167 = vmatmul.mubr.msk.bf16.vlgmr.msra.gmra.mxu1 %vm3361_vm2, %v7276_v44  ;;  %14179 = vmatmul.mubr.msk.bf16.vlgmr.msra.gmra.mxu0 %vm3361_vm2, %v7223_v46 }
0x169d   : > { %14183 = vmatpush3.bf16.msra.mxu1 %v7178_v13  ;;  %v7273_v34 = vpop.f32.mrf.mxu0  ;;  %14184 = vmatprep.mubr.msk.bf16.mxu1 %vm15878_vm4, %v15877_v5  ;;  %v7220_v0 = vpop.f32.mrf.mxu1 }
0x169e   : > { %14189 = vmatpush3.bf16.msra.mxu0 %v14825_v48  ;;  %14196 = vmatprep.mubr.msk.bf16.mxu0 %vm15878_vm4, %v15877_v5 }
0x169f   : > { %v14157_v39 = vpop.f32.mrf.mxu0  ;;  %v14151_v8 = vpop.f32.mrf.mxu1  ;;  %14190 = vmatprep.subr.bf16.mxu0 %v15877_v5 }
0x16a2   : > { %14191 = vmatpush3.bf16.msra.mxu0 %v14826_v52 }
0x16a3   : > { %14192 = vmatprep.subr.bf16.mxu0 %v15877_v5 }
0x16a4   : > { %14185 = vmatmul.mubr.msk.bf16.vlgmr.msra.gmra.mxu1 %vm3502_vm3, %v7419_v50 }
0x16a6   : > { %14193 = vmatpush3.bf16.msra.mxu0 %v14827_v36 }
0x16a7   : > { %14194 = vmatprep.subr.bf16.mxu0 %v15877_v5 }
0x16aa   : > { %14195 = vmatpush3.bf16.msra.mxu0 %v14828_v45 }
0x175c   : > { %v7346_v57 = vpop.f32.mrf.mxu1  ;;  %v7413_v10 = vpop.f32.mrf.mxu0 }
0x175d   : > { %v7414_v35 = vadd.f32 %v7413_v10, %v7346_v57 }
0x175e   : > { %v14168_v43 = vpop.f32.mrf.mxu1  ;;  %v14180_v54 = vpop.f32.mrf.mxu0 }
0x1760   : > { %v7349_v59 = vpop.f32.mrf.mxu1  ;;  %v7416_v47 = vpop.f32.mrf.mxu0 }
0x1762   : > { %v14169_v4 = vpop.f32.mrf.mxu1  ;;  %v14181_v63 = vpop.f32.mrf.mxu0 }
0x1764   : > { %v7457_v7 = vpop.f32.mrf.mxu1 }
0x1765   : > { %v7463_v61 = vpack.c.bf16 %v7457_v7, %v7457_v7 }
0x1766   : > { %v14186_v1 = vpop.f32.mrf.mxu1 }
0x1767   : > { %14197 = vmatmul.mubr.msk.bf16.vlgmr.msra.gmra.mxu0 %vm3361_vm2, %v7463_v61 }
0x1768   : > { %v7460_v3 = vpop.f32.mrf.mxu1 }
0x176a   : > { %v14187_v55 = vpop.f32.mrf.mxu1 }
0x176b   : > { %15699 = shalt.err (!%p15696_p11)  }
0x176c   : > { %s17862_s12 = sld [smem:[#allocation76_spill]]  ;;  %v12751_v56 = vld [vmem:[#allocation25] ss:$0 sm:$0xff] }
0x1772   : > { %1989 = dma.hbm_to_vmem [thread:$0]  %s17862_s12, 16384, %s1987_s24, [#allocation4] }
0x1827   : > { %v7533_v5 = vpop.f32.mrf.mxu0 }
0x1828   : > { %v7539_v9 = vadd.f32 %v7533_v5, %v7414_v35 }
0x1829   : > { %v14198_v12 = vpop.f32.mrf.mxu0 }
0x182a   : > { %v7547_v51 = vadd.f32 %v12751_v56, %v7539_v9 }
0x182b   : > { %v7536_v15 = vpop.f32.mrf.mxu0 }
0x182c   : > { %v7548_v18 = vmax.f32 %v7547_v51, 0.0 }
0x182d   : > { %v14199_v19 = vpop.f32.mrf.mxu0 }
0x182e   : > { %7549 = vst [vmem:[#allocation2 + $0x8] sm:$0xff] %v7548_v18 }
0x182f PF: > { %s17863_s23 = sld [smem:[#allocation86_spill]] }
0x1835   : > { %p7550_p12 = scmp.ge.s32.totalorder %s17863_s23, 1  ;;  %p7551_p1 = scmp.le.s32.totalorder %s17863_s23, 3 }
0x1837   : > { %p7552_p10 = pnand %p7551_p1, %p7550_p12 }
0x1838   : > { %s15885_s6 = smov (!%p7552_p10), 64   ;;  %s15886_s15 = smov (!%p7552_p10), 48  }
0x1839   : > { %7555 = sbr.rel (%p7552_p10) target bundleno = 9237 (0x2415), region = 268  ;;  %s15887_s26 = smov (!%p7552_p10), 32  }
0x183a   : > { %s15888_s24 = smov (!%p7552_p10), 16   ;;  %s15889_s1 = smov (!%p7552_p10), 96  }
0x183e   : > { %v14864_v62 = vld [vmem:[%s16506_s19 + $0xac] ss:$12 sps:$4 sm:$0xff]   ;;  %v14866_v14 = vld [vmem:[%s16506_s19 + $0xa8] ss:$12 sps:$4 sm:$0xff]   ;;  %v15880_v21 = vmov 0   ;;  %v15881_v2 = vmov 0.0   ;;  %v7593_v44 = vlaneseq }
0x183f   : > { %7768 = vmatprep.mubr.bf16.mxu0 %v15880_v21  ;;  %14200 = vmatprep.subr.bf16.mxu1 %v15881_v2  ;;  %v14867_v22 = vld [vmem:[%s16506_s19 + $0x94] ss:$12 sps:$4 sm:$0xff]   ;;  %v14869_v23 = vld [vmem:[%s16506_s19 + $0x90] ss:$12 sps:$4 sm:$0xff]   ;;  %v14872_v24 = vld [vmem:[%s16506_s19 + $0x78] ss:$12 sps:$4 sm:$0xff]  }
0x1840   : > { %7736 = vmatprep.subr.bf16.mxu0 %v14864_v62  ;;  %v14870_v20 = vld [vmem:[%s16506_s19 + $0x7c] ss:$12 sps:$4 sm:$0xff]   ;;  %v14873_v6 = vld [vmem:[%s16506_s19 + $0x64] ss:$12 sps:$4 sm:$0xff]   ;;  %v14875_v25 = vld [vmem:[%s16506_s19 + $0x60] ss:$12 sps:$4 sm:$0xff]  }
0x1841   : > { %7737 = vmatpush1.bf16.msra.mxu0 %v14866_v14  ;;  %v14876_v26 = vld [vmem:[%s16506_s19 + $0x4c] ss:$12 sps:$4 sm:$0xff]   ;;  %v14888_v27 = vld [vmem:[%s16506_s19 + $0xb0] ss:$12 sps:$4 sm:$0xff]   ;;  %v14878_v29 = vld [vmem:[%s16506_s19 + $0x48] ss:$12 sps:$4 sm:$0xff]  }
0x1842   : > { %7738 = vmatprep.subr.bf16.mxu0 %v14867_v22  ;;  %14201 = vmatpush3.bf16.msra.mxu1 %v14888_v27  ;;  %v14889_v28 = vld [vmem:[%s16506_s19 + $0x98] ss:$12 sps:$4 sm:$0xff]   ;;  %v14879_v11 = vld [vmem:[%s16506_s19 + $0x34] ss:$12 sps:$4 sm:$0xff]   ;;  %v14881_v30 = vld [vmem:[%s16506_s19 + $0x30] ss:$12 sps:$4 sm:$0xff]  }
0x1843   : > { %14202 = vmatprep.subr.bf16.mxu1 %v15881_v2  ;;  %v14882_v13 = vld [vmem:[%s16506_s19 + $0x1c] ss:$12 sps:$4 sm:$0xff]   ;;  %v14890_v37 = vld [vmem:[%s16506_s19 + $0x80] ss:$12 sps:$4 sm:$0xff]   ;;  %v14884_v40 = vld [vmem:[%s16506_s19 + $0x18] ss:$12 sps:$4 sm:$0xff]  }
0x1844   : > { %v14891_v38 = vld [vmem:[%s16506_s19 + $0x68] ss:$12 sps:$4 sm:$0xff]   ;;  %v14885_v17 = vld [vmem:[%s16506_s19 + $0x4] ss:$12 sps:$4 sm:$0xff]   ;;  %v14887_v31 = vld [vmem:[%s16506_s19] ss:$12 sps:$4 sm:$0xff]  }
0x1845   : > { %7739 = vmatpush1.bf16.msra.mxu0 %v14869_v23  ;;  %v14892_v58 = vld [vmem:[%s16506_s19 + $0x50] ss:$12 sps:$4 sm:$0xff]   ;;  %v7556_v32 = vld [vmem:[#allocation2] sm:$0xff]  ;;  %v7557_v16 = vld [vmem:[#allocation2 + $0x8] sm:$0xff]  ;;  %vm15882_vm6 = vmmov 0   ;;  %v17041_v46 = vshrl.u32 %v7593_v44, 7 }
0x1846   : > { %7740 = vmatprep.subr.bf16.mxu0 %v14870_v20  ;;  %14203 = vmatpush3.bf16.msra.mxu1 %v14889_v28  ;;  %v7558_v53 = vpack.c.bf16 %v7557_v16, %v7556_v32  ;;  %v14893_v33 = vld [vmem:[%s16506_s19 + $0x38] ss:$12 sps:$4 sm:$0xff]   ;;  %v14894_v41 = vld [vmem:[%s16506_s19 + $0x20] ss:$12 sps:$4 sm:$0xff]   ;;  %v14895_v42 = vld [vmem:[%s16506_s19 + $0x8] ss:$12 sps:$4 sm:$0xff]  }
0x1847   : > { %14204 = vmatprep.subr.bf16.mxu1 %v15881_v2  ;;  %14216 = vmatprep.mubr.msk.bf16.mxu1 %vm15882_vm6, %v15881_v2  ;;  %v17044_v48 = vsub.s32 1, %v17041_v46  ;;  %v7591_v60 = vld [vmem:[%s16516_s18] sm:$0x7]  ;;  %v17049_v50 = vsub.s32 0, %v17041_v46  ;;  %vm7825_vm7 = vcmask 130048   ;;  %v17058_v59 = vsub.s32 2, %v17041_v46 }
0x1848   : > { %v17065_v56 = vld [vmem:[#allocation26] sm:$0xff]  ;;  %v17068_v18 = vld [vmem:[#allocation26 + $0x8] sm:$0xff]  ;;  %s15883_s19 = smov 112   ;;  %s15884_s18 = smov 80   ;;  %vm8880_vm8 = vcmask 261120   ;;  %vm8883_vm9 = vcmask 392192  }
0x1849   : > { %7741 = vmatpush1.bf16.msra.mxu0 %v14872_v24  ;;  %v7600_v0 = vrot.slane %v7591_v60, %v17044_v48  ;;  %v7596_v57 = vrot.slane %v7591_v60, %v17049_v50  ;;  %v7604_v47 = vrot.slane %v7591_v60, %v17058_v59  ;;  %vm8886_vm10 = vcmask 523264  }
0x184a   : > { %7742 = vmatprep.subr.bf16.mxu0 %v14873_v6  ;;  %14205 = vmatpush3.bf16.msra.mxu1 %v14890_v37  ;;  %vm8889_vm11 = vcmask 654336   ;;  %vm8892_vm12 = vcmask 785408   ;;  %vm8895_vm13 = vcmask 916480  }
0x184b   : > { %14206 = vmatprep.subr.bf16.mxu1 %v15881_v2 }
0x184d   : > { %7743 = vmatpush1.bf16.msra.mxu0 %v14875_v25 }
0x184e   : > { %7744 = vmatprep.subr.bf16.mxu0 %v14876_v26  ;;  %14207 = vmatpush3.bf16.msra.mxu1 %v14891_v38 }
0x184f   : > { %14208 = vmatprep.subr.bf16.mxu1 %v15881_v2 }
0x1851   : > { %7745 = vmatpush1.bf16.msra.mxu0 %v14878_v29 }
0x1852   : > { %7746 = vmatprep.subr.bf16.mxu0 %v14879_v11  ;;  %14209 = vmatpush3.bf16.msra.mxu1 %v14892_v58 }
0x1853   : > { %14210 = vmatprep.subr.bf16.mxu1 %v15881_v2 }
0x1855   : > { %7747 = vmatpush1.bf16.msra.mxu0 %v14881_v30 }
0x1856   : > { %7748 = vmatprep.subr.bf16.mxu0 %v14882_v13  ;;  %14211 = vmatpush3.bf16.msra.mxu1 %v14893_v33 }
0x1857   : > { %14212 = vmatprep.subr.bf16.mxu1 %v15881_v2 }
0x1859   : > { %7749 = vmatpush1.bf16.msra.mxu0 %v14884_v40 }
0x185a   : > { %7750 = vmatprep.subr.bf16.mxu0 %v14885_v17  ;;  %14213 = vmatpush3.bf16.msra.mxu1 %v14894_v41 }
0x185b   : > { %14214 = vmatprep.subr.bf16.mxu1 %v15881_v2 }
0x185d   : > { %7751 = vmatpush1.bf16.msra.mxu0 %v14887_v31 }
0x185e   : > { %14244 = vmatprep.subr.bf16.mxu0 %v15881_v2  ;;  %14215 = vmatpush3.bf16.msra.mxu1 %v14895_v42 }
0x185f   : > { %14220 = vmatprep.subr.bf16.mxu1 %v15881_v2 }
0x1860   : > { %7769 = vmatmul.mubr.bf16.vlgmr.msra.gmra.mxu0 %v7558_v53 }
0x1861   : > { %14246 = vmatprep.mubr.msk.bf16.mxu0 %vm15882_vm6, %v15881_v2  ;;  %14217 = vmatmul.mubr.bf16.vlgmr.msra.gmra.mxu1 %v7558_v53 }
0x1862   : > { %14222 = vmatprep.mubr.msk.bf16.mxu1 %vm15882_vm6, %v15881_v2 }
0x1920   : > { %v7770_v49 = vpop.f32.mrf.mxu0 }
0x1921   : > { %v7771_v43 = vadd.f32 %v7770_v49, %v7596_v57  ;;  %v7813_v4 = vpop.f32.mrf.mxu1 }
0x1922   : > { %v7772_v34 = vpop.f32.mrf.mxu0  ;;  %v7814_v7 = vadd.f32 %v7813_v4, %v7604_v47 }
0x1923   : > { %v7773_v52 = vadd.f32 %v7772_v34, %v7600_v0  ;;  %v14218_v63 = vpop.f32.mrf.mxu1 }
0x1924   : > { %v7774_v39 = vpop.f32.mrf.mxu0 }
0x1925   : > { %v7775_v35 = vadd.f32 %v7774_v39, %v7596_v57  ;;  %v7816_v61 = vpop.f32.mrf.mxu1 }
0x1926   : > { %v7776_v8 = vpop.f32.mrf.mxu0  ;;  %v7817_v1 = vadd.f32 %v7816_v61, %v7604_v47 }
0x1927   : > { %v7777_v36 = vadd.f32 %v7776_v8, %v7600_v0  ;;  %v7822_v54 = vpack.c.bf16 %v7775_v35, %v7771_v43  ;;  %v14219_v3 = vpop.f32.mrf.mxu1 }
0x1928   : > { %v17061_v55 = vpack.c.bf16 %v7817_v1, %v7814_v7 }
0x1929   : > { %v7823_v45 = vpack.c.bf16 %v7777_v36, %v7773_v52 }
0x192b   : > { %v7830_v10 = vsel %vm7825_vm7, %v7823_v45, 0 }
0x192c   : > { %14221 = vmatpush3.bf16.xpose.msra.mxu1 %v7830_v10 }
0x192d   : > { %14226 = vmatprep.subr.bf16.mxu1 %v15881_v2 }
0x1933   : > { %14223 = vmatmul.mubr.msk.bf16.vlgmr.msra.gmra.mxu1 %vm7825_vm7, %v7822_v54 }
0x1934   : > { %14228 = vmatprep.mubr.msk.bf16.mxu1 %vm15882_vm6, %v15881_v2  ;;  %14227 = vmatpush3.bf16.msra.mxu1 %v17061_v55 }
0x1935   : > { %14232 = vmatprep.subr.bf16.mxu1 %v15881_v2 }
0x19f3   : > { %v7866_v5 = vpop.f32.mrf.mxu1 }
0x19f4   : > { %v7873_v9 = vmul.f32 0.25, %v7866_v5 }
0x19f5   : > { %v14224_v12 = vpop.f32.mrf.mxu1 }
0x19f6   : > { %v7875_v51 = vadd.f32 %v7873_v9, %v17065_v56 }
0x19f7   : > { %v7869_v15 = vpop.f32.mrf.mxu1 }
0x19f8   : > { %v7874_v19 = vmul.f32 0.25, %v7869_v15  ;;  %v7877_v62 = vsel %vm7825_vm7, %v7875_v51, -inf }
0x19f9   : > { %7878 = vmax.xlane.f32.xlu0 %v7877_v62  ;;  %v14225_v14 = vpop.f32.mrf.mxu1 }
0x19fa   : > { %v7876_v22 = vadd.f32 %v7874_v19, %v17068_v18 }
0x19fc   : > { %v7880_v23 = vsel %vm7825_vm7, %v7876_v22, -inf }
0x19fd   : > { %7881 = vmax.xlane.f32.xlu0 %v7880_v23 }
0x1a13   : > { %7948 = vrot.lane.b32.xlu0 %v7823_v45, %s15883_s19 }
0x1a17   : > { %8199 = vrot.lane.b32.xlu0 %v7823_v45, %s15884_s18 }
0x1a1b   : > { %8324 = vrot.lane.b32.xlu0 %v7823_v45, %s15885_s6 }
0x1a1f   : > { %8449 = vrot.lane.b32.xlu0 %v7823_v45, %s15886_s15 }
0x1a23   : > { %8574 = vrot.lane.b32.xlu0 %v7823_v45, %s15887_s26 }
0x1a27   : > { %8699 = vrot.lane.b32.xlu0 %v7823_v45, %s15888_s24 }
0x1a82   : > { %v7879_v20 = vpop.xlane.xlu0 %7878 }
0x1a83   : > { %v7883_v24 = vsub.f32 %v7875_v51, %v7879_v20 }
0x1a85   : > { %v7885_v6 = vmul.f32 1.442695, %v7883_v24 }
0x1a86   : > { %v7882_v25 = vpop.xlane.xlu0 %7881 }
0x1a87   : > { %14904 = vpow2.f32 %v7885_v6  ;;  %v7884_v26 = vsub.f32 %v7876_v22, %v7882_v25 }
0x1a89   : > { %v7887_v27 = vmul.f32 1.442695, %v7884_v26 }
0x1a8a   : > { %v7949_v40 = vpop.permute.xlu0 %7948 }
0x1a8b   : > { %14906 = vpow2.f32 %v7887_v27  ;;  %v7954_v49 = vsel %vm7825_vm7, %v7949_v40, 0 }
0x1a8e   : > { %v8200_v16 = vpop.permute.xlu0 %8199 }
0x1a8f   : > { %v8205_v42 = vsel %vm7825_vm7, %v8200_v16, 0 }
0x1a92   : > { %v8325_v60 = vpop.permute.xlu0 %8324 }
0x1a93   : > { %v8330_v0 = vsel %vm7825_vm7, %v8325_v60, 0 }
0x1a94   : > { %v14905_v28 = vpop.eup %14904 }
0x1a95   : > { %v7889_v29 = vsel %vm7825_vm7, %v14905_v28, 0.0 }
0x1a96   : > { %7890 = vadd.xlane.f32.xlu1 %v7889_v29  ;;  %v8450_v39 = vpop.permute.xlu0 %8449 }
0x1a97   : > { %v8455_v52 = vsel %vm7825_vm7, %v8450_v39, 0 }
0x1a98   : > { %v14907_v11 = vpop.eup %14906 }
0x1a99   : > { %v7892_v30 = vsel %vm7825_vm7, %v14907_v11, 0.0 }
0x1a9a   : > { %7893 = vadd.xlane.f32.xlu1 %v7892_v30  ;;  %v8575_v36 = vpop.permute.xlu0 %8574 }
0x1a9b   : > { %v8580_v57 = vsel %vm7825_vm7, %v8575_v36, 0 }
0x1a9e   : > { %v8700_v10 = vpop.permute.xlu0 %8699 }
0x1a9f   : > { %v8705_v43 = vsel %vm7825_vm7, %v8700_v10, 0 }
0x1aab   : > { %7945 = vrot.lane.b32.xlu1 %v7822_v54, %s15883_s19 }
0x1aaf   : > { %8074 = vrot.lane.b32.xlu1 %v7823_v45, %s15889_s1 }
0x1ab3   : > { %8072 = vrot.lane.b32.xlu1 %v7822_v54, %s15889_s1 }
0x1ab7   : > { %8197 = vrot.lane.b32.xlu1 %v7822_v54, %s15884_s18 }
0x1abb   : > { %8322 = vrot.lane.b32.xlu1 %v7822_v54, %s15885_s6 }
0x1abf   : > { %8447 = vrot.lane.b32.xlu1 %v7822_v54, %s15886_s15 }
0x1ac3   : > { %8572 = vrot.lane.b32.xlu1 %v7822_v54, %s15887_s26 }
0x1ac7   : > { %8697 = vrot.lane.b32.xlu1 %v7822_v54, %s15888_s24 }
0x1b1f   : > { %v7891_v13 = vpop.xlane.xlu1 %7890 }
0x1b20   : > { %14908 = vrcp.f32 %v7891_v13 }
0x1b23   : > { %v7894_v37 = vpop.xlane.xlu1 %7893 }
0x1b24   : > { %14910 = vrcp.f32 %v7894_v37 }
0x1b27   : > { %v7946_v38 = vpop.permute.xlu1 %7945 }
0x1b2b   : > { %v8075_v17 = vpop.permute.xlu1 %8074 }
0x1b2c   : > { %v8080_v58 = vsel %vm7825_vm7, %v8075_v17, 0 }
0x1b2d   : > { %14245 = vmatpush3.bf16.xpose.msra.mxu0 %v8080_v58  ;;  %v14909_v31 = vpop.eup %14908 }
0x1b2e   : > { %14256 = vmatprep.subr.bf16.mxu0 %v15881_v2  ;;  %v7897_v53 = vmul.f32 %v14909_v31, %v14905_v28 }
0x1b2f   : > { %v8073_v41 = vpop.permute.xlu1 %8072 }
0x1b31   : > { %v14911_v32 = vpop.eup %14910 }
0x1b32   : > { %v7898_v33 = vmul.f32 %v14911_v32, %v14907_v11 }
0x1b33   : > { %v8198_v34 = vpop.permute.xlu1 %8197 }
0x1b34   : > { %14247 = vmatmul.mubr.msk.bf16.vlgmr.msra.gmra.mxu0 %vm7825_vm7, %v8073_v41  ;;  %v7899_v44 = vpack.c.bf16 %v7898_v33, %v7897_v53 }
0x1b35   : > { %14257 = vmatpush3.bf16.xpose.msra.mxu0 %v8205_v42  ;;  %14258 = vmatprep.mubr.msk.bf16.mxu0 %vm15882_vm6, %v15881_v2 }
0x1b36   : > { %14229 = vmatmul.mubr.msk.bf16.vlgmr.msra.gmra.mxu1 %vm7825_vm7, %v7899_v44  ;;  %14268 = vmatprep.subr.bf16.mxu0 %v15881_v2 }
0x1b37   : > { %14233 = vmatpush3.bf16.xpose.msra.mxu1 %v7954_v49  ;;  %14234 = vmatprep.mubr.msk.bf16.mxu1 %vm15882_vm6, %v15881_v2  ;;  %v8323_v8 = vpop.permute.xlu1 %8322 }
0x1b38   : > { %14238 = vmatprep.subr.bf16.mxu1 %v15881_v2 }
0x1b3b   : > { %v8448_v45 = vpop.permute.xlu1 %8447 }
0x1b3c   : > { %14259 = vmatmul.mubr.msk.bf16.vlgmr.msra.gmra.mxu0 %vm7825_vm7, %v8198_v34 }
0x1b3d   : > { %14269 = vmatpush3.bf16.xpose.msra.mxu0 %v8330_v0  ;;  %14270 = vmatprep.mubr.msk.bf16.mxu0 %vm15882_vm6, %v15881_v2 }
0x1b3e   : > { %14235 = vmatmul.mubr.msk.bf16.vlgmr.msra.gmra.mxu1 %vm7825_vm7, %v7946_v38  ;;  %14280 = vmatprep.subr.bf16.mxu0 %v15881_v2 }
0x1b3f   : > { %14240 = vmatprep.mubr.msk.bf16.mxu1 %vm15882_vm6, %v15881_v2  ;;  %v8573_v35 = vpop.permute.xlu1 %8572 }
0x1b43   : > { %v8698_v54 = vpop.permute.xlu1 %8697 }
0x1b44   : > { %14271 = vmatmul.mubr.msk.bf16.vlgmr.msra.gmra.mxu0 %vm7825_vm7, %v8323_v8 }
0x1b45   : > { %14281 = vmatpush3.bf16.xpose.msra.mxu0 %v8455_v52  ;;  %14282 = vmatprep.mubr.msk.bf16.mxu0 %vm15882_vm6, %v15881_v2 }
0x1b46   : > { %14292 = vmatprep.subr.bf16.mxu0 %v15881_v2 }
0x1b4c   : > { %14283 = vmatmul.mubr.msk.bf16.vlgmr.msra.gmra.mxu0 %vm7825_vm7, %v8448_v45 }
0x1b4d   : > { %14293 = vmatpush3.bf16.xpose.msra.mxu0 %v8580_v57  ;;  %14294 = vmatprep.mubr.msk.bf16.mxu0 %vm15882_vm6, %v15881_v2 }
0x1b4e   : > { %14304 = vmatprep.subr.bf16.mxu0 %v15881_v2 }
0x1b54   : > { %14295 = vmatmul.mubr.msk.bf16.vlgmr.msra.gmra.mxu0 %vm7825_vm7, %v8573_v35 }
0x1b55   : > { %14305 = vmatpush3.bf16.xpose.msra.mxu0 %v8705_v43  ;;  %14306 = vmatprep.mubr.msk.bf16.mxu0 %vm15882_vm6, %v15881_v2 }
0x1b56   : > { %14316 = vmatprep.subr.bf16.mxu0 %v15881_v2 }
0x1b5c   : > { %14307 = vmatmul.mubr.msk.bf16.vlgmr.msra.gmra.mxu0 %vm7825_vm7, %v8698_v54 }
0x1b5d   : > { %14332 = vmatprep.mubr.msk.bf16.mxu0 %vm15882_vm6, %v15881_v2 }
0x1bf4   : > { %v8116_v47 = vpop.f32.mrf.mxu0 }
0x1bf5   : > { %v8123_v15 = vmul.f32 0.25, %v8116_v47 }
0x1bf6   : > { %v17127_v4 = vpop.f32.mrf.mxu1  ;;  %v14248_v63 = vpop.f32.mrf.mxu0 }
0x1bf7   : > { %v17137_v27 = vadd.f32 %v8123_v15, %v17065_v56 }
0x1bf8   : > { %v14230_v7 = vpop.f32.mrf.mxu1  ;;  %v8119_v61 = vpop.f32.mrf.mxu0 }
0x1bf9   : > { %v8124_v23 = vmul.f32 0.25, %v8119_v61  ;;  %v8127_v38 = vsel %vm7825_vm7, %v17137_v27, -inf }
0x1bfa   : > { %v17129_v1 = vpop.f32.mrf.mxu1  ;;  %v14249_v3 = vpop.f32.mrf.mxu0 }
0x1bfb   : > { %v17143_v13 = vadd.f32 %v8124_v23, %v17068_v18 }
0x1bfc   : > { %v14231_v5 = vpop.f32.mrf.mxu1  ;;  %v8241_v9 = vpop.f32.mrf.mxu0 }
0x1bfd   : > { %v8248_v37 = vmul.f32 0.25, %v8241_v9  ;;  %v8130_v16 = vsel %vm7825_vm7, %v17143_v13, -inf }
0x1bfe   : > { %v7990_v12 = vpop.f32.mrf.mxu1  ;;  %v14260_v51 = vpop.f32.mrf.mxu0 }
0x1bff   : > { %v7997_v19 = vmul.f32 0.25, %v7990_v12  ;;  %v17157_v41 = vadd.f32 %v8248_v37, %v17065_v56 }
0x1c00   : > { %v14236_v62 = vpop.f32.mrf.mxu1  ;;  %v8244_v14 = vpop.f32.mrf.mxu0 }
0x1c01   : > { %v17132_v22 = vadd.f32 %v7997_v19, %v17065_v56  ;;  %v8249_v6 = vmul.f32 0.25, %v8244_v14  ;;  %v8252_v34 = vsel %vm7825_vm7, %v17157_v41, -inf }
0x1c02   : > { %v7993_v20 = vpop.f32.mrf.mxu1  ;;  %v14261_v24 = vpop.f32.mrf.mxu0 }
0x1c03   : > { %v7998_v25 = vmul.f32 0.25, %v7993_v20  ;;  %v8001_v26 = vsel %vm7825_vm7, %v17132_v22, -inf  ;;  %v17150_v17 = vadd.f32 %v8249_v6, %v17068_v18 }
0x1c04   : > { %v8366_v28 = vpop.f32.mrf.mxu0  ;;  %8002 = vmax.xlane.f32.xlu0 %v8001_v26  ;;  %v14237_v29 = vpop.f32.mrf.mxu1 }
0x1c05   : > { %v17140_v11 = vadd.f32 %v7998_v25, %v17068_v18  ;;  %v8373_v53 = vmul.f32 0.25, %v8366_v28  ;;  %v8255_v33 = vsel %vm7825_vm7, %v17150_v17, -inf }
0x1c06   : > { %v14272_v30 = vpop.f32.mrf.mxu0 }
0x1c07   : > { %v8004_v40 = vsel %vm7825_vm7, %v17140_v11, -inf  ;;  %v17167_v39 = vadd.f32 %v8373_v53, %v17065_v56 }
0x1c08   : > { %v8369_v58 = vpop.f32.mrf.mxu0  ;;  %8128 = vmax.xlane.f32.xlu0 %v8127_v38  ;;  %8005 = vmax.xlane.f32.xlu1 %v8004_v40 }
0x1c09   : > { %v8374_v31 = vmul.f32 0.25, %v8369_v58  ;;  %v8377_v45 = vsel %vm7825_vm7, %v17167_v39, -inf }
0x1c0a   : > { %v14273_v32 = vpop.f32.mrf.mxu0 }
0x1c0b   : > { %v17160_v42 = vadd.f32 %v8374_v31, %v17068_v18 }
0x1c0c   : > { %v8491_v44 = vpop.f32.mrf.mxu0  ;;  %8131 = vmax.xlane.f32.xlu0 %v8130_v16  ;;  %8256 = vmax.xlane.f32.xlu1 %v8255_v33 }
0x1c0d   : > { %v8498_v60 = vmul.f32 0.25, %v8491_v44  ;;  %v8380_v0 = vsel %vm7825_vm7, %v17160_v42, -inf }
0x1c0e   : > { %v14284_v49 = vpop.f32.mrf.mxu0 }
0x1c0f   : > { %v17175_v10 = vadd.f32 %v8498_v60, %v17065_v56 }
0x1c10   : > { %v8494_v8 = vpop.f32.mrf.mxu0  ;;  %8253 = vmax.xlane.f32.xlu0 %v8252_v34  ;;  %8381 = vmax.xlane.f32.xlu1 %v8380_v0 }
0x1c11   : > { %v8499_v52 = vmul.f32 0.25, %v8494_v8  ;;  %v8502_v63 = vsel %vm7825_vm7, %v17175_v10, -inf }
0x1c12   : > { %v14285_v36 = vpop.f32.mrf.mxu0 }
0x1c13   : > { %v17172_v57 = vadd.f32 %v8499_v52, %v17068_v18 }
0x1c14   : > { %v8616_v35 = vpop.f32.mrf.mxu0  ;;  %8378 = vmax.xlane.f32.xlu0 %v8377_v45 }
0x1c15   : > { %v8623_v43 = vmul.f32 0.25, %v8616_v35  ;;  %v8505_v54 = vsel %vm7825_vm7, %v17172_v57, -inf }
0x1c16   : > { %v14296_v47 = vpop.f32.mrf.mxu0  ;;  %8506 = vmax.xlane.f32.xlu1 %v8505_v54 }
0x1c17   : > { %v17182_v7 = vadd.f32 %v8623_v43, %v17065_v56 }
0x1c18   : > { %v8619_v61 = vpop.f32.mrf.mxu0  ;;  %8503 = vmax.xlane.f32.xlu0 %v8502_v63 }
0x1c19   : > { %v8624_v3 = vmul.f32 0.25, %v8619_v61  ;;  %v8627_v9 = vsel %vm7825_vm7, %v17182_v7, -inf }
0x1c1a   : > { %v14297_v5 = vpop.f32.mrf.mxu0 }
0x1c1b   : > { %v17187_v12 = vadd.f32 %v8624_v3, %v17068_v18 }
0x1c1c   : > { %v8741_v51 = vpop.f32.mrf.mxu0  ;;  %8628 = vmax.xlane.f32.xlu0 %v8627_v9 }
0x1c1d   : > { %v8748_v15 = vmul.f32 0.25, %v8741_v51  ;;  %v8630_v19 = vsel %vm7825_vm7, %v17187_v12, -inf }
0x1c1e   : > { %v14308_v62 = vpop.f32.mrf.mxu0  ;;  %8631 = vmax.xlane.f32.xlu1 %v8630_v19 }
0x1c1f   : > { %v17192_v14 = vadd.f32 %v8748_v15, %v17065_v56 }
0x1c20   : > { %v8744_v23 = vpop.f32.mrf.mxu0 }
0x1c21   : > { %v8749_v20 = vmul.f32 0.25, %v8744_v23  ;;  %v8752_v24 = vsel %vm7825_vm7, %v17192_v14, -inf }
0x1c22   : > { %v14309_v6 = vpop.f32.mrf.mxu0  ;;  %8753 = vmax.xlane.f32.xlu0 %v8752_v24 }
0x1c23   : > { %v17197_v25 = vadd.f32 %v8749_v20, %v17068_v18 }
0x1c25   : > { %v8755_v26 = vsel %vm7825_vm7, %v17197_v25, -inf }
0x1c26   : > { %8756 = vmax.xlane.f32.xlu1 %v8755_v26 }
0x1c8d   : > { %v8003_v28 = vpop.xlane.xlu0 %8002 }
0x1c8e   : > { %v8007_v49 = vsub.f32 %v17132_v22, %v8003_v28 }
0x1c90   : > { %v8009_v0 = vmul.f32 1.442695, %v8007_v49 }
0x1c91   : > { %v8129_v29 = vpop.xlane.xlu0 %8128  ;;  %v8006_v30 = vpop.xlane.xlu1 %8005 }
0x1c92   : > { %v8133_v56 = vsub.f32 %v17137_v27, %v8129_v29  ;;  %v8008_v22 = vsub.f32 %v17140_v11, %v8006_v30 }
0x1c94   : > { %v8135_v37 = vmul.f32 1.442695, %v8133_v56  ;;  %v8011_v54 = vmul.f32 1.442695, %v8008_v22 }
0x1c95   : > { %v8132_v38 = vpop.xlane.xlu0 %8131  ;;  %v8257_v40 = vpop.xlane.xlu1 %8256 }
0x1c96   : > { %14912 = vpow2.f32 %v8135_v37  ;;  %v8134_v58 = vsub.f32 %v17143_v13, %v8132_v38  ;;  %v8259_v31 = vsub.f32 %v17150_v17, %v8257_v40 }
0x1c98   : > { %v8137_v32 = vmul.f32 1.442695, %v8134_v58  ;;  %v8262_v18 = vmul.f32 1.442695, %v8259_v31 }
0x1c99   : > { %v8254_v16 = vpop.xlane.xlu0 %8253  ;;  %v8382_v53 = vpop.xlane.xlu1 %8381 }
0x1c9a   : > { %14914 = vpow2.f32 %v8137_v32  ;;  %v8258_v33 = vsub.f32 %v17157_v41, %v8254_v16  ;;  %v8384_v44 = vsub.f32 %v17160_v42, %v8382_v53 }
0x1c9b   : > { %14916 = vpow2.f32 %v8262_v18 }
0x1c9c   : > { %v8260_v27 = vmul.f32 1.442695, %v8258_v33  ;;  %v8387_v60 = vmul.f32 1.442695, %v8384_v44 }
0x1c9d   : > { %v8379_v34 = vpop.xlane.xlu0 %8378 }
0x1c9e   : > { %14918 = vpow2.f32 %v8260_v27  ;;  %v8383_v13 = vsub.f32 %v17167_v39, %v8379_v34 }
0x1c9f   : > { %v8507_v17 = vpop.xlane.xlu1 %8506  ;;  %14920 = vpow2.f32 %v8387_v60 }
0x1ca0   : > { %v8385_v8 = vmul.f32 1.442695, %v8383_v13  ;;  %v8509_v52 = vsub.f32 %v17172_v57, %v8507_v17 }
0x1ca1   : > { %v8504_v36 = vpop.xlane.xlu0 %8503 }
0x1ca2   : > { %14922 = vpow2.f32 %v8385_v8  ;;  %v8508_v41 = vsub.f32 %v17175_v10, %v8504_v36  ;;  %v8512_v45 = vmul.f32 1.442695, %v8509_v52 }
0x1ca3   : > { %v17210_v42 = vpop.eup %14912  ;;  %14924 = vpow2.f32 %v8009_v0 }
0x1ca4   : > { %v8510_v35 = vmul.f32 1.442695, %v8508_v41  ;;  %v8139_v39 = vsel %vm7825_vm7, %v17210_v42, 0.0 }
0x1ca5   : > { %8140 = vadd.xlane.f32.xlu0 %v8139_v39  ;;  %v8629_v26 = vpop.xlane.xlu0 %8628 }
0x1ca6   : > { %14926 = vpow2.f32 %v8510_v35  ;;  %v8633_v28 = vsub.f32 %v17182_v7, %v8629_v26 }
0x1ca7   : > { %v17215_v43 = vpop.eup %14914  ;;  %14928 = vpow2.f32 %v8512_v45  ;;  %v8632_v30 = vpop.xlane.xlu1 %8631 }
0x1ca8   : > { %v8142_v57 = vsel %vm7825_vm7, %v17215_v43, 0.0  ;;  %v17219_v10 = vpop.eup %14916  ;;  %14930 = vpow2.f32 %v8011_v54  ;;  %v8635_v29 = vmul.f32 1.442695, %v8633_v28  ;;  %v8634_v56 = vsub.f32 %v17187_v12, %v8632_v30 }
0x1ca9   : > { %8143 = vadd.xlane.f32.xlu1 %v8142_v57  ;;  %v8267_v63 = vsel %vm7825_vm7, %v17219_v10, 0.0 }
0x1caa   : > { %14932 = vpow2.f32 %v8635_v29  ;;  %v8637_v38 = vmul.f32 1.442695, %v8634_v56 }
0x1cab   : > { %v17221_v47 = vpop.eup %14918  ;;  %v8754_v37 = vpop.xlane.xlu0 %8753 }
0x1cac   : > { %v8264_v11 = vsel %vm7825_vm7, %v17221_v47, 0.0  ;;  %v17227_v61 = vpop.eup %14920  ;;  %v8758_v40 = vsub.f32 %v17192_v14, %v8754_v37  ;;  %14934 = vpow2.f32 %v8637_v38 }
0x1cad   : > { %8265 = vadd.xlane.f32.xlu0 %v8264_v11  ;;  %8268 = vadd.xlane.f32.xlu1 %v8267_v63  ;;  %v8392_v51 = vsel %vm7825_vm7, %v17227_v61, 0.0 }
0x1cae   : > { %v8760_v31 = vmul.f32 1.442695, %v8758_v40 }
0x1caf   : > { %v17229_v3 = vpop.eup %14922  ;;  %v8757_v58 = vpop.xlane.xlu1 %8756 }
0x1cb0   : > { %v17231_v5 = vpop.eup %14924  ;;  %v8389_v9 = vsel %vm7825_vm7, %v17229_v3, 0.0  ;;  %v8759_v32 = vsub.f32 %v17197_v25, %v8757_v58  ;;  %14936 = vpow2.f32 %v8760_v31 }
0x1cb1   : > { %8390 = vadd.xlane.f32.xlu0 %v8389_v9  ;;  %8393 = vadd.xlane.f32.xlu1 %v8392_v51  ;;  %v8013_v19 = vsel %vm7825_vm7, %v17231_v5, 0.0 }
0x1cb2   : > { %v8762_v18 = vmul.f32 1.442695, %v8759_v32 }
0x1cb3   : > { %v17237_v15 = vpop.eup %14926 }
0x1cb4   : > { %v8514_v62 = vsel %vm7825_vm7, %v17237_v15, 0.0  ;;  %v17243_v23 = vpop.eup %14928  ;;  %14938 = vpow2.f32 %v8762_v18 }
0x1cb5   : > { %8014 = vadd.xlane.f32.xlu0 %v8013_v19  ;;  %8515 = vadd.xlane.f32.xlu1 %v8514_v62  ;;  %v8517_v20 = vsel %vm7825_vm7, %v17243_v23, 0.0  ;;  %v14931_v24 = vpop.eup %14930 }
0x1cb6   : > { %v8016_v6 = vsel %vm7825_vm7, %v14931_v24, 0.0 }
0x1cb7   : > { %v17256_v16 = vpop.eup %14932 }
0x1cb8   : > { %v8639_v7 = vsel %vm7825_vm7, %v17256_v16, 0.0 }
0x1cb9   : > { %8518 = vadd.xlane.f32.xlu1 %v8517_v20  ;;  %v17260_v53 = vpop.eup %14934 }
0x1cba   : > { %v8642_v12 = vsel %vm7825_vm7, %v17260_v53, 0.0 }
0x1cbd   : > { %8017 = vadd.xlane.f32.xlu1 %v8016_v6  ;;  %v17264_v14 = vpop.eup %14936 }
0x1cbe   : > { %v8764_v25 = vsel %vm7825_vm7, %v17264_v14, 0.0 }
0x1cc1   : > { %v17268_v33 = vpop.eup %14938 }
0x1cc2   : > { %v8767_v44 = vsel %vm7825_vm7, %v17268_v33, 0.0 }
0x1ccb   : > { %8025 = vrot.lane.b32.xlu0 %v17061_v55, %s15883_s19 }
0x1cce   : > { %8150 = vrot.lane.b32.xlu1 %v17061_v55, %s15889_s1 }
0x1cea   : > { %8640 = vadd.xlane.f32.xlu0 %v8639_v7 }
0x1cf2   : > { %8643 = vadd.xlane.f32.xlu1 %v8642_v12 }
0x1cf6   : > { %8765 = vadd.xlane.f32.xlu1 %v8764_v25 }
0x1cfa   : > { %8768 = vadd.xlane.f32.xlu1 %v8767_v44 }
0x1d00   : > { %8275 = vrot.lane.b32.xlu0 %v17061_v55, %s15884_s18 }
0x1d04   : > { %8525 = vrot.lane.b32.xlu0 %v17061_v55, %s15886_s15 }
0x1d08   : > { %8650 = vrot.lane.b32.xlu0 %v17061_v55, %s15887_s26 }
0x1d0b   : > { %8400 = vrot.lane.b32.xlu1 %v17061_v55, %s15885_s6 }
0x1d0c   : > { %8775 = vrot.lane.b32.xlu0 %v17061_v55, %s15888_s24 }
0x1d2e   : > { %v8141_v49 = vpop.xlane.xlu0 %8140 }
0x1d32   : > { %v8144_v27 = vpop.xlane.xlu1 %8143 }
0x1d36   : > { %v8266_v60 = vpop.xlane.xlu0 %8265  ;;  %v8269_v34 = vpop.xlane.xlu1 %8268 }
0x1d3a   : > { %v8391_v13 = vpop.xlane.xlu0 %8390  ;;  %v8394_v0 = vpop.xlane.xlu1 %8393 }
0x1d3e   : > { %v8015_v17 = vpop.xlane.xlu0 %8014  ;;  %v8516_v8 = vpop.xlane.xlu1 %8515 }
0x1d3f   : > { %14940 = vrcp.f32 %v8015_v17 }
0x1d42   : > { %v8026_v52 = vpop.permute.xlu0 %8025  ;;  %v8519_v36 = vpop.xlane.xlu1 %8518 }
0x1d43   : > { %14239 = vmatpush3.bf16.msra.mxu1 %v8026_v52 }
0x1d44   : > { %14250 = vmatprep.subr.bf16.mxu1 %v15881_v2 }
0x1d46   : > { %v8018_v41 = vpop.xlane.xlu1 %8017 }
0x1d47   : > { %14942 = vrcp.f32 %v8018_v41  ;;  %v14896_v41 = vld [vmem:[%s16518_s10 + $0x38] sm:$0xff]  }
0x1d48   : > { %14944 = vrcp.f32 %v8144_v27  ;;  %14317 = vmatpush3.bf16.msra.mxu0 %v14896_v41 }
0x1d49   : > { %14946 = vrcp.f32 %v8141_v49  ;;  %14318 = vmatprep.subr.bf16.mxu0 %v15881_v2 }
0x1d4a   : > { %v8151_v57 = vpop.permute.xlu1 %8150  ;;  %14948 = vrcp.f32 %v8266_v60 }
0x1d4b   : > { %14950 = vrcp.f32 %v8269_v34 }
0x1d4c   : > { %v14941_v22 = vpop.eup %14940  ;;  %14952 = vrcp.f32 %v8391_v13 }
0x1d4d   : > { %v8021_v45 = vmul.f32 %v14941_v22, %v17231_v5  ;;  %14954 = vrcp.f32 %v8394_v0 }
0x1d4e   : > { %14956 = vrcp.f32 %v8519_v36 }
0x1d4f   : > { %14958 = vrcp.f32 %v8516_v8 }
0x1d54   : > { %v14943_v55 = vpop.eup %14942 }
0x1d55   : > { %v8022_v35 = vmul.f32 %v14943_v55, %v14931_v24  ;;  %v14945_v54 = vpop.eup %14944 }
0x1d56   : > { %v14947_v11 = vpop.eup %14946  ;;  %v8148_v63 = vmul.f32 %v14945_v54, %v17215_v43  ;;  %v14897_v54 = vld [vmem:[%s16518_s10 + $0x30] sm:$0xff]  }
0x1d57   : > { %v8023_v39 = vpack.c.bf16 %v8022_v35, %v8021_v45  ;;  %v8147_v9 = vmul.f32 %v14947_v11, %v17210_v42  ;;  %v14949_v5 = vpop.eup %14948  ;;  %14319 = vmatpush3.bf16.msra.mxu0 %v14897_v54 }
0x1d58   : > { %v14951_v19 = vpop.eup %14950  ;;  %v8272_v20 = vmul.f32 %v14949_v5, %v17221_v47  ;;  %14320 = vmatprep.subr.bf16.mxu0 %v15881_v2 }
0x1d59   : > { %14241 = vmatmul.mubr.msk.bf16.vlgmr.msra.gmra.mxu1 %vm7825_vm7, %v8023_v39  ;;  %v8149_v51 = vpack.c.bf16 %v8148_v63, %v8147_v9  ;;  %v8273_v43 = vmul.f32 %v14951_v19, %v17219_v10  ;;  %v14953_v28 = vpop.eup %14952  ;;  %v14899_v9 = vld [vmem:[%s16518_s10 + $0x20] sm:$0xff]   ;;  %v14900_v19 = vld [vmem:[%s16518_s10 + $0x18] sm:$0xff]  }
0x1d5a   : > { %14251 = vmatpush3.bf16.msra.mxu1 %v8151_v57  ;;  %14252 = vmatprep.mubr.msk.bf16.mxu1 %vm15882_vm6, %v15881_v2  ;;  %v14955_v29 = vpop.eup %14954  ;;  %v8397_v10 = vmul.f32 %v14953_v28, %v17229_v3  ;;  %v14898_v57 = vld [vmem:[%s16518_s10 + $0x28] sm:$0xff]  }
0x1d5b   : > { %14262 = vmatprep.subr.bf16.mxu1 %v15881_v2  ;;  %v8274_v42 = vpack.c.bf16 %v8273_v43, %v8272_v20  ;;  %v8398_v47 = vmul.f32 %v14955_v29, %v17227_v61  ;;  %v14957_v38 = vpop.eup %14956  ;;  %14321 = vmatpush3.bf16.msra.mxu0 %v14898_v57 }
0x1d5c   : > { %v14959_v58 = vpop.eup %14958  ;;  %v8523_v61 = vmul.f32 %v14957_v38, %v17243_v23  ;;  %14322 = vmatprep.subr.bf16.mxu0 %v15881_v2 }
0x1d5d   : > { %v8399_v37 = vpack.c.bf16 %v8398_v47, %v8397_v10  ;;  %v8522_v3 = vmul.f32 %v14959_v58, %v17237_v15  ;;  %v14903_v10 = vld [vmem:[%s16518_s10] sm:$0xff]  }
0x1d5f   : > { %v8524_v31 = vpack.c.bf16 %v8523_v61, %v8522_v3  ;;  %14323 = vmatpush3.bf16.msra.mxu0 %v14899_v9 }
0x1d60   : > { %14324 = vmatprep.subr.bf16.mxu0 %v15881_v2 }
0x1d61   : > { %14253 = vmatmul.mubr.msk.bf16.vlgmr.msra.gmra.mxu1 %vm7825_vm7, %v8149_v51 }
0x1d62   : > { %14264 = vmatprep.mubr.msk.bf16.mxu1 %vm15882_vm6, %v15881_v2 }
0x1d63   : > { %14325 = vmatpush3.bf16.msra.mxu0 %v14900_v19 }
0x1d64   : > { %14326 = vmatprep.subr.bf16.mxu0 %v15881_v2 }
0x1d73   : > { %v8641_v62 = vpop.xlane.xlu0 %8640 }
0x1d77   : > { %v8276_v24 = vpop.permute.xlu0 %8275 }
0x1d78   : > { %14263 = vmatpush3.bf16.msra.mxu1 %v8276_v24  ;;  %v14901_v24 = vld [vmem:[%s16518_s10 + $0x10] sm:$0xff]  }
0x1d79   : > { %14274 = vmatprep.subr.bf16.mxu1 %v15881_v2  ;;  %14327 = vmatpush3.bf16.msra.mxu0 %v14901_v24 }
0x1d7a   : > { %14328 = vmatprep.subr.bf16.mxu0 %v15881_v2 }
0x1d7b   : > { %14265 = vmatmul.mubr.msk.bf16.vlgmr.msra.gmra.mxu1 %vm7825_vm7, %v8274_v42  ;;  %v8644_v6 = vpop.xlane.xlu1 %8643  ;;  %v8526_v40 = vpop.permute.xlu0 %8525 }
0x1d7c   : > { %14276 = vmatprep.mubr.msk.bf16.mxu1 %vm15882_vm6, %v15881_v2  ;;  %14960 = vrcp.f32 %v8644_v6 }
0x1d7d   : > { %14962 = vrcp.f32 %v8641_v62 }
0x1d7f   : > { %v8766_v26 = vpop.xlane.xlu1 %8765  ;;  %v8651_v18 = vpop.permute.xlu0 %8650 }
0x1d83   : > { %v8769_v30 = vpop.xlane.xlu1 %8768  ;;  %v8776_v49 = vpop.permute.xlu0 %8775 }
0x1d84   : > { %14964 = vrcp.f32 %v8769_v30 }
0x1d85   : > { %14966 = vrcp.f32 %v8766_v26  ;;  %v14902_v26 = vld [vmem:[%s16518_s10 + $0x8] sm:$0xff]   ;;  %s17864_s10 = scalar_lea.vmem [#allocation31], %s16503_s28 }
0x1d86   : > { %14329 = vmatpush3.bf16.msra.mxu0 %v14902_v26  ;;  %v12792_v9 = vld [vmem:[%s17864_s10] ss:$0 sm:$0xff] }
0x1d87   : > { %v8401_v56 = vpop.permute.xlu1 %8400  ;;  %14330 = vmatprep.subr.bf16.mxu0 %v15881_v2 }
0x1d88   : > { %14275 = vmatpush3.bf16.msra.mxu1 %v8401_v56 }
0x1d89   : > { %14286 = vmatprep.subr.bf16.mxu1 %v15881_v2  ;;  %v14961_v32 = vpop.eup %14960 }
0x1d8a   : > { %v14963_v7 = vpop.eup %14962  ;;  %v8648_v12 = vmul.f32 %v14961_v32, %v17260_v53  ;;  %14331 = vmatpush3.bf16.msra.mxu0 %v14903_v10 }
0x1d8b   : > { %14277 = vmatmul.mubr.msk.bf16.vlgmr.msra.gmra.mxu1 %vm7825_vm7, %v8399_v37  ;;  %v8647_v25 = vmul.f32 %v14963_v7, %v17256_v16 }
0x1d8c   : > { %14287 = vmatpush3.bf16.msra.mxu1 %v8526_v40  ;;  %14288 = vmatprep.mubr.msk.bf16.mxu1 %vm15882_vm6, %v15881_v2 }
0x1d8d   : > { %14298 = vmatprep.subr.bf16.mxu1 %v15881_v2  ;;  %v8649_v23 = vpack.c.bf16 %v8648_v12, %v8647_v25 }
0x1d91   : > { %v14965_v44 = vpop.eup %14964 }
0x1d92   : > { %v14967_v15 = vpop.eup %14966  ;;  %v8773_v27 = vmul.f32 %v14965_v44, %v17268_v33 }
0x1d93   : > { %14289 = vmatmul.mubr.msk.bf16.vlgmr.msra.gmra.mxu1 %vm7825_vm7, %v8524_v31  ;;  %v8772_v60 = vmul.f32 %v14967_v15, %v17264_v14 }
0x1d94   : > { %14299 = vmatpush3.bf16.msra.mxu1 %v8651_v18  ;;  %14300 = vmatprep.mubr.msk.bf16.mxu1 %vm15882_vm6, %v15881_v2 }
0x1d95   : > { %14310 = vmatprep.subr.bf16.mxu1 %v15881_v2  ;;  %v8774_v34 = vpack.c.bf16 %v8773_v27, %v8772_v60 }
0x1d9b   : > { %14301 = vmatmul.mubr.msk.bf16.vlgmr.msra.gmra.mxu1 %vm7825_vm7, %v8649_v23 }
0x1d9c   : > { %14311 = vmatpush3.bf16.msra.mxu1 %v8776_v49  ;;  %14312 = vmatprep.mubr.msk.bf16.mxu1 %vm15882_vm6, %v15881_v2 }
0x1da3   : > { %14313 = vmatmul.mubr.msk.bf16.vlgmr.msra.gmra.mxu1 %vm7825_vm7, %v8774_v34 }
0x1da4   : > { %9279 = vmatprep.mubr.bf16.mxu1 %v15880_v21 }
0x1e19   : > { %v8065_v16 = vpop.f32.mrf.mxu1 }
0x1e1b   : > { %v14242_v53 = vpop.f32.mrf.mxu1 }
0x1e1d   : > { %v8068_v13 = vpop.f32.mrf.mxu1 }
0x1e1e   : > { %v14829_v0 = vpack.i.bf16 %v8068_v13, %v8065_v16 }
0x1e1f   : > { %v14243_v17 = vpop.f32.mrf.mxu1 }
0x1e20   : > { %14830 = vrot.lane.b32.xlu1 %v14829_v0, %s15888_s24 }
0x1e21   : > { %v8190_v8 = vpop.f32.mrf.mxu1 }
0x1e23   : > { %v14254_v52 = vpop.f32.mrf.mxu1 }
0x1e25   : > { %v8193_v33 = vpop.f32.mrf.mxu1 }
0x1e26   : > { %v14834_v36 = vpack.i.bf16 %v8193_v33, %v8190_v8 }
0x1e27   : > { %v14255_v14 = vpop.f32.mrf.mxu1 }
0x1e28   : > { %14835 = vrot.lane.b32.xlu0 %v14834_v36, %s15887_s26 }
0x1e3b   : > { %v8315_v22 = vpop.f32.mrf.mxu1 }
0x1e3d   : > { %v14266_v55 = vpop.f32.mrf.mxu1 }
0x1e3f   : > { %v8318_v45 = vpop.f32.mrf.mxu1 }
0x1e40   : > { %v14839_v35 = vpack.i.bf16 %v8318_v45, %v8315_v22 }
0x1e41   : > { %v14267_v39 = vpop.f32.mrf.mxu1 }
0x1e42   : > { %14840 = vrot.lane.b32.xlu1 %v14839_v35, %s15886_s15 }
0x1e4b   : > { %v8440_v11 = vpop.f32.mrf.mxu1 }
0x1e4d   : > { %v14278_v63 = vpop.f32.mrf.mxu1 }
0x1e4f   : > { %v8443_v51 = vpop.f32.mrf.mxu1 }
0x1e50   : > { %v14844_v5 = vpack.i.bf16 %v8443_v51, %v8440_v11 }
0x1e51   : > { %v14279_v62 = vpop.f32.mrf.mxu1 }
0x1e52   : > { %14845 = vrot.lane.b32.xlu0 %v14844_v5, %s15885_s6  ;;  %v14976_v62 = vld [vmem:[#allocation2] sm:$0xff] }
0x1e53   : > { %v8565_v20 = vpop.f32.mrf.mxu1 }
0x1e55   : > { %v14290_v43 = vpop.f32.mrf.mxu1 }
0x1e57   : > { %v8568_v42 = vpop.f32.mrf.mxu1 }
0x1e58   : > { %v14849_v6 = vpack.i.bf16 %v8568_v42, %v8565_v20 }
0x1e59   : > { %v14291_v28 = vpop.f32.mrf.mxu1 }
0x1e5a   : > { %14850 = vrot.lane.b32.xlu1 %v14849_v6, %s15884_s18  ;;  %v14977_v6 = vld [vmem:[#allocation2 + $0x8] sm:$0xff]  ;;  %v9104_v28 = vld [vmem:[%s16521_s5 + $0x188] sm:$0xff] }
0x1e5b   : > { %v8690_v29 = vpop.f32.mrf.mxu1  ;;  %v9232_v10 = vunpack.c.h.s8.bf16 %v9104_v28 }
0x1e5d   : > { %v14302_v30 = vpop.f32.mrf.mxu1  ;;  %9247 = vmatprep.subr.bf16.mxu1 %v9232_v10 }
0x1e5e   : > { %v9103_v30 = vld [vmem:[%s16521_s5 + $0x180] sm:$0xff] }
0x1e5f   : > { %v8693_v47 = vpop.f32.mrf.mxu1 }
0x1e60   : > { %v14854_v56 = vpack.i.bf16 %v8693_v47, %v8690_v29  ;;  %v9106_v29 = vld [vmem:[%s16521_s5 + $0x198] sm:$0xff] }
0x1e61   : > { %v14303_v37 = vpop.f32.mrf.mxu1  ;;  %v9234_v47 = vunpack.c.h.s8.bf16 %v9106_v29 }
0x1e62   : > { %14855 = vrot.lane.b32.xlu0 %v14854_v56, %s15889_s1  ;;  %v9231_v56 = vunpack.c.h.s8.bf16 %v9103_v30  ;;  %v9105_v37 = vld [vmem:[%s16521_s5 + $0x190] sm:$0xff] }
0x1e63   : > { %v8815_v38 = vpop.f32.mrf.mxu1  ;;  %9290 = vmatprep.subr.bf16.mxu0 %v9234_v47 }
0x1e64   : > { %9248 = vmatpush1.bf16.msra.mxu1 %v9231_v56 }
0x1e65   : > { %v14314_v40 = vpop.f32.mrf.mxu1 }
0x1e67   : > { %v8818_v58 = vpop.f32.mrf.mxu1 }
0x1e68   : > { %v14859_v61 = vpack.i.bf16 %v8818_v58, %v8815_v38  ;;  %v9233_v38 = vunpack.c.h.s8.bf16 %v9105_v37 }
0x1e69   : > { %v14315_v3 = vpop.f32.mrf.mxu1 }
0x1e6a   : > { %14860 = vrot.lane.b32.xlu1 %v14859_v61, %s15883_s19 }
0x1e92   : > { %v14831_v31 = vpop.permute.xlu1 %14830 }
0x1e93   : > { %v14833_v12 = vunpack.i.h.bf16 %v14831_v31  ;;  %v14832_v2 = vunpack.i.l.bf16 %v14831_v31 }
0x1e95   : > { %v8879_v16 = vsel %vm7825_vm7, %v17129_v1, %v14833_v12  ;;  %v8878_v53 = vsel %vm7825_vm7, %v17127_v4, %v14832_v2  ;;  %v9216_v12 = vunpack.c.l.s8.bf16 %v9104_v28  ;;  %v9218_v2 = vunpack.c.l.s8.bf16 %v9106_v29 }
0x1e97   : > { %9249 = vmatprep.subr.bf16.mxu1 %v9216_v12 }
0x1e9a   : > { %v14836_v32 = vpop.permute.xlu0 %14835 }
0x1e9b   : > { %v14838_v25 = vunpack.i.h.bf16 %v14836_v32  ;;  %v14837_v23 = vunpack.i.l.bf16 %v14836_v32 }
0x1e9d   : > { %v8882_v17 = vsel %vm8880_vm8, %v8879_v16, %v14838_v25  ;;  %v8881_v8 = vsel %vm8880_vm8, %v8878_v53, %v14837_v23  ;;  %v9215_v25 = vunpack.c.l.s8.bf16 %v9103_v30  ;;  %v9217_v23 = vunpack.c.l.s8.bf16 %v9105_v37 }
0x1e9f   : > { %9250 = vmatpush1.bf16.msra.mxu1 %v9215_v25  ;;  %v9109_v25 = vld [vmem:[%s16521_s5 + $0x1b0] sm:$0xff] }
0x1eb4   : > { %v14841_v18 = vpop.permute.xlu1 %14840 }
0x1eb5   : > { %v14843_v49 = vunpack.i.h.bf16 %v14841_v18  ;;  %v14842_v15 = vunpack.i.l.bf16 %v14841_v18 }
0x1eb7   : > { %v8885_v36 = vsel %vm8883_vm9, %v8882_v17, %v14843_v49  ;;  %v8884_v14 = vsel %vm8883_vm9, %v8881_v8, %v14842_v15  ;;  %v9090_v49 = vld [vmem:[%s16521_s5 + $0x118] sm:$0xff] }
0x1ec4   : > { %v14846_v7 = vpop.permute.xlu0 %14845 }
0x1ec5   : > { %v14848_v60 = vunpack.i.h.bf16 %v14846_v7  ;;  %v14847_v34 = vunpack.i.l.bf16 %v14846_v7 }
0x1ec7   : > { %v8888_v41 = vsel %vm8886_vm10, %v8885_v36, %v14848_v60  ;;  %v8887_v22 = vsel %vm8886_vm10, %v8884_v14, %v14847_v34  ;;  %v9087_v60 = vld [vmem:[%s16521_s5 + $0x100] sm:$0xff]  ;;  %v9089_v34 = vld [vmem:[%s16521_s5 + $0x110] sm:$0xff] }
0x1ec8   : > { %v9199_v16 = vunpack.c.h.s8.bf16 %v9087_v60  ;;  %v9201_v53 = vunpack.c.h.s8.bf16 %v9089_v34  ;;  %v9183_v17 = vunpack.c.l.s8.bf16 %v9087_v60  ;;  %v9185_v8 = vunpack.c.l.s8.bf16 %v9089_v34  ;;  %v9094_v34 = vld [vmem:[%s16521_s5 + $0x138] sm:$0xff] }
0x1ecc   : > { %v14851_v44 = vpop.permute.xlu1 %14850 }
0x1ecd   : > { %v14853_v13 = vunpack.i.h.bf16 %v14851_v44  ;;  %v14852_v0 = vunpack.i.l.bf16 %v14851_v44  ;;  %v9088_v44 = vld [vmem:[%s16521_s5 + $0x108] sm:$0xff] }
0x1ece   : > { %v9200_v15 = vunpack.c.h.s8.bf16 %v9088_v44 }
0x1ecf   : > { %v8891_v4 = vsel %vm8889_vm11, %v8888_v41, %v14853_v13  ;;  %v8890_v55 = vsel %vm8889_vm11, %v8887_v22, %v14852_v0  ;;  %v9184_v13 = vunpack.c.l.s8.bf16 %v9088_v44  ;;  %v9186_v0 = vunpack.c.l.s8.bf16 %v9090_v49  ;;  %v9071_v41 = vld [vmem:[%s16521_s5 + $0x80] sm:$0xff]  ;;  %v9073_v22 = vld [vmem:[%s16521_s5 + $0x90] sm:$0xff] }
0x1ed0   : > { %9251 = vmatprep.subr.bf16.mxu1 %v9200_v15  ;;  %v9237_v15 = vunpack.c.h.s8.bf16 %v9109_v25 }
0x1ed1   : > { %9252 = vmatpush1.bf16.msra.mxu1 %v9199_v16 }
0x1ed2   : > { %9253 = vmatprep.subr.bf16.mxu1 %v9184_v13 }
0x1ed4   : > { %v14856_v27 = vpop.permute.xlu0 %14855 }
0x1ed5   : > { %v14858_v52 = vunpack.i.h.bf16 %v14856_v27  ;;  %v14857_v33 = vunpack.i.l.bf16 %v14856_v27  ;;  %v9202_v27 = vunpack.c.h.s8.bf16 %v9090_v49  ;;  %9254 = vmatpush1.bf16.msra.mxu1 %v9183_v17  ;;  %v9091_v17 = vld [vmem:[%s16521_s5 + $0x120] sm:$0xff] }
0x1ed7   : > { %v8894_v39 = vsel %vm8892_vm12, %v8891_v4, %v14858_v52  ;;  %v8893_v54 = vsel %vm8892_vm12, %v8890_v55, %v14857_v33  ;;  %v9072_v52 = vld [vmem:[%s16521_s5 + $0x88] sm:$0xff]  ;;  %v9074_v33 = vld [vmem:[%s16521_s5 + $0x98] sm:$0xff]  ;;  %v9169_v4 = vunpack.c.h.s8.bf16 %v9073_v22 }
0x1ed8   : > { %v9168_v36 = vunpack.c.h.s8.bf16 %v9072_v52  ;;  %v9170_v14 = vunpack.c.h.s8.bf16 %v9074_v33  ;;  %v9152_v55 = vunpack.c.l.s8.bf16 %v9072_v52  ;;  %v9203_v52 = vunpack.c.h.s8.bf16 %v9091_v17 }
0x1eda   : > { %9255 = vmatprep.subr.bf16.mxu1 %v9168_v36 }
0x1edc   : > { %v14861_v1 = vpop.permute.xlu1 %14860 }
0x1edd   : > { %v14863_v45 = vunpack.i.h.bf16 %v14861_v1  ;;  %v14862_v35 = vunpack.i.l.bf16 %v14861_v1  ;;  %v9167_v1 = vunpack.c.h.s8.bf16 %v9071_v41 }
0x1edf   : > { %v8897_v57 = vsel %vm8895_vm13, %v8894_v39, %v14863_v45  ;;  %v8896_v11 = vsel %vm8895_vm13, %v8893_v54, %v14862_v35  ;;  %9256 = vmatpush1.bf16.msra.mxu1 %v9167_v1  ;;  %v9154_v45 = vunpack.c.l.s8.bf16 %v9074_v33  ;;  %v9151_v35 = vunpack.c.l.s8.bf16 %v9071_v41  ;;  %v9056_v54 = vld [vmem:[%s16521_s5 + $0x8] sm:$0xff] }
0x1ee0   : > { %v8898_v63 = vpack.c.bf16 %v8897_v57, %v8896_v11  ;;  %v9153_v39 = vunpack.c.l.s8.bf16 %v9073_v22  ;;  %9257 = vmatprep.subr.bf16.mxu1 %v9152_v55  ;;  %v9058_v57 = vld [vmem:[%s16521_s5 + $0x18] sm:$0xff]  ;;  %v9136_v11 = vunpack.c.h.s8.bf16 %v9056_v54  ;;  %v9076_v41 = vld [vmem:[%s16521_s5 + $0xa8] sm:$0xff]  ;;  %v9187_v1 = vunpack.c.l.s8.bf16 %v9091_v17 }
0x1ee1   : > { %v9078_v22 = vld [vmem:[%s16521_s5 + $0xb8] sm:$0xff]  ;;  %v9172_v55 = vunpack.c.h.s8.bf16 %v9076_v41 }
0x1ee2   : > { %14333 = vmatmul.mubr.bf16.vlgmr.msra.gmra.mxu0 %v8898_v63  ;;  %v9138_v63 = vunpack.c.h.s8.bf16 %v9058_v57 }
0x1ee3   : > { %9322 = vmatprep.mubr.bf16.mxu0 %v15880_v21  ;;  %9291 = vmatpush1.bf16.msra.mxu0 %v9233_v38 }
0x1ee4   : > { %9292 = vmatprep.subr.bf16.mxu0 %v9218_v2  ;;  %9258 = vmatpush1.bf16.msra.mxu1 %v9151_v35  ;;  %v9107_v2 = vld [vmem:[%s16521_s5 + $0x1a0] sm:$0xff] }
0x1ee5   : > { %9259 = vmatprep.subr.bf16.mxu1 %v9136_v11  ;;  %v9235_v49 = vunpack.c.h.s8.bf16 %v9107_v2  ;;  %v9219_v16 = vunpack.c.l.s8.bf16 %v9107_v2  ;;  %v9075_v35 = vld [vmem:[%s16521_s5 + $0xa0] sm:$0xff]  ;;  %v9156_v11 = vunpack.c.l.s8.bf16 %v9076_v41 }
0x1ee7   : > { %9293 = vmatpush1.bf16.msra.mxu0 %v9217_v23 }
0x1ee8   : > { %9294 = vmatprep.subr.bf16.mxu0 %v9202_v27 }
0x1eeb   : > { %9295 = vmatpush1.bf16.msra.mxu0 %v9201_v53  ;;  %v9221_v53 = vunpack.c.l.s8.bf16 %v9109_v25 }
0x1eec   : > { %9296 = vmatprep.subr.bf16.mxu0 %v9186_v0  ;;  %v9206_v0 = vunpack.c.h.s8.bf16 %v9094_v34 }
0x1eef   : > { %9297 = vmatpush1.bf16.msra.mxu0 %v9185_v8  ;;  %v9093_v8 = vld [vmem:[%s16521_s5 + $0x130] sm:$0xff] }
0x1ef0   : > { %9298 = vmatprep.subr.bf16.mxu0 %v9170_v14  ;;  %v9205_v33 = vunpack.c.h.s8.bf16 %v9093_v8  ;;  %v9190_v14 = vunpack.c.l.s8.bf16 %v9094_v34 }
0x1ef3   : > { %9299 = vmatpush1.bf16.msra.mxu0 %v9169_v4  ;;  %v9189_v4 = vunpack.c.l.s8.bf16 %v9093_v8 }
0x1ef4   : > { %9300 = vmatprep.subr.bf16.mxu0 %v9154_v45  ;;  %v9174_v45 = vunpack.c.h.s8.bf16 %v9078_v22 }
0x1ef7   : > { %9301 = vmatpush1.bf16.msra.mxu0 %v9153_v39  ;;  %v9077_v39 = vld [vmem:[%s16521_s5 + $0xb0] sm:$0xff] }
0x1ef8   : > { %9302 = vmatprep.subr.bf16.mxu0 %v9138_v63  ;;  %v9158_v63 = vunpack.c.l.s8.bf16 %v9078_v22 }
0x1fa2   : > { %v9004_v51 = vpop.f32.mrf.mxu0 }
0x1fa3   : > { %v9005_v5 = vadd.f32 %v12792_v9, %v9004_v51  ;;  %v9057_v51 = vld [vmem:[%s16521_s5 + $0x10] sm:$0xff] }
0x1fa4   : > { %v14334_v19 = vpop.f32.mrf.mxu0 }
0x1fa5   : > { %v9011_v20 = vadd.f32 %v14976_v62, %v9005_v5  ;;  %v9137_v19 = vunpack.c.h.s8.bf16 %v9057_v51  ;;  %v9120_v62 = vunpack.c.l.s8.bf16 %v9056_v54  ;;  %v9171_v54 = vunpack.c.h.s8.bf16 %v9075_v35 }
0x1fa6   : > { %v9007_v43 = vpop.f32.mrf.mxu0 }
0x1fa7   : > { %v9008_v24 = vadd.f32 %v12792_v9, %v9007_v43  ;;  %9015 = vadd.xlane.f32.xlu0 %v9011_v20  ;;  %v9055_v9 = vld [vmem:[%s16521_s5] sm:$0xff]  ;;  %9303 = vmatpush1.bf16.msra.mxu0 %v9137_v19  ;;  %v9157_v19 = vunpack.c.l.s8.bf16 %v9077_v39 }
0x1fa8   : > { %v14335_v42 = vpop.f32.mrf.mxu0  ;;  %v9135_v5 = vunpack.c.h.s8.bf16 %v9055_v9  ;;  %v9119_v43 = vunpack.c.l.s8.bf16 %v9055_v9  ;;  %v9060_v9 = vld [vmem:[%s16521_s5 + $0x28] sm:$0xff] }
0x1fa9   : > { %v9012_v26 = vadd.f32 %v14977_v6, %v9008_v24  ;;  %v9121_v24 = vunpack.c.l.s8.bf16 %v9057_v51  ;;  %v9108_v42 = vld [vmem:[%s16521_s5 + $0x1a8] sm:$0xff]  ;;  %v9110_v6 = vld [vmem:[%s16521_s5 + $0x1b8] sm:$0xff] }
0x1faa   : > { %9260 = vmatpush1.bf16.msra.mxu1 %v9135_v5  ;;  %v9238_v28 = vunpack.c.h.s8.bf16 %v9110_v6  ;;  %v9220_v27 = vunpack.c.l.s8.bf16 %v9108_v42  ;;  %v9222_v60 = vunpack.c.l.s8.bf16 %v9110_v6  ;;  %v9062_v51 = vld [vmem:[%s16521_s5 + $0x38] sm:$0xff]  ;;  %v9155_v5 = vunpack.c.l.s8.bf16 %v9075_v35 }
0x1fab   : > { %9017 = vadd.xlane.f32.xlu1 %v9012_v26  ;;  %9261 = vmatprep.subr.bf16.mxu1 %v9120_v62  ;;  %v9140_v62 = vunpack.c.h.s8.bf16 %v9060_v9 }
0x1fae   : > { %9262 = vmatpush1.bf16.msra.mxu1 %v9119_v43  ;;  %v9059_v43 = vld [vmem:[%s16521_s5 + $0x20] sm:$0xff] }
0x2030   : > { %v9016_v40 = vpop.xlane.xlu0 %9015 }
0x2031   : > { %v9020_v58 = vmul.f32 0.0078125, %v9016_v40 }
0x2033   : > { %v17360_v61 = vsub.f32 %v9011_v20, %v9020_v58  ;;  %v9122_v20 = vunpack.c.l.s8.bf16 %v9058_v57  ;;  %v12801_v58 = vld [vmem:[%s1929_s2] ss:$0 sm:$0xff]  ;;  %v9173_v57 = vunpack.c.h.s8.bf16 %v9077_v39 }
0x2034   : > { %v9018_v3 = vpop.xlane.xlu1 %9017 }
0x2035   : > { %v9021_v31 = vmul.f32 0.0078125, %v9018_v3  ;;  %v9024_v32 = vmul.f32 %v17360_v61, %v17360_v61  ;;  %9304 = vmatprep.subr.bf16.mxu0 %v9122_v20  ;;  %v9142_v20 = vunpack.c.h.s8.bf16 %v9062_v51 }
0x2036   : > { %9305 = vmatpush1.bf16.msra.mxu0 %v9121_v24  ;;  %v9061_v24 = vld [vmem:[%s16521_s5 + $0x30] sm:$0xff] }
0x2037   : > { %v17364_v18 = vsub.f32 %v9012_v26, %v9021_v31  ;;  %9026 = vadd.xlane.f32.xlu0 %v9024_v32  ;;  %v9236_v26 = vunpack.c.h.s8.bf16 %v9108_v42  ;;  %9376 = vmatprep.subr.bf16.mxu0 %v9238_v28  ;;  %v9139_v42 = vunpack.c.h.s8.bf16 %v9059_v43  ;;  %v9141_v6 = vunpack.c.h.s8.bf16 %v9061_v24 }
0x2038   : > { %v9126_v28 = vunpack.c.l.s8.bf16 %v9062_v51 }
0x2039   : > { %v9025_v7 = vmul.f32 %v17364_v18, %v17364_v18  ;;  %9333 = vmatprep.subr.bf16.mxu1 %v9236_v26  ;;  %v9124_v26 = vunpack.c.l.s8.bf16 %v9060_v9 }
0x203b   : > { %9028 = vadd.xlane.f32.xlu0 %v9025_v7  ;;  %v12802_v7 = vld [vmem:[%s1942_s29] ss:$0 sm:$0xff] }
0x20c0   : > { %v9027_v29 = vpop.xlane.xlu0 %9026 }
0x20c1   : > { %v9030_v30 = vmul.f32 0.0078125, %v9027_v29  ;;  %v9112_v29 = vld [vmem:[%s16521_s5 + $0x1c8] sm:$0xff] }
0x20c3   : > { %v9032_v10 = vadd.f32 1e-05, %v9030_v30  ;;  %v9114_v30 = vld [vmem:[%s16521_s5 + $0x1d8] sm:$0xff] }
0x20c4   : > { %v9029_v47 = vpop.xlane.xlu0 %9028 }
0x20c5   : > { %14968 = vrsqrt.f32 %v9032_v10  ;;  %v9031_v56 = vmul.f32 0.0078125, %v9029_v47  ;;  %v9123_v10 = vunpack.c.l.s8.bf16 %v9059_v43  ;;  %v9125_v47 = vunpack.c.l.s8.bf16 %v9061_v24 }
0x20c7   : > { %v9033_v37 = vadd.f32 1e-05, %v9031_v56  ;;  %v9240_v56 = vunpack.c.h.s8.bf16 %v9112_v29 }
0x20c9   : > { %14970 = vrsqrt.f32 %v9033_v37  ;;  %v9242_v37 = vunpack.c.h.s8.bf16 %v9114_v30 }
0x20d2   : > { %v14969_v38 = vpop.eup %14968 }
0x20d3   : > { %v9036_v40 = vmul.f32 %v14969_v38, %v17360_v61  ;;  %v9111_v38 = vld [vmem:[%s16521_s5 + $0x1c0] sm:$0xff] }
0x20d4   : > { %v9223_v2 = vunpack.c.l.s8.bf16 %v9111_v38 }
0x20d5   : > { %v9044_v31 = vmul.f32 %v12801_v58, %v9036_v40  ;;  %v9113_v40 = vld [vmem:[%s16521_s5 + $0x1d0] sm:$0xff] }
0x20d6   : > { %v14971_v3 = vpop.eup %14970  ;;  %v9225_v25 = vunpack.c.l.s8.bf16 %v9113_v40 }
0x20d7   : > { %v9037_v32 = vmul.f32 %v14971_v3, %v17364_v18  ;;  %v17392_v23 = vadd.f32 %v12802_v7, %v9044_v31  ;;  %v9092_v18 = vld [vmem:[%s16521_s5 + $0x128] sm:$0xff]  ;;  %v9241_v3 = vunpack.c.h.s8.bf16 %v9113_v40  ;;  %v9224_v31 = vunpack.c.l.s8.bf16 %v9112_v29 }
0x20d8   : > { %v9204_v13 = vunpack.c.h.s8.bf16 %v9092_v18  ;;  %v9188_v36 = vunpack.c.l.s8.bf16 %v9092_v18 }
0x20d9   : > { %v9045_v12 = vmul.f32 %v12801_v58, %v9037_v32  ;;  %v9239_v58 = vunpack.c.h.s8.bf16 %v9111_v38  ;;  %v9226_v32 = vunpack.c.l.s8.bf16 %v9114_v30 }
0x20db   : > { %v17394_v44 = vadd.f32 %v12802_v7, %v9045_v12  ;;  %v9096_v7 = vld [vmem:[%s16521_s5 + $0x148] sm:$0xff]  ;;  %v9098_v12 = vld [vmem:[%s16521_s5 + $0x158] sm:$0xff] }
0x20dd   : > { %v17398_v61 = vpack.c.bf16 %v17394_v44, %v17392_v23 }
0x20df   : > { %9280 = vmatmul.mubr.bf16.vlgmr.msra.gmra.mxu1 %v17398_v61  ;;  %9323 = vmatmul.mubr.bf16.vlgmr.msra.gmra.mxu0 %v17398_v61 }
0x20e0   : > { %9334 = vmatpush1.bf16.msra.mxu1 %v9235_v49  ;;  %9377 = vmatpush1.bf16.msra.mxu0 %v9237_v15  ;;  %v9208_v49 = vunpack.c.h.s8.bf16 %v9096_v7  ;;  %v9210_v15 = vunpack.c.h.s8.bf16 %v9098_v12 }
0x20e1   : > { %9335 = vmatprep.subr.bf16.mxu1 %v9220_v27  ;;  %9378 = vmatprep.subr.bf16.mxu0 %v9222_v60  ;;  %v9095_v27 = vld [vmem:[%s16521_s5 + $0x140] sm:$0xff]  ;;  %v9097_v60 = vld [vmem:[%s16521_s5 + $0x150] sm:$0xff] }
0x20e2   : > { %9365 = vmatprep.mubr.bf16.mxu1 %v15880_v21  ;;  %9408 = vmatprep.mubr.bf16.mxu0 %v15880_v21  ;;  %v9207_v18 = vunpack.c.h.s8.bf16 %v9095_v27  ;;  %v9209_v34 = vunpack.c.h.s8.bf16 %v9097_v60  ;;  %v9191_v17 = vunpack.c.l.s8.bf16 %v9095_v27  ;;  %v9193_v8 = vunpack.c.l.s8.bf16 %v9097_v60 }
0x20e4   : > { %9336 = vmatpush1.bf16.msra.mxu1 %v9219_v16  ;;  %9379 = vmatpush1.bf16.msra.mxu0 %v9221_v53  ;;  %v9192_v16 = vunpack.c.l.s8.bf16 %v9096_v7  ;;  %v9194_v53 = vunpack.c.l.s8.bf16 %v9098_v12 }
0x20e5   : > { %9337 = vmatprep.subr.bf16.mxu1 %v9204_v13  ;;  %9380 = vmatprep.subr.bf16.mxu0 %v9206_v0  ;;  %v9080_v13 = vld [vmem:[%s16521_s5 + $0xc8] sm:$0xff]  ;;  %v9082_v0 = vld [vmem:[%s16521_s5 + $0xd8] sm:$0xff] }
0x20e8   : > { %9338 = vmatpush1.bf16.msra.mxu1 %v9203_v52  ;;  %9381 = vmatpush1.bf16.msra.mxu0 %v9205_v33  ;;  %v9176_v52 = vunpack.c.h.s8.bf16 %v9080_v13  ;;  %v9178_v33 = vunpack.c.h.s8.bf16 %v9082_v0 }
0x20e9   : > { %9339 = vmatprep.subr.bf16.mxu1 %v9188_v36  ;;  %9382 = vmatprep.subr.bf16.mxu0 %v9190_v14  ;;  %v9079_v36 = vld [vmem:[%s16521_s5 + $0xc0] sm:$0xff]  ;;  %v9081_v14 = vld [vmem:[%s16521_s5 + $0xd0] sm:$0xff] }
0x20ea   : > { %v9175_v41 = vunpack.c.h.s8.bf16 %v9079_v36  ;;  %v9177_v22 = vunpack.c.h.s8.bf16 %v9081_v14  ;;  %v9159_v35 = vunpack.c.l.s8.bf16 %v9079_v36  ;;  %v9161_v39 = vunpack.c.l.s8.bf16 %v9081_v14 }
0x20ec   : > { %9340 = vmatpush1.bf16.msra.mxu1 %v9187_v1  ;;  %9383 = vmatpush1.bf16.msra.mxu0 %v9189_v4  ;;  %v9160_v1 = vunpack.c.l.s8.bf16 %v9080_v13  ;;  %v9162_v4 = vunpack.c.l.s8.bf16 %v9082_v0 }
0x20ed   : > { %9341 = vmatprep.subr.bf16.mxu1 %v9172_v55  ;;  %9384 = vmatprep.subr.bf16.mxu0 %v9174_v45  ;;  %v9064_v55 = vld [vmem:[%s16521_s5 + $0x48] sm:$0xff]  ;;  %v9066_v45 = vld [vmem:[%s16521_s5 + $0x58] sm:$0xff] }
0x20f0   : > { %9342 = vmatpush1.bf16.msra.mxu1 %v9171_v54  ;;  %9385 = vmatpush1.bf16.msra.mxu0 %v9173_v57  ;;  %v9144_v54 = vunpack.c.h.s8.bf16 %v9064_v55  ;;  %v9146_v57 = vunpack.c.h.s8.bf16 %v9066_v45 }
0x20f1   : > { %9343 = vmatprep.subr.bf16.mxu1 %v9156_v11  ;;  %9386 = vmatprep.subr.bf16.mxu0 %v9158_v63  ;;  %v9063_v11 = vld [vmem:[%s16521_s5 + $0x40] sm:$0xff]  ;;  %v9065_v63 = vld [vmem:[%s16521_s5 + $0x50] sm:$0xff] }
0x20f2   : > { %v9143_v9 = vunpack.c.h.s8.bf16 %v9063_v11  ;;  %v9145_v51 = vunpack.c.h.s8.bf16 %v9065_v63  ;;  %v9127_v43 = vunpack.c.l.s8.bf16 %v9063_v11  ;;  %v9129_v24 = vunpack.c.l.s8.bf16 %v9065_v63 }
0x20f4   : > { %9344 = vmatpush1.bf16.msra.mxu1 %v9155_v5  ;;  %9387 = vmatpush1.bf16.msra.mxu0 %v9157_v19  ;;  %v9128_v5 = vunpack.c.l.s8.bf16 %v9064_v55  ;;  %v9130_v19 = vunpack.c.l.s8.bf16 %v9066_v45 }
0x20f5   : > { %9345 = vmatprep.subr.bf16.mxu1 %v9140_v62  ;;  %9388 = vmatprep.subr.bf16.mxu0 %v9142_v20  ;;  %v9116_v62 = vld [vmem:[%s16521_s5 + $0x1e8] sm:$0xff]  ;;  %v9118_v20 = vld [vmem:[%s16521_s5 + $0x1f8] sm:$0xff] }
0x20f8   : > { %9346 = vmatpush1.bf16.msra.mxu1 %v9139_v42  ;;  %9389 = vmatpush1.bf16.msra.mxu0 %v9141_v6  ;;  %v9244_v42 = vunpack.c.h.s8.bf16 %v9116_v62  ;;  %v9246_v6 = vunpack.c.h.s8.bf16 %v9118_v20 }
0x20f9   : > { %9347 = vmatprep.subr.bf16.mxu1 %v9124_v26  ;;  %9390 = vmatprep.subr.bf16.mxu0 %v9126_v28  ;;  %v9115_v26 = vld [vmem:[%s16521_s5 + $0x1e0] sm:$0xff]  ;;  %v9117_v28 = vld [vmem:[%s16521_s5 + $0x1f0] sm:$0xff] }
0x20fa   : > { %v9243_v29 = vunpack.c.h.s8.bf16 %v9115_v26  ;;  %v9245_v30 = vunpack.c.h.s8.bf16 %v9117_v28  ;;  %v9227_v38 = vunpack.c.l.s8.bf16 %v9115_v26  ;;  %v9229_v40 = vunpack.c.l.s8.bf16 %v9117_v28 }
0x20fc   : > { %9348 = vmatpush1.bf16.msra.mxu1 %v9123_v10  ;;  %9391 = vmatpush1.bf16.msra.mxu0 %v9125_v47  ;;  %v9228_v10 = vunpack.c.l.s8.bf16 %v9116_v62  ;;  %v9230_v47 = vunpack.c.l.s8.bf16 %v9118_v20 }
0x20fd   : > { %9419 = vmatprep.subr.bf16.mxu1 %v9240_v56  ;;  %9462 = vmatprep.subr.bf16.mxu0 %v9242_v37  ;;  %v9100_v56 = vld [vmem:[%s16521_s5 + $0x168] sm:$0xff]  ;;  %v9102_v37 = vld [vmem:[%s16521_s5 + $0x178] sm:$0xff] }
0x20ff   : > { %9366 = vmatmul.mubr.bf16.vlgmr.msra.gmra.mxu1 %v17398_v61  ;;  %9409 = vmatmul.mubr.bf16.vlgmr.msra.gmra.mxu0 %v17398_v61 }
0x2100   : > { %9420 = vmatpush1.bf16.msra.mxu1 %v9239_v58  ;;  %9463 = vmatpush1.bf16.msra.mxu0 %v9241_v3  ;;  %v9212_v58 = vunpack.c.h.s8.bf16 %v9100_v56  ;;  %v9214_v3 = vunpack.c.h.s8.bf16 %v9102_v37 }
0x2101   : > { %9421 = vmatprep.subr.bf16.mxu1 %v9224_v31  ;;  %9464 = vmatprep.subr.bf16.mxu0 %v9226_v32  ;;  %v9099_v31 = vld [vmem:[%s16521_s5 + $0x160] sm:$0xff]  ;;  %v9101_v32 = vld [vmem:[%s16521_s5 + $0x170] sm:$0xff] }
0x2102   : > { %9451 = vmatprep.mubr.bf16.mxu1 %v15880_v21  ;;  %9494 = vmatprep.mubr.bf16.mxu0 %v15880_v21  ;;  %v9211_v7 = vunpack.c.h.s8.bf16 %v9099_v31  ;;  %v9213_v12 = vunpack.c.h.s8.bf16 %v9101_v32  ;;  %v9195_v27 = vunpack.c.l.s8.bf16 %v9099_v31  ;;  %v9197_v60 = vunpack.c.l.s8.bf16 %v9101_v32 }
0x2104   : > { %9422 = vmatpush1.bf16.msra.mxu1 %v9223_v2  ;;  %9465 = vmatpush1.bf16.msra.mxu0 %v9225_v25  ;;  %v9196_v2 = vunpack.c.l.s8.bf16 %v9100_v56  ;;  %v9198_v25 = vunpack.c.l.s8.bf16 %v9102_v37 }
0x2105   : > { %9423 = vmatprep.subr.bf16.mxu1 %v9208_v49  ;;  %9466 = vmatprep.subr.bf16.mxu0 %v9210_v15  ;;  %v9084_v49 = vld [vmem:[%s16521_s5 + $0xe8] sm:$0xff]  ;;  %v9086_v15 = vld [vmem:[%s16521_s5 + $0xf8] sm:$0xff] }
0x2106   : > { %v9164_v0 = vunpack.c.l.s8.bf16 %v9084_v49 }
0x2108   : > { %9424 = vmatpush1.bf16.msra.mxu1 %v9207_v18  ;;  %9467 = vmatpush1.bf16.msra.mxu0 %v9209_v34  ;;  %v9182_v18 = vunpack.c.h.s8.bf16 %v9086_v15  ;;  %v9083_v34 = vld [vmem:[%s16521_s5 + $0xe0] sm:$0xff] }
0x2109   : > { %9425 = vmatprep.subr.bf16.mxu1 %v9192_v16  ;;  %9468 = vmatprep.subr.bf16.mxu0 %v9194_v53  ;;  %v9085_v16 = vld [vmem:[%s16521_s5 + $0xf0] sm:$0xff]  ;;  %v9179_v53 = vunpack.c.h.s8.bf16 %v9083_v34 }
0x210a   : > { %v9181_v13 = vunpack.c.h.s8.bf16 %v9085_v16  ;;  %v9165_v36 = vunpack.c.l.s8.bf16 %v9085_v16 }
0x210c   : > { %9426 = vmatpush1.bf16.msra.mxu1 %v9191_v17  ;;  %9469 = vmatpush1.bf16.msra.mxu0 %v9193_v8  ;;  %v9166_v17 = vunpack.c.l.s8.bf16 %v9086_v15  ;;  %v9068_v8 = vld [vmem:[%s16521_s5 + $0x68] sm:$0xff] }
0x210d   : > { %9427 = vmatprep.subr.bf16.mxu1 %v9176_v52  ;;  %9470 = vmatprep.subr.bf16.mxu0 %v9178_v33  ;;  %v9070_v52 = vld [vmem:[%s16521_s5 + $0x78] sm:$0xff]  ;;  %v9163_v33 = vunpack.c.l.s8.bf16 %v9083_v34  ;;  %v9148_v14 = vunpack.c.h.s8.bf16 %v9068_v8  ;;  %v9132_v45 = vunpack.c.l.s8.bf16 %v9068_v8 }
0x2110   : > { %9428 = vmatpush1.bf16.msra.mxu1 %v9175_v41  ;;  %9471 = vmatpush1.bf16.msra.mxu0 %v9177_v22  ;;  %v9150_v41 = vunpack.c.h.s8.bf16 %v9070_v52  ;;  %v9067_v22 = vld [vmem:[%s16521_s5 + $0x60] sm:$0xff] }
0x2111   : > { %9429 = vmatprep.subr.bf16.mxu1 %v9160_v1  ;;  %9472 = vmatprep.subr.bf16.mxu0 %v9162_v4  ;;  %v9069_v1 = vld [vmem:[%s16521_s5 + $0x70] sm:$0xff]  ;;  %v9147_v4 = vunpack.c.h.s8.bf16 %v9067_v22  ;;  %s17867_s5 = scalar_lea.vmem [#allocation35], %s16503_s28 }
0x2112   : > { %v9149_v55 = vunpack.c.h.s8.bf16 %v9069_v1  ;;  %v9133_v11 = vunpack.c.l.s8.bf16 %v9069_v1 }
0x2114   : > { %9430 = vmatpush1.bf16.msra.mxu1 %v9159_v35  ;;  %9473 = vmatpush1.bf16.msra.mxu0 %v9161_v39  ;;  %v9134_v35 = vunpack.c.l.s8.bf16 %v9070_v52  ;;  %v9878_v39 = vld [vmem:[%s16525_s11 + $0x38] sm:$0xff] }
0x2115   : > { %9431 = vmatprep.subr.bf16.mxu1 %v9144_v54  ;;  %9474 = vmatprep.subr.bf16.mxu0 %v9146_v57  ;;  %v9886_v54 = vld [vmem:[%s16525_s11 + $0x78] sm:$0xff]  ;;  %v9131_v57 = vunpack.c.l.s8.bf16 %v9067_v22  ;;  %v9950_v63 = vunpack.c.h.s8.bf16 %v9878_v39  ;;  %v9949_v20 = vunpack.c.l.s8.bf16 %v9878_v39 }
0x2118   : > { %9432 = vmatpush1.bf16.msra.mxu1 %v9143_v9  ;;  %9475 = vmatpush1.bf16.msra.mxu0 %v9145_v51  ;;  %v9966_v9 = vunpack.c.h.s8.bf16 %v9886_v54  ;;  %v9874_v51 = vld [vmem:[%s16525_s11 + $0x18] sm:$0xff] }
0x2119   : > { %9433 = vmatprep.subr.bf16.mxu1 %v9128_v5  ;;  %9476 = vmatprep.subr.bf16.mxu0 %v9130_v19  ;;  %v9882_v5 = vld [vmem:[%s16525_s11 + $0x58] sm:$0xff]  ;;  %v9942_v19 = vunpack.c.h.s8.bf16 %v9874_v51 }
0x211a   : > { %v9958_v62 = vunpack.c.h.s8.bf16 %v9882_v5  ;;  %v9957_v26 = vunpack.c.l.s8.bf16 %v9882_v5 }
0x211c   : > { %9434 = vmatpush1.bf16.msra.mxu1 %v9127_v43  ;;  %9477 = vmatpush1.bf16.msra.mxu0 %v9129_v24  ;;  %v9965_v43 = vunpack.c.l.s8.bf16 %v9886_v54  ;;  %v9877_v24 = vld [vmem:[%s16525_s11 + $0x30] sm:$0xff] }
0x211d   : > { %9505 = vmatprep.subr.bf16.mxu1 %v9244_v42  ;;  %9548 = vmatprep.subr.bf16.mxu0 %v9246_v6  ;;  %v9885_v42 = vld [vmem:[%s16525_s11 + $0x70] sm:$0xff]  ;;  %v9941_v6 = vunpack.c.l.s8.bf16 %v9874_v51  ;;  %v9948_v28 = vunpack.c.h.s8.bf16 %v9877_v24 }
0x211e   : > { %v9963_v37 = vunpack.c.l.s8.bf16 %v9885_v42 }
0x211f   : > { %9452 = vmatmul.mubr.bf16.vlgmr.msra.gmra.mxu1 %v17398_v61  ;;  %9495 = vmatmul.mubr.bf16.vlgmr.msra.gmra.mxu0 %v17398_v61 }
0x2120   : > { %9506 = vmatpush1.bf16.msra.mxu1 %v9243_v29  ;;  %9549 = vmatpush1.bf16.msra.mxu0 %v9245_v30  ;;  %v9964_v29 = vunpack.c.h.s8.bf16 %v9885_v42  ;;  %v9873_v30 = vld [vmem:[%s16525_s11 + $0x10] sm:$0xff] }
0x2121   : > { %9507 = vmatprep.subr.bf16.mxu1 %v9228_v10  ;;  %9550 = vmatprep.subr.bf16.mxu0 %v9230_v47  ;;  %v9881_v10 = vld [vmem:[%s16525_s11 + $0x50] sm:$0xff]  ;;  %v9940_v47 = vunpack.c.h.s8.bf16 %v9873_v30 }
0x2122   : > { %9537 = vmatprep.mubr.bf16.mxu1 %v15880_v21  ;;  %9580 = vmatprep.mubr.bf16.mxu0 %v15880_v21  ;;  %v9180_v21 = vunpack.c.h.s8.bf16 %v9084_v49  ;;  %v9956_v56 = vunpack.c.h.s8.bf16 %v9881_v10 }
0x2124   : > { %9508 = vmatpush1.bf16.msra.mxu1 %v9227_v38  ;;  %9551 = vmatpush1.bf16.msra.mxu0 %v9229_v40  ;;  %v9876_v38 = vld [vmem:[%s16525_s11 + $0x28] sm:$0xff] }
0x2125   : > { %9509 = vmatprep.subr.bf16.mxu1 %v9212_v58  ;;  %9552 = vmatprep.subr.bf16.mxu0 %v9214_v3  ;;  %v9884_v40 = vld [vmem:[%s16525_s11 + $0x68] sm:$0xff]  ;;  %v9939_v58 = vunpack.c.l.s8.bf16 %v9873_v30  ;;  %v9955_v3 = vunpack.c.l.s8.bf16 %v9881_v10  ;;  %v9946_v31 = vunpack.c.h.s8.bf16 %v9876_v38  ;;  %v9945_v49 = vunpack.c.l.s8.bf16 %v9876_v38 }
0x2126   : > { %v9962_v32 = vunpack.c.h.s8.bf16 %v9884_v40  ;;  %v9961_v15 = vunpack.c.l.s8.bf16 %v9884_v40 }
0x2128   : > { %9510 = vmatpush1.bf16.msra.mxu1 %v9211_v7  ;;  %9553 = vmatpush1.bf16.msra.mxu0 %v9213_v12  ;;  %v9872_v7 = vld [vmem:[%s16525_s11 + $0x8] sm:$0xff] }
0x2129   : > { %9511 = vmatprep.subr.bf16.mxu1 %v9196_v2  ;;  %9554 = vmatprep.subr.bf16.mxu0 %v9198_v25  ;;  %v9880_v12 = vld [vmem:[%s16525_s11 + $0x48] sm:$0xff]  ;;  %v9938_v2 = vunpack.c.h.s8.bf16 %v9872_v7 }
0x212a   : > { %v9954_v25 = vunpack.c.h.s8.bf16 %v9880_v12 }
0x212c   : > { %9512 = vmatpush1.bf16.msra.mxu1 %v9195_v27  ;;  %9555 = vmatpush1.bf16.msra.mxu0 %v9197_v60  ;;  %v9875_v27 = vld [vmem:[%s16525_s11 + $0x20] sm:$0xff] }
0x212d   : > { %9513 = vmatprep.subr.bf16.mxu1 %v9180_v21  ;;  %9556 = vmatprep.subr.bf16.mxu0 %v9182_v18  ;;  %v9883_v60 = vld [vmem:[%s16525_s11 + $0x60] sm:$0xff]  ;;  %v9937_v21 = vunpack.c.l.s8.bf16 %v9872_v7  ;;  %v9953_v18 = vunpack.c.l.s8.bf16 %v9880_v12  ;;  %v9944_v34 = vunpack.c.h.s8.bf16 %v9875_v27  ;;  %v9943_v8 = vunpack.c.l.s8.bf16 %v9875_v27 }
0x212e   : > { %v9960_v16 = vunpack.c.h.s8.bf16 %v9883_v60  ;;  %v9959_v52 = vunpack.c.l.s8.bf16 %v9883_v60 }
0x2130   : > { %9514 = vmatpush1.bf16.msra.mxu1 %v9179_v53  ;;  %9557 = vmatpush1.bf16.msra.mxu0 %v9181_v13  ;;  %v9871_v53 = vld [vmem:[%s16525_s11] sm:$0xff] }
0x2131   : > { %9515 = vmatprep.subr.bf16.mxu1 %v9164_v0  ;;  %9558 = vmatprep.subr.bf16.mxu0 %v9166_v17  ;;  %v9879_v13 = vld [vmem:[%s16525_s11 + $0x40] sm:$0xff]  ;;  %v9936_v0 = vunpack.c.h.s8.bf16 %v9871_v53 }
0x2132   : > { %v9952_v17 = vunpack.c.h.s8.bf16 %v9879_v13 }
0x2134   : > { %9516 = vmatpush1.bf16.msra.mxu1 %v9163_v33  ;;  %9559 = vmatpush1.bf16.msra.mxu0 %v9165_v36  ;;  %v17475_v33 = vld [vmem:[%s16525_s11 + $0xb8] sm:$0xff] }
0x2135   : > { %9517 = vmatprep.subr.bf16.mxu1 %v9148_v14  ;;  %9560 = vmatprep.subr.bf16.mxu0 %v9150_v41  ;;  %v17478_v36 = vld [vmem:[%s16525_s11 + $0xf8] sm:$0xff]  ;;  %v9935_v14 = vunpack.c.l.s8.bf16 %v9871_v53  ;;  %v9951_v41 = vunpack.c.l.s8.bf16 %v9879_v13  ;;  %v9982_v22 = vunpack.c.h.s8.bf16 %v17475_v33 }
0x2136   : > { %v9998_v1 = vunpack.c.h.s8.bf16 %v17478_v36 }
0x2138   : > { %9518 = vmatpush1.bf16.msra.mxu1 %v9147_v4  ;;  %9561 = vmatpush1.bf16.msra.mxu0 %v9149_v55  ;;  %v17483_v4 = vsub.s32 3, %v17041_v46  ;;  %v17486_v55 = vld [vmem:[%s16523_s14] sm:$0xff] }
0x2139   : > { %9519 = vmatprep.subr.bf16.mxu1 %v9132_v45  ;;  %9562 = vmatprep.subr.bf16.mxu0 %v9134_v35  ;;  %v9602_v45 = vrot.slane %v17486_v55, %v17044_v48  ;;  %v9598_v54 = vrot.slane %v17486_v55, %v17049_v50 }
0x213a   : > { %v9610_v35 = vrot.slane %v17486_v55, %v17483_v4 }
0x213c   : > { %9520 = vmatpush1.bf16.msra.mxu1 %v9131_v57  ;;  %9563 = vmatpush1.bf16.msra.mxu0 %v9133_v11  ;;  %v9606_v11 = vrot.slane %v17486_v55, %v17058_v59 }
0x213d   : > { %13299 = vmatprep.subr.bf16.mxu1 %v9950_v63  ;;  %13321 = vmatprep.subr.bf16.mxu0 %v9966_v9  ;;  %v17497_v63 = vld [vmem:[%s16544_s22] sm:$0xff] }
0x213f   : > { %9538 = vmatmul.mubr.bf16.vlgmr.msra.gmra.mxu1 %v17398_v61  ;;  %9581 = vmatmul.mubr.bf16.vlgmr.msra.gmra.mxu0 %v17398_v61  ;;  %v9947_v61 = vunpack.c.l.s8.bf16 %v9877_v24  ;;  %v9714_v24 = vrot.slane %v17497_v63, %v17049_v50 }
0x2140   : > { %13300 = vmatpush3.bf16.msra.mxu1 %v9942_v19  ;;  %13322 = vmatpush3.bf16.msra.mxu0 %v9958_v62  ;;  %v9718_v19 = vrot.slane %v17497_v63, %v17044_v48 }
0x2141   : > { %13301 = vmatprep.subr.bf16.mxu1 %v9949_v20  ;;  %13323 = vmatprep.subr.bf16.mxu0 %v9965_v43  ;;  %v9726_v20 = vrot.slane %v17497_v63, %v17483_v4 }
0x2144   : > { %13302 = vmatpush3.bf16.msra.mxu1 %v9941_v6  ;;  %13324 = vmatpush3.bf16.msra.mxu0 %v9957_v26  ;;  %v9722_v6 = vrot.slane %v17497_v63, %v17058_v59 }
0x2145   : > { %13303 = vmatprep.subr.bf16.mxu1 %v9948_v28  ;;  %13325 = vmatprep.subr.bf16.mxu0 %v9964_v29 }
0x2148   : > { %13304 = vmatpush3.bf16.msra.mxu1 %v9940_v47  ;;  %13326 = vmatpush3.bf16.msra.mxu0 %v9956_v56 }
0x2149   : > { %13305 = vmatprep.subr.bf16.mxu1 %v9947_v61  ;;  %13327 = vmatprep.subr.bf16.mxu0 %v9963_v37 }
0x214c   : > { %13306 = vmatpush3.bf16.msra.mxu1 %v9939_v58  ;;  %13328 = vmatpush3.bf16.msra.mxu0 %v9955_v3 }
0x214d   : > { %13307 = vmatprep.subr.bf16.mxu1 %v9946_v31  ;;  %13329 = vmatprep.subr.bf16.mxu0 %v9962_v32 }
0x2150   : > { %13308 = vmatpush3.bf16.msra.mxu1 %v9938_v2  ;;  %13330 = vmatpush3.bf16.msra.mxu0 %v9954_v25  ;;  %v9890_v25 = vld [vmem:[%s16525_s11 + $0x98] sm:$0xff] }
0x2151   : > { %13309 = vmatprep.subr.bf16.mxu1 %v9945_v49  ;;  %13331 = vmatprep.subr.bf16.mxu0 %v9961_v15  ;;  %v9898_v49 = vld [vmem:[%s16525_s11 + $0xd8] sm:$0xff]  ;;  %v9974_v13 = vunpack.c.h.s8.bf16 %v9890_v25 }
0x2154   : > { %13310 = vmatpush3.bf16.msra.mxu1 %v9937_v21  ;;  %13332 = vmatpush3.bf16.msra.mxu0 %v9953_v18 }
0x2155   : > { %13311 = vmatprep.subr.bf16.mxu1 %v9944_v34  ;;  %13333 = vmatprep.subr.bf16.mxu0 %v9960_v16 }
0x2158   : > { %13312 = vmatpush3.bf16.msra.mxu1 %v9936_v0  ;;  %13334 = vmatpush3.bf16.msra.mxu0 %v9952_v17  ;;  %v9990_v0 = vunpack.c.h.s8.bf16 %v9898_v49 }
0x2159   : > { %13313 = vmatprep.subr.bf16.mxu1 %v9943_v8  ;;  %13335 = vmatprep.subr.bf16.mxu0 %v9959_v52  ;;  %v9981_v52 = vunpack.c.l.s8.bf16 %v17475_v33 }
0x215c   : > { %13314 = vmatpush3.bf16.msra.mxu1 %v9935_v14  ;;  %13336 = vmatpush3.bf16.msra.mxu0 %v9951_v41  ;;  %v9997_v14 = vunpack.c.l.s8.bf16 %v17478_v36  ;;  %v9893_v41 = vld [vmem:[%s16525_s11 + $0xb0] sm:$0xff] }
0x215d   : > { %13343 = vmatprep.subr.bf16.mxu1 %v9982_v22  ;;  %13365 = vmatprep.subr.bf16.mxu0 %v9998_v1  ;;  %v9901_v22 = vld [vmem:[%s16525_s11 + $0xf0] sm:$0xff]  ;;  %v9973_v1 = vunpack.c.l.s8.bf16 %v9890_v25 }
0x215e   : > { %v9996_v33 = vunpack.c.h.s8.bf16 %v9901_v22 }
0x219f   : > { %v9281_v39 = vpop.f32.mrf.mxu1  ;;  %v9324_v57 = vpop.f32.mrf.mxu0 }
0x21a0   : > { %v9675_v43 = vmul.f32 %v9598_v54, %v9281_v39  ;;  %v9677_v42 = vmul.f32 %v9606_v11, %v9324_v57  ;;  %v9889_v39 = vld [vmem:[%s16525_s11 + $0x90] sm:$0xff] }
0x21a1   : > { %v9283_v9 = vpop.f32.mrf.mxu1  ;;  %v9326_v51 = vpop.f32.mrf.mxu0  ;;  %v9972_v36 = vunpack.c.h.s8.bf16 %v9889_v39 }
0x21a2   : > { %v9676_v5 = vmul.f32 %v9602_v45, %v9283_v9  ;;  %v9678_v62 = vmul.f32 %v9610_v35, %v9326_v51  ;;  %v9791_v40 = vadd.f32 %v9714_v24, %v9675_v43  ;;  %v9793_v58 = vadd.f32 %v9722_v6, %v9677_v42  ;;  %v9892_v51 = vld [vmem:[%s16525_s11 + $0xa8] sm:$0xff] }
0x21a3   : > { %v9285_v26 = vpop.f32.mrf.mxu1  ;;  %v9328_v28 = vpop.f32.mrf.mxu0  ;;  %v9995_v9 = vunpack.c.l.s8.bf16 %v9901_v22  ;;  %v9896_v42 = vld [vmem:[%s16525_s11 + $0xc8] sm:$0xff] }
0x21a4   : > { %v9691_v29 = vmul.f32 %v9598_v54, %v9285_v26  ;;  %v9693_v30 = vmul.f32 %v9606_v11, %v9328_v28  ;;  %v9792_v56 = vadd.f32 %v9718_v19, %v9676_v5  ;;  %v9794_v61 = vadd.f32 %v9726_v20, %v9678_v62  ;;  %v9897_v54 = vld [vmem:[%s16525_s11 + $0xd0] sm:$0xff]  ;;  %v9900_v5 = vld [vmem:[%s16525_s11 + $0xe8] sm:$0xff] }
0x21a5   : > { %v9287_v10 = vpop.f32.mrf.mxu1  ;;  %v9330_v47 = vpop.f32.mrf.mxu0  ;;  %v9823_v18 = vmax.f32 %v9791_v40, 0.0  ;;  %v9825_v34 = vmax.f32 %v9793_v58, 0.0  ;;  %v9988_v57 = vunpack.c.h.s8.bf16 %v9897_v54  ;;  %v9979_v11 = vunpack.c.l.s8.bf16 %v9893_v41  ;;  %v9899_v40 = vld [vmem:[%s16525_s11 + $0xe0] sm:$0xff] }
0x21a6   : > { %v9692_v37 = vmul.f32 %v9602_v45, %v9287_v10  ;;  %v9694_v38 = vmul.f32 %v9610_v35, %v9330_v47  ;;  %v9807_v3 = vadd.f32 %v9714_v24, %v9691_v29  ;;  %v9809_v31 = vadd.f32 %v9722_v6, %v9693_v30  ;;  %v9888_v24 = vld [vmem:[%s16525_s11 + $0x88] sm:$0xff] }
0x21a7   : > { %v9824_v15 = vmax.f32 %v9792_v56, 0.0  ;;  %v9826_v27 = vmax.f32 %v9794_v61, 0.0  ;;  %v9989_v45 = vunpack.c.l.s8.bf16 %v9898_v49  ;;  %v9980_v35 = vunpack.c.h.s8.bf16 %v9893_v41 }
0x21a8   : > { %v9808_v32 = vadd.f32 %v9718_v19, %v9692_v37  ;;  %v9810_v7 = vadd.f32 %v9726_v20, %v9694_v38  ;;  %v9839_v12 = vmax.f32 %v9807_v3, 0.0  ;;  %v9841_v2 = vmax.f32 %v9809_v31, 0.0  ;;  %v9891_v38 = vld [vmem:[%s16525_s11 + $0xa0] sm:$0xff] }
0x21a9   : > { %v9971_v19 = vunpack.c.l.s8.bf16 %v9889_v39  ;;  %v9987_v62 = vunpack.c.l.s8.bf16 %v9897_v54  ;;  %v9978_v20 = vunpack.c.h.s8.bf16 %v9892_v51  ;;  %v9994_v43 = vunpack.c.h.s8.bf16 %v9900_v5 }
0x21aa   : > { %v9840_v60 = vmax.f32 %v9808_v32, 0.0  ;;  %v9842_v21 = vmax.f32 %v9810_v7, 0.0  ;;  %v9855_v17 = vpack.c.bf16 %v9839_v12, %v9823_v18  ;;  %v9857_v8 = vpack.c.bf16 %v9841_v2, %v9825_v34 }
0x21ab   : > { %v17520_v6 = vsub.s32 5, %v17041_v46  ;;  %v17523_v26 = vsub.s32 7, %v17041_v46  ;;  %v17526_v28 = vsub.s32 4, %v17041_v46  ;;  %v17529_v29 = vsub.s32 6, %v17041_v46 }
0x21ac   : > { %v9856_v16 = vpack.c.bf16 %v9840_v60, %v9824_v15  ;;  %v9858_v53 = vpack.c.bf16 %v9842_v21, %v9826_v27  ;;  %v9970_v30 = vunpack.c.h.s8.bf16 %v9888_v24  ;;  %v9986_v10 = vunpack.c.h.s8.bf16 %v9896_v42  ;;  %v9887_v15 = vld [vmem:[%s16525_s11 + $0x80] sm:$0xff] }
0x21ad   : > { %v9977_v47 = vunpack.c.l.s8.bf16 %v9892_v51  ;;  %v9993_v56 = vunpack.c.l.s8.bf16 %v9900_v5  ;;  %v9618_v61 = vrot.slane %v17486_v55, %v17520_v6  ;;  %v9626_v37 = vrot.slane %v17486_v55, %v17523_v26  ;;  %v9895_v27 = vld [vmem:[%s16525_s11 + $0xc0] sm:$0xff] }
0x21ae   : > { %10095 = vmatprep.mubr.bf16.mxu1 %v9856_v16  ;;  %10136 = vmatprep.mubr.bf16.mxu0 %v9858_v53  ;;  %v9614_v58 = vrot.slane %v17486_v55, %v17526_v28  ;;  %v9622_v31 = vrot.slane %v17486_v55, %v17529_v29  ;;  %v9969_v32 = vunpack.c.l.s8.bf16 %v9888_v24  ;;  %v9985_v7 = vunpack.c.l.s8.bf16 %v9896_v42 }
0x21af   : > { %10096 = vmatmul.mubr.bf16.vlgmr.msra.gmra.mxu1 %v9855_v17  ;;  %10137 = vmatmul.mubr.bf16.vlgmr.msra.gmra.mxu0 %v9857_v8  ;;  %v9976_v25 = vunpack.c.h.s8.bf16 %v9891_v38  ;;  %v9992_v49 = vunpack.c.h.s8.bf16 %v9899_v40  ;;  %v9734_v21 = vrot.slane %v17497_v63, %v17520_v6  ;;  %v9742_v55 = vrot.slane %v17497_v63, %v17523_v26 }
0x21b0   : > { %13344 = vmatpush3.bf16.msra.mxu1 %v9974_v13  ;;  %13366 = vmatpush3.bf16.msra.mxu0 %v9990_v0  ;;  %v9730_v16 = vrot.slane %v17497_v63, %v17526_v28  ;;  %v9738_v13 = vrot.slane %v17497_v63, %v17529_v29  ;;  %v9968_v8 = vunpack.c.h.s8.bf16 %v9887_v15 }
0x21b1   : > { %13345 = vmatprep.subr.bf16.mxu1 %v9981_v52  ;;  %13367 = vmatprep.subr.bf16.mxu0 %v9997_v14  ;;  %v9984_v52 = vunpack.c.h.s8.bf16 %v9895_v27 }
0x21b4   : > { %13346 = vmatpush3.bf16.msra.mxu1 %v9973_v1  ;;  %13368 = vmatpush3.bf16.msra.mxu0 %v9989_v45  ;;  %v9975_v45 = vunpack.c.l.s8.bf16 %v9891_v38 }
0x21b5   : > { %13347 = vmatprep.subr.bf16.mxu1 %v9980_v35  ;;  %13369 = vmatprep.subr.bf16.mxu0 %v9996_v33  ;;  %v9991_v35 = vunpack.c.l.s8.bf16 %v9899_v40 }
0x21b8   : > { %13348 = vmatpush3.bf16.msra.mxu1 %v9972_v36  ;;  %13370 = vmatpush3.bf16.msra.mxu0 %v9988_v57  ;;  %v9910_v36 = vld [vmem:[%s16525_s11 + $0x138] sm:$0xff] }
0x21b9   : > { %13349 = vmatprep.subr.bf16.mxu1 %v9979_v11  ;;  %13371 = vmatprep.subr.bf16.mxu0 %v9995_v9  ;;  %v9918_v57 = vld [vmem:[%s16525_s11 + $0x178] sm:$0xff] }
0x21bc   : > { %13350 = vmatpush3.bf16.msra.mxu1 %v9971_v19  ;;  %13372 = vmatpush3.bf16.msra.mxu0 %v9987_v62 }
0x21bd   : > { %13351 = vmatprep.subr.bf16.mxu1 %v9978_v20  ;;  %13373 = vmatprep.subr.bf16.mxu0 %v9994_v43  ;;  %v9967_v20 = vunpack.c.l.s8.bf16 %v9887_v15  ;;  %v9983_v43 = vunpack.c.l.s8.bf16 %v9895_v27  ;;  %v9909_v15 = vld [vmem:[%s16525_s11 + $0x130] sm:$0xff] }
0x21be   : > { %v9917_v27 = vld [vmem:[%s16525_s11 + $0x170] sm:$0xff] }
0x21bf   : > { %v9367_v46 = vpop.f32.mrf.mxu1  ;;  %v9410_v3 = vpop.f32.mrf.mxu0 }
0x21c0   : > { %13352 = vmatpush3.bf16.msra.mxu1 %v9970_v30  ;;  %13374 = vmatpush3.bf16.msra.mxu0 %v9986_v10  ;;  %v9679_v34 = vmul.f32 %v9614_v58, %v9367_v46  ;;  %v9681_v53 = vmul.f32 %v9622_v31, %v9410_v3  ;;  %v10014_v30 = vunpack.c.h.s8.bf16 %v9910_v36  ;;  %v10030_v10 = vunpack.c.h.s8.bf16 %v9918_v57 }
0x21c1   : > { %v9369_v12 = vpop.f32.mrf.mxu1  ;;  %v9412_v2 = vpop.f32.mrf.mxu0  ;;  %13353 = vmatprep.subr.bf16.mxu1 %v9977_v47  ;;  %13375 = vmatprep.subr.bf16.mxu0 %v9993_v56  ;;  %v9906_v47 = vld [vmem:[%s16525_s11 + $0x118] sm:$0xff] }
0x21c2   : > { %v9680_v60 = vmul.f32 %v9618_v61, %v9369_v12  ;;  %v9682_v18 = vmul.f32 %v9626_v37, %v9412_v2  ;;  %v9795_v11 = vadd.f32 %v9730_v16, %v9679_v34  ;;  %v9797_v9 = vadd.f32 %v9738_v13, %v9681_v53  ;;  %v9914_v56 = vld [vmem:[%s16525_s11 + $0x158] sm:$0xff]  ;;  %v9905_v34 = vld [vmem:[%s16525_s11 + $0x110] sm:$0xff] }
0x21c3   : > { %v9371_v0 = vpop.f32.mrf.mxu1  ;;  %v9414_v17 = vpop.f32.mrf.mxu0  ;;  %v10004_v53 = vunpack.c.h.s8.bf16 %v9905_v34 }
0x21c4   : > { %13354 = vmatpush3.bf16.msra.mxu1 %v9969_v32  ;;  %13376 = vmatpush3.bf16.msra.mxu0 %v9985_v7  ;;  %v9695_v14 = vmul.f32 %v9614_v58, %v9371_v0  ;;  %v9697_v41 = vmul.f32 %v9622_v31, %v9414_v17  ;;  %v9796_v33 = vadd.f32 %v9734_v21, %v9680_v60  ;;  %v9827_v46 = vmax.f32 %v9795_v11, 0.0 }
0x21c5   : > { %v9373_v22 = vpop.f32.mrf.mxu1  ;;  %v9416_v1 = vpop.f32.mrf.mxu0  ;;  %13355 = vmatprep.subr.bf16.mxu1 %v9976_v25  ;;  %13377 = vmatprep.subr.bf16.mxu0 %v9992_v49  ;;  %v9798_v39 = vadd.f32 %v9742_v55, %v9682_v18  ;;  %v9829_v58 = vmax.f32 %v9797_v9, 0.0  ;;  %v10006_v32 = vunpack.c.h.s8.bf16 %v9906_v47  ;;  %v10022_v7 = vunpack.c.h.s8.bf16 %v9914_v56  ;;  %v9907_v9 = vld [vmem:[%s16525_s11 + $0x120] sm:$0xff] }
0x21c6   : > { %v9696_v54 = vmul.f32 %v9618_v61, %v9373_v22  ;;  %v9698_v63 = vmul.f32 %v9626_v37, %v9416_v1  ;;  %v9811_v51 = vadd.f32 %v9730_v16, %v9695_v14  ;;  %v9813_v5 = vadd.f32 %v9738_v13, %v9697_v41  ;;  %v9913_v16 = vld [vmem:[%s16525_s11 + $0x150] sm:$0xff] }
0x21c7   : > { %v9828_v61 = vmax.f32 %v9796_v33, 0.0  ;;  %v9830_v37 = vmax.f32 %v9798_v39, 0.0  ;;  %v10013_v25 = vunpack.c.l.s8.bf16 %v9910_v36  ;;  %v10029_v49 = vunpack.c.l.s8.bf16 %v9918_v57  ;;  %v17564_v33 = vld [vmem:[%s16523_s14 + $0x8] sm:$0xff]  ;;  %s17868_s14 = scalar_lea.vmem [#allocation36], %s16503_s28 }
0x21c8   : > { %v9812_v19 = vadd.f32 %v9734_v21, %v9696_v54  ;;  %v9814_v62 = vadd.f32 %v9742_v55, %v9698_v63  ;;  %13356 = vmatpush3.bf16.msra.mxu1 %v9968_v8  ;;  %13378 = vmatpush3.bf16.msra.mxu0 %v9984_v52  ;;  %v9843_v24 = vmax.f32 %v9811_v51, 0.0  ;;  %v9845_v42 = vmax.f32 %v9813_v5, 0.0  ;;  %v9908_v8 = vld [vmem:[%s16525_s11 + $0x128] sm:$0xff]  ;;  %v9915_v51 = vld [vmem:[%s16525_s11 + $0x160] sm:$0xff] }
0x21c9   : > { %13357 = vmatprep.subr.bf16.mxu1 %v9975_v45  ;;  %13379 = vmatprep.subr.bf16.mxu0 %v9991_v35  ;;  %v10005_v60 = vunpack.c.l.s8.bf16 %v9906_v47  ;;  %v10021_v21 = vunpack.c.l.s8.bf16 %v9914_v56  ;;  %v10012_v18 = vunpack.c.h.s8.bf16 %v9909_v15  ;;  %v10028_v55 = vunpack.c.h.s8.bf16 %v9917_v27  ;;  %v9916_v52 = vld [vmem:[%s16525_s11 + $0x168] sm:$0xff] }
0x21ca   : > { %v9844_v38 = vmax.f32 %v9812_v19, 0.0  ;;  %v9846_v40 = vmax.f32 %v9814_v62, 0.0  ;;  %v9859_v12 = vpack.c.bf16 %v9843_v24, %v9827_v46  ;;  %v9861_v2 = vpack.c.bf16 %v9845_v42, %v9829_v58  ;;  %v9904_v45 = vld [vmem:[%s16525_s11 + $0x108] sm:$0xff] }
0x21cb   : > { %v10020_v13 = vunpack.c.h.s8.bf16 %v9913_v16  ;;  %v10011_v0 = vunpack.c.l.s8.bf16 %v9909_v15  ;;  %v10027_v17 = vunpack.c.l.s8.bf16 %v9917_v27  ;;  %v10003_v14 = vunpack.c.l.s8.bf16 %v9905_v34  ;;  %v9912_v35 = vld [vmem:[%s16525_s11 + $0x148] sm:$0xff]  ;;  %v9926_v34 = vld [vmem:[%s16525_s11 + $0x1b8] sm:$0xff] }
0x21cc   : > { %13358 = vmatpush3.bf16.msra.mxu1 %v9967_v20  ;;  %13380 = vmatpush3.bf16.msra.mxu0 %v9983_v43  ;;  %v9860_v3 = vpack.c.bf16 %v9844_v38, %v9828_v61  ;;  %v9862_v31 = vpack.c.bf16 %v9846_v40, %v9830_v37  ;;  %v10019_v41 = vunpack.c.l.s8.bf16 %v9913_v16  ;;  %v10010_v22 = vunpack.c.h.s8.bf16 %v9908_v8  ;;  %v17577_v43 = vld [vmem:[%s16544_s22 + $0x8] sm:$0xff]  ;;  %v9934_v16 = vld [vmem:[%s16525_s11 + $0x1f8] sm:$0xff] }
0x21cd   : > { %13387 = vmatprep.subr.bf16.mxu1 %v10014_v30  ;;  %13409 = vmatprep.subr.bf16.mxu0 %v10030_v10  ;;  %v10026_v1 = vunpack.c.h.s8.bf16 %v9916_v52  ;;  %v10002_v39 = vunpack.c.h.s8.bf16 %v9904_v45  ;;  %v10018_v54 = vunpack.c.h.s8.bf16 %v9912_v35  ;;  %v10009_v63 = vunpack.c.l.s8.bf16 %v9908_v8  ;;  %v9903_v61 = vld [vmem:[%s16525_s11 + $0x100] sm:$0xff] }
0x21ce   : > { %10177 = vmatprep.mubr.bf16.mxu1 %v9860_v3  ;;  %10218 = vmatprep.mubr.bf16.mxu0 %v9862_v31  ;;  %v10025_v36 = vunpack.c.l.s8.bf16 %v9916_v52  ;;  %v9634_v57 = vrot.slane %v17564_v33, %v17044_v48  ;;  %v9642_v11 = vrot.slane %v17564_v33, %v17483_v4  ;;  %v9630_v19 = vrot.slane %v17564_v33, %v17049_v50  ;;  %v9911_v37 = vld [vmem:[%s16525_s11 + $0x140] sm:$0xff] }
0x21cf   : > { %10178 = vmatmul.mubr.bf16.vlgmr.msra.gmra.mxu1 %v9859_v12  ;;  %10219 = vmatmul.mubr.bf16.vlgmr.msra.gmra.mxu0 %v9861_v2  ;;  %v9638_v20 = vrot.slane %v17564_v33, %v17058_v59  ;;  %v10001_v24 = vunpack.c.l.s8.bf16 %v9904_v45  ;;  %v10017_v42 = vunpack.c.l.s8.bf16 %v9912_v35  ;;  %v10008_v47 = vunpack.c.h.s8.bf16 %v9907_v9 }
0x21d0   : > { %13388 = vmatpush3.bf16.msra.mxu1 %v10006_v32  ;;  %13410 = vmatpush3.bf16.msra.mxu0 %v10022_v7  ;;  %v10024_v56 = vunpack.c.h.s8.bf16 %v9915_v51  ;;  %v9750_v40 = vrot.slane %v17577_v43, %v17044_v48  ;;  %v9758_v58 = vrot.slane %v17577_v43, %v17483_v4  ;;  %v9746_v31 = vrot.slane %v17577_v43, %v17049_v50 }
0x21d1   : > { %13389 = vmatprep.subr.bf16.mxu1 %v10013_v25  ;;  %13411 = vmatprep.subr.bf16.mxu0 %v10029_v49  ;;  %v9754_v7 = vrot.slane %v17577_v43, %v17058_v59  ;;  %v10000_v25 = vunpack.c.h.s8.bf16 %v9903_v61  ;;  %v10016_v48 = vunpack.c.h.s8.bf16 %v9911_v37  ;;  %v10023_v50 = vunpack.c.l.s8.bf16 %v9915_v51 }
0x21d2   : > { %v10046_v45 = vunpack.c.h.s8.bf16 %v9926_v34  ;;  %v10062_v35 = vunpack.c.h.s8.bf16 %v9934_v16 }
0x21d4   : > { %13390 = vmatpush3.bf16.msra.mxu1 %v10005_v60  ;;  %13412 = vmatpush3.bf16.msra.mxu0 %v10021_v21  ;;  %v10007_v60 = vunpack.c.l.s8.bf16 %v9907_v9 }
0x21d5   : > { %13391 = vmatprep.subr.bf16.mxu1 %v10012_v18  ;;  %13413 = vmatprep.subr.bf16.mxu0 %v10028_v55 }
0x21d8   : > { %13392 = vmatpush3.bf16.msra.mxu1 %v10004_v53  ;;  %13414 = vmatpush3.bf16.msra.mxu0 %v10020_v13 }
0x21d9   : > { %13393 = vmatprep.subr.bf16.mxu1 %v10011_v0  ;;  %13415 = vmatprep.subr.bf16.mxu0 %v10027_v17 }
0x21dc   : > { %13394 = vmatpush3.bf16.msra.mxu1 %v10003_v14  ;;  %13416 = vmatpush3.bf16.msra.mxu0 %v10019_v41  ;;  %v9999_v14 = vunpack.c.l.s8.bf16 %v9903_v61  ;;  %v10015_v41 = vunpack.c.l.s8.bf16 %v9911_v37 }
0x21dd   : > { %13395 = vmatprep.subr.bf16.mxu1 %v10010_v22  ;;  %13417 = vmatprep.subr.bf16.mxu0 %v10026_v1 }
0x21df   : > { %v9453_v5 = vpop.f32.mrf.mxu1  ;;  %v9496_v62 = vpop.f32.mrf.mxu0 }
0x21e0   : > { %13396 = vmatpush3.bf16.msra.mxu1 %v10002_v39  ;;  %13418 = vmatpush3.bf16.msra.mxu0 %v10018_v54  ;;  %v9683_v3 = vmul.f32 %v9630_v19, %v9453_v5  ;;  %v9685_v32 = vmul.f32 %v9638_v20, %v9496_v62  ;;  %v9922_v39 = vld [vmem:[%s16525_s11 + $0x198] sm:$0xff] }
0x21e1   : > { %v9455_v30 = vpop.f32.mrf.mxu1  ;;  %v9498_v10 = vpop.f32.mrf.mxu0  ;;  %13397 = vmatprep.subr.bf16.mxu1 %v10009_v63  ;;  %13419 = vmatprep.subr.bf16.mxu0 %v10025_v36  ;;  %v9930_v54 = vld [vmem:[%s16525_s11 + $0x1d8] sm:$0xff]  ;;  %v10038_v62 = vunpack.c.h.s8.bf16 %v9922_v39  ;;  %v10037_v61 = vunpack.c.l.s8.bf16 %v9922_v39 }
0x21e2   : > { %v9684_v38 = vmul.f32 %v9634_v57, %v9455_v30  ;;  %v9686_v46 = vmul.f32 %v9642_v11, %v9498_v10  ;;  %v9799_v53 = vadd.f32 %v9746_v31, %v9683_v3  ;;  %v9801_v13 = vadd.f32 %v9754_v7, %v9685_v32 }
0x21e3   : > { %v9457_v12 = vpop.f32.mrf.mxu1  ;;  %v9500_v2 = vpop.f32.mrf.mxu0  ;;  %v10045_v30 = vunpack.c.l.s8.bf16 %v9926_v34  ;;  %v10061_v10 = vunpack.c.l.s8.bf16 %v9934_v16  ;;  %v10053_v37 = vunpack.c.l.s8.bf16 %v9930_v54  ;;  %v9923_v34 = vld [vmem:[%s16525_s11 + $0x1a0] sm:$0xff] }
0x21e4   : > { %13398 = vmatpush3.bf16.msra.mxu1 %v10001_v24  ;;  %13420 = vmatpush3.bf16.msra.mxu0 %v10017_v42  ;;  %v9699_v49 = vmul.f32 %v9630_v19, %v9457_v12  ;;  %v9701_v15 = vmul.f32 %v9638_v20, %v9500_v2  ;;  %v9800_v21 = vadd.f32 %v9750_v40, %v9684_v38  ;;  %v9831_v9 = vmax.f32 %v9799_v53, 0.0  ;;  %v9924_v12 = vld [vmem:[%s16525_s11 + $0x1a8] sm:$0xff]  ;;  %v9931_v16 = vld [vmem:[%s16525_s11 + $0x1e0] sm:$0xff] }
0x21e5   : > { %v9459_v27 = vpop.f32.mrf.mxu1  ;;  %v9502_v4 = vpop.f32.mrf.mxu0  ;;  %13399 = vmatprep.subr.bf16.mxu1 %v10008_v47  ;;  %13421 = vmatprep.subr.bf16.mxu0 %v10024_v56  ;;  %v9802_v18 = vadd.f32 %v9758_v58, %v9686_v46  ;;  %v9833_v51 = vmax.f32 %v9801_v13, 0.0  ;;  %v10054_v20 = vunpack.c.h.s8.bf16 %v9930_v54  ;;  %v9925_v47 = vld [vmem:[%s16525_s11 + $0x1b0] sm:$0xff]  ;;  %v9932_v2 = vld [vmem:[%s16525_s11 + $0x1e8] sm:$0xff]  ;;  %v9646_v13 = vrot.slane %v17564_v33, %v17526_v28 }
0x21e6   : > { %v9700_v55 = vmul.f32 %v9634_v57, %v9459_v27  ;;  %v9702_v59 = vmul.f32 %v9642_v11, %v9502_v4  ;;  %v9815_v0 = vadd.f32 %v9746_v31, %v9699_v49  ;;  %v9817_v17 = vadd.f32 %v9754_v7, %v9701_v15  ;;  %v9933_v56 = vld [vmem:[%s16525_s11 + $0x1f0] sm:$0xff]  ;;  %v9920_v27 = vld [vmem:[%s16525_s11 + $0x188] sm:$0xff] }
0x21e7   : > { %v9832_v63 = vmax.f32 %v9800_v21, 0.0  ;;  %v9834_v36 = vmax.f32 %v9802_v18, 0.0  ;;  %v10044_v38 = vunpack.c.h.s8.bf16 %v9925_v47  ;;  %v9921_v46 = vld [vmem:[%s16525_s11 + $0x190] sm:$0xff]  ;;  %v10043_v32 = vunpack.c.l.s8.bf16 %v9925_v47  ;;  %v9928_v4 = vld [vmem:[%s16525_s11 + $0x1c8] sm:$0xff] }
0x21e8   : > { %v9816_v8 = vadd.f32 %v9750_v40, %v9700_v55  ;;  %v9818_v52 = vadd.f32 %v9758_v58, %v9702_v59  ;;  %13400 = vmatpush3.bf16.msra.mxu1 %v10000_v25  ;;  %13422 = vmatpush3.bf16.msra.mxu0 %v10016_v48  ;;  %v9847_v22 = vmax.f32 %v9815_v0, 0.0  ;;  %v9849_v1 = vmax.f32 %v9817_v17, 0.0  ;;  %v9929_v58 = vld [vmem:[%s16525_s11 + $0x1d0] sm:$0xff] }
0x21e9   : > { %13401 = vmatprep.subr.bf16.mxu1 %v10007_v60  ;;  %13423 = vmatprep.subr.bf16.mxu0 %v10023_v50  ;;  %v10060_v40 = vunpack.c.h.s8.bf16 %v9933_v56  ;;  %v10036_v3 = vunpack.c.h.s8.bf16 %v9921_v46  ;;  %v10052_v31 = vunpack.c.h.s8.bf16 %v9929_v58  ;;  %v10059_v7 = vunpack.c.l.s8.bf16 %v9933_v56 }
0x21ea   : > { %v9848_v57 = vmax.f32 %v9816_v8, 0.0  ;;  %v9850_v11 = vmax.f32 %v9818_v52, 0.0  ;;  %v9863_v24 = vpack.c.bf16 %v9847_v22, %v9831_v9  ;;  %v9865_v42 = vpack.c.bf16 %v9849_v1, %v9833_v51 }
0x21eb   : > { %v10035_v25 = vunpack.c.l.s8.bf16 %v9921_v46  ;;  %v10051_v48 = vunpack.c.l.s8.bf16 %v9929_v58  ;;  %v10042_v49 = vunpack.c.h.s8.bf16 %v9924_v12  ;;  %v10058_v15 = vunpack.c.h.s8.bf16 %v9932_v2 }
0x21ec   : > { %13402 = vmatpush3.bf16.msra.mxu1 %v9999_v14  ;;  %13424 = vmatpush3.bf16.msra.mxu0 %v10015_v41  ;;  %v9864_v5 = vpack.c.bf16 %v9848_v57, %v9832_v63  ;;  %v9866_v19 = vpack.c.bf16 %v9850_v11, %v9834_v36  ;;  %v10034_v60 = vunpack.c.h.s8.bf16 %v9920_v27  ;;  %v10050_v50 = vunpack.c.h.s8.bf16 %v9928_v4 }
0x21ed   : > { %13431 = vmatprep.subr.bf16.mxu1 %v10046_v45  ;;  %13453 = vmatprep.subr.bf16.mxu0 %v10062_v35  ;;  %v10041_v21 = vunpack.c.l.s8.bf16 %v9924_v12  ;;  %v10057_v18 = vunpack.c.l.s8.bf16 %v9932_v2  ;;  %v9650_v55 = vrot.slane %v17564_v33, %v17520_v6  ;;  %v9658_v59 = vrot.slane %v17564_v33, %v17523_v26  ;;  %v9919_v45 = vld [vmem:[%s16525_s11 + $0x180] sm:$0xff] }
0x21ee   : > { %10259 = vmatprep.mubr.bf16.mxu1 %v9864_v5  ;;  %10300 = vmatprep.mubr.bf16.mxu0 %v9866_v19  ;;  %v9654_v17 = vrot.slane %v17564_v33, %v17529_v29  ;;  %v10033_v8 = vunpack.c.l.s8.bf16 %v9920_v27  ;;  %v10049_v52 = vunpack.c.l.s8.bf16 %v9928_v4  ;;  %v10040_v22 = vunpack.c.h.s8.bf16 %v9923_v34  ;;  %v9927_v35 = vld [vmem:[%s16525_s11 + $0x1c0] sm:$0xff] }
0x21ef   : > { %10260 = vmatmul.mubr.bf16.vlgmr.msra.gmra.mxu1 %v9863_v24  ;;  %10301 = vmatmul.mubr.bf16.vlgmr.msra.gmra.mxu0 %v9865_v42  ;;  %v10056_v1 = vunpack.c.h.s8.bf16 %v9931_v16  ;;  %v9766_v54 = vrot.slane %v17577_v43, %v17520_v6  ;;  %v9774_v33 = vrot.slane %v17577_v43, %v17523_v26  ;;  %v9762_v57 = vrot.slane %v17577_v43, %v17526_v28 }
0x21f0   : > { %13432 = vmatpush3.bf16.msra.mxu1 %v10038_v62  ;;  %13454 = vmatpush3.bf16.msra.mxu0 %v10054_v20  ;;  %v9770_v9 = vrot.slane %v17577_v43, %v17529_v29  ;;  %v10032_v19 = vunpack.c.h.s8.bf16 %v9919_v45  ;;  %v10048_v62 = vunpack.c.h.s8.bf16 %v9927_v35  ;;  %v10039_v26 = vunpack.c.l.s8.bf16 %v9923_v34 }
0x21f1   : > { %13433 = vmatprep.subr.bf16.mxu1 %v10045_v30  ;;  %13455 = vmatprep.subr.bf16.mxu0 %v10061_v10  ;;  %v10055_v30 = vunpack.c.l.s8.bf16 %v9931_v16  ;;  %v10031_v46 = vunpack.c.l.s8.bf16 %v9919_v45  ;;  %v10047_v58 = vunpack.c.l.s8.bf16 %v9927_v35 }
0x21f4   : > { %13434 = vmatpush3.bf16.msra.mxu1 %v10037_v61  ;;  %13456 = vmatpush3.bf16.msra.mxu0 %v10053_v37 }
0x21f5   : > { %13435 = vmatprep.subr.bf16.mxu1 %v10044_v38  ;;  %13457 = vmatprep.subr.bf16.mxu0 %v10060_v40 }
0x21f8   : > { %13436 = vmatpush3.bf16.msra.mxu1 %v10036_v3  ;;  %13458 = vmatpush3.bf16.msra.mxu0 %v10052_v31 }
0x21f9   : > { %13437 = vmatprep.subr.bf16.mxu1 %v10043_v32  ;;  %13459 = vmatprep.subr.bf16.mxu0 %v10059_v7 }
0x21fc   : > { %13438 = vmatpush3.bf16.msra.mxu1 %v10035_v25  ;;  %13460 = vmatpush3.bf16.msra.mxu0 %v10051_v48 }
0x21fd   : > { %13439 = vmatprep.subr.bf16.mxu1 %v10042_v49  ;;  %13461 = vmatprep.subr.bf16.mxu0 %v10058_v15 }
0x21ff   : > { %v9539_v53 = vpop.f32.mrf.mxu1  ;;  %v9582_v0 = vpop.f32.mrf.mxu0 }
0x2200   : > { %13440 = vmatpush3.bf16.msra.mxu1 %v10034_v60  ;;  %13462 = vmatpush3.bf16.msra.mxu0 %v10050_v50  ;;  %v9687_v36 = vmul.f32 %v9646_v13, %v9539_v53  ;;  %v9689_v11 = vmul.f32 %v9654_v17, %v9582_v0 }
0x2201   : > { %v9541_v14 = vpop.f32.mrf.mxu1  ;;  %v9584_v41 = vpop.f32.mrf.mxu0  ;;  %13441 = vmatprep.subr.bf16.mxu1 %v10041_v21  ;;  %13463 = vmatprep.subr.bf16.mxu0 %v10057_v18 }
0x2202   : > { %v9688_v39 = vmul.f32 %v9650_v55, %v9541_v14  ;;  %v9690_v63 = vmul.f32 %v9658_v59, %v9584_v41  ;;  %v9803_v61 = vadd.f32 %v9762_v57, %v9687_v36  ;;  %v9805_v29 = vadd.f32 %v9770_v9, %v9689_v11 }
0x2203   : > { %v9543_v51 = vpop.f32.mrf.mxu1  ;;  %v9586_v5 = vpop.f32.mrf.mxu0 }
0x2204   : > { %13442 = vmatpush3.bf16.msra.mxu1 %v10033_v8  ;;  %13464 = vmatpush3.bf16.msra.mxu0 %v10049_v52  ;;  %v9703_v20 = vmul.f32 %v9646_v13, %v9543_v51  ;;  %v9705_v6 = vmul.f32 %v9654_v17, %v9586_v5  ;;  %v9804_v10 = vadd.f32 %v9766_v54, %v9688_v39  ;;  %v9835_v25 = vmax.f32 %v9803_v61, 0.0 }
0x2205   : > { %v9545_v24 = vpop.f32.mrf.mxu1  ;;  %v9588_v42 = vpop.f32.mrf.mxu0  ;;  %13443 = vmatprep.subr.bf16.mxu1 %v10040_v22  ;;  %13465 = vmatprep.subr.bf16.mxu0 %v10056_v1  ;;  %v9806_v28 = vadd.f32 %v9774_v33, %v9690_v63  ;;  %v9837_v48 = vmax.f32 %v9805_v29, 0.0 }
0x2206   : > { %v9704_v47 = vmul.f32 %v9650_v55, %v9545_v24  ;;  %v9706_v56 = vmul.f32 %v9658_v59, %v9588_v42  ;;  %v9819_v43 = vadd.f32 %v9762_v57, %v9703_v20  ;;  %v9821_v37 = vadd.f32 %v9770_v9, %v9705_v6 }
0x2207   : > { %v9836_v32 = vmax.f32 %v9804_v10, 0.0  ;;  %v9838_v7 = vmax.f32 %v9806_v28, 0.0 }
0x2208   : > { %v9820_v38 = vadd.f32 %v9766_v54, %v9704_v47  ;;  %v9822_v40 = vadd.f32 %v9774_v33, %v9706_v56  ;;  %13444 = vmatpush3.bf16.msra.mxu1 %v10032_v19  ;;  %13466 = vmatpush3.bf16.msra.mxu0 %v10048_v62  ;;  %v9851_v3 = vmax.f32 %v9819_v43, 0.0  ;;  %v9853_v31 = vmax.f32 %v9821_v37, 0.0 }
0x2209   : > { %13445 = vmatprep.subr.bf16.mxu1 %v10039_v26  ;;  %13467 = vmatprep.subr.bf16.mxu0 %v10055_v30 }
0x220a   : > { %v9852_v12 = vmax.f32 %v9820_v38, 0.0  ;;  %v9854_v2 = vmax.f32 %v9822_v40, 0.0  ;;  %v9867_v27 = vpack.c.bf16 %v9851_v3, %v9835_v25  ;;  %v9869_v4 = vpack.c.bf16 %v9853_v31, %v9837_v48 }
0x220c   : > { %13446 = vmatpush3.bf16.msra.mxu1 %v10031_v46  ;;  %13468 = vmatpush3.bf16.msra.mxu0 %v10047_v58  ;;  %v9868_v49 = vpack.c.bf16 %v9852_v12, %v9836_v32  ;;  %v9870_v15 = vpack.c.bf16 %v9854_v2, %v9838_v7  ;;  %v12803_v12 = vld [vmem:[%s17867_s5] ss:$0 sm:$0xff] }
0x220e   : > { %10341 = vmatprep.mubr.bf16.mxu1 %v9868_v49  ;;  %10382 = vmatprep.mubr.bf16.mxu0 %v9870_v15 }
0x220f   : > { %10342 = vmatmul.mubr.bf16.vlgmr.msra.gmra.mxu1 %v9867_v27  ;;  %10383 = vmatmul.mubr.bf16.vlgmr.msra.gmra.mxu0 %v9869_v4  ;;  %v12804_v27 = vld [vmem:[%s17868_s14] ss:$0 sm:$0xff] }
0x226f   : > { %v13315_v60 = vpop.f32.mrf.mxu1  ;;  %v13337_v50 = vpop.f32.mrf.mxu0 }
0x2271   : > { %v13316_v21 = vpop.f32.mrf.mxu1  ;;  %v13338_v18 = vpop.f32.mrf.mxu0 }
0x2272   : > { %v13317_v45 = vadd.f32 %v13316_v21, %v13315_v60  ;;  %v13339_v35 = vadd.f32 %v13338_v18, %v13337_v50 }
0x2273   : > { %v13318_v55 = vpop.f32.mrf.mxu1  ;;  %v13340_v59 = vpop.f32.mrf.mxu0 }
0x2274   : > { %v10139_v33 = vadd.f32 %v13339_v35, %v13317_v45 }
0x2275   : > { %v13319_v34 = vpop.f32.mrf.mxu1  ;;  %v13341_v16 = vpop.f32.mrf.mxu0 }
0x2276   : > { %v13320_v36 = vadd.f32 %v13319_v34, %v13318_v55  ;;  %v13342_v57 = vadd.f32 %v13341_v16, %v13340_v59 }
0x2278   : > { %v10142_v19 = vadd.f32 %v13342_v57, %v13320_v36 }
0x228f   : > { %v13359_v53 = vpop.f32.mrf.mxu1  ;;  %v13381_v13 = vpop.f32.mrf.mxu0 }
0x2291   : > { %v13360_v0 = vpop.f32.mrf.mxu1  ;;  %v13382_v17 = vpop.f32.mrf.mxu0 }
0x2292   : > { %v13361_v54 = vadd.f32 %v13360_v0, %v13359_v53  ;;  %v13383_v62 = vadd.f32 %v13382_v17, %v13381_v13 }
0x2293   : > { %v13362_v8 = vpop.f32.mrf.mxu1  ;;  %v13384_v52 = vpop.f32.mrf.mxu0 }
0x2294   : > { %v10180_v9 = vadd.f32 %v13361_v54, %v10139_v33  ;;  %v12805_v54 = vld [vmem:[%s1955_s0] ss:$0 sm:$0xff] }
0x2295   : > { %v13363_v14 = vpop.f32.mrf.mxu1  ;;  %v13385_v41 = vpop.f32.mrf.mxu0  ;;  %v12806_v33 = vld [vmem:[%s1968_s3] ss:$0 sm:$0xff] }
0x2296   : > { %v13364_v51 = vadd.f32 %v13363_v14, %v13362_v8  ;;  %v10221_v24 = vadd.f32 %v13383_v62, %v10180_v9  ;;  %v13386_v30 = vadd.f32 %v13385_v41, %v13384_v52 }
0x2298   : > { %v10183_v42 = vadd.f32 %v13364_v51, %v10142_v19 }
0x229a   : > { %v10224_v61 = vadd.f32 %v13386_v30, %v10183_v42 }
0x22af   : > { %v13403_v22 = vpop.f32.mrf.mxu1  ;;  %v13425_v1 = vpop.f32.mrf.mxu0 }
0x22b1   : > { %v13404_v39 = vpop.f32.mrf.mxu1  ;;  %v13426_v63 = vpop.f32.mrf.mxu0 }
0x22b2   : > { %v13405_v20 = vadd.f32 %v13404_v39, %v13403_v22  ;;  %v13427_v29 = vadd.f32 %v13426_v63, %v13425_v1 }
0x22b3   : > { %v13406_v11 = vpop.f32.mrf.mxu1  ;;  %v13428_v5 = vpop.f32.mrf.mxu0 }
0x22b4   : > { %v10262_v10 = vadd.f32 %v13405_v20, %v10221_v24 }
0x22b5   : > { %v13407_v6 = vpop.f32.mrf.mxu1  ;;  %v13429_v26 = vpop.f32.mrf.mxu0 }
0x22b6   : > { %v13408_v28 = vadd.f32 %v13407_v6, %v13406_v11  ;;  %v10303_v38 = vadd.f32 %v13427_v29, %v10262_v10  ;;  %v13430_v31 = vadd.f32 %v13429_v26, %v13428_v5 }
0x22b8   : > { %v10265_v40 = vadd.f32 %v13408_v28, %v10224_v61 }
0x22ba   : > { %v10306_v48 = vadd.f32 %v13430_v31, %v10265_v40 }
0x22cf   : > { %v13447_v47 = vpop.f32.mrf.mxu1  ;;  %v13469_v56 = vpop.f32.mrf.mxu0 }
0x22d1   : > { %v13448_v43 = vpop.f32.mrf.mxu1  ;;  %v13470_v37 = vpop.f32.mrf.mxu0 }
0x22d2   : > { %v13449_v46 = vadd.f32 %v13448_v43, %v13447_v47  ;;  %v13471_v7 = vadd.f32 %v13470_v37, %v13469_v56 }
0x22d3   : > { %v13450_v58 = vpop.f32.mrf.mxu1  ;;  %v13472_v3 = vpop.f32.mrf.mxu0 }
0x22d4   : > { %v10344_v32 = vadd.f32 %v13449_v46, %v10303_v38 }
0x22d5   : > { %v13451_v2 = vpop.f32.mrf.mxu1  ;;  %v13473_v25 = vpop.f32.mrf.mxu0 }
0x22d6   : > { %v10385_v49 = vadd.f32 %v13471_v7, %v10344_v32  ;;  %v13452_v15 = vadd.f32 %v13451_v2, %v13450_v58  ;;  %v13474_v50 = vadd.f32 %v13473_v25, %v13472_v3 }
0x22d8   : > { %v10398_v4 = vmul.f32 %v12803_v12, %v10385_v49  ;;  %v10347_v60 = vadd.f32 %v13452_v15, %v10306_v48 }
0x22da   : > { %v10388_v21 = vadd.f32 %v13474_v50, %v10347_v60  ;;  %v10407_v18 = vadd.f32 %v12804_v27, %v10398_v4 }
0x22dc   : > { %v10399_v55 = vmul.f32 %v12803_v12, %v10388_v21  ;;  %v10409_v59 = vadd.f32 %v10407_v18, %v17392_v23 }
0x22de   : > { %10413 = vadd.xlane.f32.xlu0 %v10409_v59  ;;  %v10408_v34 = vadd.f32 %v12804_v27, %v10399_v55 }
0x22e0   : > { %v10410_v16 = vadd.f32 %v10408_v34, %v17394_v44 }
0x22e2   : > { %10415 = vadd.xlane.f32.xlu1 %v10410_v16 }
0x2367   : > { %v10414_v53 = vpop.xlane.xlu0 %10413 }
0x2368   : > { %v10417_v13 = vmul.f32 0.0078125, %v10414_v53 }
0x236a   : > { %v10419_v0 = vsub.f32 %v10409_v59, %v10417_v13 }
0x236b   : > { %v10416_v17 = vpop.xlane.xlu1 %10415 }
0x236c   : > { %v10418_v8 = vmul.f32 0.0078125, %v10416_v17  ;;  %v10421_v52 = vmul.f32 %v10419_v0, %v10419_v0 }
0x236e   : > { %v10420_v14 = vsub.f32 %v10410_v16, %v10418_v8  ;;  %10423 = vadd.xlane.f32.xlu0 %v10421_v52 }
0x2370   : > { %v10422_v41 = vmul.f32 %v10420_v14, %v10420_v14 }
0x2372   : > { %10425 = vadd.xlane.f32.xlu1 %v10422_v41 }
0x23f7   : > { %v10424_v23 = vpop.xlane.xlu0 %10423 }
0x23f8   : > { %v10427_v22 = vmul.f32 0.0078125, %v10424_v23 }
0x23fa   : > { %v10429_v1 = vadd.f32 1e-05, %v10427_v22 }
0x23fb   : > { %v10426_v45 = vpop.xlane.xlu1 %10425 }
0x23fc   : > { %14972 = vrsqrt.f32 %v10429_v1  ;;  %v10428_v44 = vmul.f32 0.0078125, %v10426_v45 }
0x23fe   : > { %v10430_v35 = vadd.f32 1e-05, %v10428_v44 }
0x2400   : > { %14974 = vrsqrt.f32 %v10430_v35 }
0x2409   : > { %v14973_v39 = vpop.eup %14972 }
0x240a   : > { %v10433_v63 = vmul.f32 %v14973_v39, %v10419_v0 }
0x240c   : > { %v10441_v36 = vmul.f32 %v12805_v54, %v10433_v63 }
0x240d   : > { %v14975_v57 = vpop.eup %14974 }
0x240e   : > { %v10449_v11 = vadd.f32 %v12806_v33, %v10441_v36  ;;  %v10434_v9 = vmul.f32 %v14975_v57, %v10420_v14 }
0x2410   : > { %10451 = vst [vmem:[#allocation2] sm:$0xff] %v10449_v11  ;;  %v10442_v51 = vmul.f32 %v12805_v54, %v10434_v9 }
0x2412   : > { %v10450_v5 = vadd.f32 %v12806_v33, %v10442_v51 }
0x2414   : > { %10452 = vst [vmem:[#allocation2 + $0x8] sm:$0xff] %v10450_v5 }
0x2415 PF: > { %s17871_s29 = sld [smem:[#allocation86_spill]] }
0x241b   : > { %p12807_p8 = scmp.ne.s32.totalorder %s17871_s29, 4 }
0x241d   : > { %10456 = sbr.rel (%p12807_p8) target bundleno = 10115 (0x2783), region = 272 }
0x2422   : > { %15784 = dma.done.wait [#allocation4], 16384 }
0x2423   : > { %15785 = vsyncadd [#allocation4], 4294950912  ;;  %v10627_v19 = vld [vmem:[#allocation3 + $0x168] sm:$0xff]  ;;  %v10629_v62 = vld [vmem:[#allocation3 + $0x178] sm:$0xff]  ;;  %vm10501_vm14 = vcmask 1040384   ;;  %s17872_s3 = sld [smem:[#allocation77_spill]] }
0x2424   : > { %v10626_v20 = vld [vmem:[#allocation3 + $0x160] sm:$0xff]  ;;  %v10671_v6 = vunpack.c.l.s8.bf16 %v10627_v19  ;;  %v10675_v24 = vunpack.c.h.s8.bf16 %v10627_v19  ;;  %v10673_v42 = vunpack.c.l.s8.bf16 %v10629_v62  ;;  %v10677_v26 = vunpack.c.h.s8.bf16 %v10629_v62  ;;  %v10628_v30 = vld [vmem:[#allocation3 + $0x170] sm:$0xff]  ;;  %v10623_v47 = vld [vmem:[#allocation3 + $0x148] sm:$0xff]  ;;  %s17873_s0 = sld [smem:[#allocation78_spill]] }
0x2425   : > { %v10674_v10 = vunpack.c.h.s8.bf16 %v10626_v20  ;;  %v10676_v28 = vunpack.c.h.s8.bf16 %v10628_v30  ;;  %v10625_v56 = vld [vmem:[#allocation3 + $0x158] sm:$0xff]  ;;  %v10670_v61 = vunpack.c.l.s8.bf16 %v10626_v20  ;;  %v10672_v29 = vunpack.c.l.s8.bf16 %v10628_v30  ;;  %v10622_v38 = vld [vmem:[#allocation3 + $0x140] sm:$0xff]  ;;  %v10624_v40 = vld [vmem:[#allocation3 + $0x150] sm:$0xff]  ;;  %s17874_s22 = sld [smem:[#allocation80_spill]] }
0x2426   : > { %10710 = vmatprep.subr.bf16.mxu0 %v10675_v24  ;;  %10751 = vmatprep.subr.bf16.mxu1 %v10677_v26  ;;  %v10667_v43 = vunpack.c.h.s8.bf16 %v10623_v47  ;;  %v10669_v37 = vunpack.c.h.s8.bf16 %v10625_v56  ;;  %v10666_v46 = vunpack.c.h.s8.bf16 %v10622_v38  ;;  %v10668_v58 = vunpack.c.h.s8.bf16 %v10624_v40  ;;  %v10619_v32 = vld [vmem:[#allocation3 + $0x128] sm:$0xff]  ;;  %v10621_v7 = vld [vmem:[#allocation3 + $0x138] sm:$0xff]  ;;  %v10618_v49 = vld [vmem:[#allocation3 + $0x120] sm:$0xff]  ;;  %s17875_s4 = sld [smem:[#allocation82_spill]] }
0x2427   : > { %10711 = vmatpush1.bf16.msra.mxu0 %v10674_v10  ;;  %10752 = vmatpush1.bf16.msra.mxu1 %v10676_v28  ;;  %v10663_v3 = vunpack.c.l.s8.bf16 %v10623_v47  ;;  %v10665_v31 = vunpack.c.l.s8.bf16 %v10625_v56  ;;  %v10662_v12 = vunpack.c.l.s8.bf16 %v10622_v38  ;;  %v10664_v2 = vunpack.c.l.s8.bf16 %v10624_v40  ;;  %v10620_v15 = vld [vmem:[#allocation3 + $0x130] sm:$0xff]  ;;  %v17636_v4 = vld [vmem:[#allocation2 + $0x8] sm:$0xff]  ;;  %v10615_v34 = vld [vmem:[#allocation3 + $0x108] sm:$0xff] }
0x2428   : > { %10712 = vmatprep.subr.bf16.mxu0 %v10671_v6  ;;  %10753 = vmatprep.subr.bf16.mxu1 %v10673_v42  ;;  %v10659_v25 = vunpack.c.h.s8.bf16 %v10619_v32  ;;  %v10661_v48 = vunpack.c.h.s8.bf16 %v10621_v7  ;;  %v17634_v27 = vld [vmem:[#allocation2] sm:$0xff]  ;;  %v10658_v60 = vunpack.c.h.s8.bf16 %v10618_v49  ;;  %v10660_v50 = vunpack.c.h.s8.bf16 %v10620_v15  ;;  %v10617_v16 = vld [vmem:[#allocation3 + $0x118] sm:$0xff]  ;;  %v10614_v14 = vld [vmem:[#allocation3 + $0x100] sm:$0xff] }
0x2429   : > { %v10655_v21 = vunpack.c.l.s8.bf16 %v10619_v32  ;;  %v10657_v18 = vunpack.c.l.s8.bf16 %v10621_v7  ;;  %v10468_v55 = vrot.slane %v17634_v27, 3  ;;  %v12810_v59 = vrot.slane %v17636_v4, 10  ;;  %v10616_v41 = vld [vmem:[#allocation3 + $0x110] sm:$0xff]  ;;  %v10643_v44 = vld [vmem:[#allocation3 + $0x1e8] sm:$0xff]  ;;  %v10645_v35 = vld [vmem:[#allocation3 + $0x1f8] sm:$0xff] }
0x242a   : > { %v10654_v13 = vunpack.c.l.s8.bf16 %v10618_v49  ;;  %v10656_v0 = vunpack.c.l.s8.bf16 %v10620_v15  ;;  %v10651_v8 = vunpack.c.h.s8.bf16 %v10615_v34  ;;  %v10653_v52 = vunpack.c.h.s8.bf16 %v10617_v16  ;;  %v10642_v39 = vld [vmem:[#allocation3 + $0x1e0] sm:$0xff]  ;;  %v10644_v54 = vld [vmem:[#allocation3 + $0x1f0] sm:$0xff]  ;;  %v10639_v19 = vld [vmem:[#allocation3 + $0x1c8] sm:$0xff] }
0x242b   : > { %10713 = vmatpush1.bf16.msra.mxu0 %v10670_v61  ;;  %10754 = vmatpush1.bf16.msra.mxu1 %v10672_v29  ;;  %v10505_v53 = vsel %vm10501_vm14, %v10468_v55, %v12810_v59  ;;  %v10650_v23 = vunpack.c.h.s8.bf16 %v10614_v14  ;;  %v10652_v22 = vunpack.c.h.s8.bf16 %v10616_v41  ;;  %v10647_v1 = vunpack.c.l.s8.bf16 %v10615_v34  ;;  %v10641_v62 = vld [vmem:[#allocation3 + $0x1d8] sm:$0xff]  ;;  %v10638_v20 = vld [vmem:[#allocation3 + $0x1c0] sm:$0xff]  ;;  %v10640_v6 = vld [vmem:[#allocation3 + $0x1d0] sm:$0xff] }
0x242c   : > { %10714 = vmatprep.subr.bf16.mxu0 %v10667_v43  ;;  %10755 = vmatprep.subr.bf16.mxu1 %v10669_v37  ;;  %v10513_v17 = vpack.c.bf16 %v10505_v53, %v10505_v53  ;;  %v10649_v45 = vunpack.c.l.s8.bf16 %v10617_v16  ;;  %v10646_v63 = vunpack.c.l.s8.bf16 %v10614_v14  ;;  %v10648_v33 = vunpack.c.l.s8.bf16 %v10616_v41  ;;  %v10635_v61 = vld [vmem:[#allocation3 + $0x1a8] sm:$0xff]  ;;  %v10637_v29 = vld [vmem:[#allocation3 + $0x1b8] sm:$0xff]  ;;  %v10634_v43 = vld [vmem:[#allocation3 + $0x1a0] sm:$0xff] }
0x242d   : > { %v10707_v36 = vunpack.c.h.s8.bf16 %v10643_v44  ;;  %v10709_v57 = vunpack.c.h.s8.bf16 %v10645_v35  ;;  %v10706_v11 = vunpack.c.h.s8.bf16 %v10642_v39  ;;  %v10708_v9 = vunpack.c.h.s8.bf16 %v10644_v54  ;;  %v10636_v37 = vld [vmem:[#allocation3 + $0x1b0] sm:$0xff]  ;;  %v10531_v53 = vld [vmem:[#allocation3 + $0x68] sm:$0xff] }
0x242e   : > { %10742 = vmatprep.mubr.bf16.mxu0 %v10513_v17  ;;  %10783 = vmatprep.mubr.bf16.mxu1 %v10513_v17  ;;  %v10703_v51 = vunpack.c.l.s8.bf16 %v10643_v44  ;;  %v10705_v5 = vunpack.c.l.s8.bf16 %v10645_v35  ;;  %v10702_v24 = vunpack.c.l.s8.bf16 %v10642_v39  ;;  %v10704_v42 = vunpack.c.l.s8.bf16 %v10644_v54 }
0x242f   : > { %10715 = vmatpush1.bf16.msra.mxu0 %v10666_v46  ;;  %10756 = vmatpush1.bf16.msra.mxu1 %v10668_v58  ;;  %v10699_v26 = vunpack.c.h.s8.bf16 %v10639_v19  ;;  %v10701_v30 = vunpack.c.h.s8.bf16 %v10641_v62  ;;  %v10698_v10 = vunpack.c.h.s8.bf16 %v10638_v20  ;;  %v10700_v28 = vunpack.c.h.s8.bf16 %v10640_v6 }
0x2430   : > { %10716 = vmatprep.subr.bf16.mxu0 %v10663_v3  ;;  %10757 = vmatprep.subr.bf16.mxu1 %v10665_v31  ;;  %v10695_v47 = vunpack.c.l.s8.bf16 %v10639_v19  ;;  %v10697_v56 = vunpack.c.l.s8.bf16 %v10641_v62  ;;  %v10694_v38 = vunpack.c.l.s8.bf16 %v10638_v20  ;;  %v10696_v40 = vunpack.c.l.s8.bf16 %v10640_v6  ;;  %v10528_v19 = vld [vmem:[#allocation3 + $0x50] sm:$0xff] }
0x2431   : > { %v10691_v46 = vunpack.c.h.s8.bf16 %v10635_v61  ;;  %v10693_v58 = vunpack.c.h.s8.bf16 %v10637_v29  ;;  %v10690_v3 = vunpack.c.h.s8.bf16 %v10634_v43  ;;  %v10692_v31 = vunpack.c.h.s8.bf16 %v10636_v37 }
0x2432   : > { %v10687_v32 = vunpack.c.l.s8.bf16 %v10635_v61  ;;  %v10689_v7 = vunpack.c.l.s8.bf16 %v10637_v29  ;;  %v10466_v55 = vrot.slane %v17634_v27, 2  ;;  %v12809_v59 = vrot.slane %v17636_v4, 9  ;;  %v10524_v61 = vld [vmem:[#allocation3 + $0x30] sm:$0xff] }
0x2433   : > { %10717 = vmatpush1.bf16.msra.mxu0 %v10662_v12  ;;  %10758 = vmatpush1.bf16.msra.mxu1 %v10664_v2  ;;  %v10631_v12 = vld [vmem:[#allocation3 + $0x188] sm:$0xff]  ;;  %v10633_v2 = vld [vmem:[#allocation3 + $0x198] sm:$0xff]  ;;  %v10579_v14 = vunpack.c.h.s8.bf16 %v10531_v53  ;;  %v10575_v39 = vunpack.c.l.s8.bf16 %v10531_v53  ;;  %v10572_v20 = vunpack.c.h.s8.bf16 %v10528_v19  ;;  %vm15891_vm15 = vmmov 0  }
0x2434   : > { %10718 = vmatprep.subr.bf16.mxu0 %v10659_v25  ;;  %10759 = vmatprep.subr.bf16.mxu1 %v10661_v48  ;;  %v10686_v25 = vunpack.c.l.s8.bf16 %v10634_v43  ;;  %v10688_v48 = vunpack.c.l.s8.bf16 %v10636_v37  ;;  %v10683_v49 = vunpack.c.h.s8.bf16 %v10631_v12  ;;  %v10685_v15 = vunpack.c.h.s8.bf16 %v10633_v2 }
0x2435   : > { %v10679_v34 = vunpack.c.l.s8.bf16 %v10631_v12  ;;  %v10681_v16 = vunpack.c.l.s8.bf16 %v10633_v2  ;;  %v10564_v43 = vunpack.c.h.s8.bf16 %v10524_v61  ;;  %v10520_v12 = vld [vmem:[#allocation3 + $0x10] sm:$0xff]  ;;  %vm11735_vm0 = vcmask 41984  }
0x2437   : > { %10719 = vmatpush1.bf16.msra.mxu0 %v10658_v60  ;;  %10760 = vmatpush1.bf16.msra.mxu1 %v10660_v50  ;;  %v10630_v60 = vld [vmem:[#allocation3 + $0x180] sm:$0xff]  ;;  %v10632_v50 = vld [vmem:[#allocation3 + $0x190] sm:$0xff] }
0x2438   : > { %10720 = vmatprep.subr.bf16.mxu0 %v10655_v21  ;;  %10761 = vmatprep.subr.bf16.mxu1 %v10657_v18  ;;  %v10682_v21 = vunpack.c.h.s8.bf16 %v10630_v60  ;;  %v10684_v18 = vunpack.c.h.s8.bf16 %v10632_v50  ;;  %v10678_v17 = vunpack.c.l.s8.bf16 %v10630_v60  ;;  %v10549_v60 = vld [vmem:[#allocation3 + $0xf8] sm:$0xff] }
0x243b   : > { %10721 = vmatpush1.bf16.msra.mxu0 %v10654_v13  ;;  %10762 = vmatpush1.bf16.msra.mxu1 %v10656_v0  ;;  %v10533_v13 = vld [vmem:[#allocation3 + $0x78] sm:$0xff]  ;;  %v10464_v0 = vrot.slane %v17634_v27, 1 }
0x243c   : > { %10722 = vmatprep.subr.bf16.mxu0 %v10651_v8  ;;  %10763 = vmatprep.subr.bf16.mxu1 %v10653_v52  ;;  %v10680_v8 = vunpack.c.l.s8.bf16 %v10632_v50  ;;  %v10504_v52 = vsel %vm10501_vm14, %v10466_v55, %v12809_v59  ;;  %v10581_v41 = vunpack.c.h.s8.bf16 %v10533_v13  ;;  %v10577_v54 = vunpack.c.l.s8.bf16 %v10533_v13  ;;  %v10546_v59 = vld [vmem:[#allocation3 + $0xe0] sm:$0xff] }
0x243d   : > { %v10613_v55 = vunpack.c.h.s8.bf16 %v10549_v60 }
0x243f   : > { %10723 = vmatpush1.bf16.msra.mxu0 %v10650_v23  ;;  %10764 = vmatpush1.bf16.msra.mxu1 %v10652_v22  ;;  %v10530_v23 = vld [vmem:[#allocation3 + $0x60] sm:$0xff]  ;;  %v10532_v22 = vld [vmem:[#allocation3 + $0x70] sm:$0xff] }
0x2440   : > { %10724 = vmatprep.subr.bf16.mxu0 %v10647_v1  ;;  %10765 = vmatprep.subr.bf16.mxu1 %v10649_v45  ;;  %v10512_v1 = vpack.c.bf16 %v10504_v52, %v10504_v52  ;;  %v10503_v45 = vsel %vm10501_vm14, %v10464_v0, %v17636_v4  ;;  %v10578_v44 = vunpack.c.h.s8.bf16 %v10530_v23  ;;  %v10580_v35 = vunpack.c.h.s8.bf16 %v10532_v22 }
0x2441   : > { %v10609_v0 = vunpack.c.l.s8.bf16 %v10549_v60  ;;  %v10606_v52 = vunpack.c.l.s8.bf16 %v10546_v59 }
0x2443   : > { %10725 = vmatpush1.bf16.msra.mxu0 %v10646_v63  ;;  %10766 = vmatpush1.bf16.msra.mxu1 %v10648_v33  ;;  %v10527_v63 = vld [vmem:[#allocation3 + $0x48] sm:$0xff]  ;;  %v10529_v33 = vld [vmem:[#allocation3 + $0x58] sm:$0xff] }
0x2444   : > { %10726 = vmatprep.subr.bf16.mxu0 %v10707_v36  ;;  %10767 = vmatprep.subr.bf16.mxu1 %v10709_v57  ;;  %v10511_v36 = vpack.c.bf16 %v10503_v45, %v10503_v45  ;;  %v10574_v57 = vunpack.c.l.s8.bf16 %v10530_v23  ;;  %v10567_v6 = vunpack.c.l.s8.bf16 %v10527_v63 }
0x2447   : > { %10727 = vmatpush2.bf16.msra.mxu0 %v10706_v11  ;;  %10768 = vmatpush2.bf16.msra.mxu1 %v10708_v9  ;;  %v10576_v11 = vunpack.c.l.s8.bf16 %v10532_v22  ;;  %v10571_v9 = vunpack.c.h.s8.bf16 %v10527_v63  ;;  %v10542_v22 = vld [vmem:[#allocation3 + $0xc0] sm:$0xff]  ;;  %v10541_v63 = vld [vmem:[#allocation3 + $0xb8] sm:$0xff] }
0x2448   : > { %10728 = vmatprep.subr.bf16.mxu0 %v10703_v51  ;;  %10769 = vmatprep.subr.bf16.mxu1 %v10705_v5  ;;  %v10573_v51 = vunpack.c.h.s8.bf16 %v10529_v33  ;;  %v10526_v5 = vld [vmem:[#allocation3 + $0x40] sm:$0xff]  ;;  %v10602_v45 = vunpack.c.h.s8.bf16 %v10542_v22 }
0x2449   : > { %v10570_v62 = vunpack.c.h.s8.bf16 %v10526_v5 }
0x244b   : > { %10729 = vmatpush2.bf16.msra.mxu0 %v10702_v24  ;;  %10770 = vmatpush2.bf16.msra.mxu1 %v10704_v42  ;;  %v10569_v24 = vunpack.c.l.s8.bf16 %v10529_v33  ;;  %v10523_v42 = vld [vmem:[#allocation3 + $0x28] sm:$0xff]  ;;  %v10598_v33 = vunpack.c.l.s8.bf16 %v10542_v22 }
0x244c   : > { %10730 = vmatprep.subr.bf16.mxu0 %v10699_v26  ;;  %10771 = vmatprep.subr.bf16.mxu1 %v10701_v30  ;;  %v10525_v26 = vld [vmem:[#allocation3 + $0x38] sm:$0xff]  ;;  %v10566_v30 = vunpack.c.l.s8.bf16 %v10526_v5  ;;  %v10559_v37 = vunpack.c.l.s8.bf16 %v10523_v42 }
0x244f   : > { %10731 = vmatpush2.bf16.msra.mxu0 %v10698_v10  ;;  %10772 = vmatpush2.bf16.msra.mxu1 %v10700_v28  ;;  %v10568_v10 = vunpack.c.l.s8.bf16 %v10528_v19  ;;  %v10563_v28 = vunpack.c.h.s8.bf16 %v10523_v42 }
0x2450   : > { %10732 = vmatprep.subr.bf16.mxu0 %v10695_v47  ;;  %10773 = vmatprep.subr.bf16.mxu1 %v10697_v56  ;;  %v10565_v47 = vunpack.c.h.s8.bf16 %v10525_v26  ;;  %v10522_v56 = vld [vmem:[#allocation3 + $0x20] sm:$0xff] }
0x2451   : > { %v10562_v29 = vunpack.c.h.s8.bf16 %v10522_v56 }
0x2453   : > { %10733 = vmatpush2.bf16.msra.mxu0 %v10694_v38  ;;  %10774 = vmatpush2.bf16.msra.mxu1 %v10696_v40  ;;  %v10561_v38 = vunpack.c.l.s8.bf16 %v10525_v26  ;;  %v10519_v40 = vld [vmem:[#allocation3 + $0x8] sm:$0xff] }
0x2454   : > { %10734 = vmatprep.subr.bf16.mxu0 %v10691_v46  ;;  %10775 = vmatprep.subr.bf16.mxu1 %v10693_v58  ;;  %v10521_v46 = vld [vmem:[#allocation3 + $0x18] sm:$0xff]  ;;  %v10558_v58 = vunpack.c.l.s8.bf16 %v10522_v56 }
0x2457   : > { %10735 = vmatpush2.bf16.msra.mxu0 %v10690_v3  ;;  %10776 = vmatpush2.bf16.msra.mxu1 %v10692_v31  ;;  %v10560_v3 = vunpack.c.l.s8.bf16 %v10524_v61  ;;  %v10555_v31 = vunpack.c.h.s8.bf16 %v10519_v40 }
0x2458   : > { %10736 = vmatprep.subr.bf16.mxu0 %v10687_v32  ;;  %10777 = vmatprep.subr.bf16.mxu1 %v10689_v7  ;;  %v10557_v32 = vunpack.c.h.s8.bf16 %v10521_v46  ;;  %v10518_v7 = vld [vmem:[#allocation3] sm:$0xff] }
0x2459   : > { %v10554_v2 = vunpack.c.h.s8.bf16 %v10518_v7  ;;  %v10550_v50 = vunpack.c.l.s8.bf16 %v10518_v7 }
0x245b   : > { %10737 = vmatpush2.bf16.msra.mxu0 %v10686_v25  ;;  %10778 = vmatpush2.bf16.msra.mxu1 %v10688_v48  ;;  %v10556_v25 = vunpack.c.h.s8.bf16 %v10520_v12  ;;  %v10551_v48 = vunpack.c.l.s8.bf16 %v10519_v40  ;;  %v10889_v40 = vld [vmem:[#allocation3 + $0x278] sm:$0xff] }
0x245c   : > { %10738 = vmatprep.subr.bf16.mxu0 %v10683_v49  ;;  %10779 = vmatprep.subr.bf16.mxu1 %v10685_v15  ;;  %v10553_v49 = vunpack.c.l.s8.bf16 %v10521_v46  ;;  %v10547_v15 = vld [vmem:[#allocation3 + $0xe8] sm:$0xff]  ;;  %v10472_v46 = vrot.slane %v17634_v27, 5 }
0x245d   : > { %v10607_v13 = vunpack.c.l.s8.bf16 %v10547_v15 }
0x245f   : > { %10739 = vmatpush2.bf16.msra.mxu0 %v10682_v21  ;;  %10780 = vmatpush2.bf16.msra.mxu1 %v10684_v18  ;;  %v10552_v21 = vunpack.c.l.s8.bf16 %v10520_v12  ;;  %v10611_v18 = vunpack.c.h.s8.bf16 %v10547_v15  ;;  %v10937_v12 = vunpack.c.h.s8.bf16 %v10889_v40 }
0x2460   : > { %10740 = vmatprep.subr.bf16.mxu0 %v10679_v34  ;;  %10781 = vmatprep.subr.bf16.mxu1 %v10681_v16  ;;  %v10548_v34 = vld [vmem:[#allocation3 + $0xf0] sm:$0xff]  ;;  %v10610_v16 = vunpack.c.h.s8.bf16 %v10546_v59 }
0x2461   : > { %v10612_v53 = vunpack.c.h.s8.bf16 %v10548_v34 }
0x2463   : > { %10741 = vmatpush2.bf16.msra.mxu0 %v10678_v17  ;;  %10782 = vmatpush2.bf16.msra.mxu1 %v10680_v8  ;;  %v10543_v17 = vld [vmem:[#allocation3 + $0xc8] sm:$0xff]  ;;  %v10545_v8 = vld [vmem:[#allocation3 + $0xd8] sm:$0xff] }
0x2464   : > { %10792 = vmatprep.subr.bf16.mxu0 %v10579_v14  ;;  %10833 = vmatprep.subr.bf16.mxu1 %v10581_v41  ;;  %v10608_v14 = vunpack.c.l.s8.bf16 %v10548_v34  ;;  %v10603_v41 = vunpack.c.h.s8.bf16 %v10543_v17  ;;  %v10605_v23 = vunpack.c.h.s8.bf16 %v10545_v8 }
0x2466   : > { %10743 = vmatmul.mubr.bf16.vlgmr.msra.gmra.mxu0 %v10512_v1  ;;  %10784 = vmatmul.mubr.bf16.vlgmr.msra.gmra.mxu1 %v10512_v1  ;;  %v10544_v1 = vld [vmem:[#allocation3 + $0xd0] sm:$0xff] }
0x2467   : > { %10793 = vmatpush1.bf16.msra.mxu0 %v10578_v44  ;;  %10834 = vmatpush1.bf16.msra.mxu1 %v10580_v35  ;;  %v10604_v44 = vunpack.c.h.s8.bf16 %v10544_v1  ;;  %v10599_v35 = vunpack.c.l.s8.bf16 %v10543_v17 }
0x2468   : > { %10794 = vmatprep.subr.bf16.mxu0 %v10575_v39  ;;  %10835 = vmatprep.subr.bf16.mxu1 %v10577_v54  ;;  %v10601_v39 = vunpack.c.l.s8.bf16 %v10545_v8  ;;  %v10539_v54 = vld [vmem:[#allocation3 + $0xa8] sm:$0xff] }
0x2469   : > { %10824 = vmatprep.mubr.bf16.mxu0 %v10511_v36  ;;  %10865 = vmatprep.mubr.bf16.mxu1 %v10511_v36  ;;  %v10600_v36 = vunpack.c.l.s8.bf16 %v10544_v1 }
0x246b   : > { %10795 = vmatpush1.bf16.msra.mxu0 %v10574_v57  ;;  %10836 = vmatpush1.bf16.msra.mxu1 %v10576_v11  ;;  %v10595_v57 = vunpack.c.h.s8.bf16 %v10539_v54  ;;  %v10597_v11 = vunpack.c.h.s8.bf16 %v10541_v63 }
0x246c   : > { %10796 = vmatprep.subr.bf16.mxu0 %v10571_v9  ;;  %10837 = vmatprep.subr.bf16.mxu1 %v10573_v51  ;;  %v10538_v9 = vld [vmem:[#allocation3 + $0xa0] sm:$0xff]  ;;  %v10540_v51 = vld [vmem:[#allocation3 + $0xb0] sm:$0xff] }
0x246d   : > { %v10594_v5 = vunpack.c.h.s8.bf16 %v10538_v9  ;;  %v10596_v19 = vunpack.c.h.s8.bf16 %v10540_v51  ;;  %v10590_v42 = vunpack.c.l.s8.bf16 %v10538_v9  ;;  %v10592_v26 = vunpack.c.l.s8.bf16 %v10540_v51 }
0x246f   : > { %10797 = vmatpush1.bf16.msra.mxu0 %v10570_v62  ;;  %10838 = vmatpush1.bf16.msra.mxu1 %v10572_v20  ;;  %v10591_v62 = vunpack.c.l.s8.bf16 %v10539_v54  ;;  %v10593_v20 = vunpack.c.l.s8.bf16 %v10541_v63 }
0x2470   : > { %10798 = vmatprep.subr.bf16.mxu0 %v10567_v6  ;;  %10839 = vmatprep.subr.bf16.mxu1 %v10569_v24  ;;  %v10535_v6 = vld [vmem:[#allocation3 + $0x88] sm:$0xff]  ;;  %v10537_v24 = vld [vmem:[#allocation3 + $0x98] sm:$0xff] }
0x2473   : > { %10799 = vmatpush1.bf16.msra.mxu0 %v10566_v30  ;;  %10840 = vmatpush1.bf16.msra.mxu1 %v10568_v10  ;;  %v10587_v30 = vunpack.c.h.s8.bf16 %v10535_v6  ;;  %v10589_v10 = vunpack.c.h.s8.bf16 %v10537_v24 }
0x2474   : > { %10800 = vmatprep.subr.bf16.mxu0 %v10563_v28  ;;  %10841 = vmatprep.subr.bf16.mxu1 %v10565_v47  ;;  %v10534_v28 = vld [vmem:[#allocation3 + $0x80] sm:$0xff]  ;;  %v10536_v47 = vld [vmem:[#allocation3 + $0x90] sm:$0xff] }
0x2475   : > { %v10586_v56 = vunpack.c.h.s8.bf16 %v10534_v28  ;;  %v10588_v61 = vunpack.c.h.s8.bf16 %v10536_v47 }
0x2477   : > { %10801 = vmatpush1.bf16.msra.mxu0 %v10562_v29  ;;  %10842 = vmatpush1.bf16.msra.mxu1 %v10564_v43  ;;  %v10485_v29 = vrot.slane %v17636_v4, 7  ;;  %v10583_v43 = vunpack.c.l.s8.bf16 %v10535_v6 }
0x2478   : > { %10802 = vmatprep.subr.bf16.mxu0 %v10559_v37  ;;  %10843 = vmatprep.subr.bf16.mxu1 %v10561_v38  ;;  %v10585_v37 = vunpack.c.l.s8.bf16 %v10537_v24  ;;  %v10887_v38 = vld [vmem:[#allocation3 + $0x268] sm:$0xff] }
0x2479   : > { %v10935_v7 = vunpack.c.h.s8.bf16 %v10887_v38 }
0x247b   : > { %10803 = vmatpush1.bf16.msra.mxu0 %v10558_v58  ;;  %10844 = vmatpush1.bf16.msra.mxu1 %v10560_v3  ;;  %v12812_v58 = vrot.slane %v17636_v4, 12  ;;  %v10582_v3 = vunpack.c.l.s8.bf16 %v10534_v28 }
0x247c   : > { %10804 = vmatprep.subr.bf16.mxu0 %v10555_v31  ;;  %10845 = vmatprep.subr.bf16.mxu1 %v10557_v32  ;;  %v10584_v31 = vunpack.c.l.s8.bf16 %v10536_v47  ;;  %v10502_v32 = vsel %vm10501_vm14, %v17634_v27, %v10485_v29 }
0x247f   : > { %10805 = vmatpush1.bf16.msra.mxu0 %v10554_v2  ;;  %10846 = vmatpush1.bf16.msra.mxu1 %v10556_v25  ;;  %v10886_v2 = vld [vmem:[#allocation3 + $0x260] sm:$0xff]  ;;  %v10888_v25 = vld [vmem:[#allocation3 + $0x270] sm:$0xff] }
0x2480   : > { %10806 = vmatprep.subr.bf16.mxu0 %v10551_v48  ;;  %10847 = vmatprep.subr.bf16.mxu1 %v10553_v49  ;;  %v10510_v48 = vpack.c.bf16 %v10502_v32, %v10502_v32  ;;  %v10507_v49 = vsel %vm10501_vm14, %v10472_v46, %v12812_v58  ;;  %v10934_v15 = vunpack.c.h.s8.bf16 %v10886_v2  ;;  %v10936_v60 = vunpack.c.h.s8.bf16 %v10888_v25 }
0x2481   : > { %v10515_v27 = vpack.c.bf16 %v10507_v49, %v10507_v49  ;;  %v10930_v59 = vunpack.c.l.s8.bf16 %v10886_v2  ;;  %v10932_v34 = vunpack.c.l.s8.bf16 %v10888_v25  ;;  %v10898_v25 = vld [vmem:[#allocation3 + $0x2c0] sm:$0xff] }
0x2482   : > { %v10958_v49 = vunpack.c.h.s8.bf16 %v10898_v25 }
0x2483   : > { %10807 = vmatpush1.bf16.msra.mxu0 %v10550_v50  ;;  %10848 = vmatpush1.bf16.msra.mxu1 %v10552_v21  ;;  %v10931_v50 = vunpack.c.l.s8.bf16 %v10887_v38  ;;  %v10933_v21 = vunpack.c.l.s8.bf16 %v10889_v40 }
0x2484   : > { %10808 = vmatprep.subr.bf16.mxu0 %v10611_v18  ;;  %10849 = vmatprep.subr.bf16.mxu1 %v10613_v55  ;;  %v10883_v18 = vld [vmem:[#allocation3 + $0x248] sm:$0xff]  ;;  %v10885_v55 = vld [vmem:[#allocation3 + $0x258] sm:$0xff] }
0x2487   : > { %10809 = vmatpush2.bf16.msra.mxu0 %v10610_v16  ;;  %10850 = vmatpush2.bf16.msra.mxu1 %v10612_v53  ;;  %v10927_v16 = vunpack.c.h.s8.bf16 %v10883_v18  ;;  %v10929_v53 = vunpack.c.h.s8.bf16 %v10885_v55 }
0x2488   : > { %10810 = vmatprep.subr.bf16.mxu0 %v10607_v13  ;;  %10851 = vmatprep.subr.bf16.mxu1 %v10609_v0  ;;  %v10882_v13 = vld [vmem:[#allocation3 + $0x240] sm:$0xff]  ;;  %v10884_v0 = vld [vmem:[#allocation3 + $0x250] sm:$0xff] }
0x2489   : > { %v10926_v17 = vunpack.c.h.s8.bf16 %v10882_v13  ;;  %v10928_v8 = vunpack.c.h.s8.bf16 %v10884_v0  ;;  %v10922_v22 = vunpack.c.l.s8.bf16 %v10882_v13  ;;  %v10924_v1 = vunpack.c.l.s8.bf16 %v10884_v0 }
0x248b   : > { %10811 = vmatpush2.bf16.msra.mxu0 %v10606_v52  ;;  %10852 = vmatpush2.bf16.msra.mxu1 %v10608_v14  ;;  %v10923_v52 = vunpack.c.l.s8.bf16 %v10883_v18  ;;  %v10925_v14 = vunpack.c.l.s8.bf16 %v10885_v55  ;;  %v10897_v18 = vld [vmem:[#allocation3 + $0x2b8] sm:$0xff]  ;;  %v10954_v55 = vunpack.c.l.s8.bf16 %v10898_v25  ;;  %v11061_v25 = vld [vmem:[#allocation3 + $0x328] sm:$0xff] }
0x248c   : > { %10812 = vmatprep.subr.bf16.mxu0 %v10603_v41  ;;  %10853 = vmatprep.subr.bf16.mxu1 %v10605_v23  ;;  %v10879_v41 = vld [vmem:[#allocation3 + $0x228] sm:$0xff]  ;;  %v10881_v23 = vld [vmem:[#allocation3 + $0x238] sm:$0xff] }
0x248f   : > { %10813 = vmatpush2.bf16.msra.mxu0 %v10602_v45  ;;  %10854 = vmatpush2.bf16.msra.mxu1 %v10604_v44  ;;  %v10919_v45 = vunpack.c.h.s8.bf16 %v10879_v41  ;;  %v10921_v44 = vunpack.c.h.s8.bf16 %v10881_v23 }
0x2490   : > { %10814 = vmatprep.subr.bf16.mxu0 %v10599_v35  ;;  %10855 = vmatprep.subr.bf16.mxu1 %v10601_v39  ;;  %v10878_v35 = vld [vmem:[#allocation3 + $0x220] sm:$0xff]  ;;  %v10880_v39 = vld [vmem:[#allocation3 + $0x230] sm:$0xff] }
0x2491   : > { %v10918_v54 = vunpack.c.h.s8.bf16 %v10878_v35  ;;  %v10920_v63 = vunpack.c.h.s8.bf16 %v10880_v39  ;;  %v10914_v9 = vunpack.c.l.s8.bf16 %v10878_v35  ;;  %v10916_v51 = vunpack.c.l.s8.bf16 %v10880_v39 }
0x2493   : > { %10815 = vmatpush2.bf16.msra.mxu0 %v10598_v33  ;;  %10856 = vmatpush2.bf16.msra.mxu1 %v10600_v36  ;;  %v10915_v33 = vunpack.c.l.s8.bf16 %v10879_v41  ;;  %v10917_v36 = vunpack.c.l.s8.bf16 %v10881_v23 }
0x2494   : > { %10816 = vmatprep.subr.bf16.mxu0 %v10595_v57  ;;  %10857 = vmatprep.subr.bf16.mxu1 %v10597_v11  ;;  %v10875_v57 = vld [vmem:[#allocation3 + $0x208] sm:$0xff]  ;;  %v10877_v11 = vld [vmem:[#allocation3 + $0x218] sm:$0xff] }
0x2497   : > { %10817 = vmatpush2.bf16.msra.mxu0 %v10594_v5  ;;  %10858 = vmatpush2.bf16.msra.mxu1 %v10596_v19  ;;  %v10911_v5 = vunpack.c.h.s8.bf16 %v10875_v57  ;;  %v10913_v19 = vunpack.c.h.s8.bf16 %v10877_v11 }
0x2498   : > { %10818 = vmatprep.subr.bf16.mxu0 %v10591_v62  ;;  %10859 = vmatprep.subr.bf16.mxu1 %v10593_v20  ;;  %v10874_v62 = vld [vmem:[#allocation3 + $0x200] sm:$0xff]  ;;  %v10876_v20 = vld [vmem:[#allocation3 + $0x210] sm:$0xff] }
0x2499   : > { %v10910_v6 = vunpack.c.h.s8.bf16 %v10874_v62  ;;  %v10912_v24 = vunpack.c.h.s8.bf16 %v10876_v20  ;;  %v10906_v28 = vunpack.c.l.s8.bf16 %v10874_v62  ;;  %v10908_v47 = vunpack.c.l.s8.bf16 %v10876_v20 }
0x249b   : > { %10819 = vmatpush2.bf16.msra.mxu0 %v10590_v42  ;;  %10860 = vmatpush2.bf16.msra.mxu1 %v10592_v26  ;;  %v10907_v42 = vunpack.c.l.s8.bf16 %v10875_v57  ;;  %v10909_v26 = vunpack.c.l.s8.bf16 %v10877_v11 }
0x249c   : > { %10820 = vmatprep.subr.bf16.mxu0 %v10587_v30  ;;  %10861 = vmatprep.subr.bf16.mxu1 %v10589_v10  ;;  %v10903_v30 = vld [vmem:[#allocation3 + $0x2e8] sm:$0xff]  ;;  %v10905_v10 = vld [vmem:[#allocation3 + $0x2f8] sm:$0xff] }
0x249d   : > { %v10963_v46 = vunpack.c.l.s8.bf16 %v10903_v30  ;;  %v10965_v58 = vunpack.c.l.s8.bf16 %v10905_v10 }
0x249f   : > { %10821 = vmatpush2.bf16.msra.mxu0 %v10586_v56  ;;  %10862 = vmatpush2.bf16.msra.mxu1 %v10588_v61  ;;  %v10967_v56 = vunpack.c.h.s8.bf16 %v10903_v30  ;;  %v10969_v61 = vunpack.c.h.s8.bf16 %v10905_v10  ;;  %v11070_v30 = vld [vmem:[#allocation3 + $0x370] sm:$0xff] }
0x24a0   : > { %10822 = vmatprep.subr.bf16.mxu0 %v10583_v43  ;;  %10863 = vmatprep.subr.bf16.mxu1 %v10585_v37  ;;  %v10902_v43 = vld [vmem:[#allocation3 + $0x2e0] sm:$0xff]  ;;  %v10904_v37 = vld [vmem:[#allocation3 + $0x2f0] sm:$0xff]  ;;  %v11118_v4 = vunpack.c.h.s8.bf16 %v11070_v30 }
0x24a1   : > { %v10966_v38 = vunpack.c.h.s8.bf16 %v10902_v43  ;;  %v10968_v40 = vunpack.c.h.s8.bf16 %v10904_v37  ;;  %v10962_v32 = vunpack.c.l.s8.bf16 %v10902_v43  ;;  %v11067_v43 = vld [vmem:[#allocation3 + $0x358] sm:$0xff] }
0x24a3   : > { %10823 = vmatpush2.bf16.msra.mxu0 %v10582_v3  ;;  %10864 = vmatpush2.bf16.msra.mxu1 %v10584_v31  ;;  %v10899_v3 = vld [vmem:[#allocation3 + $0x2c8] sm:$0xff]  ;;  %v10901_v31 = vld [vmem:[#allocation3 + $0x2d8] sm:$0xff] }
0x24a4   : > { %10970 = vmatprep.subr.bf16.mxu0 %v10935_v7  ;;  %11011 = vmatprep.subr.bf16.mxu1 %v10937_v12  ;;  %v10964_v7 = vunpack.c.l.s8.bf16 %v10904_v37  ;;  %v10959_v12 = vunpack.c.h.s8.bf16 %v10899_v3  ;;  %v10961_v2 = vunpack.c.h.s8.bf16 %v10901_v31 }
0x24a6   : > { %10825 = vmatmul.mubr.bf16.vlgmr.msra.gmra.mxu0 %v10510_v48  ;;  %10866 = vmatmul.mubr.bf16.vlgmr.msra.gmra.mxu1 %v10510_v48  ;;  %v10900_v48 = vld [vmem:[#allocation3 + $0x2d0] sm:$0xff] }
0x24a7   : > { %10971 = vmatpush1.bf16.msra.mxu0 %v10934_v15  ;;  %11012 = vmatpush1.bf16.msra.mxu1 %v10936_v60  ;;  %v10960_v15 = vunpack.c.h.s8.bf16 %v10900_v48  ;;  %v10955_v60 = vunpack.c.l.s8.bf16 %v10899_v3  ;;  %v11064_v3 = vld [vmem:[#allocation3 + $0x340] sm:$0xff] }
0x24a8   : > { %10972 = vmatprep.subr.bf16.mxu0 %v10931_v50  ;;  %11013 = vmatprep.subr.bf16.mxu1 %v10933_v21  ;;  %v10957_v50 = vunpack.c.l.s8.bf16 %v10901_v31  ;;  %v10895_v21 = vld [vmem:[#allocation3 + $0x2a8] sm:$0xff]  ;;  %v11066_v31 = vld [vmem:[#allocation3 + $0x350] sm:$0xff] }
0x24a9   : > { %11002 = vmatprep.mubr.bf16.mxu0 %v10515_v27  ;;  %11043 = vmatprep.mubr.bf16.mxu1 %v10515_v27  ;;  %v10956_v27 = vunpack.c.l.s8.bf16 %v10900_v48  ;;  %v11063_v48 = vld [vmem:[#allocation3 + $0x338] sm:$0xff] }
0x24ab   : > { %10973 = vmatpush1.bf16.msra.mxu0 %v10930_v59  ;;  %11014 = vmatpush1.bf16.msra.mxu1 %v10932_v34  ;;  %v10951_v59 = vunpack.c.h.s8.bf16 %v10895_v21  ;;  %v10953_v34 = vunpack.c.h.s8.bf16 %v10897_v18 }
0x24ac   : > { %10974 = vmatprep.subr.bf16.mxu0 %v10927_v16  ;;  %11015 = vmatprep.subr.bf16.mxu1 %v10929_v53  ;;  %v10894_v16 = vld [vmem:[#allocation3 + $0x2a0] sm:$0xff]  ;;  %v10896_v53 = vld [vmem:[#allocation3 + $0x2b0] sm:$0xff] }
0x24ad   : > { %v10950_v13 = vunpack.c.h.s8.bf16 %v10894_v16  ;;  %v10952_v0 = vunpack.c.h.s8.bf16 %v10896_v53  ;;  %v10946_v41 = vunpack.c.l.s8.bf16 %v10894_v16  ;;  %v10948_v23 = vunpack.c.l.s8.bf16 %v10896_v53  ;;  %v11057_v16 = vld [vmem:[#allocation3 + $0x308] sm:$0xff]  ;;  %v11059_v53 = vld [vmem:[#allocation3 + $0x318] sm:$0xff] }
0x24af   : > { %10975 = vmatpush1.bf16.msra.mxu0 %v10926_v17  ;;  %11016 = vmatpush1.bf16.msra.mxu1 %v10928_v8  ;;  %v10947_v17 = vunpack.c.l.s8.bf16 %v10895_v21  ;;  %v10949_v8 = vunpack.c.l.s8.bf16 %v10897_v18  ;;  %v11060_v21 = vld [vmem:[#allocation3 + $0x320] sm:$0xff]  ;;  %v11062_v18 = vld [vmem:[#allocation3 + $0x330] sm:$0xff] }
0x24b0   : > { %10976 = vmatprep.subr.bf16.mxu0 %v10923_v52  ;;  %11017 = vmatprep.subr.bf16.mxu1 %v10925_v14  ;;  %v10891_v52 = vld [vmem:[#allocation3 + $0x288] sm:$0xff]  ;;  %v10893_v14 = vld [vmem:[#allocation3 + $0x298] sm:$0xff] }
0x24b1   : > { %v10939_v57 = vunpack.c.l.s8.bf16 %v10891_v52  ;;  %v10941_v11 = vunpack.c.l.s8.bf16 %v10893_v14 }
0x24b3   : > { %10977 = vmatpush1.bf16.msra.mxu0 %v10922_v22  ;;  %11018 = vmatpush1.bf16.msra.mxu1 %v10924_v1  ;;  %v10943_v22 = vunpack.c.h.s8.bf16 %v10891_v52  ;;  %v10945_v1 = vunpack.c.h.s8.bf16 %v10893_v14  ;;  %v11056_v52 = vld [vmem:[#allocation3 + $0x300] sm:$0xff]  ;;  %v11058_v14 = vld [vmem:[#allocation3 + $0x310] sm:$0xff] }
0x24b4   : > { %10978 = vmatprep.subr.bf16.mxu0 %v10919_v45  ;;  %11019 = vmatprep.subr.bf16.mxu1 %v10921_v44  ;;  %v10890_v45 = vld [vmem:[#allocation3 + $0x280] sm:$0xff]  ;;  %v10892_v44 = vld [vmem:[#allocation3 + $0x290] sm:$0xff] }
0x24b5   : > { %v10942_v35 = vunpack.c.h.s8.bf16 %v10890_v45  ;;  %v10944_v39 = vunpack.c.h.s8.bf16 %v10892_v44  ;;  %v10938_v62 = vunpack.c.l.s8.bf16 %v10890_v45  ;;  %v10940_v20 = vunpack.c.l.s8.bf16 %v10892_v44  ;;  %v11085_v45 = vld [vmem:[#allocation3 + $0x3e8] sm:$0xff]  ;;  %v11087_v44 = vld [vmem:[#allocation3 + $0x3f8] sm:$0xff] }
0x24b7   : > { %10979 = vmatpush1.bf16.msra.mxu0 %v10918_v54  ;;  %11020 = vmatpush1.bf16.msra.mxu1 %v10920_v63  ;;  %v17655_v54 = vld [vmem:[#allocation2] sm:$0xff] }
0x24b8   : > { %10980 = vmatprep.subr.bf16.mxu0 %v10915_v33  ;;  %11021 = vmatprep.subr.bf16.mxu1 %v10917_v36  ;;  %v10470_v63 = vrot.slane %v17655_v54, 4  ;;  %v17658_v33 = vld [vmem:[#allocation2 + $0x8] sm:$0xff] }
0x24b9   : > { %v12811_v36 = vrot.slane %v17658_v33, 11 }
0x24bb   : > { %10981 = vmatpush1.bf16.msra.mxu0 %v10914_v9  ;;  %11022 = vmatpush1.bf16.msra.mxu1 %v10916_v51  ;;  %v11069_v9 = vld [vmem:[#allocation3 + $0x368] sm:$0xff]  ;;  %v11071_v51 = vld [vmem:[#allocation3 + $0x378] sm:$0xff] }
0x24bc   : > { %10982 = vmatprep.subr.bf16.mxu0 %v10911_v5  ;;  %11023 = vmatprep.subr.bf16.mxu1 %v10913_v19  ;;  %v10476_v5 = vrot.slane %v17655_v54, 7  ;;  %v10492_v19 = vrot.slane %v10485_v29, 7  ;;  %v11113_v29 = vunpack.c.l.s8.bf16 %v11069_v9 }
0x24bf   : > { %10983 = vmatpush1.bf16.msra.mxu0 %v10910_v6  ;;  %11024 = vmatpush1.bf16.msra.mxu1 %v10912_v24  ;;  %v10506_v6 = vsel %vm10501_vm14, %v10470_v63, %v12811_v36  ;;  %v11117_v24 = vunpack.c.h.s8.bf16 %v11069_v9  ;;  %v11149_v63 = vunpack.c.h.s8.bf16 %v11085_v45  ;;  %v11151_v36 = vunpack.c.h.s8.bf16 %v11087_v44 }
0x24c0   : > { %10984 = vmatprep.subr.bf16.mxu0 %v10907_v42  ;;  %11025 = vmatprep.subr.bf16.mxu1 %v10909_v26  ;;  %v11119_v42 = vunpack.c.h.s8.bf16 %v11071_v51  ;;  %v11068_v26 = vld [vmem:[#allocation3 + $0x360] sm:$0xff]  ;;  %v10514_v10 = vpack.c.bf16 %v10506_v6, %v10506_v6 }
0x24c3   : > { %10985 = vmatpush1.bf16.msra.mxu0 %v10906_v28  ;;  %11026 = vmatpush1.bf16.msra.mxu1 %v10908_v47  ;;  %v10509_v28 = vsel %vm10501_vm14, %v10476_v5, %v10492_v19  ;;  %v11116_v47 = vunpack.c.h.s8.bf16 %v11068_v26  ;;  %v11145_v5 = vunpack.c.l.s8.bf16 %v11085_v45  ;;  %v11147_v19 = vunpack.c.l.s8.bf16 %v11087_v44  ;;  %v14980_v45 = vld [vmem:[#allocation37 + $0x38] sm:$0xff]  }
0x24c4   : > { %10986 = vmatprep.subr.bf16.mxu0 %v10967_v56  ;;  %11027 = vmatprep.subr.bf16.mxu1 %v10969_v61  ;;  %v11115_v56 = vunpack.c.l.s8.bf16 %v11071_v51  ;;  %v11065_v61 = vld [vmem:[#allocation3 + $0x348] sm:$0xff]  ;;  %v10517_v37 = vpack.c.bf16 %v10509_v28, %v10509_v28  ;;  %v14981_v44 = vld [vmem:[#allocation37 + $0xb8] sm:$0xff]  }
0x24c7   : > { %10987 = vmatpush2.bf16.msra.mxu0 %v10966_v38  ;;  %11028 = vmatpush2.bf16.msra.mxu1 %v10968_v40  ;;  %v11112_v38 = vunpack.c.l.s8.bf16 %v11068_v26  ;;  %v11114_v40 = vunpack.c.l.s8.bf16 %v11070_v30  ;;  %v11080_v30 = vld [vmem:[#allocation3 + $0x3c0] sm:$0xff] }
0x24c8   : > { %10988 = vmatprep.subr.bf16.mxu0 %v10963_v46  ;;  %11029 = vmatprep.subr.bf16.mxu1 %v10965_v58  ;;  %v11109_v46 = vunpack.c.h.s8.bf16 %v11065_v61  ;;  %v11111_v58 = vunpack.c.h.s8.bf16 %v11067_v43  ;;  %v11140_v28 = vunpack.c.h.s8.bf16 %v11080_v30 }
0x24cb   : > { %10989 = vmatpush2.bf16.msra.mxu0 %v10962_v32  ;;  %11030 = vmatpush2.bf16.msra.mxu1 %v10964_v7  ;;  %v11108_v32 = vunpack.c.h.s8.bf16 %v11064_v3  ;;  %v11110_v7 = vunpack.c.h.s8.bf16 %v11066_v31 }
0x24cc   : > { %10990 = vmatprep.subr.bf16.mxu0 %v10959_v12  ;;  %11031 = vmatprep.subr.bf16.mxu1 %v10961_v2  ;;  %v11105_v12 = vunpack.c.l.s8.bf16 %v11065_v61  ;;  %v11107_v2 = vunpack.c.l.s8.bf16 %v11067_v43  ;;  %v11079_v61 = vld [vmem:[#allocation3 + $0x3b8] sm:$0xff]  ;;  %v11136_v43 = vunpack.c.l.s8.bf16 %v11080_v30 }
0x24cf   : > { %10991 = vmatpush2.bf16.msra.mxu0 %v10958_v49  ;;  %11032 = vmatpush2.bf16.msra.mxu1 %v10960_v15  ;;  %v11104_v49 = vunpack.c.l.s8.bf16 %v11064_v3  ;;  %v11106_v15 = vunpack.c.l.s8.bf16 %v11066_v31 }
0x24d0   : > { %10992 = vmatprep.subr.bf16.mxu0 %v10955_v60  ;;  %11033 = vmatprep.subr.bf16.mxu1 %v10957_v50  ;;  %v11101_v60 = vunpack.c.h.s8.bf16 %v11061_v25  ;;  %v11103_v50 = vunpack.c.h.s8.bf16 %v11063_v48 }
0x24d3   : > { %10993 = vmatpush2.bf16.msra.mxu0 %v10954_v55  ;;  %11034 = vmatpush2.bf16.msra.mxu1 %v10956_v27  ;;  %v11100_v55 = vunpack.c.h.s8.bf16 %v11060_v21  ;;  %v11102_v27 = vunpack.c.h.s8.bf16 %v11062_v18 }
0x24d4   : > { %10994 = vmatprep.subr.bf16.mxu0 %v10951_v59  ;;  %11035 = vmatprep.subr.bf16.mxu1 %v10953_v34  ;;  %v11097_v59 = vunpack.c.l.s8.bf16 %v11061_v25  ;;  %v11099_v34 = vunpack.c.l.s8.bf16 %v11063_v48 }
0x24d7   : > { %10995 = vmatpush2.bf16.msra.mxu0 %v10950_v13  ;;  %11036 = vmatpush2.bf16.msra.mxu1 %v10952_v0  ;;  %v11096_v13 = vunpack.c.l.s8.bf16 %v11060_v21  ;;  %v11098_v0 = vunpack.c.l.s8.bf16 %v11062_v18 }
0x24d8   : > { %10996 = vmatprep.subr.bf16.mxu0 %v10947_v17  ;;  %11037 = vmatprep.subr.bf16.mxu1 %v10949_v8  ;;  %v11093_v17 = vunpack.c.h.s8.bf16 %v11057_v16  ;;  %v11095_v8 = vunpack.c.h.s8.bf16 %v11059_v53 }
0x24db   : > { %10997 = vmatpush2.bf16.msra.mxu0 %v10946_v41  ;;  %11038 = vmatpush2.bf16.msra.mxu1 %v10948_v23  ;;  %v11092_v41 = vunpack.c.h.s8.bf16 %v11056_v52  ;;  %v11094_v23 = vunpack.c.h.s8.bf16 %v11058_v14 }
0x24dc   : > { %10998 = vmatprep.subr.bf16.mxu0 %v10943_v22  ;;  %11039 = vmatprep.subr.bf16.mxu1 %v10945_v1  ;;  %v11089_v22 = vunpack.c.l.s8.bf16 %v11057_v16  ;;  %v11091_v1 = vunpack.c.l.s8.bf16 %v11059_v53 }
0x24df   : > { %10999 = vmatpush2.bf16.msra.mxu0 %v10942_v35  ;;  %11040 = vmatpush2.bf16.msra.mxu1 %v10944_v39  ;;  %v11088_v35 = vunpack.c.l.s8.bf16 %v11056_v52  ;;  %v11090_v39 = vunpack.c.l.s8.bf16 %v11058_v14 }
0x24e0   : > { %11000 = vmatprep.subr.bf16.mxu0 %v10939_v57  ;;  %11041 = vmatprep.subr.bf16.mxu1 %v10941_v11  ;;  %v11084_v57 = vld [vmem:[#allocation3 + $0x3e0] sm:$0xff]  ;;  %v11086_v11 = vld [vmem:[#allocation3 + $0x3f0] sm:$0xff] }
0x24e1   : > { %v11148_v9 = vunpack.c.h.s8.bf16 %v11084_v57  ;;  %v11150_v51 = vunpack.c.h.s8.bf16 %v11086_v11  ;;  %v11144_v6 = vunpack.c.l.s8.bf16 %v11084_v57  ;;  %v14986_v57 = vld [vmem:[#allocation37 + $0x68] sm:$0xff]  }
0x24e3   : > { %11001 = vmatpush2.bf16.msra.mxu0 %v10938_v62  ;;  %11042 = vmatpush2.bf16.msra.mxu1 %v10940_v20  ;;  %v11081_v62 = vld [vmem:[#allocation3 + $0x3c8] sm:$0xff]  ;;  %v11083_v20 = vld [vmem:[#allocation3 + $0x3d8] sm:$0xff] }
0x24e4   : > { %11152 = vmatprep.subr.bf16.mxu0 %v11117_v24  ;;  %11193 = vmatprep.subr.bf16.mxu1 %v11119_v42  ;;  %v11146_v24 = vunpack.c.l.s8.bf16 %v11086_v11  ;;  %v11141_v42 = vunpack.c.h.s8.bf16 %v11081_v62  ;;  %v11143_v26 = vunpack.c.h.s8.bf16 %v11083_v20  ;;  %v14987_v11 = vld [vmem:[#allocation37 + $0xe8] sm:$0xff]  }
0x24e6   : > { %11003 = vmatmul.mubr.bf16.vlgmr.msra.gmra.mxu0 %v10514_v10  ;;  %11044 = vmatmul.mubr.bf16.vlgmr.msra.gmra.mxu1 %v10514_v10  ;;  %v11082_v10 = vld [vmem:[#allocation3 + $0x3d0] sm:$0xff] }
0x24e7   : > { %11153 = vmatpush1.bf16.msra.mxu0 %v11116_v47  ;;  %11194 = vmatpush1.bf16.msra.mxu1 %v11118_v4  ;;  %v11142_v47 = vunpack.c.h.s8.bf16 %v11082_v10  ;;  %v11137_v4 = vunpack.c.l.s8.bf16 %v11081_v62  ;;  %v14992_v62 = vld [vmem:[#allocation37 + $0x20] sm:$0xff]  }
0x24e8   : > { %11154 = vmatprep.subr.bf16.mxu0 %v11113_v29  ;;  %11195 = vmatprep.subr.bf16.mxu1 %v11115_v56  ;;  %v11139_v29 = vunpack.c.l.s8.bf16 %v11083_v20  ;;  %v11077_v56 = vld [vmem:[#allocation3 + $0x3a8] sm:$0xff]  ;;  %v14993_v20 = vld [vmem:[#allocation37 + $0xa0] sm:$0xff]  }
0x24e9   : > { %11184 = vmatprep.mubr.bf16.mxu0 %v10517_v37  ;;  %11225 = vmatprep.mubr.bf16.mxu1 %v10517_v37  ;;  %v11138_v37 = vunpack.c.l.s8.bf16 %v11082_v10 }
0x24eb   : > { %11155 = vmatpush1.bf16.msra.mxu0 %v11112_v38  ;;  %11196 = vmatpush1.bf16.msra.mxu1 %v11114_v40  ;;  %v11133_v38 = vunpack.c.h.s8.bf16 %v11077_v56  ;;  %v11135_v40 = vunpack.c.h.s8.bf16 %v11079_v61 }
0x24ec   : > { %11156 = vmatprep.subr.bf16.mxu0 %v11109_v46  ;;  %11197 = vmatprep.subr.bf16.mxu1 %v11111_v58  ;;  %v11076_v46 = vld [vmem:[#allocation3 + $0x3a0] sm:$0xff]  ;;  %v11078_v58 = vld [vmem:[#allocation3 + $0x3b0] sm:$0xff] }
0x24ed   : > { %v11132_v3 = vunpack.c.h.s8.bf16 %v11076_v46  ;;  %v11134_v31 = vunpack.c.h.s8.bf16 %v11078_v58  ;;  %v11128_v25 = vunpack.c.l.s8.bf16 %v11076_v46  ;;  %v11130_v48 = vunpack.c.l.s8.bf16 %v11078_v58 }
0x24ef   : > { %11157 = vmatpush1.bf16.msra.mxu0 %v11108_v32  ;;  %11198 = vmatpush1.bf16.msra.mxu1 %v11110_v7  ;;  %v11129_v32 = vunpack.c.l.s8.bf16 %v11077_v56  ;;  %v11131_v7 = vunpack.c.l.s8.bf16 %v11079_v61  ;;  %v15000_v56 = vld [vmem:[#allocation37 + $0x10] sm:$0xff]  }
0x24f0   : > { %11158 = vmatprep.subr.bf16.mxu0 %v11105_v12  ;;  %11199 = vmatprep.subr.bf16.mxu1 %v11107_v2  ;;  %v11073_v12 = vld [vmem:[#allocation3 + $0x388] sm:$0xff]  ;;  %v11075_v2 = vld [vmem:[#allocation3 + $0x398] sm:$0xff] }
0x24f1   : > { %v15001_v61 = vld [vmem:[#allocation37 + $0x90] sm:$0xff]  }
0x24f3   : > { %11159 = vmatpush1.bf16.msra.mxu0 %v11104_v49  ;;  %11200 = vmatpush1.bf16.msra.mxu1 %v11106_v15  ;;  %v11125_v49 = vunpack.c.h.s8.bf16 %v11073_v12  ;;  %v11127_v15 = vunpack.c.h.s8.bf16 %v11075_v2 }
0x24f4   : > { %11160 = vmatprep.subr.bf16.mxu0 %v11101_v60  ;;  %11201 = vmatprep.subr.bf16.mxu1 %v11103_v50  ;;  %v11072_v60 = vld [vmem:[#allocation3 + $0x380] sm:$0xff]  ;;  %v11074_v50 = vld [vmem:[#allocation3 + $0x390] sm:$0xff] }
0x24f5   : > { %v11124_v21 = vunpack.c.h.s8.bf16 %v11072_v60  ;;  %v11126_v18 = vunpack.c.h.s8.bf16 %v11074_v50  ;;  %v11120_v16 = vunpack.c.l.s8.bf16 %v11072_v60  ;;  %v11122_v53 = vunpack.c.l.s8.bf16 %v11074_v50 }
0x24f6   : > { %v15890_v60 = vmov 0.0  }
0x24f7   : > { %11161 = vmatpush1.bf16.msra.mxu0 %v11100_v55  ;;  %11202 = vmatpush1.bf16.msra.mxu1 %v11102_v27  ;;  %v10474_v55 = vrot.slane %v17655_v54, 6  ;;  %v12813_v27 = vrot.slane %v17658_v33, 13 }
0x24f8   : > { %11162 = vmatprep.subr.bf16.mxu0 %v11097_v59  ;;  %11203 = vmatprep.subr.bf16.mxu1 %v11099_v34  ;;  %v11121_v59 = vunpack.c.l.s8.bf16 %v11073_v12  ;;  %v11123_v34 = vunpack.c.l.s8.bf16 %v11075_v2 }
0x24fb   : > { %11163 = vmatpush1.bf16.msra.mxu0 %v11096_v13  ;;  %11204 = vmatpush1.bf16.msra.mxu1 %v11098_v0  ;;  %v10508_v13 = vsel %vm10501_vm14, %v10474_v55, %v12813_v27 }
0x24fc   : > { %11164 = vmatprep.subr.bf16.mxu0 %v11093_v17  ;;  %11205 = vmatprep.subr.bf16.mxu1 %v11095_v8  ;;  %v10516_v0 = vpack.c.bf16 %v10508_v13, %v10508_v13 }
0x24ff   : > { %11165 = vmatpush1.bf16.msra.mxu0 %v11092_v41  ;;  %11206 = vmatpush1.bf16.msra.mxu1 %v11094_v23 }
0x2500   : > { %11166 = vmatprep.subr.bf16.mxu0 %v11089_v22  ;;  %11207 = vmatprep.subr.bf16.mxu1 %v11091_v1  ;;  %v14978_v22 = vld [vmem:[#allocation37 + $0x78] sm:$0xff]  }
0x2501   : > { %v14979_v1 = vld [vmem:[#allocation37 + $0xf8] sm:$0xff]  }
0x2503   : > { %11167 = vmatpush1.bf16.msra.mxu0 %v11088_v35  ;;  %11208 = vmatpush1.bf16.msra.mxu1 %v11090_v39  ;;  %v14982_v35 = vld [vmem:[#allocation37 + $0x70] sm:$0xff]  }
0x2504   : > { %11168 = vmatprep.subr.bf16.mxu0 %v11149_v63  ;;  %11209 = vmatprep.subr.bf16.mxu1 %v11151_v36  ;;  %v14983_v39 = vld [vmem:[#allocation37 + $0xf0] sm:$0xff]  }
0x2505   : > { %v14984_v63 = vld [vmem:[#allocation37 + $0x30] sm:$0xff]  }
0x2506   : > { %v14985_v36 = vld [vmem:[#allocation37 + $0xb0] sm:$0xff]  }
0x2507   : > { %11169 = vmatpush2.bf16.msra.mxu0 %v11148_v9  ;;  %11210 = vmatpush2.bf16.msra.mxu1 %v11150_v51  ;;  %v14988_v9 = vld [vmem:[#allocation37 + $0x28] sm:$0xff]  }
0x2508   : > { %11170 = vmatprep.subr.bf16.mxu0 %v11145_v5  ;;  %11211 = vmatprep.subr.bf16.mxu1 %v11147_v19  ;;  %v14989_v51 = vld [vmem:[#allocation37 + $0xa8] sm:$0xff]   ;;  %v14990_v5 = vld [vmem:[#allocation37 + $0x60] sm:$0xff]  }
0x2509   : > { %v14991_v19 = vld [vmem:[#allocation37 + $0xe0] sm:$0xff]  }
0x250b   : > { %11171 = vmatpush2.bf16.msra.mxu0 %v11144_v6  ;;  %11212 = vmatpush2.bf16.msra.mxu1 %v11146_v24  ;;  %v14994_v6 = vld [vmem:[#allocation37 + $0x58] sm:$0xff]  }
0x250c   : > { %11172 = vmatprep.subr.bf16.mxu0 %v11141_v42  ;;  %11213 = vmatprep.subr.bf16.mxu1 %v11143_v26  ;;  %v14995_v24 = vld [vmem:[#allocation37 + $0xd8] sm:$0xff]  }
0x250d   : > { %v14996_v42 = vld [vmem:[#allocation37 + $0x18] sm:$0xff]  }
0x250e   : > { %v14997_v26 = vld [vmem:[#allocation37 + $0x98] sm:$0xff]  }
0x250f   : > { %11173 = vmatpush2.bf16.msra.mxu0 %v11140_v28  ;;  %11214 = vmatpush2.bf16.msra.mxu1 %v11142_v47  ;;  %v14998_v28 = vld [vmem:[#allocation37 + $0x50] sm:$0xff]  }
0x2510   : > { %11174 = vmatprep.subr.bf16.mxu0 %v11137_v4  ;;  %11215 = vmatprep.subr.bf16.mxu1 %v11139_v29  ;;  %v14999_v47 = vld [vmem:[#allocation37 + $0xd0] sm:$0xff]  }
0x2513   : > { %11175 = vmatpush2.bf16.msra.mxu0 %v11136_v43  ;;  %11216 = vmatpush2.bf16.msra.mxu1 %v11138_v37 }
0x2514   : > { %11176 = vmatprep.subr.bf16.mxu0 %v11133_v38  ;;  %11217 = vmatprep.subr.bf16.mxu1 %v11135_v40 }
0x2517   : > { %11177 = vmatpush2.bf16.msra.mxu0 %v11132_v3  ;;  %11218 = vmatpush2.bf16.msra.mxu1 %v11134_v31  ;;  %v15002_v3 = vld [vmem:[#allocation37 + $0x48] sm:$0xff]  }
0x2518   : > { %11178 = vmatprep.subr.bf16.mxu0 %v11129_v32  ;;  %11219 = vmatprep.subr.bf16.mxu1 %v11131_v7  ;;  %v15003_v31 = vld [vmem:[#allocation37 + $0xc8] sm:$0xff]  }
0x2519   : > { %v15004_v32 = vld [vmem:[#allocation37 + $0x8] sm:$0xff]  }
0x251a   : > { %v15005_v7 = vld [vmem:[#allocation37 + $0x88] sm:$0xff]  }
0x251b   : > { %11179 = vmatpush2.bf16.msra.mxu0 %v11128_v25  ;;  %11220 = vmatpush2.bf16.msra.mxu1 %v11130_v48  ;;  %v15006_v25 = vld [vmem:[#allocation37 + $0x40] sm:$0xff]  }
0x251c   : > { %11180 = vmatprep.subr.bf16.mxu0 %v11125_v49  ;;  %11221 = vmatprep.subr.bf16.mxu1 %v11127_v15  ;;  %v15007_v48 = vld [vmem:[#allocation37 + $0xc0] sm:$0xff]  }
0x251d   : > { %v15008_v49 = vld [vmem:[#allocation37] sm:$0xff]  }
0x251e   : > { %v15009_v15 = vld [vmem:[#allocation37 + $0x80] sm:$0xff]  }
0x251f   : > { %11181 = vmatpush2.bf16.msra.mxu0 %v11124_v21  ;;  %11222 = vmatpush2.bf16.msra.mxu1 %v11126_v18 }
0x2520   : > { %11182 = vmatprep.subr.bf16.mxu0 %v11121_v59  ;;  %11223 = vmatprep.subr.bf16.mxu1 %v11123_v34 }
0x2523   : > { %11183 = vmatpush2.bf16.msra.mxu0 %v11120_v16  ;;  %11224 = vmatpush2.bf16.msra.mxu1 %v11122_v53 }
0x2524   : > { %13475 = vmatprep.subr.bf16.mxu0 %v14978_v22  ;;  %13497 = vmatprep.subr.bf16.mxu1 %v14979_v1 }
0x2526   : > { %v10744_v17 = vpop.f32.mrf.mxu0  ;;  %v10785_v8 = vpop.f32.mrf.mxu1  ;;  %11185 = vmatmul.mubr.bf16.vlgmr.msra.gmra.mxu0 %v10516_v0  ;;  %11226 = vmatmul.mubr.bf16.vlgmr.msra.gmra.mxu1 %v10516_v0  ;;  %v11240_v0 = vlaneseq }
0x2527   : > { %13476 = vmatpush3.bf16.msra.mxu0 %v14980_v45  ;;  %13498 = vmatpush3.bf16.msra.mxu1 %v14981_v44 }
0x2528   : > { %v10746_v54 = vpop.f32.mrf.mxu0  ;;  %v10787_v33 = vpop.f32.mrf.mxu1  ;;  %13477 = vmatprep.subr.bf16.mxu0 %v14982_v35  ;;  %13499 = vmatprep.subr.bf16.mxu1 %v14983_v39 }
0x252a   : > { %v10748_v52 = vpop.f32.mrf.mxu0  ;;  %v10789_v14 = vpop.f32.mrf.mxu1 }
0x252b   : > { %13478 = vmatpush3.bf16.msra.mxu0 %v14984_v63  ;;  %13500 = vmatpush3.bf16.msra.mxu1 %v14985_v36 }
0x252c   : > { %v10749_v41 = vpop.f32.mrf.mxu0  ;;  %v10790_v23 = vpop.f32.mrf.mxu1  ;;  %13479 = vmatprep.subr.bf16.mxu0 %v14986_v57  ;;  %13501 = vmatprep.subr.bf16.mxu1 %v14987_v11 }
0x252d   : > { %v11264_v41 = vld [vmem:[%s17873_s0] sm:$0xf] }
0x252f   : > { %13480 = vmatpush3.bf16.msra.mxu0 %v14988_v9  ;;  %13502 = vmatpush3.bf16.msra.mxu1 %v14989_v51 }
0x2530   : > { %13481 = vmatprep.subr.bf16.mxu0 %v14990_v5  ;;  %13503 = vmatprep.subr.bf16.mxu1 %v14991_v19 }
0x2533   : > { %13482 = vmatpush3.bf16.msra.mxu0 %v14992_v62  ;;  %13504 = vmatpush3.bf16.msra.mxu1 %v14993_v20 }
0x2534   : > { %13483 = vmatprep.subr.bf16.mxu0 %v14994_v6  ;;  %13505 = vmatprep.subr.bf16.mxu1 %v14995_v24 }
0x2537   : > { %13484 = vmatpush3.bf16.msra.mxu0 %v14996_v42  ;;  %13506 = vmatpush3.bf16.msra.mxu1 %v14997_v26 }
0x2538   : > { %13485 = vmatprep.subr.bf16.mxu0 %v14998_v28  ;;  %13507 = vmatprep.subr.bf16.mxu1 %v14999_v47 }
0x253b   : > { %13486 = vmatpush3.bf16.msra.mxu0 %v15000_v56  ;;  %13508 = vmatpush3.bf16.msra.mxu1 %v15001_v61 }
0x253c   : > { %13487 = vmatprep.subr.bf16.mxu0 %v15002_v3  ;;  %13509 = vmatprep.subr.bf16.mxu1 %v15003_v31 }
0x253f   : > { %13488 = vmatpush3.bf16.msra.mxu0 %v15004_v32  ;;  %13510 = vmatpush3.bf16.msra.mxu1 %v15005_v7  ;;  %v11657_v7 = vld [vmem:[#allocation38 + $0x78] sm:$0xff] }
0x2540   : > { %13489 = vmatprep.subr.bf16.mxu0 %v15006_v25  ;;  %13511 = vmatprep.subr.bf16.mxu1 %v15007_v48  ;;  %v11654_v25 = vld [vmem:[#allocation38 + $0x60] sm:$0xff]  ;;  %v11653_v48 = vld [vmem:[#allocation38 + $0x58] sm:$0xff] }
0x2543   : > { %13490 = vmatpush3.bf16.msra.mxu0 %v15008_v49  ;;  %13512 = vmatpush3.bf16.msra.mxu1 %v15009_v15  ;;  %v11652_v49 = vld [vmem:[#allocation38 + $0x50] sm:$0xff]  ;;  %v11651_v15 = vld [vmem:[#allocation38 + $0x48] sm:$0xff] }
0x2544   : > { %14336 = vmatprep.subr.mxu0 %v15890_v60 }
0x2566   : > { %v10826_v30 = vpop.f32.mrf.mxu0  ;;  %v10867_v10 = vpop.f32.mrf.mxu1 }
0x2567   : > { %v10827_v4 = vadd.f32 %v10826_v30, %v10744_v17  ;;  %v10868_v29 = vadd.f32 %v10867_v10, %v10785_v8  ;;  %v11241_v17 = vshrl.u32 %v11240_v0, 7 }
0x2568   : > { %v10828_v43 = vpop.f32.mrf.mxu0  ;;  %v10869_v37 = vpop.f32.mrf.mxu1 }
0x2569   : > { %v10829_v38 = vadd.f32 %v10828_v43, %v10746_v54  ;;  %v10870_v40 = vadd.f32 %v10869_v37, %v10787_v33  ;;  %v11242_v8 = vsub.s32 0, %v11241_v17  ;;  %v11250_v54 = vsub.s32 2, %v11241_v17  ;;  %v11238_v33 = vld [vmem:[%s17872_s3] sm:$0xf] }
0x256a   : > { %v10830_v46 = vpop.f32.mrf.mxu0  ;;  %v10871_v58 = vpop.f32.mrf.mxu1  ;;  %v11246_v52 = vsub.s32 1, %v11241_v17  ;;  %v11254_v14 = vsub.s32 3, %v11241_v17  ;;  %v12814_v17 = vld [vmem:[%s17874_s22] ss:$0 sm:$0xff] }
0x256b   : > { %v11243_v23 = vrot.slane %v11238_v33, %v11242_v8  ;;  %v11251_v22 = vrot.slane %v11238_v33, %v11250_v54  ;;  %v11269_v45 = vrot.slane %v11264_v41, %v11242_v8  ;;  %v11277_v35 = vrot.slane %v11264_v41, %v11250_v54 }
0x256c   : > { %v10831_v12 = vpop.f32.mrf.mxu0  ;;  %v10872_v2 = vpop.f32.mrf.mxu1  ;;  %v11247_v39 = vrot.slane %v11238_v33, %v11246_v52  ;;  %v11255_v63 = vrot.slane %v11238_v33, %v11254_v14  ;;  %v11273_v5 = vrot.slane %v11264_v41, %v11246_v52  ;;  %v11281_v62 = vrot.slane %v11264_v41, %v11254_v14 }
0x256d   : > { %v11656_v12 = vld [vmem:[#allocation38 + $0x70] sm:$0xff]  ;;  %v11655_v2 = vld [vmem:[#allocation38 + $0x68] sm:$0xff] }
0x25a6   : > { %v11004_v50 = vpop.f32.mrf.mxu0  ;;  %v11045_v21 = vpop.f32.mrf.mxu1 }
0x25a7   : > { %v11052_v18 = vadd.f32 %v11004_v50, %v10827_v4  ;;  %v11054_v55 = vadd.f32 %v11045_v21, %v10868_v29  ;;  %v11650_v50 = vld [vmem:[#allocation38 + $0x40] sm:$0xff]  ;;  %v11649_v21 = vld [vmem:[#allocation38 + $0x38] sm:$0xff] }
0x25a8   : > { %v11006_v27 = vpop.f32.mrf.mxu0  ;;  %v11047_v59 = vpop.f32.mrf.mxu1 }
0x25a9   : > { %v11053_v36 = vadd.f32 %v11006_v27, %v10829_v38  ;;  %v11055_v57 = vadd.f32 %v11047_v59, %v10870_v40  ;;  %v11646_v27 = vld [vmem:[#allocation38 + $0x20] sm:$0xff]  ;;  %v11645_v59 = vld [vmem:[#allocation38 + $0x18] sm:$0xff] }
0x25aa   : > { %v11008_v34 = vpop.f32.mrf.mxu0  ;;  %v11049_v16 = vpop.f32.mrf.mxu1 }
0x25ab   : > { %v11644_v34 = vld [vmem:[#allocation38 + $0x10] sm:$0xff]  ;;  %v11643_v16 = vld [vmem:[#allocation38 + $0x8] sm:$0xff] }
0x25ac   : > { %v11009_v53 = vpop.f32.mrf.mxu0  ;;  %v11050_v13 = vpop.f32.mrf.mxu1 }
0x25ad   : > { %v11642_v53 = vld [vmem:[#allocation38] sm:$0xff] }
0x25e6   : > { %v11186_v1 = vpop.f32.mrf.mxu0  ;;  %v11227_v44 = vpop.f32.mrf.mxu1 }
0x25e7   : > { %v11234_v11 = vadd.f32 %v11186_v1, %v11052_v18  ;;  %v11236_v9 = vadd.f32 %v11227_v44, %v11054_v55  ;;  %v11648_v18 = vld [vmem:[#allocation38 + $0x30] sm:$0xff]  ;;  %v11647_v55 = vld [vmem:[#allocation38 + $0x28] sm:$0xff] }
0x25e8   : > { %v11188_v51 = vpop.f32.mrf.mxu0  ;;  %v11229_v19 = vpop.f32.mrf.mxu1 }
0x25e9   : > { %v11260_v20 = vmul.f32 %v11243_v23, %v11234_v11  ;;  %v11262_v6 = vmul.f32 %v11251_v22, %v11236_v9  ;;  %v11235_v24 = vadd.f32 %v11188_v51, %v11053_v36  ;;  %v11237_v42 = vadd.f32 %v11229_v19, %v11055_v57 }
0x25ea   : > { %v11190_v26 = vpop.f32.mrf.mxu0  ;;  %v11231_v30 = vpop.f32.mrf.mxu1 }
0x25eb   : > { %v11286_v10 = vadd.f32 %v11269_v45, %v11260_v20  ;;  %v11288_v28 = vadd.f32 %v11277_v35, %v11262_v6  ;;  %v11261_v47 = vmul.f32 %v11247_v39, %v11235_v24  ;;  %v11263_v4 = vmul.f32 %v11255_v63, %v11237_v42  ;;  %v12847_v35 = vld [vmem:[%s17875_s4] ss:$0 sm:$0xff] }
0x25ec   : > { %v11191_v29 = vpop.f32.mrf.mxu0  ;;  %v11232_v56 = vpop.f32.mrf.mxu1 }
0x25ed   : > { %v11287_v61 = vadd.f32 %v11273_v5, %v11261_v47  ;;  %v11289_v43 = vadd.f32 %v11281_v62, %v11263_v4  ;;  %v11290_v37 = vmax.f32 %v11286_v10, 0.0  ;;  %v11292_v38 = vmax.f32 %v11288_v28, 0.0 }
0x25ef   : > { %v11291_v40 = vmax.f32 %v11287_v61, 0.0  ;;  %v11293_v46 = vmax.f32 %v11289_v43, 0.0  ;;  %v11294_v31 = vpack.c.bf16 %v11290_v37, %v11290_v37  ;;  %v11296_v32 = vpack.c.bf16 %v11292_v38, %v11292_v38 }
0x25f1   : > { %v11295_v58 = vpack.c.bf16 %v11291_v40, %v11291_v40  ;;  %v11297_v3 = vpack.c.bf16 %v11293_v46, %v11293_v46 }
0x25f3   : > { %11593 = vmatprep.mubr.bf16.mxu0 %v11295_v58  ;;  %11633 = vmatprep.mubr.bf16.mxu1 %v11297_v3 }
0x25f4   : > { %11594 = vmatmul.mubr.bf16.vlgmr.msra.gmra.mxu0 %v11294_v31  ;;  %11634 = vmatmul.mubr.bf16.vlgmr.msra.gmra.mxu1 %v11296_v32 }
0x25f5   : > { %14337 = vmatpush3.msra.mxu0 %v11657_v7  ;;  %14368 = vmatprep.mubr.msk.f32.mxu0 %vm15891_vm15, %v15890_v60 }
0x25f6   : > { %14338 = vmatprep.subr.mxu0 %v15890_v60 }
0x25f7   : > { %14339 = vmatpush3.msra.mxu0 %v11656_v12 }
0x25f8   : > { %14340 = vmatprep.subr.mxu0 %v15890_v60 }
0x25f9   : > { %14341 = vmatpush3.msra.mxu0 %v11655_v2 }
0x25fa   : > { %14342 = vmatprep.subr.mxu0 %v15890_v60 }
0x25fb   : > { %14343 = vmatpush3.msra.mxu0 %v11654_v25 }
0x25fc   : > { %14344 = vmatprep.subr.mxu0 %v15890_v60 }
0x25fd   : > { %14345 = vmatpush3.msra.mxu0 %v11653_v48 }
0x25fe   : > { %14346 = vmatprep.subr.mxu0 %v15890_v60 }
0x25ff   : > { %14347 = vmatpush3.msra.mxu0 %v11652_v49 }
0x2600   : > { %14348 = vmatprep.subr.mxu0 %v15890_v60 }
0x2601   : > { %14349 = vmatpush3.msra.mxu0 %v11651_v15 }
0x2602   : > { %14350 = vmatprep.subr.mxu0 %v15890_v60 }
0x2603   : > { %14351 = vmatpush3.msra.mxu0 %v11650_v50 }
0x2604   : > { %14352 = vmatprep.subr.mxu0 %v15890_v60 }
0x2605   : > { %14353 = vmatpush3.msra.mxu0 %v11649_v21 }
0x2606   : > { %14354 = vmatprep.subr.mxu0 %v15890_v60 }
0x2607   : > { %14355 = vmatpush3.msra.mxu0 %v11648_v18 }
0x2608   : > { %14356 = vmatprep.subr.mxu0 %v15890_v60 }
0x2609   : > { %14357 = vmatpush3.msra.mxu0 %v11647_v55 }
0x260a   : > { %14358 = vmatprep.subr.mxu0 %v15890_v60 }
0x260b   : > { %14359 = vmatpush3.msra.mxu0 %v11646_v27 }
0x260c   : > { %14360 = vmatprep.subr.mxu0 %v15890_v60 }
0x260d   : > { %14361 = vmatpush3.msra.mxu0 %v11645_v59 }
0x260e   : > { %14362 = vmatprep.subr.mxu0 %v15890_v60 }
0x260f   : > { %14363 = vmatpush3.msra.mxu0 %v11644_v34 }
0x2610   : > { %14364 = vmatprep.subr.mxu0 %v15890_v60 }
0x2611   : > { %14365 = vmatpush3.msra.mxu0 %v11643_v16 }
0x2612   : > { %14366 = vmatprep.subr.mxu0 %v15890_v60 }
0x2613   : > { %14367 = vmatpush3.msra.mxu0 %v11642_v53 }
0x26b4   : > { %v13491_v13 = vpop.f32.mrf.mxu0  ;;  %v13513_v0 = vpop.f32.mrf.mxu1 }
0x26b6   : > { %v13492_v8 = vpop.f32.mrf.mxu0  ;;  %v13514_v54 = vpop.f32.mrf.mxu1 }
0x26b7   : > { %v13493_v33 = vadd.f32 %v13492_v8, %v13491_v13  ;;  %v13515_v23 = vadd.f32 %v13514_v54, %v13513_v0 }
0x26b8   : > { %v13494_v52 = vpop.f32.mrf.mxu0  ;;  %v13516_v14 = vpop.f32.mrf.mxu1 }
0x26b9   : > { %v11596_v41 = vadd.f32 %v13493_v33, %v12814_v17 }
0x26ba   : > { %v13495_v22 = vpop.f32.mrf.mxu0  ;;  %v13517_v1 = vpop.f32.mrf.mxu1 }
0x26bb   : > { %v11636_v45 = vadd.f32 %v13515_v23, %v11596_v41 }
0x26bd   : > { %v11641_v44 = vmax.f32 %v11636_v45, 0.0 }
0x26bf   : > { %14369 = vmatmul.mubr.f32.vlgmr.msra.gmra.mxu0 %v11641_v44 }
0x277f   : > { %v11731_v39 = vpop.f32.mrf.mxu0 }
0x2780   : > { %v11732_v60 = vadd.f32 %v12847_v35, %v11731_v39 }
0x2781   : > { %v14370_v63 = vpop.f32.mrf.mxu0 }
0x2782   : > { %11736 = vst.msk [vmem:[#allocation39] sm:$0x3] %vm11735_vm0, %v11732_v60 }
0x2783 PF: > { %s17876_s2 = sld [smem:[#allocation86_spill]]  ;;  %s15892_s19 = smov [#allocation39]  }
0x2784   : > { %s11744_s18 = sshll.u32 %s15892_s19, 4  ;;  %s11745_s18 = int_to_ptr.vmem [resolvable:$true] %s11744_s18 }
0x2785   : > { %s15700_s6 = scalar_lea.vmem %s11745_s18, 32  ;;  %p15707_p7 = scmp.lt.s32.totalorder %s11745_s18, %s11745_s18 }
0x2786   : > { %p15701_p13 = scmp.ne.s32.totalorder %s11745_s18, %s15700_s6  ;;  %p15708_p9 = scmp.lt.s32.totalorder %s15700_s6, %s15700_s6 }
0x2788   : > { %p15709_p6 = por %p15708_p9, %p15707_p7 }
0x2789   : > { %p14589_p0 = scmp.eq.s32.totalorder %s17876_s2, 4 }
0x278b   : > { %p15702_p3 = pnand %p15701_p13, %p14589_p0 }
0x278d   : > { %p15703_p4 = pneg %p15702_p3 }
0x278f   : > { %p15710_p5 = pnand %p15709_p6, %p15703_p4 }
0x2791   : > { %15713 = shalt.err (!%p15710_p5)
}
0x2792   : > { %s17877_s15 = sld [smem:[#allocation83_spill]] }
0x2798   : > { %14476 = dma.vmem_to_hbm [thread:$0]  (%p14589_p0), %s11745_s18, 32, %s17877_s15, [#allocation7]  }
0x2799   : > { %15787 = dma.done.wait (%p14589_p0), [#allocation7], 32  }
0x279a   : > { %15789 = vsyncadd (%p14589_p0), [#allocation7], 4294967264 }
0x279b PF: > { %s17878_s28 = sld [smem:[#allocation88_spill]] }
0x279c   : > { %s17879_s22 = sld [smem:[#allocation84_spill]] }
0x279d   : > { %s17880_s23 = sld [smem:[#allocation85_spill]] }
0x279e   : > { %s17881_s26 = sld [smem:[#allocation90_spill]] }
0x27a1   : > { %p87_p2 = scmp.ge.s32.totalorder %s17878_s28, 7  }
0x27a3   :  { %89 = sbr.rel (!%p87_p2) target bundleno = 77 (0x4d), region = 439 }
0x27a8   :  { %11757 = vsyncpa [#allocation6], 1 }
0x27a9   :  { %11759 = vsyncpa [#allocation6 + $0x1], 1 }
0x27aa   :  { %11760 = vsyncpa [#allocation9], 1 }
0x27ab   :  { %11761 = vsyncpa [#allocation12], 1 }
0x27ac   :  { %11762 = vsyncpa [#allocation15], 1 }
0x27ad   :  { %11763 = vsyncpa [#allocation18], 1 }
0x27ae   :  { %11764 = vsyncpa [#allocation21], 1 }
0x27af   :  { %11765 = vsyncpa [#allocation24], 1 }
0x27b0   :  { %11766 = vsyncpa [#allocation27], 1 }
0x27b1   :  { %11767 = vsyncpa [#allocation7], 1 }
0x27b2   :  { %11769 = vsyncpa [#allocation7 + $0x1], 1 }
0x27b3   :  { %11770 = vsyncmov [#allocation4] }
0x27b6   :  { %s11771_s24 = vpop.sfrf %11770 }
0x27b7   :  { %p12852_p11 = scmp.ne.s32.totalorder %s11771_s24, 0 }
0x27b9   :  { %11775 = shalt.err (%p12852_p11)  }

</bundles_post_ra>
